<compile_context>
chip_gen: v7x
topology: tpu7x:2x2x1
jax: 0.10.0
libtpu: 0.0.40
codegen_flags: <defaults>
</compile_context>

<pallas_src>
import functools

import numpy as np
import jax
import jax.numpy as jnp
from jax.experimental import pallas as pl
from jax.experimental.pallas import tpu as pltpu

HIDDEN = 512      # GNNEncoder hidden_size (fixed by Network_Dis)
NODE_FEAT = 256   # GNNEncoder node_feat_size
EDGE_TYPES = 3
NUM_ITERS = 2

_N_DATA = 10      # data inputs to the fused kernel
_N_GNN1 = 16      # kernel-ready param count, lower GNN
_N_GNN2 = 17      # upper GNN (boxencoder first weight pre-split into 256 || 4 rows)
_N_HEAD = 6


def _leaky(x, slope):
    return jnp.where(x > 0, x, slope * x)


def _dot_w(a, w):
    """Matmul against a (possibly bf16) weight with f32 accumulation on the MXU."""
    if w.dtype == jnp.bfloat16:
        a = a.astype(jnp.bfloat16)
    return jnp.dot(a, w, preferred_element_type=jnp.float32)


def _gnn_body(h_pre, ei, src_row, et, n_nodes, p):
    """GNNEncoder.forward after the boxencoder's first Linear (h_pre = x @ W1 + b1)."""
    f32 = jnp.float32
    (bw2, bb2, ws0, wd0, we0, b0, ws1, wd1, we1, b1, sw0, sw1, sw2, sb) = p
    n_edges = ei.shape[0]

    # BoxEncoder1: LeakyReLU(0.1) applied twice (fused: slope 0.01), Linear, LeakyReLU(0.1).
    h = _leaky(h_pre, 0.01)
    cf0 = _leaky(_dot_w(h, bw2) + bb2, 0.1)                          # (N, 512)

    # Gather / scatter matrices built in-kernel (VPU iota + compare), no XLA glue.
    lane_iota = jax.lax.broadcasted_iota(jnp.int32, (n_edges, n_nodes), 1)
    src_oh = (ei[:, 0:1] == lane_iota).astype(f32)                   # (E, N): child_feats[src]
    dst_oh = (ei[:, 1:2] == lane_iota).astype(f32)                   # (E, N): child_feats[dst]
    row_iota = jax.lax.broadcasted_iota(jnp.int32, (n_nodes, n_edges), 0)
    scat_oh = (src_row == row_iota).astype(f32)                      # (N, E): scatter by src
    counts = jnp.maximum(jnp.sum(scat_oh, axis=1, keepdims=True), 1.0)   # clamp(min=1)
    scat = scat_oh / counts                                          # scatter_mean ('avg')

    def message_pass(cf, ws, wd, we, b):
        s = jnp.dot(src_oh, cf, preferred_element_type=f32)          # (E, 512)
        d = jnp.dot(dst_oh, cf, preferred_element_type=f32)          # (E, 512)
        # cat([s, d, et]) @ W == s@Ws + d@Wd + et@We; et is one-hot over 3 edge types, so the
        # K=3 contraction is done with VPU broadcast-mults instead of an MXU pass.
        et_w = (et[:, 0:1] * we[0:1, :] + et[:, 1:2] * we[1:2, :]
                + et[:, 2:3] * we[2:3, :])
        nef = jnp.maximum(_dot_w(s, ws) + _dot_w(d, wd) + et_w + b, 0.0)   # relu
        return jnp.dot(scat, nef, preferred_element_type=f32)        # (N, 512); 0 if no out-edge

    cf1 = message_pass(cf0, ws0, wd0, we0, b0)
    cf2 = message_pass(cf1, ws1, wd1, we1, b1)

    # second_object(cat([cf0, cf1, cf2], dim=1)), with the 1536x256 weight pre-split.
    return _leaky(_dot_w(cf0, sw0) + _dot_w(cf1, sw1) + _dot_w(cf2, sw2) + sb, 0.1)


def _network_dis_kernel(*refs):
    f32 = jnp.float32
    out_ref = refs[-1]
    v = [r[...] for r in refs[:-1]]

    x1, ei1, src1r, et1, seg1, wall, ei2, src2r, et2, seg2 = v[:_N_DATA]
    i = _N_DATA
    g1 = v[i:i + _N_GNN1]; i += _N_GNN1
    g2 = v[i:i + _N_GNN2]; i += _N_GNN2
    hw1, hb1, hwm, hbm, hw2t, hb2 = v[i:i + _N_HEAD]

    n_boxes = x1.shape[0]
    n_rooms = seg1.shape[0]

    # -------- lower GNN over sub-boxes --------
    h1 = _dot_w(x1, g1[0]) + g1[1]                                   # boxencoder.mlp1 Linear
    graph_feature = _gnn_body(h1, ei1, src1r, et1, n_boxes, g1[2:])  # (M, 256)

    # -------- per-room segment mean, (|| wall contour), upper GNN --------
    gseg = jnp.dot(seg1, graph_feature, preferred_element_type=f32)  # (G, 256)
    # upper boxencoder.mlp1 with its (256+4, 512) weight pre-split -> no in-kernel concat
    h2 = _dot_w(gseg, g2[0]) + _dot_w(wall, g2[1]) + g2[2]
    graph_feature_upper = _gnn_body(h2, ei2, src2r, et2, n_rooms, g2[3:])   # (G, 256)

    # -------- value head: mlp1 -> split(lengths).mean -> sigmoid / mlpm_v / mlp2_v --------
    state = jnp.dot(graph_feature_upper, hw1, preferred_element_type=f32) + hb1    # (G, 32)
    vs = jax.nn.sigmoid(jnp.dot(seg2, state, preferred_element_type=f32))          # (F, 32)
    vm = jax.nn.sigmoid(jnp.dot(vs, hwm, preferred_element_type=f32) + hbm)        # (F, 16)
    # final Linear as (1,16) x (F,16)^T so the kernel output is lane-dense (1, F)
    logit = jax.lax.dot_general(hw2t, vm, (((1,), (1,)), ((), ())),
                                preferred_element_type=f32)                         # (1, F)
    out_ref[...] = jax.nn.sigmoid(logit + hb2)


# --------------------------------- wrapper -----------------------------------
_VMEM = pl.BlockSpec(memory_space=pltpu.MemorySpace.VMEM)


def _seg_avg_matrix(lengths, n):
    """(len(lengths), n) row-averaging matrix for split(lengths).mean(dim=0) (static)."""
    m = np.zeros((len(lengths), n), np.float32)
    start = 0
    for i, L in enumerate(lengths):
        m[i, start:start + L] = 1.0 / L
        start += L
    return jnp.asarray(m)


@functools.partial(jax.jit, static_argnums=(8, 9))
def network_dis_forward(gnn1_params, gnn2_params, head_params,
                        all_edge, all_type, data_input, edge_index, edge_type,
                        lengths, subbox_lengths, wall_countour):
    M = data_input.shape[1]
    G = len(subbox_lengths)
    Fnum = len(lengths)

    seg1 = _seg_avg_matrix(subbox_lengths, M)                  # (G, M) static constant
    seg2 = _seg_avg_matrix(lengths, G)                         # (F, G) static constant

    x1 = data_input[0].astype(jnp.float32)                     # (M, 11)
    ei1 = edge_index[0].astype(jnp.int32)                      # (E1, 2)
    src1r = edge_index[:, :, 0].astype(jnp.int32)              # (1, E1)
    et1 = edge_type[0].astype(jnp.float32)                     # (E1, 3)
    ei2 = all_edge[0].astype(jnp.int32)                        # (E2, 2)
    src2r = all_edge[:, :, 0].astype(jnp.int32)                # (1, E2)
    et2 = all_type[0].astype(jnp.float32)                      # (E2, 3)
    wall = wall_countour.astype(jnp.float32)                   # (G, 4)

    args = (x1, ei1, src1r, et1, seg1, wall, ei2, src2r, et2, seg2,
            *gnn1_params, *gnn2_params, *head_params)

    out = pl.pallas_call(
        _network_dis_kernel,
        out_shape=jax.ShapeDtypeStruct((1, Fnum), jnp.float32),
        in_specs=[_VMEM] * len(args),
        out_specs=_VMEM,
        compiler_params=pltpu.CompilerParams(vmem_limit_bytes=32 * 1024 * 1024),
    )(*args)
    return out[0]                                              # (Fnum,) like torch .flatten()


# ------------------------------ parameter init --------------------------------
def _init_linear(key, fan_in, fan_out, scale=0.1):
    kw, kb = jax.random.split(key)
    w = jax.random.normal(kw, (fan_in, fan_out), jnp.float32) * scale
    b = jax.random.normal(kb, (1, fan_out), jnp.float32) * scale
    return w, b


def init_gnn_params(key, feat_in, box_split=None):
    """Kernel-ready GNNEncoder params.  Large matmul weights stored in bf16 (halves HBM DMA
    bytes; MXU consumes bf16 with f32 accumulation); biases / small weights / edge-type rows
    stay f32 for the VPU path.
    NOTE: child_op / parent_op / skip_op_object / moveableencoder are unused in forward."""
    bf16 = jnp.bfloat16
    keys = jax.random.split(key, 5)
    bw1, bb1 = _init_linear(keys[0], feat_in, HIDDEN)           # boxencoder.mlp1
    bw2, bb2 = _init_linear(keys[1], HIDDEN, HIDDEN)            # boxencoder.mlp2
    ne = []
    for i in range(NUM_ITERS):                                  # node_edge_op[i]: Linear(2*512+3, 512)
        w, b = _init_linear(keys[2 + i], 2 * HIDDEN + EDGE_TYPES, HIDDEN)
        ne.extend([w[:HIDDEN].astype(bf16),                     # rows hit by child_feats[src]
                   w[HIDDEN:2 * HIDDEN].astype(bf16),           # rows hit by child_feats[dst]
                   w[2 * HIDDEN:],                              # edge-type rows (f32, VPU path)
                   b])
    sw, sb = _init_linear(keys[4], HIDDEN * (NUM_ITERS + 1), NODE_FEAT)   # second_object
    tail = (bw2.astype(bf16), bb2, *ne,
            sw[:HIDDEN].astype(bf16), sw[HIDDEN:2 * HIDDEN].astype(bf16),
            sw[2 * HIDDEN:].astype(bf16), sb)
    if box_split is None:
        return (bw1, bb1, *tail)                                # 16 entries (bw1 tiny: keep f32)
    a = box_split                                               # upper GNN: split (256+4, 512)
    return (bw1[:a].astype(bf16), bw1[a:], bb1, *tail)          # 17 entries


def init_head_params(key, hidden_size):
    k1, k2, k3 = jax.random.split(key, 3)
    w1, b1 = _init_linear(k1, NODE_FEAT, hidden_size)           # mlp1
    wm, bm = _init_linear(k2, hidden_size, hidden_size // 2)    # mlpm_v
    w2, b2 = _init_linear(k3, hidden_size // 2, 1)              # mlp2_v
    return (w1, b1, wm, bm, w2.T, b2)                           # w2 pre-transposed -> (1, h/2)
    # mlpm / mlp2 exist in the torch module but are unused in forward.


# ----------------------------------- main --------------------------------------
if __name__ == "__main__":
    key = jax.random.PRNGKey(0)
    ks = jax.random.split(key, 12)

    M, E1 = 16, 8                    # lower graph: 16 sub-boxes, 8 edges
    G, E2 = 4, 4                     # upper graph: 4 rooms, 4 edges
    subbox_lengths = (4, 4, 4, 4)    # static, sums to M
    lengths = (2, 2)                 # static, sums to G
    Fnum = len(lengths)
    HSIZE = 32                       # Network_Dis hidden_size

    data_input = jax.random.normal(ks[0], (1, M, 11), jnp.float32)
    edge_index = jax.random.randint(ks[1], (1, E1, 2), 0, M, jnp.int32)
    edge_type = jax.nn.one_hot(
        jax.random.randint(ks[2], (1, E1), 0, EDGE_TYPES), EDGE_TYPES, dtype=jnp.float32)
    all_edge = jax.random.randint(ks[3], (1, E2, 2), 0, G, jnp.int32)
    all_type = jax.nn.one_hot(
        jax.random.randint(ks[4], (1, E2), 0, EDGE_TYPES), EDGE_TYPES, dtype=jnp.float32)
    wall_countour = jax.random.normal(ks[5], (G, 4), jnp.float32)

    gnn1_params = init_gnn_params(ks[6], 11)                                   # gnnencoder
    gnn2_params = init_gnn_params(ks[7], NODE_FEAT + 4, box_split=NODE_FEAT)   # gnnencoder_upper
    head_params = init_head_params(ks[8], HSIZE)

    out = network_dis_forward(gnn1_params, gnn2_params, head_params,
                              all_edge, all_type, data_input, edge_index, edge_type,
                              lengths, subbox_lengths, wall_countour)
    out = jax.block_until_ready(out)
    assert out.shape == (Fnum,)
    assert bool(jnp.all(jnp.isfinite(out)))
    print("KERNEL_OK")
</pallas_src>

<mosaic_0001>
module attributes {stable_mosaic.version = 11 : i64} {
  func.func @_network_dis_kernel(%arg0: memref<16x11xf32, #tpu.memory_space<vmem>>, %arg1: memref<8x2xi32, #tpu.memory_space<vmem>>, %arg2: memref<1x8xi32, #tpu.memory_space<vmem>>, %arg3: memref<8x3xf32, #tpu.memory_space<vmem>>, %arg4: memref<4x16xf32, #tpu.memory_space<vmem>>, %arg5: memref<4x4xf32, #tpu.memory_space<vmem>>, %arg6: memref<4x2xi32, #tpu.memory_space<vmem>>, %arg7: memref<1x4xi32, #tpu.memory_space<vmem>>, %arg8: memref<4x3xf32, #tpu.memory_space<vmem>>, %arg9: memref<2x4xf32, #tpu.memory_space<vmem>>, %arg10: memref<11x512xf32, #tpu.memory_space<vmem>>, %arg11: memref<1x512xf32, #tpu.memory_space<vmem>>, %arg12: memref<512x512xbf16, #tpu.memory_space<vmem>>, %arg13: memref<1x512xf32, #tpu.memory_space<vmem>>, %arg14: memref<512x512xbf16, #tpu.memory_space<vmem>>, %arg15: memref<512x512xbf16, #tpu.memory_space<vmem>>, %arg16: memref<3x512xf32, #tpu.memory_space<vmem>>, %arg17: memref<1x512xf32, #tpu.memory_space<vmem>>, %arg18: memref<512x512xbf16, #tpu.memory_space<vmem>>, %arg19: memref<512x512xbf16, #tpu.memory_space<vmem>>, %arg20: memref<3x512xf32, #tpu.memory_space<vmem>>, %arg21: memref<1x512xf32, #tpu.memory_space<vmem>>, %arg22: memref<512x256xbf16, #tpu.memory_space<vmem>>, %arg23: memref<512x256xbf16, #tpu.memory_space<vmem>>, %arg24: memref<512x256xbf16, #tpu.memory_space<vmem>>, %arg25: memref<1x256xf32, #tpu.memory_space<vmem>>, %arg26: memref<256x512xbf16, #tpu.memory_space<vmem>>, %arg27: memref<4x512xf32, #tpu.memory_space<vmem>>, %arg28: memref<1x512xf32, #tpu.memory_space<vmem>>, %arg29: memref<512x512xbf16, #tpu.memory_space<vmem>>, %arg30: memref<1x512xf32, #tpu.memory_space<vmem>>, %arg31: memref<512x512xbf16, #tpu.memory_space<vmem>>, %arg32: memref<512x512xbf16, #tpu.memory_space<vmem>>, %arg33: memref<3x512xf32, #tpu.memory_space<vmem>>, %arg34: memref<1x512xf32, #tpu.memory_space<vmem>>, %arg35: memref<512x512xbf16, #tpu.memory_space<vmem>>, %arg36: memref<512x512xbf16, #tpu.memory_space<vmem>>, %arg37: memref<3x512xf32, #tpu.memory_space<vmem>>, %arg38: memref<1x512xf32, #tpu.memory_space<vmem>>, %arg39: memref<512x256xbf16, #tpu.memory_space<vmem>>, %arg40: memref<512x256xbf16, #tpu.memory_space<vmem>>, %arg41: memref<512x256xbf16, #tpu.memory_space<vmem>>, %arg42: memref<1x256xf32, #tpu.memory_space<vmem>>, %arg43: memref<256x32xf32, #tpu.memory_space<vmem>>, %arg44: memref<1x32xf32, #tpu.memory_space<vmem>>, %arg45: memref<32x16xf32, #tpu.memory_space<vmem>>, %arg46: memref<1x16xf32, #tpu.memory_space<vmem>>, %arg47: memref<1x16xf32, #tpu.memory_space<vmem>>, %arg48: memref<1x1xf32, #tpu.memory_space<vmem>>, %arg49: memref<1x2xf32, #tpu.memory_space<vmem>>) attributes {dimension_semantics = [], scalar_prefetch = 0 : i64, scratch_operands = 0 : i64, tpu.core_type = #tpu.core_type<tc>} {
    %c0 = arith.constant 0 : index
    %c0_0 = arith.constant 0 : index
    %0 = vector.load %arg0[%c0, %c0_0] : memref<16x11xf32, #tpu.memory_space<vmem>>, vector<16x11xf32>
    %c0_1 = arith.constant 0 : index
    %c0_2 = arith.constant 0 : index
    %1 = vector.load %arg1[%c0_1, %c0_2] : memref<8x2xi32, #tpu.memory_space<vmem>>, vector<8x2xi32>
    %c0_3 = arith.constant 0 : index
    %c0_4 = arith.constant 0 : index
    %2 = vector.load %arg2[%c0_3, %c0_4] : memref<1x8xi32, #tpu.memory_space<vmem>>, vector<1x8xi32>
    %c0_5 = arith.constant 0 : index
    %c0_6 = arith.constant 0 : index
    %3 = vector.load %arg3[%c0_5, %c0_6] : memref<8x3xf32, #tpu.memory_space<vmem>>, vector<8x3xf32>
    %c0_7 = arith.constant 0 : index
    %c0_8 = arith.constant 0 : index
    %4 = vector.load %arg4[%c0_7, %c0_8] : memref<4x16xf32, #tpu.memory_space<vmem>>, vector<4x16xf32>
    %c0_9 = arith.constant 0 : index
    %c0_10 = arith.constant 0 : index
    %5 = vector.load %arg5[%c0_9, %c0_10] : memref<4x4xf32, #tpu.memory_space<vmem>>, vector<4x4xf32>
    %c0_11 = arith.constant 0 : index
    %c0_12 = arith.constant 0 : index
    %6 = vector.load %arg6[%c0_11, %c0_12] : memref<4x2xi32, #tpu.memory_space<vmem>>, vector<4x2xi32>
    %c0_13 = arith.constant 0 : index
    %c0_14 = arith.constant 0 : index
    %7 = vector.load %arg7[%c0_13, %c0_14] : memref<1x4xi32, #tpu.memory_space<vmem>>, vector<1x4xi32>
    %c0_15 = arith.constant 0 : index
    %c0_16 = arith.constant 0 : index
    %8 = vector.load %arg8[%c0_15, %c0_16] : memref<4x3xf32, #tpu.memory_space<vmem>>, vector<4x3xf32>
    %c0_17 = arith.constant 0 : index
    %c0_18 = arith.constant 0 : index
    %9 = vector.load %arg9[%c0_17, %c0_18] : memref<2x4xf32, #tpu.memory_space<vmem>>, vector<2x4xf32>
    %c0_19 = arith.constant 0 : index
    %c0_20 = arith.constant 0 : index
    %10 = vector.load %arg10[%c0_19, %c0_20] : memref<11x512xf32, #tpu.memory_space<vmem>>, vector<11x512xf32>
    %c0_21 = arith.constant 0 : index
    %c0_22 = arith.constant 0 : index
    %11 = vector.load %arg11[%c0_21, %c0_22] : memref<1x512xf32, #tpu.memory_space<vmem>>, vector<1x512xf32>
    %c0_23 = arith.constant 0 : index
    %c0_24 = arith.constant 0 : index
    %12 = vector.load %arg12[%c0_23, %c0_24] : memref<512x512xbf16, #tpu.memory_space<vmem>>, vector<512x512xbf16>
    %c0_25 = arith.constant 0 : index
    %c0_26 = arith.constant 0 : index
    %13 = vector.load %arg13[%c0_25, %c0_26] : memref<1x512xf32, #tpu.memory_space<vmem>>, vector<1x512xf32>
    %c0_27 = arith.constant 0 : index
    %c0_28 = arith.constant 0 : index
    %14 = vector.load %arg14[%c0_27, %c0_28] : memref<512x512xbf16, #tpu.memory_space<vmem>>, vector<512x512xbf16>
    %c0_29 = arith.constant 0 : index
    %c0_30 = arith.constant 0 : index
    %15 = vector.load %arg15[%c0_29, %c0_30] : memref<512x512xbf16, #tpu.memory_space<vmem>>, vector<512x512xbf16>
    %c0_31 = arith.constant 0 : index
    %c0_32 = arith.constant 0 : index
    %16 = vector.load %arg16[%c0_31, %c0_32] : memref<3x512xf32, #tpu.memory_space<vmem>>, vector<3x512xf32>
    %c0_33 = arith.constant 0 : index
    %c0_34 = arith.constant 0 : index
    %17 = vector.load %arg17[%c0_33, %c0_34] : memref<1x512xf32, #tpu.memory_space<vmem>>, vector<1x512xf32>
    %c0_35 = arith.constant 0 : index
    %c0_36 = arith.constant 0 : index
    %18 = vector.load %arg18[%c0_35, %c0_36] : memref<512x512xbf16, #tpu.memory_space<vmem>>, vector<512x512xbf16>
    %c0_37 = arith.constant 0 : index
    %c0_38 = arith.constant 0 : index
    %19 = vector.load %arg19[%c0_37, %c0_38] : memref<512x512xbf16, #tpu.memory_space<vmem>>, vector<512x512xbf16>
    %c0_39 = arith.constant 0 : index
    %c0_40 = arith.constant 0 : index
    %20 = vector.load %arg20[%c0_39, %c0_40] : memref<3x512xf32, #tpu.memory_space<vmem>>, vector<3x512xf32>
    %c0_41 = arith.constant 0 : index
    %c0_42 = arith.constant 0 : index
    %21 = vector.load %arg21[%c0_41, %c0_42] : memref<1x512xf32, #tpu.memory_space<vmem>>, vector<1x512xf32>
    %c0_43 = arith.constant 0 : index
    %c0_44 = arith.constant 0 : index
    %22 = vector.load %arg22[%c0_43, %c0_44] : memref<512x256xbf16, #tpu.memory_space<vmem>>, vector<512x256xbf16>
    %c0_45 = arith.constant 0 : index
    %c0_46 = arith.constant 0 : index
    %23 = vector.load %arg23[%c0_45, %c0_46] : memref<512x256xbf16, #tpu.memory_space<vmem>>, vector<512x256xbf16>
    %c0_47 = arith.constant 0 : index
    %c0_48 = arith.constant 0 : index
    %24 = vector.load %arg24[%c0_47, %c0_48] : memref<512x256xbf16, #tpu.memory_space<vmem>>, vector<512x256xbf16>
    %c0_49 = arith.constant 0 : index
    %c0_50 = arith.constant 0 : index
    %25 = vector.load %arg25[%c0_49, %c0_50] : memref<1x256xf32, #tpu.memory_space<vmem>>, vector<1x256xf32>
    %c0_51 = arith.constant 0 : index
    %c0_52 = arith.constant 0 : index
    %26 = vector.load %arg26[%c0_51, %c0_52] : memref<256x512xbf16, #tpu.memory_space<vmem>>, vector<256x512xbf16>
    %c0_53 = arith.constant 0 : index
    %c0_54 = arith.constant 0 : index
    %27 = vector.load %arg27[%c0_53, %c0_54] : memref<4x512xf32, #tpu.memory_space<vmem>>, vector<4x512xf32>
    %c0_55 = arith.constant 0 : index
    %c0_56 = arith.constant 0 : index
    %28 = vector.load %arg28[%c0_55, %c0_56] : memref<1x512xf32, #tpu.memory_space<vmem>>, vector<1x512xf32>
    %c0_57 = arith.constant 0 : index
    %c0_58 = arith.constant 0 : index
    %29 = vector.load %arg29[%c0_57, %c0_58] : memref<512x512xbf16, #tpu.memory_space<vmem>>, vector<512x512xbf16>
    %c0_59 = arith.constant 0 : index
    %c0_60 = arith.constant 0 : index
    %30 = vector.load %arg30[%c0_59, %c0_60] : memref<1x512xf32, #tpu.memory_space<vmem>>, vector<1x512xf32>
    %c0_61 = arith.constant 0 : index
    %c0_62 = arith.constant 0 : index
    %31 = vector.load %arg31[%c0_61, %c0_62] : memref<512x512xbf16, #tpu.memory_space<vmem>>, vector<512x512xbf16>
    %c0_63 = arith.constant 0 : index
    %c0_64 = arith.constant 0 : index
    %32 = vector.load %arg32[%c0_63, %c0_64] : memref<512x512xbf16, #tpu.memory_space<vmem>>, vector<512x512xbf16>
    %c0_65 = arith.constant 0 : index
    %c0_66 = arith.constant 0 : index
    %33 = vector.load %arg33[%c0_65, %c0_66] : memref<3x512xf32, #tpu.memory_space<vmem>>, vector<3x512xf32>
    %c0_67 = arith.constant 0 : index
    %c0_68 = arith.constant 0 : index
    %34 = vector.load %arg34[%c0_67, %c0_68] : memref<1x512xf32, #tpu.memory_space<vmem>>, vector<1x512xf32>
    %c0_69 = arith.constant 0 : index
    %c0_70 = arith.constant 0 : index
    %35 = vector.load %arg35[%c0_69, %c0_70] : memref<512x512xbf16, #tpu.memory_space<vmem>>, vector<512x512xbf16>
    %c0_71 = arith.constant 0 : index
    %c0_72 = arith.constant 0 : index
    %36 = vector.load %arg36[%c0_71, %c0_72] : memref<512x512xbf16, #tpu.memory_space<vmem>>, vector<512x512xbf16>
    %c0_73 = arith.constant 0 : index
    %c0_74 = arith.constant 0 : index
    %37 = vector.load %arg37[%c0_73, %c0_74] : memref<3x512xf32, #tpu.memory_space<vmem>>, vector<3x512xf32>
    %c0_75 = arith.constant 0 : index
    %c0_76 = arith.constant 0 : index
    %38 = vector.load %arg38[%c0_75, %c0_76] : memref<1x512xf32, #tpu.memory_space<vmem>>, vector<1x512xf32>
    %c0_77 = arith.constant 0 : index
    %c0_78 = arith.constant 0 : index
    %39 = vector.load %arg39[%c0_77, %c0_78] : memref<512x256xbf16, #tpu.memory_space<vmem>>, vector<512x256xbf16>
    %c0_79 = arith.constant 0 : index
    %c0_80 = arith.constant 0 : index
    %40 = vector.load %arg40[%c0_79, %c0_80] : memref<512x256xbf16, #tpu.memory_space<vmem>>, vector<512x256xbf16>
    %c0_81 = arith.constant 0 : index
    %c0_82 = arith.constant 0 : index
    %41 = vector.load %arg41[%c0_81, %c0_82] : memref<512x256xbf16, #tpu.memory_space<vmem>>, vector<512x256xbf16>
    %c0_83 = arith.constant 0 : index
    %c0_84 = arith.constant 0 : index
    %42 = vector.load %arg42[%c0_83, %c0_84] : memref<1x256xf32, #tpu.memory_space<vmem>>, vector<1x256xf32>
    %c0_85 = arith.constant 0 : index
    %c0_86 = arith.constant 0 : index
    %43 = vector.load %arg43[%c0_85, %c0_86] : memref<256x32xf32, #tpu.memory_space<vmem>>, vector<256x32xf32>
    %c0_87 = arith.constant 0 : index
    %c0_88 = arith.constant 0 : index
    %44 = vector.load %arg44[%c0_87, %c0_88] : memref<1x32xf32, #tpu.memory_space<vmem>>, vector<1x32xf32>
    %c0_89 = arith.constant 0 : index
    %c0_90 = arith.constant 0 : index
    %45 = vector.load %arg45[%c0_89, %c0_90] : memref<32x16xf32, #tpu.memory_space<vmem>>, vector<32x16xf32>
    %c0_91 = arith.constant 0 : index
    %c0_92 = arith.constant 0 : index
    %46 = vector.load %arg46[%c0_91, %c0_92] : memref<1x16xf32, #tpu.memory_space<vmem>>, vector<1x16xf32>
    %c0_93 = arith.constant 0 : index
    %c0_94 = arith.constant 0 : index
    %47 = vector.load %arg47[%c0_93, %c0_94] : memref<1x16xf32, #tpu.memory_space<vmem>>, vector<1x16xf32>
    %c0_95 = arith.constant 0 : index
    %c0_96 = arith.constant 0 : index
    %48 = vector.load %arg48[%c0_95, %c0_96] : memref<1x1xf32, #tpu.memory_space<vmem>>, vector<1x1xf32>
    %cst = arith.constant dense<0.000000e+00> : vector<16x512xf32>
    %49 = tpu.matmul %0, %10, %cst {dimension_numbers = #tpu.dot_dimension_numbers<[1], [0], [0], [1], [0, 0, 1, 1], [], []>} : vector<16x11xf32>, vector<11x512xf32>, vector<16x512xf32> -> vector<16x512xf32>
    %50 = vector.broadcast %11 : vector<1x512xf32> to vector<16x512xf32>
    %51 = arith.addf %49, %50 : vector<16x512xf32>
    %cst_97 = arith.constant 0.000000e+00 : f32
    %52 = vector.broadcast %cst_97 : f32 to vector<16x512xf32>
    %53 = arith.cmpf ogt, %51, %52 : vector<16x512xf32>
    %cst_98 = arith.constant 0.00999999977 : f32
    %54 = vector.broadcast %cst_98 : f32 to vector<16x512xf32>
    %55 = arith.mulf %54, %51 : vector<16x512xf32>
    %56 = arith.select %53, %51, %55 : vector<16x512xi1>, vector<16x512xf32>
    %57 = arith.truncf %56 : vector<16x512xf32> to vector<16x512xbf16>
    %cst_99 = arith.constant dense<0.000000e+00> : vector<16x512xf32>
    %58 = tpu.matmul %57, %12, %cst_99 {dimension_numbers = #tpu.dot_dimension_numbers<[1], [0], [0], [1], [0, 0, 1, 1], [], []>} : vector<16x512xbf16>, vector<512x512xbf16>, vector<16x512xf32> -> vector<16x512xf32>
    %59 = vector.broadcast %13 : vector<1x512xf32> to vector<16x512xf32>
    %60 = arith.addf %58, %59 : vector<16x512xf32>
    %cst_100 = arith.constant 0.000000e+00 : f32
    %61 = vector.broadcast %cst_100 : f32 to vector<16x512xf32>
    %62 = arith.cmpf ogt, %60, %61 : vector<16x512xf32>
    %cst_101 = arith.constant 1.000000e-01 : f32
    %63 = vector.broadcast %cst_101 : f32 to vector<16x512xf32>
    %64 = arith.mulf %63, %60 : vector<16x512xf32>
    %65 = arith.select %62, %60, %64 : vector<16x512xi1>, vector<16x512xf32>
    %66 = tpu.iota {dimensions = array<i32: 1>} : vector<8x16xi32>
    %67 = vector.extract_strided_slice %1 {offsets = [0, 0], sizes = [8, 1], strides = [1, 1]} : vector<8x2xi32> to vector<8x1xi32>
    %68 = vector.broadcast %67 : vector<8x1xi32> to vector<8x16xi32>
    %69 = arith.cmpi eq, %68, %66 : vector<8x16xi32>
    %70 = arith.extui %69 : vector<8x16xi1> to vector<8x16xi32>
    %71 = arith.sitofp %70 : vector<8x16xi32> to vector<8x16xf32>
    %72 = vector.extract_strided_slice %1 {offsets = [0, 1], sizes = [8, 1], strides = [1, 1]} : vector<8x2xi32> to vector<8x1xi32>
    %73 = vector.broadcast %72 : vector<8x1xi32> to vector<8x16xi32>
    %74 = arith.cmpi eq, %73, %66 : vector<8x16xi32>
    %75 = arith.extui %74 : vector<8x16xi1> to vector<8x16xi32>
    %76 = arith.sitofp %75 : vector<8x16xi32> to vector<8x16xf32>
    %77 = tpu.iota {dimensions = array<i32: 0>} : vector<16x8xi32>
    %78 = vector.broadcast %2 : vector<1x8xi32> to vector<16x8xi32>
    %79 = arith.cmpi eq, %78, %77 : vector<16x8xi32>
    %80 = arith.extui %79 : vector<16x8xi1> to vector<16x8xi32>
    %81 = arith.sitofp %80 : vector<16x8xi32> to vector<16x8xf32>
    %cst_102 = arith.constant dense<0.000000e+00> : vector<16xf32>
    %82 = vector.multi_reduction <add>, %81, %cst_102 [1] : vector<16x8xf32> to vector<16xf32>
    %83 = vector.shape_cast %82 : vector<16xf32> to vector<16x1xf32>
    %cst_103 = arith.constant 1.000000e+00 : f32
    %84 = vector.broadcast %cst_103 : f32 to vector<16x1xf32>
    %85 = arith.maximumf %83, %84 : vector<16x1xf32>
    %86 = vector.broadcast %85 : vector<16x1xf32> to vector<16x8xf32>
    %87 = arith.divf %81, %86 : vector<16x8xf32>
    %cst_104 = arith.constant dense<0.000000e+00> : vector<8x512xf32>
    %88 = tpu.matmul %71, %65, %cst_104 {dimension_numbers = #tpu.dot_dimension_numbers<[1], [0], [0], [1], [0, 0, 1, 1], [], []>} : vector<8x16xf32>, vector<16x512xf32>, vector<8x512xf32> -> vector<8x512xf32>
    %cst_105 = arith.constant dense<0.000000e+00> : vector<8x512xf32>
    %89 = tpu.matmul %76, %65, %cst_105 {dimension_numbers = #tpu.dot_dimension_numbers<[1], [0], [0], [1], [0, 0, 1, 1], [], []>} : vector<8x16xf32>, vector<16x512xf32>, vector<8x512xf32> -> vector<8x512xf32>
    %90 = vector.extract_strided_slice %3 {offsets = [0, 0], sizes = [8, 1], strides = [1, 1]} : vector<8x3xf32> to vector<8x1xf32>
    %91 = vector.extract_strided_slice %16 {offsets = [0, 0], sizes = [1, 512], strides = [1, 1]} : vector<3x512xf32> to vector<1x512xf32>
    %92 = vector.broadcast %90 : vector<8x1xf32> to vector<8x512xf32>
    %93 = vector.broadcast %91 : vector<1x512xf32> to vector<8x512xf32>
    %94 = arith.mulf %92, %93 : vector<8x512xf32>
    %95 = vector.extract_strided_slice %3 {offsets = [0, 1], sizes = [8, 1], strides = [1, 1]} : vector<8x3xf32> to vector<8x1xf32>
    %96 = vector.extract_strided_slice %16 {offsets = [1, 0], sizes = [1, 512], strides = [1, 1]} : vector<3x512xf32> to vector<1x512xf32>
    %97 = vector.broadcast %95 : vector<8x1xf32> to vector<8x512xf32>
    %98 = vector.broadcast %96 : vector<1x512xf32> to vector<8x512xf32>
    %99 = arith.mulf %97, %98 : vector<8x512xf32>
    %100 = arith.addf %94, %99 : vector<8x512xf32>
    %101 = vector.extract_strided_slice %3 {offsets = [0, 2], sizes = [8, 1], strides = [1, 1]} : vector<8x3xf32> to vector<8x1xf32>
    %102 = vector.extract_strided_slice %16 {offsets = [2, 0], sizes = [1, 512], strides = [1, 1]} : vector<3x512xf32> to vector<1x512xf32>
    %103 = vector.broadcast %101 : vector<8x1xf32> to vector<8x512xf32>
    %104 = vector.broadcast %102 : vector<1x512xf32> to vector<8x512xf32>
    %105 = arith.mulf %103, %104 : vector<8x512xf32>
    %106 = arith.addf %100, %105 : vector<8x512xf32>
    %107 = arith.truncf %88 : vector<8x512xf32> to vector<8x512xbf16>
    %cst_106 = arith.constant dense<0.000000e+00> : vector<8x512xf32>
    %108 = tpu.matmul %107, %14, %cst_106 {dimension_numbers = #tpu.dot_dimension_numbers<[1], [0], [0], [1], [0, 0, 1, 1], [], []>} : vector<8x512xbf16>, vector<512x512xbf16>, vector<8x512xf32> -> vector<8x512xf32>
    %109 = arith.truncf %89 : vector<8x512xf32> to vector<8x512xbf16>
    %cst_107 = arith.constant dense<0.000000e+00> : vector<8x512xf32>
    %110 = tpu.matmul %109, %15, %cst_107 {dimension_numbers = #tpu.dot_dimension_numbers<[1], [0], [0], [1], [0, 0, 1, 1], [], []>} : vector<8x512xbf16>, vector<512x512xbf16>, vector<8x512xf32> -> vector<8x512xf32>
    %111 = arith.addf %108, %110 : vector<8x512xf32>
    %112 = arith.addf %111, %106 : vector<8x512xf32>
    %113 = vector.broadcast %17 : vector<1x512xf32> to vector<8x512xf32>
    %114 = arith.addf %112, %113 : vector<8x512xf32>
    %cst_108 = arith.constant 0.000000e+00 : f32
    %115 = vector.broadcast %cst_108 : f32 to vector<8x512xf32>
    %116 = arith.maximumf %114, %115 : vector<8x512xf32>
    %cst_109 = arith.constant dense<0.000000e+00> : vector<16x512xf32>
    %117 = tpu.matmul %87, %116, %cst_109 {dimension_numbers = #tpu.dot_dimension_numbers<[1], [0], [0], [1], [0, 0, 1, 1], [], []>} : vector<16x8xf32>, vector<8x512xf32>, vector<16x512xf32> -> vector<16x512xf32>
    %cst_110 = arith.constant dense<0.000000e+00> : vector<8x512xf32>
    %118 = tpu.matmul %71, %117, %cst_110 {dimension_numbers = #tpu.dot_dimension_numbers<[1], [0], [0], [1], [0, 0, 1, 1], [], []>} : vector<8x16xf32>, vector<16x512xf32>, vector<8x512xf32> -> vector<8x512xf32>
    %cst_111 = arith.constant dense<0.000000e+00> : vector<8x512xf32>
    %119 = tpu.matmul %76, %117, %cst_111 {dimension_numbers = #tpu.dot_dimension_numbers<[1], [0], [0], [1], [0, 0, 1, 1], [], []>} : vector<8x16xf32>, vector<16x512xf32>, vector<8x512xf32> -> vector<8x512xf32>
    %120 = vector.extract_strided_slice %3 {offsets = [0, 0], sizes = [8, 1], strides = [1, 1]} : vector<8x3xf32> to vector<8x1xf32>
    %121 = vector.extract_strided_slice %20 {offsets = [0, 0], sizes = [1, 512], strides = [1, 1]} : vector<3x512xf32> to vector<1x512xf32>
    %122 = vector.broadcast %120 : vector<8x1xf32> to vector<8x512xf32>
    %123 = vector.broadcast %121 : vector<1x512xf32> to vector<8x512xf32>
    %124 = arith.mulf %122, %123 : vector<8x512xf32>
    %125 = vector.extract_strided_slice %3 {offsets = [0, 1], sizes = [8, 1], strides = [1, 1]} : vector<8x3xf32> to vector<8x1xf32>
    %126 = vector.extract_strided_slice %20 {offsets = [1, 0], sizes = [1, 512], strides = [1, 1]} : vector<3x512xf32> to vector<1x512xf32>
    %127 = vector.broadcast %125 : vector<8x1xf32> to vector<8x512xf32>
    %128 = vector.broadcast %126 : vector<1x512xf32> to vector<8x512xf32>
    %129 = arith.mulf %127, %128 : vector<8x512xf32>
    %130 = arith.addf %124, %129 : vector<8x512xf32>
    %131 = vector.extract_strided_slice %3 {offsets = [0, 2], sizes = [8, 1], strides = [1, 1]} : vector<8x3xf32> to vector<8x1xf32>
    %132 = vector.extract_strided_slice %20 {offsets = [2, 0], sizes = [1, 512], strides = [1, 1]} : vector<3x512xf32> to vector<1x512xf32>
    %133 = vector.broadcast %131 : vector<8x1xf32> to vector<8x512xf32>
    %134 = vector.broadcast %132 : vector<1x512xf32> to vector<8x512xf32>
    %135 = arith.mulf %133, %134 : vector<8x512xf32>
    %136 = arith.addf %130, %135 : vector<8x512xf32>
    %137 = arith.truncf %118 : vector<8x512xf32> to vector<8x512xbf16>
    %cst_112 = arith.constant dense<0.000000e+00> : vector<8x512xf32>
    %138 = tpu.matmul %137, %18, %cst_112 {dimension_numbers = #tpu.dot_dimension_numbers<[1], [0], [0], [1], [0, 0, 1, 1], [], []>} : vector<8x512xbf16>, vector<512x512xbf16>, vector<8x512xf32> -> vector<8x512xf32>
    %139 = arith.truncf %119 : vector<8x512xf32> to vector<8x512xbf16>
    %cst_113 = arith.constant dense<0.000000e+00> : vector<8x512xf32>
    %140 = tpu.matmul %139, %19, %cst_113 {dimension_numbers = #tpu.dot_dimension_numbers<[1], [0], [0], [1], [0, 0, 1, 1], [], []>} : vector<8x512xbf16>, vector<512x512xbf16>, vector<8x512xf32> -> vector<8x512xf32>
    %141 = arith.addf %138, %140 : vector<8x512xf32>
    %142 = arith.addf %141, %136 : vector<8x512xf32>
    %143 = vector.broadcast %21 : vector<1x512xf32> to vector<8x512xf32>
    %144 = arith.addf %142, %143 : vector<8x512xf32>
    %cst_114 = arith.constant 0.000000e+00 : f32
    %145 = vector.broadcast %cst_114 : f32 to vector<8x512xf32>
    %146 = arith.maximumf %144, %145 : vector<8x512xf32>
    %cst_115 = arith.constant dense<0.000000e+00> : vector<16x512xf32>
    %147 = tpu.matmul %87, %146, %cst_115 {dimension_numbers = #tpu.dot_dimension_numbers<[1], [0], [0], [1], [0, 0, 1, 1], [], []>} : vector<16x8xf32>, vector<8x512xf32>, vector<16x512xf32> -> vector<16x512xf32>
    %148 = arith.truncf %65 : vector<16x512xf32> to vector<16x512xbf16>
    %cst_116 = arith.constant dense<0.000000e+00> : vector<16x256xf32>
    %149 = tpu.matmul %148, %22, %cst_116 {dimension_numbers = #tpu.dot_dimension_numbers<[1], [0], [0], [1], [0, 0, 1, 1], [], []>} : vector<16x512xbf16>, vector<512x256xbf16>, vector<16x256xf32> -> vector<16x256xf32>
    %150 = arith.truncf %117 : vector<16x512xf32> to vector<16x512xbf16>
    %cst_117 = arith.constant dense<0.000000e+00> : vector<16x256xf32>
    %151 = tpu.matmul %150, %23, %cst_117 {dimension_numbers = #tpu.dot_dimension_numbers<[1], [0], [0], [1], [0, 0, 1, 1], [], []>} : vector<16x512xbf16>, vector<512x256xbf16>, vector<16x256xf32> -> vector<16x256xf32>
    %152 = arith.addf %149, %151 : vector<16x256xf32>
    %153 = arith.truncf %147 : vector<16x512xf32> to vector<16x512xbf16>
    %cst_118 = arith.constant dense<0.000000e+00> : vector<16x256xf32>
    %154 = tpu.matmul %153, %24, %cst_118 {dimension_numbers = #tpu.dot_dimension_numbers<[1], [0], [0], [1], [0, 0, 1, 1], [], []>} : vector<16x512xbf16>, vector<512x256xbf16>, vector<16x256xf32> -> vector<16x256xf32>
    %155 = arith.addf %152, %154 : vector<16x256xf32>
    %156 = vector.broadcast %25 : vector<1x256xf32> to vector<16x256xf32>
    %157 = arith.addf %155, %156 : vector<16x256xf32>
    %cst_119 = arith.constant 0.000000e+00 : f32
    %158 = vector.broadcast %cst_119 : f32 to vector<16x256xf32>
    %159 = arith.cmpf ogt, %157, %158 : vector<16x256xf32>
    %cst_120 = arith.constant 1.000000e-01 : f32
    %160 = vector.broadcast %cst_120 : f32 to vector<16x256xf32>
    %161 = arith.mulf %160, %157 : vector<16x256xf32>
    %162 = arith.select %159, %157, %161 : vector<16x256xi1>, vector<16x256xf32>
    %cst_121 = arith.constant dense<0.000000e+00> : vector<4x256xf32>
    %163 = tpu.matmul %4, %162, %cst_121 {dimension_numbers = #tpu.dot_dimension_numbers<[1], [0], [0], [1], [0, 0, 1, 1], [], []>} : vector<4x16xf32>, vector<16x256xf32>, vector<4x256xf32> -> vector<4x256xf32>
    %164 = arith.truncf %163 : vector<4x256xf32> to vector<4x256xbf16>
    %cst_122 = arith.constant dense<0.000000e+00> : vector<4x512xf32>
    %165 = tpu.matmul %164, %26, %cst_122 {dimension_numbers = #tpu.dot_dimension_numbers<[1], [0], [0], [1], [0, 0, 1, 1], [], []>} : vector<4x256xbf16>, vector<256x512xbf16>, vector<4x512xf32> -> vector<4x512xf32>
    %cst_123 = arith.constant dense<0.000000e+00> : vector<4x512xf32>
    %166 = tpu.matmul %5, %27, %cst_123 {dimension_numbers = #tpu.dot_dimension_numbers<[1], [0], [0], [1], [0, 0, 1, 1], [], []>} : vector<4x4xf32>, vector<4x512xf32>, vector<4x512xf32> -> vector<4x512xf32>
    %167 = arith.addf %165, %166 : vector<4x512xf32>
    %168 = vector.broadcast %28 : vector<1x512xf32> to vector<4x512xf32>
    %169 = arith.addf %167, %168 : vector<4x512xf32>
    %cst_124 = arith.constant 0.000000e+00 : f32
    %170 = vector.broadcast %cst_124 : f32 to vector<4x512xf32>
    %171 = arith.cmpf ogt, %169, %170 : vector<4x512xf32>
    %cst_125 = arith.constant 0.00999999977 : f32
    %172 = vector.broadcast %cst_125 : f32 to vector<4x512xf32>
    %173 = arith.mulf %172, %169 : vector<4x512xf32>
    %174 = arith.select %171, %169, %173 : vector<4x512xi1>, vector<4x512xf32>
    %175 = arith.truncf %174 : vector<4x512xf32> to vector<4x512xbf16>
    %cst_126 = arith.constant dense<0.000000e+00> : vector<4x512xf32>
    %176 = tpu.matmul %175, %29, %cst_126 {dimension_numbers = #tpu.dot_dimension_numbers<[1], [0], [0], [1], [0, 0, 1, 1], [], []>} : vector<4x512xbf16>, vector<512x512xbf16>, vector<4x512xf32> -> vector<4x512xf32>
    %177 = vector.broadcast %30 : vector<1x512xf32> to vector<4x512xf32>
    %178 = arith.addf %176, %177 : vector<4x512xf32>
    %cst_127 = arith.constant 0.000000e+00 : f32
    %179 = vector.broadcast %cst_127 : f32 to vector<4x512xf32>
    %180 = arith.cmpf ogt, %178, %179 : vector<4x512xf32>
    %cst_128 = arith.constant 1.000000e-01 : f32
    %181 = vector.broadcast %cst_128 : f32 to vector<4x512xf32>
    %182 = arith.mulf %181, %178 : vector<4x512xf32>
    %183 = arith.select %180, %178, %182 : vector<4x512xi1>, vector<4x512xf32>
    %184 = tpu.iota {dimensions = array<i32: 1>} : vector<4x4xi32>
    %185 = vector.extract_strided_slice %6 {offsets = [0, 0], sizes = [4, 1], strides = [1, 1]} : vector<4x2xi32> to vector<4x1xi32>
    %186 = vector.broadcast %185 : vector<4x1xi32> to vector<4x4xi32>
    %187 = arith.cmpi eq, %186, %184 : vector<4x4xi32>
    %188 = arith.extui %187 : vector<4x4xi1> to vector<4x4xi32>
    %189 = arith.sitofp %188 : vector<4x4xi32> to vector<4x4xf32>
    %190 = vector.extract_strided_slice %6 {offsets = [0, 1], sizes = [4, 1], strides = [1, 1]} : vector<4x2xi32> to vector<4x1xi32>
    %191 = vector.broadcast %190 : vector<4x1xi32> to vector<4x4xi32>
    %192 = arith.cmpi eq, %191, %184 : vector<4x4xi32>
    %193 = arith.extui %192 : vector<4x4xi1> to vector<4x4xi32>
    %194 = arith.sitofp %193 : vector<4x4xi32> to vector<4x4xf32>
    %195 = tpu.iota {dimensions = array<i32: 0>} : vector<4x4xi32>
    %196 = vector.broadcast %7 : vector<1x4xi32> to vector<4x4xi32>
    %197 = arith.cmpi eq, %196, %195 : vector<4x4xi32>
    %198 = arith.extui %197 : vector<4x4xi1> to vector<4x4xi32>
    %199 = arith.sitofp %198 : vector<4x4xi32> to vector<4x4xf32>
    %cst_129 = arith.constant dense<0.000000e+00> : vector<4xf32>
    %200 = vector.multi_reduction <add>, %199, %cst_129 [1] : vector<4x4xf32> to vector<4xf32>
    %201 = vector.shape_cast %200 : vector<4xf32> to vector<4x1xf32>
    %cst_130 = arith.constant 1.000000e+00 : f32
    %202 = vector.broadcast %cst_130 : f32 to vector<4x1xf32>
    %203 = arith.maximumf %201, %202 : vector<4x1xf32>
    %204 = vector.broadcast %203 : vector<4x1xf32> to vector<4x4xf32>
    %205 = arith.divf %199, %204 : vector<4x4xf32>
    %cst_131 = arith.constant dense<0.000000e+00> : vector<4x512xf32>
    %206 = tpu.matmul %189, %183, %cst_131 {dimension_numbers = #tpu.dot_dimension_numbers<[1], [0], [0], [1], [0, 0, 1, 1], [], []>} : vector<4x4xf32>, vector<4x512xf32>, vector<4x512xf32> -> vector<4x512xf32>
    %cst_132 = arith.constant dense<0.000000e+00> : vector<4x512xf32>
    %207 = tpu.matmul %194, %183, %cst_132 {dimension_numbers = #tpu.dot_dimension_numbers<[1], [0], [0], [1], [0, 0, 1, 1], [], []>} : vector<4x4xf32>, vector<4x512xf32>, vector<4x512xf32> -> vector<4x512xf32>
    %208 = vector.extract_strided_slice %8 {offsets = [0, 0], sizes = [4, 1], strides = [1, 1]} : vector<4x3xf32> to vector<4x1xf32>
    %209 = vector.extract_strided_slice %33 {offsets = [0, 0], sizes = [1, 512], strides = [1, 1]} : vector<3x512xf32> to vector<1x512xf32>
    %210 = vector.broadcast %208 : vector<4x1xf32> to vector<4x512xf32>
    %211 = vector.broadcast %209 : vector<1x512xf32> to vector<4x512xf32>
    %212 = arith.mulf %210, %211 : vector<4x512xf32>
    %213 = vector.extract_strided_slice %8 {offsets = [0, 1], sizes = [4, 1], strides = [1, 1]} : vector<4x3xf32> to vector<4x1xf32>
    %214 = vector.extract_strided_slice %33 {offsets = [1, 0], sizes = [1, 512], strides = [1, 1]} : vector<3x512xf32> to vector<1x512xf32>
    %215 = vector.broadcast %213 : vector<4x1xf32> to vector<4x512xf32>
    %216 = vector.broadcast %214 : vector<1x512xf32> to vector<4x512xf32>
    %217 = arith.mulf %215, %216 : vector<4x512xf32>
    %218 = arith.addf %212, %217 : vector<4x512xf32>
    %219 = vector.extract_strided_slice %8 {offsets = [0, 2], sizes = [4, 1], strides = [1, 1]} : vector<4x3xf32> to vector<4x1xf32>
    %220 = vector.extract_strided_slice %33 {offsets = [2, 0], sizes = [1, 512], strides = [1, 1]} : vector<3x512xf32> to vector<1x512xf32>
    %221 = vector.broadcast %219 : vector<4x1xf32> to vector<4x512xf32>
    %222 = vector.broadcast %220 : vector<1x512xf32> to vector<4x512xf32>
    %223 = arith.mulf %221, %222 : vector<4x512xf32>
    %224 = arith.addf %218, %223 : vector<4x512xf32>
    %225 = arith.truncf %206 : vector<4x512xf32> to vector<4x512xbf16>
    %cst_133 = arith.constant dense<0.000000e+00> : vector<4x512xf32>
    %226 = tpu.matmul %225, %31, %cst_133 {dimension_numbers = #tpu.dot_dimension_numbers<[1], [0], [0], [1], [0, 0, 1, 1], [], []>} : vector<4x512xbf16>, vector<512x512xbf16>, vector<4x512xf32> -> vector<4x512xf32>
    %227 = arith.truncf %207 : vector<4x512xf32> to vector<4x512xbf16>
    %cst_134 = arith.constant dense<0.000000e+00> : vector<4x512xf32>
    %228 = tpu.matmul %227, %32, %cst_134 {dimension_numbers = #tpu.dot_dimension_numbers<[1], [0], [0], [1], [0, 0, 1, 1], [], []>} : vector<4x512xbf16>, vector<512x512xbf16>, vector<4x512xf32> -> vector<4x512xf32>
    %229 = arith.addf %226, %228 : vector<4x512xf32>
    %230 = arith.addf %229, %224 : vector<4x512xf32>
    %231 = vector.broadcast %34 : vector<1x512xf32> to vector<4x512xf32>
    %232 = arith.addf %230, %231 : vector<4x512xf32>
    %cst_135 = arith.constant 0.000000e+00 : f32
    %233 = vector.broadcast %cst_135 : f32 to vector<4x512xf32>
    %234 = arith.maximumf %232, %233 : vector<4x512xf32>
    %cst_136 = arith.constant dense<0.000000e+00> : vector<4x512xf32>
    %235 = tpu.matmul %205, %234, %cst_136 {dimension_numbers = #tpu.dot_dimension_numbers<[1], [0], [0], [1], [0, 0, 1, 1], [], []>} : vector<4x4xf32>, vector<4x512xf32>, vector<4x512xf32> -> vector<4x512xf32>
    %cst_137 = arith.constant dense<0.000000e+00> : vector<4x512xf32>
    %236 = tpu.matmul %189, %235, %cst_137 {dimension_numbers = #tpu.dot_dimension_numbers<[1], [0], [0], [1], [0, 0, 1, 1], [], []>} : vector<4x4xf32>, vector<4x512xf32>, vector<4x512xf32> -> vector<4x512xf32>
    %cst_138 = arith.constant dense<0.000000e+00> : vector<4x512xf32>
    %237 = tpu.matmul %194, %235, %cst_138 {dimension_numbers = #tpu.dot_dimension_numbers<[1], [0], [0], [1], [0, 0, 1, 1], [], []>} : vector<4x4xf32>, vector<4x512xf32>, vector<4x512xf32> -> vector<4x512xf32>
    %238 = vector.extract_strided_slice %8 {offsets = [0, 0], sizes = [4, 1], strides = [1, 1]} : vector<4x3xf32> to vector<4x1xf32>
    %239 = vector.extract_strided_slice %37 {offsets = [0, 0], sizes = [1, 512], strides = [1, 1]} : vector<3x512xf32> to vector<1x512xf32>
    %240 = vector.broadcast %238 : vector<4x1xf32> to vector<4x512xf32>
    %241 = vector.broadcast %239 : vector<1x512xf32> to vector<4x512xf32>
    %242 = arith.mulf %240, %241 : vector<4x512xf32>
    %243 = vector.extract_strided_slice %8 {offsets = [0, 1], sizes = [4, 1], strides = [1, 1]} : vector<4x3xf32> to vector<4x1xf32>
    %244 = vector.extract_strided_slice %37 {offsets = [1, 0], sizes = [1, 512], strides = [1, 1]} : vector<3x512xf32> to vector<1x512xf32>
    %245 = vector.broadcast %243 : vector<4x1xf32> to vector<4x512xf32>
    %246 = vector.broadcast %244 : vector<1x512xf32> to vector<4x512xf32>
    %247 = arith.mulf %245, %246 : vector<4x512xf32>
    %248 = arith.addf %242, %247 : vector<4x512xf32>
    %249 = vector.extract_strided_slice %8 {offsets = [0, 2], sizes = [4, 1], strides = [1, 1]} : vector<4x3xf32> to vector<4x1xf32>
    %250 = vector.extract_strided_slice %37 {offsets = [2, 0], sizes = [1, 512], strides = [1, 1]} : vector<3x512xf32> to vector<1x512xf32>
    %251 = vector.broadcast %249 : vector<4x1xf32> to vector<4x512xf32>
    %252 = vector.broadcast %250 : vector<1x512xf32> to vector<4x512xf32>
    %253 = arith.mulf %251, %252 : vector<4x512xf32>
    %254 = arith.addf %248, %253 : vector<4x512xf32>
    %255 = arith.truncf %236 : vector<4x512xf32> to vector<4x512xbf16>
    %cst_139 = arith.constant dense<0.000000e+00> : vector<4x512xf32>
    %256 = tpu.matmul %255, %35, %cst_139 {dimension_numbers = #tpu.dot_dimension_numbers<[1], [0], [0], [1], [0, 0, 1, 1], [], []>} : vector<4x512xbf16>, vector<512x512xbf16>, vector<4x512xf32> -> vector<4x512xf32>
    %257 = arith.truncf %237 : vector<4x512xf32> to vector<4x512xbf16>
    %cst_140 = arith.constant dense<0.000000e+00> : vector<4x512xf32>
    %258 = tpu.matmul %257, %36, %cst_140 {dimension_numbers = #tpu.dot_dimension_numbers<[1], [0], [0], [1], [0, 0, 1, 1], [], []>} : vector<4x512xbf16>, vector<512x512xbf16>, vector<4x512xf32> -> vector<4x512xf32>
    %259 = arith.addf %256, %258 : vector<4x512xf32>
    %260 = arith.addf %259, %254 : vector<4x512xf32>
    %261 = vector.broadcast %38 : vector<1x512xf32> to vector<4x512xf32>
    %262 = arith.addf %260, %261 : vector<4x512xf32>
    %cst_141 = arith.constant 0.000000e+00 : f32
    %263 = vector.broadcast %cst_141 : f32 to vector<4x512xf32>
    %264 = arith.maximumf %262, %263 : vector<4x512xf32>
    %cst_142 = arith.constant dense<0.000000e+00> : vector<4x512xf32>
    %265 = tpu.matmul %205, %264, %cst_142 {dimension_numbers = #tpu.dot_dimension_numbers<[1], [0], [0], [1], [0, 0, 1, 1], [], []>} : vector<4x4xf32>, vector<4x512xf32>, vector<4x512xf32> -> vector<4x512xf32>
    %266 = arith.truncf %183 : vector<4x512xf32> to vector<4x512xbf16>
    %cst_143 = arith.constant dense<0.000000e+00> : vector<4x256xf32>
    %267 = tpu.matmul %266, %39, %cst_143 {dimension_numbers = #tpu.dot_dimension_numbers<[1], [0], [0], [1], [0, 0, 1, 1], [], []>} : vector<4x512xbf16>, vector<512x256xbf16>, vector<4x256xf32> -> vector<4x256xf32>
    %268 = arith.truncf %235 : vector<4x512xf32> to vector<4x512xbf16>
    %cst_144 = arith.constant dense<0.000000e+00> : vector<4x256xf32>
    %269 = tpu.matmul %268, %40, %cst_144 {dimension_numbers = #tpu.dot_dimension_numbers<[1], [0], [0], [1], [0, 0, 1, 1], [], []>} : vector<4x512xbf16>, vector<512x256xbf16>, vector<4x256xf32> -> vector<4x256xf32>
    %270 = arith.addf %267, %269 : vector<4x256xf32>
    %271 = arith.truncf %265 : vector<4x512xf32> to vector<4x512xbf16>
    %cst_145 = arith.constant dense<0.000000e+00> : vector<4x256xf32>
    %272 = tpu.matmul %271, %41, %cst_145 {dimension_numbers = #tpu.dot_dimension_numbers<[1], [0], [0], [1], [0, 0, 1, 1], [], []>} : vector<4x512xbf16>, vector<512x256xbf16>, vector<4x256xf32> -> vector<4x256xf32>
    %273 = arith.addf %270, %272 : vector<4x256xf32>
    %274 = vector.broadcast %42 : vector<1x256xf32> to vector<4x256xf32>
    %275 = arith.addf %273, %274 : vector<4x256xf32>
    %cst_146 = arith.constant 0.000000e+00 : f32
    %276 = vector.broadcast %cst_146 : f32 to vector<4x256xf32>
    %277 = arith.cmpf ogt, %275, %276 : vector<4x256xf32>
    %cst_147 = arith.constant 1.000000e-01 : f32
    %278 = vector.broadcast %cst_147 : f32 to vector<4x256xf32>
    %279 = arith.mulf %278, %275 : vector<4x256xf32>
    %280 = arith.select %277, %275, %279 : vector<4x256xi1>, vector<4x256xf32>
    %cst_148 = arith.constant dense<0.000000e+00> : vector<4x32xf32>
    %281 = tpu.matmul %280, %43, %cst_148 {dimension_numbers = #tpu.dot_dimension_numbers<[1], [0], [0], [1], [0, 0, 1, 1], [], []>} : vector<4x256xf32>, vector<256x32xf32>, vector<4x32xf32> -> vector<4x32xf32>
    %282 = vector.broadcast %44 : vector<1x32xf32> to vector<4x32xf32>
    %283 = arith.addf %281, %282 : vector<4x32xf32>
    %cst_149 = arith.constant dense<0.000000e+00> : vector<2x32xf32>
    %284 = tpu.matmul %9, %283, %cst_149 {dimension_numbers = #tpu.dot_dimension_numbers<[1], [0], [0], [1], [0, 0, 1, 1], [], []>} : vector<2x4xf32>, vector<4x32xf32>, vector<2x32xf32> -> vector<2x32xf32>
    %285 = arith.negf %284 : vector<2x32xf32>
    %286 = math.exp %285 : vector<2x32xf32>
    %cst_150 = arith.constant 1.000000e+00 : f32
    %287 = vector.broadcast %cst_150 : f32 to vector<2x32xf32>
    %288 = arith.addf %287, %286 : vector<2x32xf32>
    %289 = arith.divf %287, %288 : vector<2x32xf32>
    %cst_151 = arith.constant dense<0.000000e+00> : vector<2x16xf32>
    %290 = tpu.matmul %289, %45, %cst_151 {dimension_numbers = #tpu.dot_dimension_numbers<[1], [0], [0], [1], [0, 0, 1, 1], [], []>} : vector<2x32xf32>, vector<32x16xf32>, vector<2x16xf32> -> vector<2x16xf32>
    %291 = vector.broadcast %46 : vector<1x16xf32> to vector<2x16xf32>
    %292 = arith.addf %290, %291 : vector<2x16xf32>
    %293 = arith.negf %292 : vector<2x16xf32>
    %294 = math.exp %293 : vector<2x16xf32>
    %cst_152 = arith.constant 1.000000e+00 : f32
    %295 = vector.broadcast %cst_152 : f32 to vector<2x16xf32>
    %296 = arith.addf %295, %294 : vector<2x16xf32>
    %297 = arith.divf %295, %296 : vector<2x16xf32>
    %cst_153 = arith.constant dense<0.000000e+00> : vector<1x2xf32>
    %298 = tpu.matmul %47, %297, %cst_153 {dimension_numbers = #tpu.dot_dimension_numbers<[1], [1], [0], [0], [0, 0, 1, 0], [], []>} : vector<1x16xf32>, vector<2x16xf32>, vector<1x2xf32> -> vector<1x2xf32>
    %299 = vector.broadcast %48 : vector<1x1xf32> to vector<1x2xf32>
    %300 = arith.addf %298, %299 : vector<1x2xf32>
    %301 = arith.negf %300 : vector<1x2xf32>
    %302 = math.exp %301 : vector<1x2xf32>
    %cst_154 = arith.constant 1.000000e+00 : f32
    %303 = vector.broadcast %cst_154 : f32 to vector<1x2xf32>
    %304 = arith.addf %303, %302 : vector<1x2xf32>
    %305 = arith.divf %303, %304 : vector<1x2xf32>
    %c0_155 = arith.constant 0 : index
    %c0_156 = arith.constant 0 : index
    %306 = vector.load %arg49[%c0_155, %c0_156] : memref<1x2xf32, #tpu.memory_space<vmem>>, vector<1x2xf32>
    tpu.vector_store %arg49[%c0_155, %c0_156], %305 {strides = array<i32>} : memref<1x2xf32, #tpu.memory_space<vmem>>, vector<1x2xf32>,
    return
  }
}

</mosaic_0001>

<bundles_post_ra>
// kernel: network_dis_forward.1
= control target key start
LH: loop header
LB: loop body
LE: loop exit
PB: predicated region body
PF: predicated region fallthrough
CT: control target
= control target key end

     0   :  { %s22530_s6 = smov 1   ;;  %s22531_s10 = smov 2   ;;  %s24026_s0 = inlined_call_operand.smem [shape: u32[50], index: -1, kind: input, shape index: {}] }
   0x1   :  { %s22636_s5 = sld [smem:[%s24026_s0]]   ;;  %s22532_s14 = smov 3  }
   0x2   :  { %s22641_s9 = sld [smem:[%s24026_s0 + %s22530_s6]]   ;;  %s22533_s18 = smov 4  }
   0x3   :  { %s22646_s13 = sld [smem:[%s24026_s0 + %s22531_s10]]   ;;  %s22534_s22 = smov 5  }
   0x4   :  { %s22651_s17 = sld [smem:[%s24026_s0 + %s22532_s14]]   ;;  %s22535_s26 = smov 6  }
   0x5   :  { %s22656_s21 = sld [smem:[%s24026_s0 + %s22533_s18]]   ;;  %s22536_s30 = smov 7  }
   0x6   :  { %s22661_s25 = sld [smem:[%s24026_s0 + %s22534_s22]]   ;;  %s22537_s4 = smov 8  }
   0x7   :  { %24050 = sst [smem:[#allocation77_spill]] %s22636_s5  ;;  %s22538_s10 = smov 9  }
   0x8   :  { %24051 = sst [smem:[#allocation78_spill]] %s22641_s9  ;;  %s22539_s15 = smov 10  }
   0x9   :  { %24052 = sst [smem:[#allocation79_spill]] %s22646_s13  ;;  %s22540_s20 = smov 11  }
   0xa   :  { %24053 = sst [smem:[#allocation80_spill]] %s22651_s17  ;;  %s22542_s1 = smov 13  }
   0xb   :  { %24054 = sst [smem:[#allocation81_spill]] %s22656_s21  ;;  %s22543_s7 = smov 14  }
   0xc   :  { %24055 = sst [smem:[#allocation82_spill]] %s22661_s25  ;;  %s22545_s22 = smov 16  }
   0xd   :  { %s22666_s29 = sld [smem:[%s24026_s0 + %s22535_s26]]   ;;  %s22541_s26 = smov 12  }
   0xe   :  { %s22671_s3 = sld [smem:[%s24026_s0 + %s22536_s30]]   ;;  %s22546_s28 = smov 17  }
   0xf   :  { %s22676_s8 = sld [smem:[%s24026_s0 + %s22537_s4]]  }
  0x10   :  { %s22681_s14 = sld [smem:[%s24026_s0 + %s22538_s10]]  }
  0x11   :  { %s22686_s19 = sld [smem:[%s24026_s0 + %s22539_s15]]   ;;  %s22544_s15 = smov 15  }
  0x12   :  { %s22691_s24 = sld [smem:[%s24026_s0 + %s22540_s20]]  }
  0x13   :  { %24056 = sst [smem:[#allocation83_spill]] %s22666_s29 }
  0x14   :  { %24057 = sst [smem:[#allocation84_spill]] %s22671_s3 }
  0x15   :  { %24058 = sst [smem:[#allocation85_spill]] %s22676_s8 }
  0x16   :  { %24059 = sst [smem:[#allocation86_spill]] %s22681_s14 }
  0x17   :  { %24060 = sst [smem:[#allocation87_spill]] %s22686_s19 }
  0x18   :  { %s22696_s30 = sld [smem:[%s24026_s0 + %s22541_s26]]  }
  0x19   :  { %s22701_s6 = sld [smem:[%s24026_s0 + %s22542_s1]]   ;;  %s22578_s1 = smov 49  }
  0x1a   :  { %s22706_s12 = sld [smem:[%s24026_s0 + %s22543_s7]]   ;;  %s22547_s7 = smov 18  }
  0x1b   :  { %s22711_s20 = sld [smem:[%s24026_s0 + %s22544_s15]]   ;;  %s22548_s15 = smov 19  }
  0x1c   :  { %s22716_s27 = sld [smem:[%s24026_s0 + %s22545_s22]]   ;;  %s22549_s22 = smov 20  }
  0x1d   :  { %s22721_s4 = sld [smem:[%s24026_s0 + %s22546_s28]]   ;;  %s22550_s28 = smov 21  }
  0x1e   :  { %24061 = sst [smem:[#allocation88_spill]] %s22696_s30 }
  0x1f   :  { %s22726_s14 = sld [smem:[%s24026_s0 + %s22547_s7]]   ;;  %s22551_s7 = smov 22  }
  0x20   :  { %24062 = sst [smem:[#allocation89_spill]] %s22706_s12 }
  0x21   :  { %s22731_s3 = sld [smem:[%s24026_s0 + %s22548_s15]]   ;;  %s22552_s15 = smov 23  }
  0x22   :  { %24063 = sst [smem:[#allocation90_spill]] %s22716_s27 }
  0x23   :  { %s22736_s8 = sld [smem:[%s24026_s0 + %s22549_s22]]   ;;  %s22553_s22 = smov 24  }
  0x24   :  { %s22741_s29 = sld [smem:[%s24026_s0 + %s22550_s28]]   ;;  %s22554_s28 = smov 25  }
  0x25   :  { %24064 = sst [smem:[#allocation91_spill]] %s22726_s14 }
  0x26   :  { %s22746_s25 = sld [smem:[%s24026_s0 + %s22551_s7]]   ;;  %s22555_s7 = smov 26  }
  0x27   :  { %s22751_s21 = sld [smem:[%s24026_s0 + %s22552_s15]]   ;;  %s22556_s15 = smov 27  }
  0x28   :  { %s22756_s17 = sld [smem:[%s24026_s0 + %s22553_s22]]   ;;  %s22557_s22 = smov 28  }
  0x29   :  { %24065 = sst [smem:[#allocation92_spill]] %s22736_s8 }
  0x2a   :  { %s22761_s9 = sld [smem:[%s24026_s0 + %s22554_s28]]   ;;  %s22558_s28 = smov 29  }
  0x2b   :  { %s22766_s13 = sld [smem:[%s24026_s0 + %s22555_s7]]   ;;  %s22559_s7 = smov 30  }
  0x2c   :  { %24066 = sst [smem:[#allocation93_spill]] %s22746_s25 }
  0x2d   :  { %s22771_s5 = sld [smem:[%s24026_s0 + %s22556_s15]]   ;;  %s22560_s15 = smov 31  }
  0x2e   :  { %24067 = sst [smem:[#allocation94_spill]] %s22756_s17 }
  0x2f   :  { %s22776_s17 = sld [smem:[%s24026_s0 + %s22557_s22]]   ;;  %s22561_s22 = smov 32  }
  0x30   :  { %24068 = sst [smem:[#allocation95_spill]] %s22761_s9 }
  0x31   :  { %s22781_s9 = sld [smem:[%s24026_s0 + %s22558_s28]]   ;;  %s22562_s28 = smov 33  }
  0x32   :  { %s22786_s25 = sld [smem:[%s24026_s0 + %s22559_s7]]   ;;  %s22563_s7 = smov 34  }
  0x33   :  { %24069 = sst [smem:[#allocation96_spill]] %s22771_s5 }
  0x34   :  { %s22791_s5 = sld [smem:[%s24026_s0 + %s22560_s15]]   ;;  %s22564_s15 = smov 35  }
  0x35   :  { %s22796_s8 = sld [smem:[%s24026_s0 + %s22561_s22]]   ;;  %s22565_s22 = smov 36  }
  0x36   :  { %s22806_s14 = sld [smem:[%s24026_s0 + %s22563_s7]]   ;;  %s22567_s7 = smov 38  }
  0x37   :  { %24070 = sst [smem:[#allocation97_spill]] %s22781_s9 }
  0x38   :  { %s22801_s9 = sld [smem:[%s24026_s0 + %s22562_s28]]   ;;  %s22566_s28 = smov 37  }
  0x39   :  { %s22816_s27 = sld [smem:[%s24026_s0 + %s22565_s22]]   ;;  %s22569_s22 = smov 40  }
  0x3a   :  { %24071 = sst [smem:[#allocation98_spill]] %s22791_s5 }
  0x3b   :  { %s22811_s5 = sld [smem:[%s24026_s0 + %s22564_s15]]   ;;  %s22568_s15 = smov 39  }
  0x3c   :  { %s22826_s12 = sld [smem:[%s24026_s0 + %s22567_s7]]   ;;  %s22571_s7 = smov 42  }
  0x3d   :  { %s22836_s30 = sld [smem:[%s24026_s0 + %s22569_s22]]   ;;  %s22573_s22 = smov 44  }
  0x3e   :  { %24072 = sst [smem:[#allocation99_spill]] %s22801_s9 }
  0x3f   :  { %s22821_s9 = sld [smem:[%s24026_s0 + %s22566_s28]]   ;;  %s22570_s28 = smov 41  }
  0x40   :  { %s22846_s19 = sld [smem:[%s24026_s0 + %s22571_s7]]   ;;  %s22575_s7 = smov 46  }
  0x41   :  { %24073 = sst [smem:[#allocation100_spill]] %s22811_s5 }
  0x42   :  { %s22831_s5 = sld [smem:[%s24026_s0 + %s22568_s15]]   ;;  %s22572_s15 = smov 43  }
  0x43   :  { %24076 = sst [smem:[#allocation103_spill]] %s22836_s30 }
  0x44   :  { %s22856_s30 = sld [smem:[%s24026_s0 + %s22573_s22]]   ;;  %s22577_s22 = smov 48  }
  0x45   :  { %24074 = sst [smem:[#allocation101_spill]] %s22821_s9 }
  0x46   :  { %s22841_s9 = sld [smem:[%s24026_s0 + %s22570_s28]]   ;;  %s22574_s28 = smov 45  }
  0x47   :  { %24078 = sst [smem:[#allocation105_spill]] %s22846_s19 }
  0x48   :  { %24075 = sst [smem:[#allocation102_spill]] %s22831_s5 }
  0x49   :  { %s22851_s5 = sld [smem:[%s24026_s0 + %s22572_s15]]   ;;  %s22576_s15 = smov 47  }
  0x4a   :  { %24080 = sst [smem:[#allocation107_spill]] %s22856_s30 }
  0x4b   :  { %s22866_s19 = sld [smem:[%s24026_s0 + %s22575_s7]]  }
  0x4c   :  { %24077 = sst [smem:[#allocation104_spill]] %s22841_s9 }
  0x4d   :  { %s22861_s9 = sld [smem:[%s24026_s0 + %s22574_s28]]  }
  0x4e   :  { %s16966_s30 = sld [smem:[%s24026_s0 + %s22577_s22]]  }
  0x4f   :  { %24079 = sst [smem:[#allocation106_spill]] %s22851_s5 }
  0x50   :  { %s22871_s5 = sld [smem:[%s24026_s0 + %s22576_s15]]  }
  0x53   :  { %24081 = sst [smem:[#allocation108_spill]] %s22861_s9 }
  0x54   :  { %s22879_s9 = sld [smem:[%s24026_s0 + %s22578_s1]]   ;;  %v104_v0 = vstv %s16966_s30 }
  0x55   :  { %105 = vst [vmem:[#allocation2] sm:$0x1] %v104_v0 }
  0x56   :  { %106 = vsyncpa [#allocation4], 0 }
  0x57   :  { %107 = vsyncpa [#allocation7], 0 }
  0x58   :  { %108 = vsyncpa [#allocation10], 0 }
  0x59   :  { %109 = vsyncpa [#allocation13], 0 }
  0x5a   :  { %110 = vsyncpa [#allocation16], 0 }
  0x5b   :  { %111 = vsyncpa [#allocation19], 0 }
  0x5c   :  { %112 = vsyncpa [#allocation22], 0 }
  0x5d   :  { %113 = vsyncpa [#allocation25], 0 }
  0x5e   :  { %114 = vsyncpa [#allocation28], 0 }
  0x5f   :  { %115 = vsyncpa [#allocation31], 0 }
  0x60   :  { %116 = vsyncpa [#allocation34], 0 }
  0x61   :  { %117 = vsyncpa [#allocation37], 0 }
  0x62   :  { %118 = vsyncpa [#allocation40], 0 }
  0x63   :  { %119 = vsyncpa [#allocation43], 0 }
  0x64   :  { %120 = vsyncpa [#allocation46], 0 }
  0x65   :  { %121 = vsyncpa [#allocation49], 0 }
  0x66   :  { %122 = vsyncpa [#allocation52], 0 }
  0x67   :  { %123 = vsyncpa [#allocation55], 0 }
  0x68   :  { %124 = vsyncpa [#allocation5], 0  ;;  %s22579_s0 = smov [#allocation6]   ;;  %s22580_s7 = smov [#allocation9]  }
  0x69   :  { %s163_s30 = sshll.u32 %s22579_s0, 4  ;;  %s185_s10 = sshll.u32 %s22580_s7, 4  ;;  %s164_s30 = int_to_ptr.vmem [resolvable:$true] %s163_s30  ;;  %s186_s10 = int_to_ptr.vmem [resolvable:$true] %s185_s10 }
  0x6a   :  { %s21700_s11 = scalar_lea.hbm %s22691_s24, 64 }
  0x6b   :  { %p21701_p0 = scmp.ne.s32.totalorder %s22691_s24, %s21700_s11  ;;  %p21704_p1 = scmp.lt.u32.totalorder %s21700_s11, %s22691_s24 }
  0x6d   :  { %p21706_p2 = pnand %p21704_p1, %p21701_p0 }
  0x6f   :  { %21709 = shalt.err (!%p21706_p2)
}
  0x70   :  { %s21710_s15 = scalar_lea.vmem %s164_s30, 64  ;;  %p21715_p4 = scmp.lt.s32.totalorder %s164_s30, %s164_s30 }
  0x71   :  { %p21711_p3 = scmp.ne.s32.totalorder %s164_s30, %s21710_s15  ;;  %p21716_p5 = scmp.lt.s32.totalorder %s21710_s15, %s21710_s15 }
  0x73   :  { %p21717_p6 = por %p21716_p5, %p21715_p4 }
  0x75   :  { %p21718_p7 = pnand %p21717_p6, %p21711_p3 }
  0x77   :  { %21721 = shalt.err (!%p21718_p7)
}
  0x78   :  { %166 = dma.hbm_to_vmem [thread:$0]  %s22691_s24, 64, %s164_s30, [#allocation7]  }
  0x79   :  { %s21722_s16 = scalar_lea.hbm %s22701_s6, 64 }
  0x7a   :  { %p21723_p8 = scmp.ne.s32.totalorder %s22701_s6, %s21722_s16  ;;  %p21726_p9 = scmp.lt.u32.totalorder %s21722_s16, %s22701_s6 }
  0x7c   :  { %p21728_p10 = pnand %p21726_p9, %p21723_p8 }
  0x7e   :  { %21731 = shalt.err (!%p21728_p10)
}
  0x7f   :  { %s21732_s18 = scalar_lea.vmem %s186_s10, 64  ;;  %p21737_p12 = scmp.lt.s32.totalorder %s186_s10, %s186_s10 }
  0x80   :  { %p21733_p11 = scmp.ne.s32.totalorder %s186_s10, %s21732_s18  ;;  %p21738_p13 = scmp.lt.s32.totalorder %s21732_s18, %s21732_s18 }
  0x82   :  { %p21739_p0 = por %p21738_p13, %p21737_p12 }
  0x84   :  { %p21740_p1 = pnand %p21739_p0, %p21733_p11 }
  0x86   :  { %21743 = shalt.err (!%p21740_p1)
}
  0x87   :  { %188 = dma.hbm_to_vmem [thread:$0]  %s22701_s6, 64, %s186_s10, [#allocation10]  }
  0x88   :  { %s22581_s22 = smov [#allocation12]   ;;  %s22582_s24 = smov [#allocation15]  }
  0x89   :  { %s206_s23 = sshll.u32 %s22581_s22, 4  ;;  %s229_s26 = sshll.u32 %s22582_s24, 4  ;;  %s207_s23 = int_to_ptr.vmem [resolvable:$true] %s206_s23  ;;  %s230_s26 = int_to_ptr.vmem [resolvable:$true] %s229_s26 }
  0x8a   :  { %s21744_s1 = scalar_lea.hbm %s22711_s20, 16384 }
  0x8b   :  { %p21745_p2 = scmp.ne.s32.totalorder %s22711_s20, %s21744_s1  ;;  %p21748_p3 = scmp.lt.u32.totalorder %s21744_s1, %s22711_s20 }
  0x8d   :  { %p21750_p4 = pnand %p21748_p3, %p21745_p2 }
  0x8f   :  { %21753 = shalt.err (!%p21750_p4)
}
  0x90   :  { %s21754_s28 = scalar_lea.vmem %s207_s23, 16384  ;;  %p21759_p6 = scmp.lt.s32.totalorder %s207_s23, %s207_s23 }
  0x91   :  { %p21755_p5 = scmp.ne.s32.totalorder %s207_s23, %s21754_s28  ;;  %p21760_p7 = scmp.lt.s32.totalorder %s21754_s28, %s21754_s28 }
  0x93   :  { %p21761_p8 = por %p21760_p7, %p21759_p6 }
  0x95   :  { %p21762_p9 = pnand %p21761_p8, %p21755_p5 }
  0x97   :  { %21765 = shalt.err (!%p21762_p9)
}
  0x98   :  { %s22583_s2 = smov 256   ;;  %s22584_s6 = smov 16  }
  0x99   :  { %212 = dma.hbm_to_vmem [thread:$0]  %s22711_s20, 16384, %s207_s23, [#allocation13], %s22583_s2, %s22583_s2, %s22584_s6  }
  0x9a   :  { %s21766_s0 = scalar_lea.hbm %s22721_s4, 64 }
  0x9b   :  { %p21767_p10 = scmp.ne.s32.totalorder %s22721_s4, %s21766_s0  ;;  %p21770_p11 = scmp.lt.u32.totalorder %s21766_s0, %s22721_s4 }
  0x9d   :  { %p21772_p12 = pnand %p21770_p11, %p21767_p10 }
  0x9f   :  { %21775 = shalt.err (!%p21772_p12)
}
  0xa0   :  { %s21776_s30 = scalar_lea.vmem %s230_s26, 64  ;;  %p21781_p0 = scmp.lt.s32.totalorder %s230_s26, %s230_s26 }
  0xa1   :  { %p21777_p13 = scmp.ne.s32.totalorder %s230_s26, %s21776_s30  ;;  %p21782_p1 = scmp.lt.s32.totalorder %s21776_s30, %s21776_s30 }
  0xa3   :  { %p21783_p2 = por %p21782_p1, %p21781_p0 }
  0xa5   :  { %p21784_p3 = pnand %p21783_p2, %p21777_p13 }
  0xa7   :  { %21787 = shalt.err (!%p21784_p3)
}
  0xa8   :  { %232 = dma.hbm_to_vmem [thread:$0]  %s22721_s4, 64, %s230_s26, [#allocation16]  }
  0xa9   :  { %s22585_s7 = smov [#allocation18]   ;;  %s22586_s20 = smov [#allocation21]  }
  0xaa   :  { %s250_s10 = sshll.u32 %s22585_s7, 4  ;;  %s273_s11 = sshll.u32 %s22586_s20, 4  ;;  %s251_s10 = int_to_ptr.vmem [resolvable:$true] %s250_s10  ;;  %s274_s11 = int_to_ptr.vmem [resolvable:$true] %s273_s11 }
  0xab   :  { %s21788_s15 = scalar_lea.hbm %s22731_s3, 16384 }
  0xac   :  { %p21789_p4 = scmp.ne.s32.totalorder %s22731_s3, %s21788_s15  ;;  %p21792_p5 = scmp.lt.u32.totalorder %s21788_s15, %s22731_s3 }
  0xae   :  { %p21794_p6 = pnand %p21792_p5, %p21789_p4 }
  0xb0   :  { %21797 = shalt.err (!%p21794_p6)
}
  0xb1   :  { %s21798_s16 = scalar_lea.vmem %s251_s10, 16384  ;;  %p21803_p8 = scmp.lt.s32.totalorder %s251_s10, %s251_s10 }
  0xb2   :  { %p21799_p7 = scmp.ne.s32.totalorder %s251_s10, %s21798_s16  ;;  %p21804_p9 = scmp.lt.s32.totalorder %s21798_s16, %s21798_s16 }
  0xb4   :  { %p21805_p10 = por %p21804_p9, %p21803_p8 }
  0xb6   :  { %p21806_p11 = pnand %p21805_p10, %p21799_p7 }
  0xb8   :  { %21809 = shalt.err (!%p21806_p11)
}
  0xb9   :  { %256 = dma.hbm_to_vmem [thread:$0]  %s22731_s3, 16384, %s251_s10, [#allocation19], %s22583_s2, %s22583_s2, %s22584_s6  }
  0xba   :  { %s21810_s4 = scalar_lea.hbm %s22741_s29, 64 }
  0xbb   :  { %p21811_p12 = scmp.ne.s32.totalorder %s22741_s29, %s21810_s4  ;;  %p21814_p13 = scmp.lt.u32.totalorder %s21810_s4, %s22741_s29 }
  0xbd   :  { %p21816_p0 = pnand %p21814_p13, %p21811_p12 }
  0xbf   :  { %21819 = shalt.err (!%p21816_p0)
}
  0xc0   :  { %s21820_s18 = scalar_lea.vmem %s274_s11, 64  ;;  %p21825_p2 = scmp.lt.s32.totalorder %s274_s11, %s274_s11 }
  0xc1   :  { %p21821_p1 = scmp.ne.s32.totalorder %s274_s11, %s21820_s18  ;;  %p21826_p3 = scmp.lt.s32.totalorder %s21820_s18, %s21820_s18 }
  0xc3   :  { %p21827_p4 = por %p21826_p3, %p21825_p2 }
  0xc5   :  { %p21828_p5 = pnand %p21827_p4, %p21821_p1 }
  0xc7   :  { %21831 = shalt.err (!%p21828_p5)
}
  0xc8   :  { %276 = dma.hbm_to_vmem [thread:$0]  %s22741_s29, 64, %s274_s11, [#allocation22]  }
  0xc9   :  { %s22587_s22 = smov [#allocation24]   ;;  %s22588_s3 = smov [#allocation27]  }
  0xca   :  { %s294_s23 = sshll.u32 %s22587_s22, 4  ;;  %s318_s24 = sshll.u32 %s22588_s3, 4  ;;  %s295_s23 = int_to_ptr.vmem [resolvable:$true] %s294_s23  ;;  %s22911_s24 = int_to_ptr.vmem [resolvable:$true] %s318_s24 }
  0xcb   :  { %s21832_s26 = scalar_lea.hbm %s22751_s21, 8192 }
  0xcc   :  { %p21833_p6 = scmp.ne.s32.totalorder %s22751_s21, %s21832_s26  ;;  %p21836_p7 = scmp.lt.u32.totalorder %s21832_s26, %s22751_s21 }
  0xce   :  { %p21838_p8 = pnand %p21836_p7, %p21833_p6 }
  0xd0   :  { %21841 = shalt.err (!%p21838_p8)
}
  0xd1   :  { %s21842_s1 = scalar_lea.vmem %s295_s23, 8192  ;;  %p21847_p10 = scmp.lt.s32.totalorder %s295_s23, %s295_s23 }
  0xd2   :  { %p21843_p9 = scmp.ne.s32.totalorder %s295_s23, %s21842_s1  ;;  %p21848_p11 = scmp.lt.s32.totalorder %s21842_s1, %s21842_s1 }
  0xd4   :  { %p21849_p12 = por %p21848_p11, %p21847_p10 }
  0xd6   :  { %p21850_p13 = pnand %p21849_p12, %p21843_p9 }
  0xd8   :  { %21853 = shalt.err (!%p21850_p13)
}
  0xd9   :  { %s22589_s29 = smov 128   ;;  %s22590_s28 = smov 8  }
  0xda   :  { %300 = dma.hbm_to_vmem [thread:$0]  %s22751_s21, 8192, %s295_s23, [#allocation25], %s22589_s29, %s22589_s29, %s22590_s28  }
  0xdb   :  { %s21854_s0 = scalar_lea.hbm %s22766_s13, 8192 }
  0xdc   :  { %p21855_p0 = scmp.ne.s32.totalorder %s22766_s13, %s21854_s0  ;;  %p21858_p1 = scmp.lt.u32.totalorder %s21854_s0, %s22766_s13 }
  0xde   :  { %p21860_p2 = pnand %p21858_p1, %p21855_p0 }
  0xe0   :  { %21863 = shalt.err (!%p21860_p2)
}
  0xe1   :  { %s21864_s30 = scalar_lea.vmem %s22911_s24, 8192  ;;  %p21869_p4 = scmp.lt.s32.totalorder %s22911_s24, %s22911_s24 }
  0xe2   :  { %p21865_p3 = scmp.ne.s32.totalorder %s22911_s24, %s21864_s30  ;;  %p21870_p5 = scmp.lt.s32.totalorder %s21864_s30, %s21864_s30 }
  0xe4   :  { %p21871_p6 = por %p21870_p5, %p21869_p4 }
  0xe6   :  { %p21872_p7 = pnand %p21871_p6, %p21865_p3 }
  0xe8   :  { %21875 = shalt.err (!%p21872_p7)
}
  0xe9   :  { %324 = dma.hbm_to_vmem [thread:$0]  %s22766_s13, 8192, %s22911_s24, [#allocation28], %s22583_s2, %s22583_s2, %s22584_s6  }
  0xea   :  { %s22591_s21 = smov [#allocation30]   ;;  %s22592_s10 = smov [#allocation33]  }
  0xeb   :  { %s341_s7 = sshll.u32 %s22591_s21, 4  ;;  %s363_s20 = sshll.u32 %s22592_s10, 4  ;;  %s342_s7 = int_to_ptr.vmem [resolvable:$true] %s341_s7  ;;  %s364_s20 = int_to_ptr.vmem [resolvable:$true] %s363_s20 }
  0xec   :  { %s21876_s11 = scalar_lea.hbm %s22776_s17, 64 }
  0xed   :  { %p21877_p8 = scmp.ne.s32.totalorder %s22776_s17, %s21876_s11  ;;  %p21880_p9 = scmp.lt.u32.totalorder %s21876_s11, %s22776_s17 }
  0xef   :  { %p21882_p10 = pnand %p21880_p9, %p21877_p8 }
  0xf1   :  { %21885 = shalt.err (!%p21882_p10)
}
  0xf2   :  { %s21886_s15 = scalar_lea.vmem %s342_s7, 64  ;;  %p21891_p12 = scmp.lt.s32.totalorder %s342_s7, %s342_s7 }
  0xf3   :  { %p21887_p11 = scmp.ne.s32.totalorder %s342_s7, %s21886_s15  ;;  %p21892_p13 = scmp.lt.s32.totalorder %s21886_s15, %s21886_s15 }
  0xf5   :  { %p21893_p0 = por %p21892_p13, %p21891_p12 }
  0xf7   :  { %p21894_p1 = pnand %p21893_p0, %p21887_p11 }
  0xf9   :  { %21897 = shalt.err (!%p21894_p1)
}
  0xfa   :  { %344 = dma.hbm_to_vmem [thread:$0]  %s22776_s17, 64, %s342_s7, [#allocation31]  }
  0xfb   :  { %s21898_s13 = scalar_lea.hbm %s22786_s25, 64 }
  0xfc   :  { %p21899_p2 = scmp.ne.s32.totalorder %s22786_s25, %s21898_s13  ;;  %p21902_p3 = scmp.lt.u32.totalorder %s21898_s13, %s22786_s25 }
  0xfe   :  { %p21904_p4 = pnand %p21902_p3, %p21899_p2 }
 0x100   :  { %21907 = shalt.err (!%p21904_p4)
}
 0x101   :  { %s21908_s16 = scalar_lea.vmem %s364_s20, 64  ;;  %p21913_p6 = scmp.lt.s32.totalorder %s364_s20, %s364_s20 }
 0x102   :  { %p21909_p5 = scmp.ne.s32.totalorder %s364_s20, %s21908_s16  ;;  %p21914_p7 = scmp.lt.s32.totalorder %s21908_s16, %s21908_s16 }
 0x104   :  { %p21915_p8 = por %p21914_p7, %p21913_p6 }
 0x106   :  { %p21916_p9 = pnand %p21915_p8, %p21909_p5 }
 0x108   :  { %21919 = shalt.err (!%p21916_p9)
}
 0x109   :  { %366 = dma.hbm_to_vmem [thread:$0]  %s22786_s25, 64, %s364_s20, [#allocation34]  }
 0x10a   :  { %s22593_s4 = smov [#allocation36]   ;;  %s22594_s17 = smov [#allocation39]  }
 0x10b   :  { %s384_s18 = sshll.u32 %s22593_s4, 4  ;;  %s407_s22 = sshll.u32 %s22594_s17, 4  ;;  %s385_s18 = int_to_ptr.vmem [resolvable:$true] %s384_s18  ;;  %s408_s22 = int_to_ptr.vmem [resolvable:$true] %s407_s22 }
 0x10c   :  { %s21920_s23 = scalar_lea.hbm %s22796_s8, 16384 }
 0x10d   :  { %p21921_p10 = scmp.ne.s32.totalorder %s22796_s8, %s21920_s23  ;;  %p21924_p11 = scmp.lt.u32.totalorder %s21920_s23, %s22796_s8 }
 0x10f   :  { %p21926_p12 = pnand %p21924_p11, %p21921_p10 }
 0x111   :  { %21929 = shalt.err (!%p21926_p12)
}
 0x112   :  { %s21930_s3 = scalar_lea.vmem %s385_s18, 16384  ;;  %p21935_p0 = scmp.lt.s32.totalorder %s385_s18, %s385_s18 }
 0x113   :  { %p21931_p13 = scmp.ne.s32.totalorder %s385_s18, %s21930_s3  ;;  %p21936_p1 = scmp.lt.s32.totalorder %s21930_s3, %s21930_s3 }
 0x115   :  { %p21937_p2 = por %p21936_p1, %p21935_p0 }
 0x117   :  { %p21938_p3 = pnand %p21937_p2, %p21931_p13 }
 0x119   :  { %21941 = shalt.err (!%p21938_p3)
}
 0x11a   :  { %390 = dma.hbm_to_vmem [thread:$0]  %s22796_s8, 16384, %s385_s18, [#allocation37], %s22583_s2, %s22583_s2, %s22584_s6  }
 0x11b   :  { %s21942_s25 = scalar_lea.hbm %s22806_s14, 64 }
 0x11c   :  { %p21943_p4 = scmp.ne.s32.totalorder %s22806_s14, %s21942_s25  ;;  %p21946_p5 = scmp.lt.u32.totalorder %s21942_s25, %s22806_s14 }
 0x11e   :  { %p21948_p6 = pnand %p21946_p5, %p21943_p4 }
 0x120   :  { %21951 = shalt.err (!%p21948_p6)
}
 0x121   :  { %s21952_s24 = scalar_lea.vmem %s408_s22, 64  ;;  %p21957_p8 = scmp.lt.s32.totalorder %s408_s22, %s408_s22 }
 0x122   :  { %p21953_p7 = scmp.ne.s32.totalorder %s408_s22, %s21952_s24  ;;  %p21958_p9 = scmp.lt.s32.totalorder %s21952_s24, %s21952_s24 }
 0x124   :  { %p21959_p10 = por %p21958_p9, %p21957_p8 }
 0x126   :  { %p21960_p11 = pnand %p21959_p10, %p21953_p7 }
 0x128   :  { %21963 = shalt.err (!%p21960_p11)
}
 0x129   :  { %410 = dma.hbm_to_vmem [thread:$0]  %s22806_s14, 64, %s408_s22, [#allocation40]  }
 0x12a   :  { %s22595_s26 = smov [#allocation42]   ;;  %s22596_s8 = smov [#allocation45]  }
 0x12b   :  { %s428_s1 = sshll.u32 %s22595_s26, 4  ;;  %s451_s0 = sshll.u32 %s22596_s8, 4  ;;  %s429_s1 = int_to_ptr.vmem [resolvable:$true] %s428_s1  ;;  %s452_s0 = int_to_ptr.vmem [resolvable:$true] %s451_s0 }
 0x12c   :  { %s21964_s30 = scalar_lea.hbm %s22816_s27, 16384 }
 0x12d   :  { %p21965_p12 = scmp.ne.s32.totalorder %s22816_s27, %s21964_s30  ;;  %p21968_p13 = scmp.lt.u32.totalorder %s21964_s30, %s22816_s27 }
 0x12f   :  { %p21970_p0 = pnand %p21968_p13, %p21965_p12 }
 0x131   :  { %21973 = shalt.err (!%p21970_p0)
}
 0x132   :  { %s21974_s21 = scalar_lea.vmem %s429_s1, 16384  ;;  %p21979_p2 = scmp.lt.s32.totalorder %s429_s1, %s429_s1 }
 0x133   :  { %p21975_p1 = scmp.ne.s32.totalorder %s429_s1, %s21974_s21  ;;  %p21980_p3 = scmp.lt.s32.totalorder %s21974_s21, %s21974_s21 }
 0x135   :  { %p21981_p4 = por %p21980_p3, %p21979_p2 }
 0x137   :  { %p21982_p5 = pnand %p21981_p4, %p21975_p1 }
 0x139   :  { %21985 = shalt.err (!%p21982_p5)
}
 0x13a   :  { %434 = dma.hbm_to_vmem [thread:$0]  %s22816_s27, 16384, %s429_s1, [#allocation43], %s22583_s2, %s22583_s2, %s22584_s6  }
 0x13b   :  { %s21986_s14 = scalar_lea.hbm %s22826_s12, 64 }
 0x13c   :  { %p21987_p6 = scmp.ne.s32.totalorder %s22826_s12, %s21986_s14  ;;  %p21990_p7 = scmp.lt.u32.totalorder %s21986_s14, %s22826_s12 }
 0x13e   :  { %p21992_p8 = pnand %p21990_p7, %p21987_p6 }
 0x140   :  { %21995 = shalt.err (!%p21992_p8)
}
 0x141   :  { %s21996_s7 = scalar_lea.vmem %s452_s0, 64  ;;  %p22001_p10 = scmp.lt.s32.totalorder %s452_s0, %s452_s0 }
 0x142   :  { %p21997_p9 = scmp.ne.s32.totalorder %s452_s0, %s21996_s7  ;;  %p22002_p11 = scmp.lt.s32.totalorder %s21996_s7, %s21996_s7 }
 0x144   :  { %p22003_p12 = por %p22002_p11, %p22001_p10 }
 0x146   :  { %p22004_p13 = pnand %p22003_p12, %p21997_p9 }
 0x148   :  { %22007 = shalt.err (!%p22004_p13)
}
 0x149   :  { %s24082_s10 = sld [smem:[#allocation103_spill]]  ;;  %s22597_s20 = smov [#allocation48]  }
 0x14a   :  { %454 = dma.hbm_to_vmem [thread:$0]  %s22826_s12, 64, %s452_s0, [#allocation46]  }
 0x14b   :  { %s472_s11 = sshll.u32 %s22597_s20, 4  ;;  %s22598_s27 = smov [#allocation51]   ;;  %s473_s11 = int_to_ptr.vmem [resolvable:$true] %s472_s11 }
 0x14c   :  { %s497_s15 = sshll.u32 %s22598_s27, 4  ;;  %s498_s15 = int_to_ptr.vmem [resolvable:$true] %s497_s15 }
 0x14f   :  { %s22008_s13 = scalar_lea.hbm %s24082_s10, 8192 }
 0x150   :  { %p22009_p0 = scmp.ne.s32.totalorder %s24082_s10, %s22008_s13  ;;  %p22012_p1 = scmp.lt.u32.totalorder %s22008_s13, %s24082_s10 }
 0x152   :  { %p22014_p2 = pnand %p22012_p1, %p22009_p0 }
 0x154   :  { %22017 = shalt.err (!%p22014_p2)
}
 0x155   :  { %s22018_s16 = scalar_lea.vmem %s473_s11, 8192  ;;  %p22023_p4 = scmp.lt.s32.totalorder %s473_s11, %s473_s11 }
 0x156   :  { %p22019_p3 = scmp.ne.s32.totalorder %s473_s11, %s22018_s16  ;;  %p22024_p5 = scmp.lt.s32.totalorder %s22018_s16, %s22018_s16 }
 0x158   :  { %p22025_p6 = por %p22024_p5, %p22023_p4 }
 0x15a   :  { %p22026_p7 = pnand %p22025_p6, %p22019_p3 }
 0x15c   :  { %22029 = shalt.err (!%p22026_p7)
}
 0x15d   :  { %s24083_s12 = sld [smem:[#allocation105_spill]] }
 0x15e   :  { %478 = dma.hbm_to_vmem [thread:$0]  %s24082_s10, 8192, %s473_s11, [#allocation49], %s22589_s29, %s22589_s29, %s22590_s28  }
 0x163   :  { %s22030_s4 = scalar_lea.hbm %s24083_s12, 32 }
 0x164   :  { %p22031_p8 = scmp.ne.s32.totalorder %s24083_s12, %s22030_s4  ;;  %p22034_p9 = scmp.lt.u32.totalorder %s22030_s4, %s24083_s12 }
 0x166   :  { %p22036_p10 = pnand %p22034_p9, %p22031_p8 }
 0x168   :  { %22039 = shalt.err (!%p22036_p10)
}
 0x169   :  { %s22040_s18 = scalar_lea.vmem %s498_s15, 32  ;;  %p22045_p12 = scmp.lt.s32.totalorder %s498_s15, %s498_s15 }
 0x16a   :  { %p22041_p11 = scmp.ne.s32.totalorder %s498_s15, %s22040_s18  ;;  %p22046_p13 = scmp.lt.s32.totalorder %s22040_s18, %s22040_s18 }
 0x16c   :  { %p22047_p0 = por %p22046_p13, %p22045_p12 }
 0x16e   :  { %p22048_p1 = pnand %p22047_p0, %p22041_p11 }
 0x170   :  { %22051 = shalt.err (!%p22048_p1)
}
 0x171   :  { %500 = dma.hbm_to_vmem [thread:$0]  %s24083_s12, 32, %s498_s15, [#allocation52]  }
 0x172   :  { %s22599_s17 = smov [#allocation54]   ;;  %s22600_s23 = smov [#allocation3]  }
 0x173   :  { %s521_s22 = sshll.u32 %s22599_s17, 4  ;;  %s150_s3 = sshll.u32 %s22600_s23, 4  ;;  %s522_s22 = int_to_ptr.vmem [resolvable:$true] %s521_s22  ;;  %s22973_s3 = int_to_ptr.vmem [resolvable:$true] %s150_s3 }
 0x174   :  { %s22052_s25 = scalar_lea.hbm %s22866_s19, 16 }
 0x175   :  { %p22053_p2 = scmp.ne.s32.totalorder %s22866_s19, %s22052_s25  ;;  %p22056_p3 = scmp.lt.u32.totalorder %s22052_s25, %s22866_s19 }
 0x177   :  { %p22058_p4 = pnand %p22056_p3, %p22053_p2 }
 0x179   :  { %22061 = shalt.err (!%p22058_p4)
}
 0x17a   :  { %s22062_s24 = scalar_lea.vmem %s522_s22, 16  ;;  %s22066_s26 = scalar_lea.vmem %s522_s22, 32 }
 0x17b   :  { %p22063_p5 = scmp.ne.s32.totalorder %s522_s22, %s22062_s24  ;;  %p22067_p6 = scmp.lt.s32.totalorder %s522_s22, %s522_s22 }
 0x17c   :  { %p22068_p7 = scmp.lt.s32.totalorder %s22066_s26, %s22062_s24 }
 0x17e   :  { %p22069_p8 = por %p22068_p7, %p22067_p6 }
 0x180   :  { %p22070_p9 = pnand %p22069_p8, %p22063_p5 }
 0x182   :  { %22073 = shalt.err (!%p22070_p9)
}
 0x183   :  { %s24084_s1 = sld [smem:[#allocation87_spill]] }
 0x184   :  { %524 = dma.hbm_to_vmem [thread:$0]  %s22866_s19, 16, %s522_s22, [#allocation55]  }
 0x189   :  { %s22074_s8 = scalar_lea.hbm %s24084_s1, 1024 }
 0x18a   :  { %p22075_p10 = scmp.ne.s32.totalorder %s24084_s1, %s22074_s8  ;;  %p22078_p11 = scmp.lt.u32.totalorder %s22074_s8, %s24084_s1 }
 0x18c   :  { %p22080_p12 = pnand %p22078_p11, %p22075_p10 }
 0x18e   :  { %22083 = shalt.err (!%p22080_p12)
}
 0x18f   :  { %s22084_s0 = scalar_lea.vmem %s22973_s3, 1024  ;;  %p22089_p0 = scmp.lt.s32.totalorder %s22973_s3, %s22973_s3 }
 0x190   :  { %p22085_p13 = scmp.ne.s32.totalorder %s22973_s3, %s22084_s0  ;;  %p22090_p1 = scmp.lt.s32.totalorder %s22084_s0, %s22084_s0 }
 0x192   :  { %p22091_p2 = por %p22090_p1, %p22089_p0 }
 0x194   :  { %p22092_p3 = pnand %p22091_p2, %p22085_p13 }
 0x196   :  { %22095 = shalt.err (!%p22092_p3)
}
 0x197   :  { %s22601_s30 = smov 512   ;;  %s24085_s19 = sld [smem:[#allocation88_spill]] }
 0x198   :  { %s22602_s21 = smov 32   ;;  %s22603_s14 = smov [#allocation8]  }
 0x199   :  { %156 = dma.hbm_to_vmem [thread:$0]  %s24084_s1, 1024, %s22973_s3, [#allocation4], %s22601_s30, %s22601_s30, %s22602_s21  }
 0x19a   :  { %s172_s7 = sshll.u32 %s22603_s14, 4  ;;  %s22604_s10 = smov [#allocation11]   ;;  %s173_s7 = int_to_ptr.vmem [resolvable:$true] %s172_s7 }
 0x19b   :  { %s194_s20 = sshll.u32 %s22604_s10, 4  ;;  %s22988_s20 = int_to_ptr.vmem [resolvable:$true] %s194_s20 }
 0x19d   :  { %s22096_s11 = scalar_lea.hbm %s24085_s19, 16384 }
 0x19e   :  { %p22097_p4 = scmp.ne.s32.totalorder %s24085_s19, %s22096_s11  ;;  %p22100_p5 = scmp.lt.u32.totalorder %s22096_s11, %s24085_s19 }
 0x1a0   :  { %p22102_p6 = pnand %p22100_p5, %p22097_p4 }
 0x1a2   :  { %22105 = shalt.err (!%p22102_p6)
}
 0x1a3   :  { %s22106_s27 = scalar_lea.vmem %s173_s7, 16384  ;;  %p22111_p8 = scmp.lt.s32.totalorder %s173_s7, %s173_s7 }
 0x1a4   :  { %p22107_p7 = scmp.ne.s32.totalorder %s173_s7, %s22106_s27  ;;  %p22112_p9 = scmp.lt.s32.totalorder %s22106_s27, %s22106_s27 }
 0x1a6   :  { %p22113_p10 = por %p22112_p9, %p22111_p8 }
 0x1a8   :  { %p22114_p11 = pnand %p22113_p10, %p22107_p7 }
 0x1aa   :  { %22117 = shalt.err (!%p22114_p11)
}
 0x1ab   :  { %s24086_s15 = sld [smem:[#allocation89_spill]] }
 0x1ac   :  { %178 = dma.hbm_to_vmem [thread:$0]  %s24085_s19, 16384, %s173_s7, [#allocation7], %s22583_s2, %s22583_s2, %s22584_s6  }
 0x1b1   :  { %s22118_s13 = scalar_lea.hbm %s24086_s15, 16384 }
 0x1b2   :  { %p22119_p12 = scmp.ne.s32.totalorder %s24086_s15, %s22118_s13  ;;  %p22122_p13 = scmp.lt.u32.totalorder %s22118_s13, %s24086_s15 }
 0x1b4   :  { %p22124_p0 = pnand %p22122_p13, %p22119_p12 }
 0x1b6   :  { %22127 = shalt.err (!%p22124_p0)
}
 0x1b7   :  { %s22128_s16 = scalar_lea.vmem %s22988_s20, 16384  ;;  %p22133_p2 = scmp.lt.s32.totalorder %s22988_s20, %s22988_s20 }
 0x1b8   :  { %p22129_p1 = scmp.ne.s32.totalorder %s22988_s20, %s22128_s16  ;;  %p22134_p3 = scmp.lt.s32.totalorder %s22128_s16, %s22128_s16 }
 0x1ba   :  { %p22135_p4 = por %p22134_p3, %p22133_p2 }
 0x1bc   :  { %p22136_p5 = pnand %p22135_p4, %p22129_p1 }
 0x1be   :  { %22139 = shalt.err (!%p22136_p5)
}
 0x1bf   :  { %s24087_s12 = sld [smem:[#allocation90_spill]]  ;;  %s22605_s4 = smov [#allocation14]  }
 0x1c0   :  { %200 = dma.hbm_to_vmem [thread:$0]  %s24086_s15, 16384, %s22988_s20, [#allocation10], %s22583_s2, %s22583_s2, %s22584_s6  }
 0x1c1   :  { %s219_s18 = sshll.u32 %s22605_s4, 4  ;;  %s22606_s17 = smov [#allocation17]   ;;  %s220_s18 = int_to_ptr.vmem [resolvable:$true] %s219_s18 }
 0x1c2   :  { %s238_s22 = sshll.u32 %s22606_s17, 4  ;;  %s23009_s22 = int_to_ptr.vmem [resolvable:$true] %s238_s22 }
 0x1c5   :  { %s22140_s23 = scalar_lea.hbm %s24087_s12, 256 }
 0x1c6   :  { %p22141_p6 = scmp.ne.s32.totalorder %s24087_s12, %s22140_s23  ;;  %p22144_p7 = scmp.lt.u32.totalorder %s22140_s23, %s24087_s12 }
 0x1c8   :  { %p22146_p8 = pnand %p22144_p7, %p22141_p6 }
 0x1ca   :  { %22149 = shalt.err (!%p22146_p8)
}
 0x1cb   :  { %s22150_s3 = scalar_lea.vmem %s220_s18, 256  ;;  %p22155_p10 = scmp.lt.s32.totalorder %s220_s18, %s220_s18 }
 0x1cc   :  { %p22151_p9 = scmp.ne.s32.totalorder %s220_s18, %s22150_s3  ;;  %p22156_p11 = scmp.lt.s32.totalorder %s22150_s3, %s22150_s3 }
 0x1ce   :  { %p22157_p12 = por %p22156_p11, %p22155_p10 }
 0x1d0   :  { %p22158_p13 = pnand %p22157_p12, %p22151_p9 }
 0x1d2   :  { %22161 = shalt.err (!%p22158_p13)
}
 0x1d3   :  { %s24088_s25 = sld [smem:[#allocation91_spill]] }
 0x1d4   :  { %222 = dma.hbm_to_vmem [thread:$0]  %s24087_s12, 256, %s220_s18, [#allocation13]  }
 0x1d9   :  { %s22162_s24 = scalar_lea.hbm %s24088_s25, 16384 }
 0x1da   :  { %p22163_p0 = scmp.ne.s32.totalorder %s24088_s25, %s22162_s24  ;;  %p22166_p1 = scmp.lt.u32.totalorder %s22162_s24, %s24088_s25 }
 0x1dc   :  { %p22168_p2 = pnand %p22166_p1, %p22163_p0 }
 0x1de   :  { %22171 = shalt.err (!%p22168_p2)
}
 0x1df   :  { %s22172_s26 = scalar_lea.vmem %s23009_s22, 16384  ;;  %p22177_p4 = scmp.lt.s32.totalorder %s23009_s22, %s23009_s22 }
 0x1e0   :  { %p22173_p3 = scmp.ne.s32.totalorder %s23009_s22, %s22172_s26  ;;  %p22178_p5 = scmp.lt.s32.totalorder %s22172_s26, %s22172_s26 }
 0x1e2   :  { %p22179_p6 = por %p22178_p5, %p22177_p4 }
 0x1e4   :  { %p22180_p7 = pnand %p22179_p6, %p22173_p3 }
 0x1e6   :  { %22183 = shalt.err (!%p22180_p7)
}
 0x1e7   :  { %s24089_s1 = sld [smem:[#allocation92_spill]]  ;;  %s22607_s8 = smov [#allocation20]  }
 0x1e8   :  { %244 = dma.hbm_to_vmem [thread:$0]  %s24088_s25, 16384, %s23009_s22, [#allocation16], %s22583_s2, %s22583_s2, %s22584_s6  }
 0x1e9   :  { %s263_s0 = sshll.u32 %s22607_s8, 4  ;;  %s22608_s30 = smov [#allocation23]   ;;  %s264_s0 = int_to_ptr.vmem [resolvable:$true] %s263_s0 }
 0x1ea   :  { %s282_s19 = sshll.u32 %s22608_s30, 4  ;;  %s23027_s19 = int_to_ptr.vmem [resolvable:$true] %s282_s19 }
 0x1ed   :  { %s22184_s21 = scalar_lea.hbm %s24089_s1, 256 }
 0x1ee   :  { %p22185_p8 = scmp.ne.s32.totalorder %s24089_s1, %s22184_s21  ;;  %p22188_p9 = scmp.lt.u32.totalorder %s22184_s21, %s24089_s1 }
 0x1f0   :  { %p22190_p10 = pnand %p22188_p9, %p22185_p8 }
 0x1f2   :  { %22193 = shalt.err (!%p22190_p10)
}
 0x1f3   :  { %s22194_s14 = scalar_lea.vmem %s264_s0, 256  ;;  %p22199_p12 = scmp.lt.s32.totalorder %s264_s0, %s264_s0 }
 0x1f4   :  { %p22195_p11 = scmp.ne.s32.totalorder %s264_s0, %s22194_s14  ;;  %p22200_p13 = scmp.lt.s32.totalorder %s22194_s14, %s22194_s14 }
 0x1f6   :  { %p22201_p0 = por %p22200_p13, %p22199_p12 }
 0x1f8   :  { %p22202_p1 = pnand %p22201_p0, %p22195_p11 }
 0x1fa   :  { %22205 = shalt.err (!%p22202_p1)
}
 0x1fb   :  { %s24090_s7 = sld [smem:[#allocation93_spill]] }
 0x1fc   :  { %266 = dma.hbm_to_vmem [thread:$0]  %s24089_s1, 256, %s264_s0, [#allocation19]  }
 0x201   :  { %s22206_s10 = scalar_lea.hbm %s24090_s7, 8192 }
 0x202   :  { %p22207_p2 = scmp.ne.s32.totalorder %s24090_s7, %s22206_s10  ;;  %p22210_p3 = scmp.lt.u32.totalorder %s22206_s10, %s24090_s7 }
 0x204   :  { %p22212_p4 = pnand %p22210_p3, %p22207_p2 }
 0x206   :  { %22215 = shalt.err (!%p22212_p4)
}
 0x207   :  { %s22216_s20 = scalar_lea.vmem %s23027_s19, 8192  ;;  %p22221_p6 = scmp.lt.s32.totalorder %s23027_s19, %s23027_s19 }
 0x208   :  { %p22217_p5 = scmp.ne.s32.totalorder %s23027_s19, %s22216_s20  ;;  %p22222_p7 = scmp.lt.s32.totalorder %s22216_s20, %s22216_s20 }
 0x20a   :  { %p22223_p8 = por %p22222_p7, %p22221_p6 }
 0x20c   :  { %p22224_p9 = pnand %p22223_p8, %p22217_p5 }
 0x20e   :  { %22227 = shalt.err (!%p22224_p9)
}
 0x20f   :  { %s24091_s11 = sld [smem:[#allocation95_spill]]  ;;  %s22609_s27 = smov [#allocation26]  }
 0x210   :  { %288 = dma.hbm_to_vmem [thread:$0]  %s24090_s7, 8192, %s23027_s19, [#allocation22], %s22589_s29, %s22589_s29, %s22590_s28  }
 0x211   :  { %s309_s15 = sshll.u32 %s22609_s27, 4  ;;  %s22610_s13 = smov [#allocation29]   ;;  %s310_s15 = int_to_ptr.vmem [resolvable:$true] %s309_s15 }
 0x212   :  { %s331_s16 = sshll.u32 %s22610_s13, 4  ;;  %s332_s16 = int_to_ptr.vmem [resolvable:$true] %s331_s16 }
 0x215   :  { %s22228_s12 = scalar_lea.hbm %s24091_s11, 32 }
 0x216   :  { %p22229_p10 = scmp.ne.s32.totalorder %s24091_s11, %s22228_s12  ;;  %p22232_p11 = scmp.lt.u32.totalorder %s22228_s12, %s24091_s11 }
 0x218   :  { %p22234_p12 = pnand %p22232_p11, %p22229_p10 }
 0x21a   :  { %22237 = shalt.err (!%p22234_p12)
}
 0x21b   :  { %s22238_s4 = scalar_lea.vmem %s310_s15, 32  ;;  %p22243_p0 = scmp.lt.s32.totalorder %s310_s15, %s310_s15 }
 0x21c   :  { %p22239_p13 = scmp.ne.s32.totalorder %s310_s15, %s22238_s4  ;;  %p22244_p1 = scmp.lt.s32.totalorder %s22238_s4, %s22238_s4 }
 0x21e   :  { %p22245_p2 = por %p22244_p1, %p22243_p0 }
 0x220   :  { %p22246_p3 = pnand %p22245_p2, %p22239_p13 }
 0x222   :  { %22249 = shalt.err (!%p22246_p3)
}
 0x223   :  { %s24092_s18 = sld [smem:[#allocation96_spill]] }
 0x224   :  { %312 = dma.hbm_to_vmem [thread:$0]  %s24091_s11, 32, %s310_s15, [#allocation25]  }
 0x229   :  { %s22250_s17 = scalar_lea.hbm %s24092_s18, 256 }
 0x22a   :  { %p22251_p4 = scmp.ne.s32.totalorder %s24092_s18, %s22250_s17  ;;  %p22254_p5 = scmp.lt.u32.totalorder %s22250_s17, %s24092_s18 }
 0x22c   :  { %p22256_p6 = pnand %p22254_p5, %p22251_p4 }
 0x22e   :  { %22259 = shalt.err (!%p22256_p6)
}
 0x22f   :  { %s22260_s22 = scalar_lea.vmem %s332_s16, 256  ;;  %p22265_p8 = scmp.lt.s32.totalorder %s332_s16, %s332_s16 }
 0x230   :  { %p22261_p7 = scmp.ne.s32.totalorder %s332_s16, %s22260_s22  ;;  %p22266_p9 = scmp.lt.s32.totalorder %s22260_s22, %s22260_s22 }
 0x232   :  { %p22267_p10 = por %p22266_p9, %p22265_p8 }
 0x234   :  { %p22268_p11 = pnand %p22267_p10, %p22261_p7 }
 0x236   :  { %22271 = shalt.err (!%p22268_p11)
}
 0x237   :  { %s24093_s23 = sld [smem:[#allocation97_spill]]  ;;  %s22611_s3 = smov [#allocation32]  }
 0x238   :  { %334 = dma.hbm_to_vmem [thread:$0]  %s24092_s18, 256, %s332_s16, [#allocation28]  }
 0x239   :  { %s350_s25 = sshll.u32 %s22611_s3, 4  ;;  %s22612_s24 = smov [#allocation35]   ;;  %s351_s25 = int_to_ptr.vmem [resolvable:$true] %s350_s25 }
 0x23a   :  { %s372_s26 = sshll.u32 %s22612_s24, 4  ;;  %s23053_s26 = int_to_ptr.vmem [resolvable:$true] %s372_s26 }
 0x23d   :  { %s22272_s1 = scalar_lea.hbm %s24093_s23, 16384 }
 0x23e   :  { %p22273_p12 = scmp.ne.s32.totalorder %s24093_s23, %s22272_s1  ;;  %p22276_p13 = scmp.lt.u32.totalorder %s22272_s1, %s24093_s23 }
 0x240   :  { %p22278_p0 = pnand %p22276_p13, %p22273_p12 }
 0x242   :  { %22281 = shalt.err (!%p22278_p0)
}
 0x243   :  { %s22282_s8 = scalar_lea.vmem %s351_s25, 16384  ;;  %p22287_p2 = scmp.lt.s32.totalorder %s351_s25, %s351_s25 }
 0x244   :  { %p22283_p1 = scmp.ne.s32.totalorder %s351_s25, %s22282_s8  ;;  %p22288_p3 = scmp.lt.s32.totalorder %s22282_s8, %s22282_s8 }
 0x246   :  { %p22289_p4 = por %p22288_p3, %p22287_p2 }
 0x248   :  { %p22290_p5 = pnand %p22289_p4, %p22283_p1 }
 0x24a   :  { %22293 = shalt.err (!%p22290_p5)
}
 0x24b   :  { %s24094_s0 = sld [smem:[#allocation98_spill]] }
 0x24c   :  { %356 = dma.hbm_to_vmem [thread:$0]  %s24093_s23, 16384, %s351_s25, [#allocation31], %s22583_s2, %s22583_s2, %s22584_s6  }
 0x251   :  { %s22294_s30 = scalar_lea.hbm %s24094_s0, 16384 }
 0x252   :  { %p22295_p6 = scmp.ne.s32.totalorder %s24094_s0, %s22294_s30  ;;  %p22298_p7 = scmp.lt.u32.totalorder %s22294_s30, %s24094_s0 }
 0x254   :  { %p22300_p8 = pnand %p22298_p7, %p22295_p6 }
 0x256   :  { %22303 = shalt.err (!%p22300_p8)
}
 0x257   :  { %s22304_s19 = scalar_lea.vmem %s23053_s26, 16384  ;;  %p22309_p10 = scmp.lt.s32.totalorder %s23053_s26, %s23053_s26 }
 0x258   :  { %p22305_p9 = scmp.ne.s32.totalorder %s23053_s26, %s22304_s19  ;;  %p22310_p11 = scmp.lt.s32.totalorder %s22304_s19, %s22304_s19 }
 0x25a   :  { %p22311_p12 = por %p22310_p11, %p22309_p10 }
 0x25c   :  { %p22312_p13 = pnand %p22311_p12, %p22305_p9 }
 0x25e   :  { %22315 = shalt.err (!%p22312_p13)
}
 0x25f   :  { %s24095_s21 = sld [smem:[#allocation99_spill]]  ;;  %s22613_s14 = smov [#allocation38]  }
 0x260   :  { %378 = dma.hbm_to_vmem [thread:$0]  %s24094_s0, 16384, %s23053_s26, [#allocation34], %s22583_s2, %s22583_s2, %s22584_s6  }
 0x261   :  { %s397_s7 = sshll.u32 %s22613_s14, 4  ;;  %s22614_s10 = smov [#allocation41]   ;;  %s398_s7 = int_to_ptr.vmem [resolvable:$true] %s397_s7 }
 0x262   :  { %s416_s20 = sshll.u32 %s22614_s10, 4  ;;  %s23074_s20 = int_to_ptr.vmem [resolvable:$true] %s416_s20 }
 0x265   :  { %s22316_s11 = scalar_lea.hbm %s24095_s21, 256 }
 0x266   :  { %p22317_p0 = scmp.ne.s32.totalorder %s24095_s21, %s22316_s11  ;;  %p22320_p1 = scmp.lt.u32.totalorder %s22316_s11, %s24095_s21 }
 0x268   :  { %p22322_p2 = pnand %p22320_p1, %p22317_p0 }
 0x26a   :  { %22325 = shalt.err (!%p22322_p2)
}
 0x26b   :  { %s22326_s27 = scalar_lea.vmem %s398_s7, 256  ;;  %p22331_p4 = scmp.lt.s32.totalorder %s398_s7, %s398_s7 }
 0x26c   :  { %p22327_p3 = scmp.ne.s32.totalorder %s398_s7, %s22326_s27  ;;  %p22332_p5 = scmp.lt.s32.totalorder %s22326_s27, %s22326_s27 }
 0x26e   :  { %p22333_p6 = por %p22332_p5, %p22331_p4 }
 0x270   :  { %p22334_p7 = pnand %p22333_p6, %p22327_p3 }
 0x272   :  { %22337 = shalt.err (!%p22334_p7)
}
 0x273   :  { %s24096_s15 = sld [smem:[#allocation100_spill]] }
 0x274   :  { %400 = dma.hbm_to_vmem [thread:$0]  %s24095_s21, 256, %s398_s7, [#allocation37]  }
 0x279   :  { %s22338_s13 = scalar_lea.hbm %s24096_s15, 16384 }
 0x27a   :  { %p22339_p8 = scmp.ne.s32.totalorder %s24096_s15, %s22338_s13  ;;  %p22342_p9 = scmp.lt.u32.totalorder %s22338_s13, %s24096_s15 }
 0x27c   :  { %p22344_p10 = pnand %p22342_p9, %p22339_p8 }
 0x27e   :  { %22347 = shalt.err (!%p22344_p10)
}
 0x27f   :  { %s22348_s16 = scalar_lea.vmem %s23074_s20, 16384  ;;  %p22353_p12 = scmp.lt.s32.totalorder %s23074_s20, %s23074_s20 }
 0x280   :  { %p22349_p11 = scmp.ne.s32.totalorder %s23074_s20, %s22348_s16  ;;  %p22354_p13 = scmp.lt.s32.totalorder %s22348_s16, %s22348_s16 }
 0x282   :  { %p22355_p0 = por %p22354_p13, %p22353_p12 }
 0x284   :  { %p22356_p1 = pnand %p22355_p0, %p22349_p11 }
 0x286   :  { %22359 = shalt.err (!%p22356_p1)
}
 0x287   :  { %s24097_s12 = sld [smem:[#allocation101_spill]]  ;;  %s22615_s4 = smov [#allocation44]  }
 0x288   :  { %422 = dma.hbm_to_vmem [thread:$0]  %s24096_s15, 16384, %s23074_s20, [#allocation40], %s22583_s2, %s22583_s2, %s22584_s6  }
 0x289   :  { %s441_s18 = sshll.u32 %s22615_s4, 4  ;;  %s22616_s17 = smov [#allocation47]   ;;  %s442_s18 = int_to_ptr.vmem [resolvable:$true] %s441_s18 }
 0x28a   :  { %s460_s22 = sshll.u32 %s22616_s17, 4  ;;  %s23092_s22 = int_to_ptr.vmem [resolvable:$true] %s460_s22 }
 0x28d   :  { %s22360_s23 = scalar_lea.hbm %s24097_s12, 256 }
 0x28e   :  { %p22361_p2 = scmp.ne.s32.totalorder %s24097_s12, %s22360_s23  ;;  %p22364_p3 = scmp.lt.u32.totalorder %s22360_s23, %s24097_s12 }
 0x290   :  { %p22366_p4 = pnand %p22364_p3, %p22361_p2 }
 0x292   :  { %22369 = shalt.err (!%p22366_p4)
}
 0x293   :  { %s22370_s3 = scalar_lea.vmem %s442_s18, 256  ;;  %p22375_p6 = scmp.lt.s32.totalorder %s442_s18, %s442_s18 }
 0x294   :  { %p22371_p5 = scmp.ne.s32.totalorder %s442_s18, %s22370_s3  ;;  %p22376_p7 = scmp.lt.s32.totalorder %s22370_s3, %s22370_s3 }
 0x296   :  { %p22377_p8 = por %p22376_p7, %p22375_p6 }
 0x298   :  { %p22378_p9 = pnand %p22377_p8, %p22371_p5 }
 0x29a   :  { %22381 = shalt.err (!%p22378_p9)
}
 0x29b   :  { %s24098_s2 = sld [smem:[#allocation102_spill]] }
 0x29c   :  { %444 = dma.hbm_to_vmem [thread:$0]  %s24097_s12, 256, %s442_s18, [#allocation43]  }
 0x2a1   :  { %s22382_s6 = scalar_lea.hbm %s24098_s2, 8192 }
 0x2a2   :  { %p22383_p10 = scmp.ne.s32.totalorder %s24098_s2, %s22382_s6  ;;  %p22386_p11 = scmp.lt.u32.totalorder %s22382_s6, %s24098_s2 }
 0x2a4   :  { %p22388_p12 = pnand %p22386_p11, %p22383_p10 }
 0x2a6   :  { %22391 = shalt.err (!%p22388_p12)
}
 0x2a7   :  { %s22392_s25 = scalar_lea.vmem %s23092_s22, 8192  ;;  %p22397_p0 = scmp.lt.s32.totalorder %s23092_s22, %s23092_s22 }
 0x2a8   :  { %p22393_p13 = scmp.ne.s32.totalorder %s23092_s22, %s22392_s25  ;;  %p22398_p1 = scmp.lt.s32.totalorder %s22392_s25, %s22392_s25 }
 0x2aa   :  { %p22399_p2 = por %p22398_p1, %p22397_p0 }
 0x2ac   :  { %p22400_p3 = pnand %p22399_p2, %p22393_p13 }
 0x2ae   :  { %22403 = shalt.err (!%p22400_p3)
}
 0x2af   :  { %s24099_s24 = sld [smem:[#allocation104_spill]]  ;;  %s22617_s26 = smov [#allocation50]  }
 0x2b0   :  { %466 = dma.hbm_to_vmem [thread:$0]  %s24098_s2, 8192, %s23092_s22, [#allocation46], %s22589_s29, %s22589_s29, %s22590_s28  }
 0x2b1   :  { %s484_s1 = sshll.u32 %s22617_s26, 4  ;;  %s22618_s8 = smov [#allocation53]   ;;  %s485_s1 = int_to_ptr.vmem [resolvable:$true] %s484_s1 }
 0x2b2   :  { %s509_s0 = sshll.u32 %s22618_s8, 4  ;;  %s510_s0 = int_to_ptr.vmem [resolvable:$true] %s509_s0 }
 0x2b5   :  { %s22404_s30 = scalar_lea.hbm %s24099_s24, 8192 }
 0x2b6   :  { %p22405_p4 = scmp.ne.s32.totalorder %s24099_s24, %s22404_s30  ;;  %p22408_p5 = scmp.lt.u32.totalorder %s22404_s30, %s24099_s24 }
 0x2b8   :  { %p22410_p6 = pnand %p22408_p5, %p22405_p4 }
 0x2ba   :  { %22413 = shalt.err (!%p22410_p6)
}
 0x2bb   :  { %s22414_s19 = scalar_lea.vmem %s485_s1, 8192  ;;  %p22419_p8 = scmp.lt.s32.totalorder %s485_s1, %s485_s1 }
 0x2bc   :  { %p22415_p7 = scmp.ne.s32.totalorder %s485_s1, %s22414_s19  ;;  %p22420_p9 = scmp.lt.s32.totalorder %s22414_s19, %s22414_s19 }
 0x2be   :  { %p22421_p10 = por %p22420_p9, %p22419_p8 }
 0x2c0   :  { %p22422_p11 = pnand %p22421_p10, %p22415_p7 }
 0x2c2   :  { %22425 = shalt.err (!%p22422_p11)
}
 0x2c3   :  { %s24100_s21 = sld [smem:[#allocation107_spill]] }
 0x2c4   :  { %490 = dma.hbm_to_vmem [thread:$0]  %s24099_s24, 8192, %s485_s1, [#allocation49], %s22589_s29, %s22589_s29, %s22590_s28  }
 0x2c9   :  { %s22426_s14 = scalar_lea.hbm %s24100_s21, 16 }
 0x2ca   :  { %p22427_p12 = scmp.ne.s32.totalorder %s24100_s21, %s22426_s14  ;;  %p22430_p13 = scmp.lt.u32.totalorder %s22426_s14, %s24100_s21 }
 0x2cc   :  { %p22432_p0 = pnand %p22430_p13, %p22427_p12 }
 0x2ce   :  { %22435 = shalt.err (!%p22432_p0)
}
 0x2cf   :  { %s22436_s7 = scalar_lea.vmem %s510_s0, 16  ;;  %s22440_s10 = scalar_lea.vmem %s510_s0, 32 }
 0x2d0   :  { %p22437_p1 = scmp.ne.s32.totalorder %s510_s0, %s22436_s7  ;;  %p22441_p2 = scmp.lt.s32.totalorder %s510_s0, %s510_s0 }
 0x2d1   :  { %p22442_p3 = scmp.lt.s32.totalorder %s22440_s10, %s22436_s7 }
 0x2d3   :  { %p22443_p4 = por %p22442_p3, %p22441_p2 }
 0x2d5   :  { %p22444_p5 = pnand %p22443_p4, %p22437_p1 }
 0x2d7   :  { %22447 = shalt.err (!%p22444_p5)
}
 0x2d8   :  { %512 = dma.hbm_to_vmem [thread:$0]  %s24100_s21, 16, %s510_s0, [#allocation52]  }
 0x2d9   :  { %s22619_s20 = smov [#allocation56]   ;;  %s22448_s28 = scalar_lea.hbm %s22871_s5, 16 }
 0x2da   :  { %s531_s29 = sshll.u32 %s22619_s20, 4  ;;  %p22449_p6 = scmp.ne.s32.totalorder %s22871_s5, %s22448_s28  ;;  %s532_s29 = int_to_ptr.vmem [resolvable:$true] %s531_s29 }
 0x2db   :  { %p22452_p7 = scmp.lt.u32.totalorder %s22448_s28, %s22871_s5 }
 0x2dd   :  { %p22454_p8 = pnand %p22452_p7, %p22449_p6 }
 0x2df   :  { %22457 = shalt.err (!%p22454_p8)
}
 0x2e0   :  { %s22458_s11 = scalar_lea.vmem %s532_s29, 16  ;;  %s22462_s27 = scalar_lea.vmem %s532_s29, 32 }
 0x2e1   :  { %p22459_p9 = scmp.ne.s32.totalorder %s532_s29, %s22458_s11  ;;  %p22463_p10 = scmp.lt.s32.totalorder %s532_s29, %s532_s29 }
 0x2e2   :  { %p22464_p11 = scmp.lt.s32.totalorder %s22462_s27, %s22458_s11 }
 0x2e4   :  { %p22465_p12 = por %p22464_p11, %p22463_p10 }
 0x2e6   :  { %p22466_p13 = pnand %p22465_p12, %p22459_p9 }
 0x2e8   :  { %22469 = shalt.err (!%p22466_p13)
}
 0x2e9   :  { %534 = dma.hbm_to_vmem [thread:$0]  %s22871_s5, 16, %s532_s29, [#allocation55]  }
 0x2ea   :  { %22492 = dma.done.wait [#allocation4], 1024  }
 0x2eb   :  { %22493 = vsyncadd [#allocation4], 4294966272 }
 0x2ec   :  { %22494 = dma.done.wait [#allocation7], 16448  }
 0x2ed   :  { %22495 = vsyncadd [#allocation7], 4294950848 }
 0x2ee   :  { %22496 = dma.done.wait [#allocation10], 16448  }
 0x2ef   :  { %22497 = vsyncadd [#allocation10], 4294950848 }
 0x2f0   :  { %22498 = dma.done.wait [#allocation13], 16640  }
 0x2f1   :  { %22499 = vsyncadd [#allocation13], 4294950656 }
 0x2f2   :  { %22500 = dma.done.wait [#allocation16], 16448  }
 0x2f3   :  { %22501 = vsyncadd [#allocation16], 4294950848 }
 0x2f4   :  { %22502 = dma.done.wait [#allocation19], 16640  }
 0x2f5   :  { %22503 = vsyncadd [#allocation19], 4294950656 }
 0x2f6   :  { %22504 = dma.done.wait [#allocation22], 8256  }
 0x2f7   :  { %22505 = vsyncadd [#allocation22], 4294959040 }
 0x2f8   :  { %22506 = dma.done.wait [#allocation25], 8224  }
 0x2f9   :  { %22507 = vsyncadd [#allocation25], 4294959072 }
 0x2fa   :  { %22508 = dma.done.wait [#allocation28], 8448  }
 0x2fb   :  { %22509 = vsyncadd [#allocation28], 4294958848 }
 0x2fc   :  { %22510 = dma.done.wait [#allocation31], 16448  }
 0x2fd   :  { %22511 = vsyncadd [#allocation31], 4294950848 }
 0x2fe   :  { %22512 = dma.done.wait [#allocation34], 16448  }
 0x2ff   :  { %22513 = vsyncadd [#allocation34], 4294950848 }
 0x300   :  { %22514 = dma.done.wait [#allocation37], 16640  }
 0x301   :  { %22515 = vsyncadd [#allocation37], 4294950656 }
 0x302   :  { %22516 = dma.done.wait [#allocation40], 16448  }
 0x303   :  { %22517 = vsyncadd [#allocation40], 4294950848 }
 0x304   :  { %22518 = dma.done.wait [#allocation43], 16640  }
 0x305   :  { %22519 = vsyncadd [#allocation43], 4294950656 }
 0x306   :  { %22520 = dma.done.wait [#allocation46], 8256  }
 0x307   :  { %22521 = vsyncadd [#allocation46], 4294959040 }
 0x308   :  { %22522 = dma.done.wait [#allocation49], 16384  }
 0x309   :  { %22523 = vsyncadd [#allocation49], 4294950912 }
 0x30a   :  { %22524 = dma.done.wait [#allocation52], 48  }
 0x30b   :  { %22525 = vsyncadd [#allocation52], 4294967248 }
 0x30c   :  { %22526 = dma.done.wait [#allocation55], 32  }
 0x30d   :  { %22527 = vsyncadd [#allocation55], 4294967264  ;;  %s24101_s5 = sld [smem:[#allocation77_spill]]  ;;  %v22620_v1 = vmov 0.0   ;;  %vm2477_vm0 = vcmask 1042432   ;;  %vm22621_vm1 = vmmov 1  }
 0x30e   :  { %2554 = vmatprep.mubr.f32.mxu0 %v22620_v1  ;;  %2631 = vmatprep.mubr.f32.mxu1 %v22620_v1  ;;  %vm23127_vm2 = vmpackc.low %vm2477_vm0, %vm22621_vm1  ;;  %v654_v3 = vld [vmem:[#allocation3 + $0x8] sm:$0xff]  ;;  %v653_v5 = vld [vmem:[#allocation3] sm:$0xff]  ;;  %vm2470_vm3 = vcmask 89088   ;;  %s24104_s15 = sld [smem:[#allocation79_spill]]  ;;  %s24105_s13 = sld [smem:[#allocation78_spill]]  ;;  %vm3556_vm4 = vcmask 64512  }
 0x30f   :  { %v658_v4 = vld [vmem:[#allocation3 + $0x28] sm:$0x7]  ;;  %v657_v7 = vld [vmem:[#allocation3 + $0x20] sm:$0x7]  ;;  %v656_v10 = vld [vmem:[#allocation3 + $0x18] sm:$0xff]  ;;  %s24106_s16 = sld [smem:[#allocation80_spill]] }
 0x310   :  { %v18847_v6 = vpack.c.bf16 %v658_v4, %v654_v3  ;;  %v18850_v8 = vpack.c.bf16 %v657_v7, %v653_v5  ;;  %v660_v11 = vld [vmem:[#allocation3 + $0x38] sm:$0x7]  ;;  %v655_v12 = vld [vmem:[#allocation3 + $0x10] sm:$0xff]  ;;  %v19091_v20 = vld [vmem:[#allocation8 + $0x8] ss:$16 sps:$4 sm:$0xff]   ;;  %s24107_s12 = sld [smem:[#allocation94_spill]] }
 0x311   :  { %v18853_v13 = vpack.c.bf16 %v660_v11, %v656_v10  ;;  %v659_v14 = vld [vmem:[#allocation3 + $0x30] sm:$0x7]  ;;  %v19088_v16 = vld [vmem:[#allocation8] ss:$16 sps:$4 sm:$0xff]   ;;  %v19090_v17 = vld [vmem:[#allocation8 + $0x4] ss:$16 sps:$4 sm:$0xff]  }
 0x312   :  { %18849 = vmatprep.subr.msk.bf16.mxu0 %vm23127_vm2, %v18847_v6  ;;  %v18856_v15 = vpack.c.bf16 %v659_v14, %v655_v12  ;;  %v19093_v18 = vld [vmem:[#allocation8 + $0xc] ss:$16 sps:$4 sm:$0xff]   ;;  %v19096_v21 = vld [vmem:[#allocation8 + $0x24] ss:$16 sps:$4 sm:$0xff]   ;;  %v19094_v22 = vld [vmem:[#allocation8 + $0x20] ss:$16 sps:$4 sm:$0xff]  }
 0x313   :  { %v642_v9 = vld [vmem:[%s24101_s5] sm:$0xff]  ;;  %18852 = vmatpush1.bf16.msk.msra.mxu0 %vm23127_vm2, %v18850_v8  ;;  %18855 = vmatprep.subr.msk.bf16.mxu1 %vm23127_vm2, %v18853_v13  ;;  %v643_v19 = vld [vmem:[%s24101_s5 + $0x8] sm:$0xff]  ;;  %s24108_s4 = sld [smem:[#allocation81_spill]]  ;;  %s24109_s18 = sld [smem:[#allocation82_spill]] }
 0x314   :  { %18858 = vmatpush1.bf16.msk.msra.mxu1 %vm23127_vm2, %v18856_v15  ;;  %3333 = vmatprep.subr.bf16.mxu0 %v19090_v17  ;;  %v19099_v23 = vld [vmem:[#allocation8 + $0x2c] ss:$16 sps:$4 sm:$0xff]   ;;  %v19102_v24 = vld [vmem:[#allocation8 + $0x44] ss:$16 sps:$4 sm:$0xff]   ;;  %v19097_v25 = vld [vmem:[#allocation8 + $0x28] ss:$16 sps:$4 sm:$0xff]  }
 0x315   :  { %3419 = vmatprep.subr.bf16.mxu1 %v19093_v18  ;;  %v19105_v26 = vld [vmem:[#allocation8 + $0x4c] ss:$16 sps:$4 sm:$0xff]   ;;  %v19100_v27 = vld [vmem:[#allocation8 + $0x40] ss:$16 sps:$4 sm:$0xff]   ;;  %v19108_v28 = vld [vmem:[#allocation8 + $0x64] ss:$16 sps:$4 sm:$0xff]  }
 0x316   :  { %16970 = vmatmul.mubr.msk.f32.vlgmr.msra.gmra.mrb[0].mxu0 %vm2470_vm3, %v642_v9  ;;  %v19103_v29 = vld [vmem:[#allocation8 + $0x48] ss:$16 sps:$4 sm:$0xff]   ;;  %v19111_v30 = vld [vmem:[#allocation8 + $0x6c] ss:$16 sps:$4 sm:$0xff]   ;;  %v19106_v31 = vld [vmem:[#allocation8 + $0x60] ss:$16 sps:$4 sm:$0xff]  }
 0x317   :  { %2560 = vmatprep.mubr.f32.mxu0 %v22620_v1  ;;  %3334 = vmatpush1.bf16.msra.mxu0 %v19088_v16  ;;  %v19114_v32 = vld [vmem:[#allocation8 + $0x84] ss:$16 sps:$4 sm:$0xff]   ;;  %v19109_v33 = vld [vmem:[#allocation8 + $0x68] ss:$16 sps:$4 sm:$0xff]   ;;  %v19117_v34 = vld [vmem:[#allocation8 + $0x8c] ss:$16 sps:$4 sm:$0xff]  }
 0x318   :  { %16974 = vmatmul.mubr.msk.f32.vlgmr.msra.gmra.mrb[0].mxu1 %vm2470_vm3, %v642_v9  ;;  %3335 = vmatprep.subr.bf16.mxu0 %v19096_v21  ;;  %v19112_v35 = vld [vmem:[#allocation8 + $0x80] ss:$16 sps:$4 sm:$0xff]   ;;  %v19120_v36 = vld [vmem:[#allocation8 + $0xa4] ss:$16 sps:$4 sm:$0xff]   ;;  %v19115_v37 = vld [vmem:[#allocation8 + $0x88] ss:$16 sps:$4 sm:$0xff]  }
 0x319   :  { %2637 = vmatprep.mubr.f32.mxu1 %v22620_v1  ;;  %3420 = vmatpush1.bf16.msra.mxu1 %v19091_v20  ;;  %v19123_v38 = vld [vmem:[#allocation8 + $0xac] ss:$16 sps:$4 sm:$0xff]   ;;  %v19118_v39 = vld [vmem:[#allocation8 + $0xa0] ss:$16 sps:$4 sm:$0xff]   ;;  %v19126_v40 = vld [vmem:[#allocation8 + $0xc4] ss:$16 sps:$4 sm:$0xff]   ;;  %v2450_v20 = vlaneseq }
 0x31a   :  { %16971 = vmatmul.mubr.msk.f32.gmra.mrb[2].mxu0 %vm2470_vm3, %v643_v19  ;;  %3421 = vmatprep.subr.bf16.mxu1 %v19099_v23  ;;  %v19121_v41 = vld [vmem:[#allocation8 + $0xa8] ss:$16 sps:$4 sm:$0xff]   ;;  %v19129_v42 = vld [vmem:[#allocation8 + $0xcc] ss:$16 sps:$4 sm:$0xff]   ;;  %v19124_v43 = vld [vmem:[#allocation8 + $0xc0] ss:$16 sps:$4 sm:$0xff]  }
 0x31b   :  { %3336 = vmatpush1.bf16.msra.mxu0 %v19094_v22  ;;  %v19132_v44 = vld [vmem:[#allocation8 + $0xe4] ss:$16 sps:$4 sm:$0xff]   ;;  %v19127_v45 = vld [vmem:[#allocation8 + $0xc8] ss:$16 sps:$4 sm:$0xff]   ;;  %v19135_v46 = vld [vmem:[#allocation8 + $0xec] ss:$16 sps:$4 sm:$0xff]  }
 0x31c   :  { %16975 = vmatmul.mubr.msk.f32.gmra.mrb[2].mxu1 %vm2470_vm3, %v643_v19  ;;  %3337 = vmatprep.subr.bf16.mxu0 %v19102_v24  ;;  %v19130_v47 = vld [vmem:[#allocation8 + $0xe0] ss:$16 sps:$4 sm:$0xff]   ;;  %v19138_v48 = vld [vmem:[#allocation8 + $0x104] ss:$16 sps:$4 sm:$0xff]   ;;  %v19133_v49 = vld [vmem:[#allocation8 + $0xe8] ss:$16 sps:$4 sm:$0xff]  }
 0x31d   :  { %3422 = vmatpush1.bf16.msra.mxu1 %v19097_v25  ;;  %v19141_v50 = vld [vmem:[#allocation8 + $0x10c] ss:$16 sps:$4 sm:$0xff]   ;;  %v19136_v51 = vld [vmem:[#allocation8 + $0x100] ss:$16 sps:$4 sm:$0xff]   ;;  %v19139_v52 = vld [vmem:[#allocation8 + $0x108] ss:$16 sps:$4 sm:$0xff]  }
 0x31e   :  { %3423 = vmatprep.subr.bf16.mxu1 %v19105_v26  ;;  %v19144_v53 = vld [vmem:[#allocation8 + $0x124] ss:$16 sps:$4 sm:$0xff]   ;;  %v19142_v54 = vld [vmem:[#allocation8 + $0x120] ss:$16 sps:$4 sm:$0xff]   ;;  %v19147_v55 = vld [vmem:[#allocation8 + $0x12c] ss:$16 sps:$4 sm:$0xff]  }
 0x31f   :  { %3338 = vmatpush1.bf16.msra.mxu0 %v19100_v27  ;;  %v19150_v56 = vld [vmem:[#allocation8 + $0x144] ss:$16 sps:$4 sm:$0xff]   ;;  %v19145_v57 = vld [vmem:[#allocation8 + $0x128] ss:$16 sps:$4 sm:$0xff]   ;;  %v19153_v58 = vld [vmem:[#allocation8 + $0x14c] ss:$16 sps:$4 sm:$0xff]  }
 0x320   :  { %3339 = vmatprep.subr.bf16.mxu0 %v19108_v28  ;;  %v19148_v59 = vld [vmem:[#allocation8 + $0x140] ss:$16 sps:$4 sm:$0xff]   ;;  %v19156_v60 = vld [vmem:[#allocation8 + $0x164] ss:$16 sps:$4 sm:$0xff]   ;;  %v19151_v61 = vld [vmem:[#allocation8 + $0x148] ss:$16 sps:$4 sm:$0xff]  }
 0x321   :  { %3424 = vmatpush1.bf16.msra.mxu1 %v19103_v29  ;;  %v19159_v62 = vld [vmem:[#allocation8 + $0x16c] ss:$16 sps:$4 sm:$0xff]   ;;  %v19154_v63 = vld [vmem:[#allocation8 + $0x160] ss:$16 sps:$4 sm:$0xff]   ;;  %v19162_v0 = vld [vmem:[#allocation8 + $0x184] ss:$16 sps:$4 sm:$0xff]  }
 0x322   :  { %3425 = vmatprep.subr.bf16.mxu1 %v19111_v30  ;;  %v19157_v2 = vld [vmem:[#allocation8 + $0x168] ss:$16 sps:$4 sm:$0xff]   ;;  %v19165_v3 = vld [vmem:[#allocation8 + $0x18c] ss:$16 sps:$4 sm:$0xff]   ;;  %v19160_v4 = vld [vmem:[#allocation8 + $0x180] ss:$16 sps:$4 sm:$0xff]  }
 0x323   :  { %3340 = vmatpush1.bf16.msra.mxu0 %v19106_v31  ;;  %v19163_v5 = vld [vmem:[#allocation8 + $0x188] ss:$16 sps:$4 sm:$0xff]   ;;  %v19168_v6 = vld [vmem:[#allocation8 + $0x1a4] ss:$16 sps:$4 sm:$0xff]   ;;  %v19171_v7 = vld [vmem:[#allocation8 + $0x1ac] ss:$16 sps:$4 sm:$0xff]  }
 0x324   :  { %3341 = vmatprep.subr.bf16.mxu0 %v19114_v32  ;;  %v19166_v8 = vld [vmem:[#allocation8 + $0x1a0] ss:$16 sps:$4 sm:$0xff]   ;;  %v19169_v9 = vld [vmem:[#allocation8 + $0x1a8] ss:$16 sps:$4 sm:$0xff]   ;;  %v19174_v10 = vld [vmem:[#allocation8 + $0x1c4] ss:$16 sps:$4 sm:$0xff]  }
 0x325   :  { %3426 = vmatpush1.bf16.msra.mxu1 %v19109_v33  ;;  %v19177_v11 = vld [vmem:[#allocation8 + $0x1cc] ss:$16 sps:$4 sm:$0xff]   ;;  %v19172_v12 = vld [vmem:[#allocation8 + $0x1c0] ss:$16 sps:$4 sm:$0xff]   ;;  %v19175_v13 = vld [vmem:[#allocation8 + $0x1c8] ss:$16 sps:$4 sm:$0xff]  }
 0x326   :  { %3427 = vmatprep.subr.bf16.mxu1 %v19117_v34  ;;  %v19180_v14 = vld [vmem:[#allocation8 + $0x1e4] ss:$16 sps:$4 sm:$0xff]   ;;  %v19183_v15 = vld [vmem:[#allocation8 + $0x1ec] ss:$16 sps:$4 sm:$0xff]   ;;  %v19178_v16 = vld [vmem:[#allocation8 + $0x1e0] ss:$16 sps:$4 sm:$0xff]  }
 0x327   :  { %3342 = vmatpush1.bf16.msra.mxu0 %v19112_v35  ;;  %v19181_v17 = vld [vmem:[#allocation8 + $0x1e8] ss:$16 sps:$4 sm:$0xff]   ;;  %v19186_v18 = vld [vmem:[#allocation8 + $0x204] ss:$16 sps:$4 sm:$0xff]   ;;  %v19189_v19 = vld [vmem:[#allocation8 + $0x20c] ss:$16 sps:$4 sm:$0xff]  }
 0x328   :  { %3343 = vmatprep.subr.bf16.mxu0 %v19120_v36  ;;  %v23148_v21 = vshrl.u32 %v2450_v20, 7  ;;  %v17106_v22 = vld [vmem:[%s24104_s15] ss:$0 sm:$0xff]  ;;  %v22622_v25 = vmov 0   ;;  %v22623_v30 = vmov 1   ;;  %v22624_v32 = vmov 2  }
 0x329   :  { %3428 = vmatpush1.bf16.msra.mxu1 %v19115_v37  ;;  %v644_v24 = vld [vmem:[%s24105_s13] sm:$0xff]  ;;  %19079 = vset.pattern.permute.xlu0 %v22622_v25  ;;  %s24110_s17 = sld [smem:[#allocation83_spill]]  ;;  %s24111_s22 = sld [smem:[#allocation85_spill]] }
 0x32a   :  { %3429 = vmatprep.subr.bf16.mxu1 %v19123_v38  ;;  %v3545_v23 = vadd.s32 8, %v23148_v21  ;;  %vm3550_vm5 = vcmp.eq.s32.totalorder %v17106_v22, %v23148_v21  ;;  %19081 = vset.pattern.permute.xlu1 %v22622_v25  ;;  %v646_v31 = vld [vmem:[%s24106_s16] sm:$0xff]  ;;  %v23172_v34 = vsub.s32 0, %v23148_v21  ;;  %v23175_v35 = vsub.s32 1, %v23148_v21  ;;  %s24112_s23 = sld [smem:[#allocation84_spill]]  ;;  %s24113_s3 = sld [smem:[#allocation106_spill]] }
 0x32b   :  { %3344 = vmatpush1.bf16.msra.mxu0 %v19118_v39  ;;  %v23157_v26 = vsel %vm3550_vm5, 1.0, %v22620_v1  ;;  %3532 = vperm.xlu0 %19079, %v644_v24   ;;  %v661_v33 = vld [vmem:[#allocation6] sm:$0xf]  ;;  %v23178_v36 = vsub.s32 2, %v23148_v21  ;;  %v23181_v37 = vsub.s32 3, %v23148_v21  ;;  %s24114_s2 = sld [smem:[#allocation86_spill]] }
 0x32c   :  { %3345 = vmatprep.subr.bf16.mxu0 %v19126_v40  ;;  %vm3551_vm6 = vcmp.eq.s32.totalorder %v17106_v22, %v3545_v23  ;;  %v3557_v27 = vsel %vm3556_vm4, %v23157_v26, 0.0  ;;  %v2453_v38 = vrot.slane %v661_v33, %v23172_v34  ;;  %v2457_v39 = vrot.slane %v661_v33, %v23175_v35  ;;  %v19198_v23 = vld [vmem:[#allocation8 + $0x244] ss:$16 sps:$4 sm:$0xff]   ;;  %s24115_s6 = sld [smem:[#allocation108_spill]]  ;;  %s22627_s25 = smov [#allocation57]  }
 0x32d   :  { %3430 = vmatpush1.bf16.msra.mxu1 %v19121_v41  ;;  %v23162_v28 = vsel %vm3551_vm6, 1.0, %v22620_v1  ;;  %3558 = vadd.xlane.f32.xlu1 %v3557_v27  ;;  %v2461_v40 = vrot.slane %v661_v33, %v23178_v36  ;;  %v19196_v27 = vld [vmem:[#allocation8 + $0x240] ss:$16 sps:$4 sm:$0xff]   ;;  %s16893_s24 = sshll.u32 %s22627_s25, 4  ;;  %s16894_s24 = int_to_ptr.vmem [resolvable:$true] %s16893_s24 }
 0x32e   :  { %3431 = vmatprep.subr.bf16.mxu1 %v19129_v42  ;;  %v3560_v29 = vsel %vm3556_vm4, %v23162_v28, 0.0  ;;  %v2465_v42 = vrot.slane %v661_v33, %v23181_v37  ;;  %v19207_v33 = vld [vmem:[#allocation8 + $0x26c] ss:$16 sps:$4 sm:$0xff]   ;;  %s22470_s26 = scalar_lea.vmem %s16894_s24, 16  ;;  %s22474_s1 = scalar_lea.vmem %s16894_s24, 32 }
 0x32f   :  { %3346 = vmatpush1.bf16.msra.mxu0 %v19124_v43  ;;  %19080 = vset.pattern.permute.xlu0 %v22623_v30  ;;  %p22471_p0 = scmp.ne.s32.totalorder %s16894_s24, %s22470_s26  ;;  %p22475_p1 = scmp.lt.s32.totalorder %s16894_s24, %s16894_s24 }
 0x330   :  { %3347 = vmatprep.subr.bf16.mxu0 %v19132_v44  ;;  %3538 = vperm.xlu0 %19080, %v644_v24   ;;  %v19201_v24 = vld [vmem:[#allocation8 + $0x24c] ss:$16 sps:$4 sm:$0xff]   ;;  %p22476_p2 = scmp.lt.s32.totalorder %s22474_s1, %s22470_s26 }
 0x331   :  { %3432 = vmatpush1.bf16.msra.mxu1 %v19127_v45  ;;  %3561 = vadd.xlane.f32.xlu1 %v3560_v29  ;;  %v19199_v29 = vld [vmem:[#allocation8 + $0x248] ss:$16 sps:$4 sm:$0xff]  }
 0x332   :  { %3433 = vmatprep.subr.bf16.mxu1 %v19135_v46  ;;  %p22477_p3 = por %p22476_p2, %p22475_p1 }
 0x333   :  { %3348 = vmatpush1.bf16.msra.mxu0 %v19130_v47 }
 0x334   :  { %3349 = vmatprep.subr.bf16.mxu0 %v19138_v48  ;;  %3908 = vperm.xlu0 %19080, %v646_v31   ;;  %p22478_p4 = pnand %p22477_p3, %p22471_p0 }
 0x335   :  { %3434 = vmatpush1.bf16.msra.mxu1 %v19133_v49 }
 0x336   :  { %3435 = vmatprep.subr.bf16.mxu1 %v19141_v50 }
 0x337   :  { %3350 = vmatpush1.bf16.msra.mxu0 %v19136_v51 }
 0x338   :  { %3351 = vmatprep.subr.bf16.mxu0 %v19144_v53  ;;  %19082 = vset.pattern.permute.xlu0 %v22624_v32 }
 0x339   :  { %3436 = vmatpush1.bf16.msra.mxu1 %v19139_v52  ;;  %3956 = vperm.xlu0 %19082, %v646_v31  }
 0x33a   :  { %3437 = vmatprep.subr.bf16.mxu1 %v19147_v55 }
 0x33b   :  { %3352 = vmatpush1.bf16.msra.mxu0 %v19142_v54 }
 0x33c   :  { %3353 = vmatprep.subr.bf16.mxu0 %v19150_v56 }
 0x33d   :  { %3438 = vmatpush1.bf16.msra.mxu1 %v19145_v57  ;;  %19083 = vset.pattern.permute.xlu0 %v22622_v25 }
 0x33e   :  { %3439 = vmatprep.subr.bf16.mxu1 %v19153_v58 }
 0x33f   :  { %3354 = vmatpush1.bf16.msra.mxu0 %v19148_v59 }
 0x340   :  { %3355 = vmatprep.subr.bf16.mxu0 %v19156_v60 }
 0x341   :  { %3440 = vmatpush1.bf16.msra.mxu1 %v19151_v61 }
 0x342   :  { %3441 = vmatprep.subr.bf16.mxu1 %v19159_v62  ;;  %3862 = vperm.xlu1 %19081, %v646_v31   ;;  %v19204_v31 = vld [vmem:[#allocation8 + $0x264] ss:$16 sps:$4 sm:$0xff]  }
 0x343   :  { %3356 = vmatpush1.bf16.msra.mxu0 %v19154_v63 }
 0x344   :  { %3357 = vmatprep.subr.bf16.mxu0 %v19162_v0 }
 0x345   :  { %3442 = vmatpush1.bf16.msra.mxu1 %v19157_v2 }
 0x346   :  { %3443 = vmatprep.subr.bf16.mxu1 %v19165_v3  ;;  %19084 = vset.pattern.permute.xlu1 %v22623_v30 }
 0x347   :  { %3358 = vmatpush1.bf16.msra.mxu0 %v19160_v4 }
 0x348   :  { %3359 = vmatprep.subr.bf16.mxu0 %v19168_v6  ;;  %v19187_v6 = vld [vmem:[#allocation8 + $0x208] ss:$16 sps:$4 sm:$0xff]  }
 0x349   :  { %3444 = vmatpush1.bf16.msra.mxu1 %v19163_v5  ;;  %v19184_v5 = vld [vmem:[#allocation8 + $0x200] ss:$16 sps:$4 sm:$0xff]  }
 0x34a   :  { %3445 = vmatprep.subr.bf16.mxu1 %v19171_v7 }
 0x34b   :  { %3360 = vmatpush1.bf16.msra.mxu0 %v19166_v8 }
 0x34c   :  { %3361 = vmatprep.subr.bf16.mxu0 %v19174_v10 }
 0x34d   :  { %3446 = vmatpush1.bf16.msra.mxu1 %v19169_v9 }
 0x34e   :  { %3447 = vmatprep.subr.bf16.mxu1 %v19177_v11  ;;  %v19192_v11 = vld [vmem:[#allocation8 + $0x224] ss:$16 sps:$4 sm:$0xff]  }
 0x34f   :  { %3362 = vmatpush1.bf16.msra.mxu0 %v19172_v12  ;;  %v19195_v12 = vld [vmem:[#allocation8 + $0x22c] ss:$16 sps:$4 sm:$0xff]  }
 0x350   :  { %3363 = vmatprep.subr.bf16.mxu0 %v19180_v14 }
 0x351   :  { %3448 = vmatpush1.bf16.msra.mxu1 %v19175_v13 }
 0x352   :  { %3449 = vmatprep.subr.bf16.mxu1 %v19183_v15 }
 0x353   :  { %3364 = vmatpush1.bf16.msra.mxu0 %v19178_v16 }
 0x354   :  { %3376 = vmatprep.subr.bf16.mxu0 %v19186_v18  ;;  %v19190_v18 = vld [vmem:[#allocation8 + $0x220] ss:$16 sps:$4 sm:$0xff]  }
 0x355   :  { %3450 = vmatpush1.bf16.msra.mxu1 %v19181_v17 }
 0x356   :  { %3462 = vmatprep.subr.bf16.mxu1 %v19189_v19  ;;  %v19193_v19 = vld [vmem:[#allocation8 + $0x228] ss:$16 sps:$4 sm:$0xff]  }
 0x3e9   :  { %v2556_v41 = vpop.f32.mrb[0].mxu0 }
 0x3ea   :  { %v2557_v43 = vadd.f32 %v2556_v41, %v2453_v38  ;;  %v2558_v44 = vpop.f32.mrb[1].mxu0  ;;  %v19213_v41 = vld [vmem:[#allocation8 + $0x28c] ss:$16 sps:$4 sm:$0xff]  }
 0x3eb   :  { %v2559_v45 = vadd.f32 %v2558_v44, %v2457_v39  ;;  %v2633_v46 = vpop.f32.mrb[0].mxu1  ;;  %v19216_v44 = vld [vmem:[#allocation8 + $0x2a4] ss:$16 sps:$4 sm:$0xff]  }
 0x3ec   :  { %vm2644_vm7 = vcmp.gt.f32.partialorder %v2557_v43, 0.0  ;;  %v2652_v47 = vmul.f32 0.01, %v2557_v43  ;;  %v2634_v48 = vadd.f32 %v2633_v46, %v2461_v40  ;;  %v2635_v49 = vpop.f32.mrb[1].mxu1  ;;  %v19214_v46 = vld [vmem:[#allocation8 + $0x2a0] ss:$16 sps:$4 sm:$0xff]  }
 0x3ed   :  { %vm2645_vm8 = vcmp.gt.f32.partialorder %v2559_v45, 0.0  ;;  %v2653_v50 = vmul.f32 0.01, %v2559_v45  ;;  %v2562_v51 = vpop.f32.mrb[2].mxu0  ;;  %v2636_v52 = vadd.f32 %v2635_v49, %v2465_v42  ;;  %v19225_v49 = vld [vmem:[#allocation8 + $0x2cc] ss:$16 sps:$4 sm:$0xff]  }
 0x3ee   :  { %v2563_v53 = vadd.f32 %v2562_v51, %v2453_v38  ;;  %v2564_v54 = vpop.f32.mrb[3].mxu0  ;;  %vm2646_vm9 = vcmp.gt.f32.partialorder %v2634_v48, 0.0  ;;  %v2654_v55 = vmul.f32 0.01, %v2634_v48  ;;  %v2660_v56 = vsel %vm2644_vm7, %v2557_v43, %v2652_v47  ;;  %v19202_v38 = vld [vmem:[#allocation8 + $0x260] ss:$16 sps:$4 sm:$0xff]  }
 0x3ef   :  { %v2565_v57 = vadd.f32 %v2564_v54, %v2457_v39  ;;  %vm2647_vm10 = vcmp.gt.f32.partialorder %v2636_v52, 0.0  ;;  %v2655_v58 = vmul.f32 0.01, %v2636_v52  ;;  %v2639_v59 = vpop.f32.mrb[2].mxu1  ;;  %v2661_v61 = vsel %vm2645_vm8, %v2559_v45, %v2653_v50  ;;  %v19205_v39 = vld [vmem:[#allocation8 + $0x268] ss:$16 sps:$4 sm:$0xff]  }
 0x3f0   :  { %vm2648_vm11 = vcmp.gt.f32.partialorder %v2563_v53, 0.0  ;;  %v2656_v60 = vmul.f32 0.01, %v2563_v53  ;;  %v2640_v62 = vadd.f32 %v2639_v59, %v2461_v40  ;;  %v2641_v63 = vpop.f32.mrb[3].mxu1  ;;  %v2662_v2 = vsel %vm2646_vm9, %v2634_v48, %v2654_v55  ;;  %v19210_v40 = vld [vmem:[#allocation8 + $0x284] ss:$16 sps:$4 sm:$0xff]  }
 0x3f1   :  { %vm2649_vm12 = vcmp.gt.f32.partialorder %v2565_v57, 0.0  ;;  %v2657_v0 = vmul.f32 0.01, %v2565_v57  ;;  %v2642_v3 = vadd.f32 %v2641_v63, %v2465_v42  ;;  %v2663_v8 = vsel %vm2647_vm10, %v2636_v52, %v2655_v58  ;;  %v19208_v42 = vld [vmem:[#allocation8 + $0x280] ss:$16 sps:$4 sm:$0xff]  }
 0x3f2   :  { %v2664_v4 = vsel %vm2648_vm11, %v2563_v53, %v2656_v60  ;;  %vm2650_vm13 = vcmp.gt.f32.partialorder %v2640_v62, 0.0  ;;  %v2658_v7 = vmul.f32 0.01, %v2640_v62  ;;  %v19211_v43 = vld [vmem:[#allocation8 + $0x288] ss:$16 sps:$4 sm:$0xff]   ;;  %vm3569_vm10 = vcmask 130048  }
 0x3f3   :  { %v2668_v9 = vpack.c.bf16 %v2664_v4, %v2660_v56  ;;  %v2665_v10 = vsel %vm2649_vm12, %v2565_v57, %v2657_v0  ;;  %vm2651_vm14 = vcmp.gt.f32.partialorder %v2642_v3, 0.0  ;;  %v2659_v13 = vmul.f32 0.01, %v2642_v3  ;;  %v19219_v45 = vld [vmem:[#allocation8 + $0x2ac] ss:$16 sps:$4 sm:$0xff]  }
 0x3f4   :  { %v2669_v14 = vpack.c.bf16 %v2665_v10, %v2661_v61  ;;  %v2666_v15 = vsel %vm2650_vm13, %v2640_v62, %v2658_v7  ;;  %v19217_v47 = vld [vmem:[#allocation8 + $0x2a8] ss:$16 sps:$4 sm:$0xff]   ;;  %v19222_v48 = vld [vmem:[#allocation8 + $0x2c4] ss:$16 sps:$4 sm:$0xff]   ;;  %v19220_v50 = vld [vmem:[#allocation8 + $0x2c0] ss:$16 sps:$4 sm:$0xff]  }
 0x3f5   :  { %v23188_v16 = vpack.c.bf16 %v2666_v15, %v2662_v2  ;;  %v2667_v17 = vsel %vm2651_vm14, %v2642_v3, %v2659_v13  ;;  %v19223_v51 = vld [vmem:[#allocation8 + $0x2c8] ss:$16 sps:$4 sm:$0xff]   ;;  %v19228_v52 = vld [vmem:[#allocation8 + $0x2e4] ss:$16 sps:$4 sm:$0xff]   ;;  %v19231_v53 = vld [vmem:[#allocation8 + $0x2ec] ss:$16 sps:$4 sm:$0xff]  }
 0x3f6   :  { %3365 = vmatprep.mubr.bf16.mxu0 %v2669_v14  ;;  %3451 = vmatprep.mubr.bf16.mxu1 %v2669_v14  ;;  %v2671_v22 = vpack.c.bf16 %v2667_v17, %v2663_v8  ;;  %v19226_v54 = vld [vmem:[#allocation8 + $0x2e0] ss:$16 sps:$4 sm:$0xff]   ;;  %v19229_v55 = vld [vmem:[#allocation8 + $0x2e8] ss:$16 sps:$4 sm:$0xff]   ;;  %v19234_v56 = vld [vmem:[#allocation8 + $0x304] ss:$16 sps:$4 sm:$0xff]  }
 0x3f7   :  { %3366 = vmatmul.mubr.bf16.vlgmr.msra.gmra.mrb[4].mxu0 %v2668_v9  ;;  %3452 = vmatmul.mubr.bf16.vlgmr.msra.gmra.mrb[4].mxu1 %v2668_v9  ;;  %v19237_v57 = vld [vmem:[#allocation8 + $0x30c] ss:$16 sps:$4 sm:$0xff]   ;;  %v19232_v58 = vld [vmem:[#allocation8 + $0x300] ss:$16 sps:$4 sm:$0xff]   ;;  %v19235_v59 = vld [vmem:[#allocation8 + $0x308] ss:$16 sps:$4 sm:$0xff]  }
 0x3f8   :  { %3377 = vmatpush1.bf16.msra.mxu0 %v19184_v5  ;;  %3463 = vmatpush1.bf16.msra.mxu1 %v19187_v6  ;;  %v19240_v60 = vld [vmem:[#allocation8 + $0x324] ss:$16 sps:$4 sm:$0xff]   ;;  %v19243_v61 = vld [vmem:[#allocation8 + $0x32c] ss:$16 sps:$4 sm:$0xff]   ;;  %v19238_v62 = vld [vmem:[#allocation8 + $0x320] ss:$16 sps:$4 sm:$0xff]  }
 0x3f9   :  { %3378 = vmatprep.subr.bf16.mxu0 %v19192_v11  ;;  %3464 = vmatprep.subr.bf16.mxu1 %v19195_v12  ;;  %v19241_v63 = vld [vmem:[#allocation8 + $0x328] ss:$16 sps:$4 sm:$0xff]   ;;  %v19246_v0 = vld [vmem:[#allocation8 + $0x344] ss:$16 sps:$4 sm:$0xff]   ;;  %v19249_v2 = vld [vmem:[#allocation8 + $0x34c] ss:$16 sps:$4 sm:$0xff]  }
 0x3fa   :  { %3408 = vmatprep.mubr.bf16.mxu0 %v2671_v22  ;;  %3494 = vmatprep.mubr.bf16.mxu1 %v2671_v22  ;;  %v19244_v3 = vld [vmem:[#allocation8 + $0x340] ss:$16 sps:$4 sm:$0xff]   ;;  %v19247_v4 = vld [vmem:[#allocation8 + $0x348] ss:$16 sps:$4 sm:$0xff]   ;;  %v19252_v5 = vld [vmem:[#allocation8 + $0x364] ss:$16 sps:$4 sm:$0xff]  }
 0x3fb   :  { %v19255_v6 = vld [vmem:[#allocation8 + $0x36c] ss:$16 sps:$4 sm:$0xff]   ;;  %v19250_v7 = vld [vmem:[#allocation8 + $0x360] ss:$16 sps:$4 sm:$0xff]   ;;  %v19253_v8 = vld [vmem:[#allocation8 + $0x368] ss:$16 sps:$4 sm:$0xff]  }
 0x3fc   :  { %3379 = vmatpush1.bf16.msra.mxu0 %v19190_v18  ;;  %3465 = vmatpush1.bf16.msra.mxu1 %v19193_v19  ;;  %v19258_v9 = vld [vmem:[#allocation8 + $0x384] ss:$16 sps:$4 sm:$0xff]   ;;  %v19261_v10 = vld [vmem:[#allocation8 + $0x38c] ss:$16 sps:$4 sm:$0xff]   ;;  %v19256_v11 = vld [vmem:[#allocation8 + $0x380] ss:$16 sps:$4 sm:$0xff]  }
 0x3fd   :  { %3380 = vmatprep.subr.bf16.mxu0 %v19198_v23  ;;  %3466 = vmatprep.subr.bf16.mxu1 %v19201_v24  ;;  %v19259_v12 = vld [vmem:[#allocation8 + $0x388] ss:$16 sps:$4 sm:$0xff]   ;;  %v19264_v13 = vld [vmem:[#allocation8 + $0x3a4] ss:$16 sps:$4 sm:$0xff]   ;;  %v19267_v14 = vld [vmem:[#allocation8 + $0x3ac] ss:$16 sps:$4 sm:$0xff]  }
 0x3fe   :  { %v19262_v15 = vld [vmem:[#allocation8 + $0x3a0] ss:$16 sps:$4 sm:$0xff]   ;;  %v19265_v17 = vld [vmem:[#allocation8 + $0x3a8] ss:$16 sps:$4 sm:$0xff]   ;;  %v19270_v18 = vld [vmem:[#allocation8 + $0x3c4] ss:$16 sps:$4 sm:$0xff]  }
 0x3ff   :  { %v19273_v19 = vld [vmem:[#allocation8 + $0x3cc] ss:$16 sps:$4 sm:$0xff]   ;;  %v19268_v22 = vld [vmem:[#allocation8 + $0x3c0] ss:$16 sps:$4 sm:$0xff]   ;;  %v19271_v23 = vld [vmem:[#allocation8 + $0x3c8] ss:$16 sps:$4 sm:$0xff]  }
 0x400   :  { %3381 = vmatpush1.bf16.msra.mxu0 %v19196_v27  ;;  %3467 = vmatpush1.bf16.msra.mxu1 %v19199_v29  ;;  %v19276_v24 = vld [vmem:[#allocation8 + $0x3e4] ss:$16 sps:$4 sm:$0xff]   ;;  %v19279_v27 = vld [vmem:[#allocation8 + $0x3ec] ss:$16 sps:$4 sm:$0xff]   ;;  %v19274_v29 = vld [vmem:[#allocation8 + $0x3e0] ss:$16 sps:$4 sm:$0xff]  }
 0x401   :  { %3382 = vmatprep.subr.bf16.mxu0 %v19204_v31  ;;  %3468 = vmatprep.subr.bf16.mxu1 %v19207_v33  ;;  %v19277_v31 = vld [vmem:[#allocation8 + $0x3e8] ss:$16 sps:$4 sm:$0xff]   ;;  %v790_v33 = vld [vmem:[#allocation9] sm:$0xf]  ;;  %vm9374_vm14 = vcmask 1043456  }
 0x404   :  { %3383 = vmatpush1.bf16.msra.mxu0 %v19202_v38  ;;  %3469 = vmatpush1.bf16.msra.mxu1 %v19205_v39  ;;  %v2676_v38 = vrot.slane %v790_v33, %v23172_v34  ;;  %v2684_v39 = vrot.slane %v790_v33, %v23178_v36 }
 0x405   :  { %3384 = vmatprep.subr.bf16.mxu0 %v19210_v40  ;;  %3470 = vmatprep.subr.bf16.mxu1 %v19213_v41  ;;  %v2680_v40 = vrot.slane %v790_v33, %v23175_v35  ;;  %v2688_v41 = vrot.slane %v790_v33, %v23181_v37  ;;  %v19289_v33 = vld [vmem:[#allocation12 + $0x240] ss:$16 sps:$4 sm:$0xff]  }
 0x408   :  { %3385 = vmatpush1.bf16.msra.mxu0 %v19208_v42  ;;  %3471 = vmatpush1.bf16.msra.mxu1 %v19211_v43  ;;  %v3533_v42 = vpop.permute.xlu0 %3532 }
 0x409   :  { %3386 = vmatprep.subr.bf16.mxu0 %v19216_v44  ;;  %3472 = vmatprep.subr.bf16.mxu1 %v19219_v45 }
 0x40c   :  { %3387 = vmatpush1.bf16.msra.mxu0 %v19214_v46  ;;  %3473 = vmatpush1.bf16.msra.mxu1 %v19217_v47 }
 0x40d   :  { %3388 = vmatprep.subr.bf16.mxu0 %v19222_v48  ;;  %3474 = vmatprep.subr.bf16.mxu1 %v19225_v49 }
 0x410   :  { %3389 = vmatpush1.bf16.msra.mxu0 %v19220_v50  ;;  %3475 = vmatpush1.bf16.msra.mxu1 %v19223_v51 }
 0x411   :  { %3390 = vmatprep.subr.bf16.mxu0 %v19228_v52  ;;  %3476 = vmatprep.subr.bf16.mxu1 %v19231_v53 }
 0x414   :  { %3391 = vmatpush1.bf16.msra.mxu0 %v19226_v54  ;;  %3477 = vmatpush1.bf16.msra.mxu1 %v19229_v55 }
 0x415   :  { %3392 = vmatprep.subr.bf16.mxu0 %v19234_v56  ;;  %3478 = vmatprep.subr.bf16.mxu1 %v19237_v57  ;;  %v23199_v56 = vand.u32 127, %v2450_v20 }
 0x417   :  { %vm3534_vm8 = vcmp.eq.s32.totalorder %v3533_v42, %v23199_v56  ;;  %v19300_v42 = vld [vmem:[#allocation12 + $0x44] ss:$16 sps:$4 sm:$0xff]  }
 0x418   :  { %3393 = vmatpush1.bf16.msra.mxu0 %v19232_v58  ;;  %3479 = vmatpush1.bf16.msra.mxu1 %v19235_v59 }
 0x419   :  { %3394 = vmatprep.subr.bf16.mxu0 %v19240_v60  ;;  %3480 = vmatprep.subr.bf16.mxu1 %v19243_v61 }
 0x41c   :  { %3395 = vmatpush1.bf16.msra.mxu0 %v19238_v62  ;;  %3481 = vmatpush1.bf16.msra.mxu1 %v19241_v63 }
 0x41d   :  { %3396 = vmatprep.subr.bf16.mxu0 %v19246_v0  ;;  %3482 = vmatprep.subr.bf16.mxu1 %v19249_v2 }
 0x420   :  { %3397 = vmatpush1.bf16.msra.mxu0 %v19244_v3  ;;  %3483 = vmatpush1.bf16.msra.mxu1 %v19247_v4 }
 0x421   :  { %3398 = vmatprep.subr.bf16.mxu0 %v19252_v5  ;;  %3484 = vmatprep.subr.bf16.mxu1 %v19255_v6  ;;  %v3539_v6 = vpop.permute.xlu0 %3538 }
 0x422   :  { %vm3540_vm9 = vcmp.eq.s32.totalorder %v3539_v6, %v23199_v56  ;;  %v19337_v6 = vld [vmem:[#allocation12 + $0x340] ss:$16 sps:$4 sm:$0xff]  }
 0x424   :  { %3399 = vmatpush1.bf16.msra.mxu0 %v19250_v7  ;;  %3485 = vmatpush1.bf16.msra.mxu1 %v19253_v8 }
 0x425   :  { %3400 = vmatprep.subr.bf16.mxu0 %v19258_v9  ;;  %3486 = vmatprep.subr.bf16.mxu1 %v19261_v10  ;;  %v19282_v10 = vld [vmem:[#allocation12 + $0x204] ss:$16 sps:$4 sm:$0xff]  }
 0x428   :  { %3401 = vmatpush1.bf16.msra.mxu0 %v19256_v11  ;;  %3487 = vmatpush1.bf16.msra.mxu1 %v19259_v12 }
 0x429   :  { %3402 = vmatprep.subr.bf16.mxu0 %v19264_v13  ;;  %3488 = vmatprep.subr.bf16.mxu1 %v19267_v14 }
 0x42c   :  { %3403 = vmatpush1.bf16.msra.mxu0 %v19262_v15  ;;  %3489 = vmatpush1.bf16.msra.mxu1 %v19265_v17 }
 0x42d   :  { %3404 = vmatprep.subr.bf16.mxu0 %v19270_v18  ;;  %3490 = vmatprep.subr.bf16.mxu1 %v19273_v19  ;;  %v19280_v18 = vld [vmem:[#allocation12 + $0x200] ss:$16 sps:$4 sm:$0xff]   ;;  %v23216_v19 = vsel %vm3534_vm8, 1.0, %v22620_v1 }
 0x430   :  { %3405 = vmatpush1.bf16.msra.mxu0 %v19268_v22  ;;  %3491 = vmatpush1.bf16.msra.mxu1 %v19271_v23  ;;  %v23219_v22 = vsel %vm3540_vm9, 1.0, %v22620_v1  ;;  %v19285_v23 = vld [vmem:[#allocation12 + $0x224] ss:$16 sps:$4 sm:$0xff]  }
 0x431   :  { %3406 = vmatprep.subr.bf16.mxu0 %v19276_v24  ;;  %3492 = vmatprep.subr.bf16.mxu1 %v19279_v27  ;;  %v19283_v24 = vld [vmem:[#allocation12 + $0x220] ss:$16 sps:$4 sm:$0xff]   ;;  %v19288_v27 = vld [vmem:[#allocation12 + $0x4] ss:$16 sps:$4 sm:$0xff]  }
 0x434   :  { %3407 = vmatpush1.bf16.msra.mxu0 %v19274_v29  ;;  %3493 = vmatpush1.bf16.msra.mxu1 %v19277_v31  ;;  %v19291_v29 = vld [vmem:[#allocation12 + $0x244] ss:$16 sps:$4 sm:$0xff]   ;;  %v19286_v31 = vld [vmem:[#allocation12] ss:$16 sps:$4 sm:$0xff]  }
 0x437   :  { %3409 = vmatmul.mubr.bf16.vlgmr.msra.gmra.mrb[4].mxu0 %v23188_v16  ;;  %3495 = vmatmul.mubr.bf16.vlgmr.msra.gmra.mrb[4].mxu1 %v23188_v16 }
 0x438   :  { %3637 = vmatprep.mubr.f32.mxu0 %v22620_v1  ;;  %3853 = vmatprep.mubr.f32.mxu1 %v22620_v1 }
 0x50a   :  { %v3410_v43 = vpop.f32.mrb[4].mxu0  ;;  %v3496_v44 = vpop.f32.mrb[4].mxu1 }
 0x50b   :  { %v18933_v45 = vadd.f32 %v3410_v43, %v2676_v38  ;;  %v18937_v46 = vadd.f32 %v3496_v44, %v2684_v39  ;;  %v3412_v47 = vpop.f32.mrb[5].mxu0  ;;  %v3498_v16 = vpop.f32.mrb[5].mxu1  ;;  %v19303_v43 = vld [vmem:[#allocation12 + $0x284] ss:$16 sps:$4 sm:$0xff]   ;;  %v19298_v44 = vld [vmem:[#allocation12 + $0x40] ss:$16 sps:$4 sm:$0xff]  }
 0x50c   :  { %v18934_v48 = vadd.f32 %v3412_v47, %v2680_v40  ;;  %v18938_v49 = vadd.f32 %v3498_v16, %v2688_v41  ;;  %v3414_v50 = vpop.f32.mrb[6].mxu0  ;;  %v3500_v51 = vpop.f32.mrb[6].mxu1  ;;  %v19309_v47 = vld [vmem:[#allocation12 + $0x2a4] ss:$16 sps:$4 sm:$0xff]   ;;  %v19304_v16 = vld [vmem:[#allocation12 + $0x60] ss:$16 sps:$4 sm:$0xff]  }
 0x50d   :  { %vm3505_vm15 = vcmp.gt.f32.partialorder %v18933_v45, 0.0  ;;  %v3513_v52 = vmul.f32 0.1, %v18933_v45  ;;  %vm3507_vm0 = vcmp.gt.f32.partialorder %v18937_v46, 0.0  ;;  %v3515_v53 = vmul.f32 0.1, %v18937_v46 }
 0x50e   :  { %vm3506_vm1 = vcmp.gt.f32.partialorder %v18934_v48, 0.0  ;;  %v3514_v54 = vmul.f32 0.1, %v18934_v48  ;;  %v3516_v55 = vmul.f32 0.1, %v18938_v49  ;;  %vm3508_vm2 = vcmp.gt.f32.partialorder %v18938_v49, 0.0 }
 0x50f   :  { %v18935_v57 = vadd.f32 %v3414_v50, %v2676_v38  ;;  %v18939_v58 = vadd.f32 %v3500_v51, %v2684_v39  ;;  %v3416_v59 = vpop.f32.mrb[7].mxu0  ;;  %v3502_v60 = vpop.f32.mrb[7].mxu1  ;;  %v3521_v61 = vsel %vm3505_vm15, %v18933_v45, %v3513_v52  ;;  %v3523_v62 = vsel %vm3507_vm0, %v18937_v46, %v3515_v53  ;;  %v19294_v38 = vld [vmem:[#allocation12 + $0x24] ss:$16 sps:$4 sm:$0xff]   ;;  %v19301_v45 = vld [vmem:[#allocation12 + $0x280] ss:$16 sps:$4 sm:$0xff]  }
 0x510   :  { %v18936_v63 = vadd.f32 %v3416_v59, %v2680_v40  ;;  %v18940_v0 = vadd.f32 %v3502_v60, %v2688_v41  ;;  %v3522_v8 = vsel %vm3506_vm1, %v18934_v48, %v3514_v54  ;;  %v3524_v9 = vsel %vm3508_vm2, %v18938_v49, %v3516_v55  ;;  %v19297_v39 = vld [vmem:[#allocation12 + $0x264] ss:$16 sps:$4 sm:$0xff]   ;;  %v19292_v40 = vld [vmem:[#allocation12 + $0x20] ss:$16 sps:$4 sm:$0xff]  }
 0x511   :  { %vm3509_vm3 = vcmp.gt.f32.partialorder %v18935_v57, 0.0  ;;  %v3517_v2 = vmul.f32 0.1, %v18935_v57  ;;  %vm3511_vm5 = vcmp.gt.f32.partialorder %v18939_v58, 0.0  ;;  %v3519_v3 = vmul.f32 0.1, %v18939_v58 }
 0x512   :  { %vm3510_vm6 = vcmp.gt.f32.partialorder %v18936_v63, 0.0  ;;  %v3518_v4 = vmul.f32 0.1, %v18936_v63  ;;  %vm3512_vm7 = vcmp.gt.f32.partialorder %v18940_v0, 0.0  ;;  %v3520_v5 = vmul.f32 0.1, %v18940_v0 }
 0x513   :  { %v3525_v20 = vsel %vm3509_vm3, %v18935_v57, %v3517_v2  ;;  %v3527_v7 = vsel %vm3511_vm5, %v18939_v58, %v3519_v3  ;;  %v19295_v41 = vld [vmem:[#allocation12 + $0x260] ss:$16 sps:$4 sm:$0xff]   ;;  %v19306_v46 = vld [vmem:[#allocation12 + $0x64] ss:$16 sps:$4 sm:$0xff]   ;;  %vm9370_vm15 = vcmask 31744  }
 0x514   :  { %v23203_v11 = vpack.c.bf16 %v3525_v20, %v3521_v61  ;;  %v23205_v12 = vpack.c.bf16 %v3527_v7, %v3523_v62  ;;  %v3526_v13 = vsel %vm3510_vm6, %v18936_v63, %v3518_v4  ;;  %v3528_v14 = vsel %vm3512_vm7, %v18940_v0, %v3520_v5  ;;  %v19307_v48 = vld [vmem:[#allocation12 + $0x2a0] ss:$16 sps:$4 sm:$0xff]   ;;  %v19312_v49 = vld [vmem:[#allocation12 + $0x84] ss:$16 sps:$4 sm:$0xff]  }
 0x515   :  { %v23208_v15 = vpack.c.bf16 %v3526_v13, %v3522_v8  ;;  %v23210_v17 = vpack.c.bf16 %v3528_v14, %v3524_v9  ;;  %v19315_v50 = vld [vmem:[#allocation12 + $0x2c4] ss:$16 sps:$4 sm:$0xff]   ;;  %v19310_v51 = vld [vmem:[#allocation12 + $0x80] ss:$16 sps:$4 sm:$0xff]  }
 0x516   :  { %v19313_v52 = vld [vmem:[#allocation12 + $0x2c0] ss:$16 sps:$4 sm:$0xff]   ;;  %v19318_v53 = vld [vmem:[#allocation12 + $0xa4] ss:$16 sps:$4 sm:$0xff]  }
 0x517   :  { %18860 = vmatprep.subr.bf16.mxu0 %v23208_v15  ;;  %18872 = vmatprep.subr.bf16.mxu1 %v23210_v17  ;;  %v19321_v54 = vld [vmem:[#allocation12 + $0x2e4] ss:$16 sps:$4 sm:$0xff]   ;;  %v19316_v55 = vld [vmem:[#allocation12 + $0xa0] ss:$16 sps:$4 sm:$0xff]  }
 0x518   :  { %18862 = vmatpush1.bf16.msra.mxu0 %v23203_v11  ;;  %18874 = vmatpush1.bf16.msra.mxu1 %v23205_v12  ;;  %v19319_v57 = vld [vmem:[#allocation12 + $0x2e0] ss:$16 sps:$4 sm:$0xff]   ;;  %v19324_v58 = vld [vmem:[#allocation12 + $0xc4] ss:$16 sps:$4 sm:$0xff]  }
 0x519   :  { %18864 = vmatprep.subr.bf16.mxu0 %v23210_v17  ;;  %4692 = vmatprep.subr.bf16.mxu1 %v19282_v10  ;;  %v19327_v59 = vld [vmem:[#allocation12 + $0x304] ss:$16 sps:$4 sm:$0xff]   ;;  %v19322_v60 = vld [vmem:[#allocation12 + $0xc0] ss:$16 sps:$4 sm:$0xff]  }
 0x51a   :  { %v19325_v61 = vld [vmem:[#allocation12 + $0x300] ss:$16 sps:$4 sm:$0xff]   ;;  %v19330_v62 = vld [vmem:[#allocation12 + $0xe4] ss:$16 sps:$4 sm:$0xff]  }
 0x51b   :  { %17109 = vmatmul.mubr.msk.f32.vlgmr.msra.gmra.mrb[8].mxu0 %vm3569_vm10, %v23216_v19  ;;  %17112 = vmatmul.mubr.msk.f32.vlgmr.msra.gmra.mrb[8].mxu1 %vm3569_vm10, %v23219_v22  ;;  %v19333_v63 = vld [vmem:[#allocation12 + $0x324] ss:$16 sps:$4 sm:$0xff]   ;;  %v19328_v0 = vld [vmem:[#allocation12 + $0xe0] ss:$16 sps:$4 sm:$0xff]  }
 0x51c   :  { %18866 = vmatpush1.bf16.msra.mxu0 %v23205_v12  ;;  %3708 = vmatprep.mubr.f32.mxu0 %v22620_v1  ;;  %v19331_v2 = vld [vmem:[#allocation12 + $0x320] ss:$16 sps:$4 sm:$0xff]   ;;  %v19336_v3 = vld [vmem:[#allocation12 + $0x104] ss:$16 sps:$4 sm:$0xff]  }
 0x51d   :  { %18868 = vmatprep.subr.bf16.mxu0 %v23208_v15  ;;  %4693 = vmatpush1.bf16.msra.mxu1 %v19280_v18  ;;  %v19339_v4 = vld [vmem:[#allocation12 + $0x344] ss:$16 sps:$4 sm:$0xff]   ;;  %v19334_v5 = vld [vmem:[#allocation12 + $0x100] ss:$16 sps:$4 sm:$0xff]  }
 0x51e   :  { %4694 = vmatprep.subr.bf16.mxu1 %v19285_v23  ;;  %v19342_v20 = vld [vmem:[#allocation12 + $0x124] ss:$16 sps:$4 sm:$0xff]   ;;  %v19340_v8 = vld [vmem:[#allocation12 + $0x120] ss:$16 sps:$4 sm:$0xff]  }
 0x51f   :  { %17110 = vmatmul.mubr.msk.f32.vlgmr.msra.gmra.mrb[10].mxu0 %vm3569_vm10, %v23216_v19  ;;  %v19345_v7 = vld [vmem:[#allocation12 + $0x364] ss:$16 sps:$4 sm:$0xff]   ;;  %v19343_v9 = vld [vmem:[#allocation12 + $0x360] ss:$16 sps:$4 sm:$0xff]  }
 0x520   :  { %18870 = vmatpush1.bf16.msra.mxu0 %v23203_v11  ;;  %3782 = vmatprep.mubr.f32.mxu0 %v22620_v1  ;;  %v19348_v10 = vld [vmem:[#allocation12 + $0x144] ss:$16 sps:$4 sm:$0xff]   ;;  %v19346_v14 = vld [vmem:[#allocation12 + $0x140] ss:$16 sps:$4 sm:$0xff]  }
 0x521   :  { %4695 = vmatpush1.bf16.msra.mxu1 %v19283_v24  ;;  %4651 = vmatprep.subr.bf16.mxu0 %v19288_v27  ;;  %v19351_v13 = vld [vmem:[#allocation12 + $0x384] ss:$16 sps:$4 sm:$0xff]   ;;  %v19349_v18 = vld [vmem:[#allocation12 + $0x380] ss:$16 sps:$4 sm:$0xff]  }
 0x522   :  { %4696 = vmatprep.subr.bf16.mxu1 %v19291_v29  ;;  %v19354_v23 = vld [vmem:[#allocation12 + $0x164] ss:$16 sps:$4 sm:$0xff]   ;;  %v19352_v27 = vld [vmem:[#allocation12 + $0x160] ss:$16 sps:$4 sm:$0xff]  }
 0x523   :  { %17111 = vmatmul.mubr.msk.f32.vlgmr.msra.gmra.mrb[12].mxu0 %vm3569_vm10, %v23219_v22  ;;  %v19357_v24 = vld [vmem:[#allocation12 + $0x3a4] ss:$16 sps:$4 sm:$0xff]   ;;  %v19355_v29 = vld [vmem:[#allocation12 + $0x3a0] ss:$16 sps:$4 sm:$0xff]  }
 0x524   :  { %4652 = vmatpush1.bf16.msra.mxu0 %v19286_v31  ;;  %v19360_v31 = vld [vmem:[#allocation12 + $0x184] ss:$16 sps:$4 sm:$0xff]  }
 0x525   :  { %4697 = vmatpush1.bf16.msra.mxu1 %v19289_v33  ;;  %4653 = vmatprep.subr.bf16.mxu0 %v19294_v38  ;;  %v19363_v33 = vld [vmem:[#allocation12 + $0x3c4] ss:$16 sps:$4 sm:$0xff]   ;;  %v19358_v38 = vld [vmem:[#allocation12 + $0x180] ss:$16 sps:$4 sm:$0xff]  }
 0x526   :  { %4698 = vmatprep.subr.bf16.mxu1 %v19297_v39  ;;  %v19361_v39 = vld [vmem:[#allocation12 + $0x3c0] ss:$16 sps:$4 sm:$0xff]  }
 0x528   :  { %4654 = vmatpush1.bf16.msra.mxu0 %v19292_v40  ;;  %v19366_v40 = vld [vmem:[#allocation12 + $0x1a4] ss:$16 sps:$4 sm:$0xff]  }
 0x529   :  { %4699 = vmatpush1.bf16.msra.mxu1 %v19295_v41  ;;  %4655 = vmatprep.subr.bf16.mxu0 %v19300_v42  ;;  %v19369_v41 = vld [vmem:[#allocation12 + $0x3e4] ss:$16 sps:$4 sm:$0xff]   ;;  %v19364_v42 = vld [vmem:[#allocation12 + $0x1a0] ss:$16 sps:$4 sm:$0xff]  }
 0x52a   :  { %4700 = vmatprep.subr.bf16.mxu1 %v19303_v43  ;;  %v19367_v43 = vld [vmem:[#allocation12 + $0x3e0] ss:$16 sps:$4 sm:$0xff]  }
 0x52c   :  { %4656 = vmatpush1.bf16.msra.mxu0 %v19298_v44  ;;  %v19372_v44 = vld [vmem:[#allocation12 + $0x1c4] ss:$16 sps:$4 sm:$0xff]  }
 0x52d   :  { %4701 = vmatpush1.bf16.msra.mxu1 %v19301_v45  ;;  %4657 = vmatprep.subr.bf16.mxu0 %v19306_v46  ;;  %v19375_v45 = vld [vmem:[#allocation12 + $0x20c] ss:$16 sps:$4 sm:$0xff]   ;;  %v19370_v46 = vld [vmem:[#allocation12 + $0x1c0] ss:$16 sps:$4 sm:$0xff]  }
 0x52e   :  { %4702 = vmatprep.subr.bf16.mxu1 %v19309_v47  ;;  %v19378_v47 = vld [vmem:[#allocation12 + $0x1e4] ss:$16 sps:$4 sm:$0xff]  }
 0x530   :  { %4658 = vmatpush1.bf16.msra.mxu0 %v19304_v16  ;;  %v19376_v16 = vld [vmem:[#allocation12 + $0x1e0] ss:$16 sps:$4 sm:$0xff]  }
 0x531   :  { %4703 = vmatpush1.bf16.msra.mxu1 %v19307_v48  ;;  %4659 = vmatprep.subr.bf16.mxu0 %v19312_v49  ;;  %v19384_v48 = vld [vmem:[#allocation12 + $0xc] ss:$16 sps:$4 sm:$0xff]  }
 0x532   :  { %4704 = vmatprep.subr.bf16.mxu1 %v19315_v50 }
 0x534   :  { %4660 = vmatpush1.bf16.msra.mxu0 %v19310_v51 }
 0x535   :  { %4705 = vmatpush1.bf16.msra.mxu1 %v19313_v52  ;;  %4661 = vmatprep.subr.bf16.mxu0 %v19318_v53 }
 0x536   :  { %4706 = vmatprep.subr.bf16.mxu1 %v19321_v54 }
 0x538   :  { %4662 = vmatpush1.bf16.msra.mxu0 %v19316_v55  ;;  %v19373_v55 = vld [vmem:[#allocation12 + $0x208] ss:$16 sps:$4 sm:$0xff]  }
 0x539   :  { %4707 = vmatpush1.bf16.msra.mxu1 %v19319_v57  ;;  %4663 = vmatprep.subr.bf16.mxu0 %v19324_v58  ;;  %v19381_v57 = vld [vmem:[#allocation12 + $0x22c] ss:$16 sps:$4 sm:$0xff]  }
 0x53a   :  { %4708 = vmatprep.subr.bf16.mxu1 %v19327_v59 }
 0x53c   :  { %4664 = vmatpush1.bf16.msra.mxu0 %v19322_v60  ;;  %v19379_v60 = vld [vmem:[#allocation12 + $0x228] ss:$16 sps:$4 sm:$0xff]  }
 0x53d   :  { %4709 = vmatpush1.bf16.msra.mxu1 %v19325_v61  ;;  %4665 = vmatprep.subr.bf16.mxu0 %v19330_v62  ;;  %v19387_v61 = vld [vmem:[#allocation12 + $0x24c] ss:$16 sps:$4 sm:$0xff]  }
 0x53e   :  { %4710 = vmatprep.subr.bf16.mxu1 %v19333_v63 }
 0x540   :  { %4666 = vmatpush1.bf16.msra.mxu0 %v19328_v0 }
 0x541   :  { %4711 = vmatpush1.bf16.msra.mxu1 %v19331_v2  ;;  %4667 = vmatprep.subr.bf16.mxu0 %v19336_v3  ;;  %v19382_v2 = vld [vmem:[#allocation12 + $0x8] ss:$16 sps:$4 sm:$0xff]  }
 0x542   :  { %4712 = vmatprep.subr.bf16.mxu1 %v19339_v4  ;;  %v19385_v3 = vld [vmem:[#allocation12 + $0x248] ss:$16 sps:$4 sm:$0xff]  }
 0x544   :  { %4668 = vmatpush1.bf16.msra.mxu0 %v19334_v5  ;;  %v19390_v5 = vld [vmem:[#allocation12 + $0x2c] ss:$16 sps:$4 sm:$0xff]  }
 0x545   :  { %4713 = vmatpush1.bf16.msra.mxu1 %v19337_v6  ;;  %4669 = vmatprep.subr.bf16.mxu0 %v19342_v20  ;;  %v19393_v6 = vld [vmem:[#allocation12 + $0x26c] ss:$16 sps:$4 sm:$0xff]   ;;  %v19388_v20 = vld [vmem:[#allocation12 + $0x28] ss:$16 sps:$4 sm:$0xff]  }
 0x546   :  { %4714 = vmatprep.subr.bf16.mxu1 %v19345_v7  ;;  %v19391_v7 = vld [vmem:[#allocation12 + $0x268] ss:$16 sps:$4 sm:$0xff]  }
 0x548   :  { %4670 = vmatpush1.bf16.msra.mxu0 %v19340_v8  ;;  %v19396_v8 = vld [vmem:[#allocation12 + $0x4c] ss:$16 sps:$4 sm:$0xff]  }
 0x549   :  { %4715 = vmatpush1.bf16.msra.mxu1 %v19343_v9  ;;  %4671 = vmatprep.subr.bf16.mxu0 %v19348_v10  ;;  %v19399_v9 = vld [vmem:[#allocation12 + $0x28c] ss:$16 sps:$4 sm:$0xff]   ;;  %v19394_v10 = vld [vmem:[#allocation12 + $0x48] ss:$16 sps:$4 sm:$0xff]  }
 0x54a   :  { %4716 = vmatprep.subr.bf16.mxu1 %v19351_v13  ;;  %v19397_v13 = vld [vmem:[#allocation12 + $0x288] ss:$16 sps:$4 sm:$0xff]  }
 0x54c   :  { %4672 = vmatpush1.bf16.msra.mxu0 %v19346_v14  ;;  %v19402_v14 = vld [vmem:[#allocation12 + $0x6c] ss:$16 sps:$4 sm:$0xff]  }
 0x54d   :  { %4717 = vmatpush1.bf16.msra.mxu1 %v19349_v18  ;;  %4673 = vmatprep.subr.bf16.mxu0 %v19354_v23  ;;  %v19405_v18 = vld [vmem:[#allocation12 + $0x2ac] ss:$16 sps:$4 sm:$0xff]   ;;  %v19400_v23 = vld [vmem:[#allocation12 + $0x68] ss:$16 sps:$4 sm:$0xff]  }
 0x54e   :  { %4718 = vmatprep.subr.bf16.mxu1 %v19357_v24  ;;  %v19403_v24 = vld [vmem:[#allocation12 + $0x2a8] ss:$16 sps:$4 sm:$0xff]  }
 0x550   :  { %4674 = vmatpush1.bf16.msra.mxu0 %v19352_v27  ;;  %v19408_v27 = vld [vmem:[#allocation12 + $0x8c] ss:$16 sps:$4 sm:$0xff]  }
 0x551   :  { %4719 = vmatpush1.bf16.msra.mxu1 %v19355_v29  ;;  %4675 = vmatprep.subr.bf16.mxu0 %v19360_v31  ;;  %v19411_v29 = vld [vmem:[#allocation12 + $0x2cc] ss:$16 sps:$4 sm:$0xff]   ;;  %v19406_v31 = vld [vmem:[#allocation12 + $0x88] ss:$16 sps:$4 sm:$0xff]  }
 0x552   :  { %4720 = vmatprep.subr.bf16.mxu1 %v19363_v33  ;;  %v19409_v33 = vld [vmem:[#allocation12 + $0x2c8] ss:$16 sps:$4 sm:$0xff]  }
 0x554   :  { %4676 = vmatpush1.bf16.msra.mxu0 %v19358_v38  ;;  %v19414_v38 = vld [vmem:[#allocation12 + $0xac] ss:$16 sps:$4 sm:$0xff]  }
 0x555   :  { %4721 = vmatpush1.bf16.msra.mxu1 %v19361_v39  ;;  %4677 = vmatprep.subr.bf16.mxu0 %v19366_v40  ;;  %v19417_v39 = vld [vmem:[#allocation12 + $0x2ec] ss:$16 sps:$4 sm:$0xff]   ;;  %v19412_v40 = vld [vmem:[#allocation12 + $0xa8] ss:$16 sps:$4 sm:$0xff]  }
 0x556   :  { %4722 = vmatprep.subr.bf16.mxu1 %v19369_v41  ;;  %v19415_v41 = vld [vmem:[#allocation12 + $0x2e8] ss:$16 sps:$4 sm:$0xff]  }
 0x558   :  { %4678 = vmatpush1.bf16.msra.mxu0 %v19364_v42  ;;  %v19420_v42 = vld [vmem:[#allocation12 + $0xcc] ss:$16 sps:$4 sm:$0xff]  }
 0x559   :  { %4723 = vmatpush1.bf16.msra.mxu1 %v19367_v43  ;;  %4679 = vmatprep.subr.bf16.mxu0 %v19372_v44  ;;  %v19423_v43 = vld [vmem:[#allocation12 + $0x30c] ss:$16 sps:$4 sm:$0xff]   ;;  %v19418_v44 = vld [vmem:[#allocation12 + $0xc8] ss:$16 sps:$4 sm:$0xff]  }
 0x55a   :  { %4774 = vmatprep.subr.bf16.mxu1 %v19375_v45  ;;  %v19421_v45 = vld [vmem:[#allocation12 + $0x308] ss:$16 sps:$4 sm:$0xff]  }
 0x55c   :  { %4680 = vmatpush1.bf16.msra.mxu0 %v19370_v46  ;;  %v19426_v46 = vld [vmem:[#allocation12 + $0xec] ss:$16 sps:$4 sm:$0xff]  }
 0x55d   :  { %4681 = vmatprep.subr.bf16.mxu0 %v19378_v47  ;;  %v19429_v47 = vld [vmem:[#allocation12 + $0x32c] ss:$16 sps:$4 sm:$0xff]  }
 0x560   :  { %4682 = vmatpush1.bf16.msra.mxu0 %v19376_v16  ;;  %v19424_v16 = vld [vmem:[#allocation12 + $0xe8] ss:$16 sps:$4 sm:$0xff]  }
 0x561   :  { %4733 = vmatprep.subr.bf16.mxu0 %v19384_v48  ;;  %v19427_v48 = vld [vmem:[#allocation12 + $0x328] ss:$16 sps:$4 sm:$0xff]  }
 0x5ee   :  { %v23237_v49 = vpop.f32.mrb[8].mxu0  ;;  %v3855_v50 = vpop.f32.mrb[8].mxu1 }
 0x5ef   :  { %v23239_v51 = vpack.c.bf16 %v3855_v50, %v3855_v50  ;;  %v23241_v52 = vpop.f32.mrb[9].mxu0  ;;  %v3857_v53 = vpop.f32.mrb[9].mxu1  ;;  %v19432_v50 = vld [vmem:[#allocation12 + $0x10c] ss:$16 sps:$4 sm:$0xff]  }
 0x5f0   :  { %v4010_v54 = vpack.c.bf16 %v3857_v53, %v3857_v53  ;;  %v19435_v53 = vld [vmem:[#allocation12 + $0x34c] ss:$16 sps:$4 sm:$0xff]  }
 0x5f2   :  { %v23243_v58 = vpop.f32.mrb[10].mxu0  ;;  %4724 = vmatprep.mubr.bf16.mxu1 %v4010_v54 }
 0x5f3   :  { %v23245_v59 = vpop.f32.mrb[11].mxu0  ;;  %4725 = vmatmul.mubr.bf16.vlgmr.msra.gmra.mrb[12].mxu1 %v23239_v51 }
 0x5f4   :  { %4775 = vmatpush1.bf16.msra.mxu1 %v19373_v55  ;;  %4806 = vmatprep.mubr.bf16.mxu1 %v4010_v54  ;;  %v19430_v54 = vld [vmem:[#allocation12 + $0x108] ss:$16 sps:$4 sm:$0xff]  }
 0x5f5   :  { %4776 = vmatprep.subr.bf16.mxu1 %v19381_v57  ;;  %v19433_v55 = vld [vmem:[#allocation12 + $0x348] ss:$16 sps:$4 sm:$0xff]   ;;  %v19438_v57 = vld [vmem:[#allocation12 + $0x12c] ss:$16 sps:$4 sm:$0xff]  }
 0x5f6   :  { %v3784_v62 = vpop.f32.mrb[12].mxu0 }
 0x5f7   :  { %v3786_v63 = vpop.f32.mrb[13].mxu0  ;;  %v23248_v4 = vpack.c.bf16 %v3784_v62, %v3784_v62  ;;  %v19439_v62 = vld [vmem:[#allocation12 + $0x368] ss:$16 sps:$4 sm:$0xff]  }
 0x5f8   :  { %v4008_v0 = vpack.c.bf16 %v3786_v63, %v3786_v63  ;;  %4777 = vmatpush1.bf16.msra.mxu1 %v19379_v60  ;;  %v19441_v60 = vld [vmem:[#allocation12 + $0x36c] ss:$16 sps:$4 sm:$0xff]  }
 0x5f9   :  { %4778 = vmatprep.subr.bf16.mxu1 %v19387_v61  ;;  %v19436_v61 = vld [vmem:[#allocation12 + $0x128] ss:$16 sps:$4 sm:$0xff]   ;;  %v19444_v63 = vld [vmem:[#allocation12 + $0x14c] ss:$16 sps:$4 sm:$0xff]  }
 0x5fa   :  { %4683 = vmatprep.mubr.bf16.mxu0 %v4008_v0 }
 0x5fb   :  { %4684 = vmatmul.mubr.bf16.vlgmr.msra.gmra.mrb[16].mxu0 %v23248_v4 }
 0x5fc   :  { %4734 = vmatpush1.bf16.msra.mxu0 %v19382_v2  ;;  %4779 = vmatpush1.bf16.msra.mxu1 %v19385_v3  ;;  %v19442_v2 = vld [vmem:[#allocation12 + $0x148] ss:$16 sps:$4 sm:$0xff]  }
 0x5fd   :  { %4765 = vmatprep.mubr.bf16.mxu0 %v4008_v0  ;;  %4735 = vmatprep.subr.bf16.mxu0 %v19390_v5  ;;  %v19447_v0 = vld [vmem:[#allocation12 + $0x38c] ss:$16 sps:$4 sm:$0xff]   ;;  %v19445_v3 = vld [vmem:[#allocation12 + $0x388] ss:$16 sps:$4 sm:$0xff]  }
 0x5fe   :  { %4780 = vmatprep.subr.bf16.mxu1 %v19393_v6  ;;  %v19450_v5 = vld [vmem:[#allocation12 + $0x16c] ss:$16 sps:$4 sm:$0xff]  }
 0x5ff   :  { %v19453_v6 = vld [vmem:[#allocation12 + $0x3ac] ss:$16 sps:$4 sm:$0xff]  }
 0x600   :  { %4736 = vmatpush1.bf16.msra.mxu0 %v19388_v20  ;;  %4781 = vmatpush1.bf16.msra.mxu1 %v19391_v7  ;;  %v19448_v20 = vld [vmem:[#allocation12 + $0x168] ss:$16 sps:$4 sm:$0xff]  }
 0x601   :  { %4737 = vmatprep.subr.bf16.mxu0 %v19396_v8  ;;  %4782 = vmatprep.subr.bf16.mxu1 %v19399_v9  ;;  %v19451_v7 = vld [vmem:[#allocation12 + $0x3a8] ss:$16 sps:$4 sm:$0xff]   ;;  %v19456_v8 = vld [vmem:[#allocation12 + $0x18c] ss:$16 sps:$4 sm:$0xff]  }
 0x602   :  { %v19459_v9 = vld [vmem:[#allocation12 + $0x3cc] ss:$16 sps:$4 sm:$0xff]  }
 0x604   :  { %4738 = vmatpush1.bf16.msra.mxu0 %v19394_v10  ;;  %4783 = vmatpush1.bf16.msra.mxu1 %v19397_v13  ;;  %v19454_v10 = vld [vmem:[#allocation12 + $0x188] ss:$16 sps:$4 sm:$0xff]  }
 0x605   :  { %4739 = vmatprep.subr.bf16.mxu0 %v19402_v14  ;;  %4784 = vmatprep.subr.bf16.mxu1 %v19405_v18  ;;  %v19457_v13 = vld [vmem:[#allocation12 + $0x3c8] ss:$16 sps:$4 sm:$0xff]   ;;  %v19462_v14 = vld [vmem:[#allocation12 + $0x1ac] ss:$16 sps:$4 sm:$0xff]  }
 0x606   :  { %v19465_v18 = vld [vmem:[#allocation12 + $0x3ec] ss:$16 sps:$4 sm:$0xff]  }
 0x608   :  { %4740 = vmatpush1.bf16.msra.mxu0 %v19400_v23  ;;  %4785 = vmatpush1.bf16.msra.mxu1 %v19403_v24  ;;  %v19460_v23 = vld [vmem:[#allocation12 + $0x1a8] ss:$16 sps:$4 sm:$0xff]  }
 0x609   :  { %4741 = vmatprep.subr.bf16.mxu0 %v19408_v27  ;;  %4786 = vmatprep.subr.bf16.mxu1 %v19411_v29  ;;  %v19463_v24 = vld [vmem:[#allocation12 + $0x3e8] ss:$16 sps:$4 sm:$0xff]   ;;  %v19468_v27 = vld [vmem:[#allocation12 + $0x1cc] ss:$16 sps:$4 sm:$0xff]   ;;  %v19471_v29 = vld [vmem:[#allocation11 + $0x204] ss:$16 sps:$4 sm:$0xff]  }
 0x60c   :  { %4742 = vmatpush1.bf16.msra.mxu0 %v19406_v31  ;;  %4787 = vmatpush1.bf16.msra.mxu1 %v19409_v33  ;;  %v19466_v31 = vld [vmem:[#allocation12 + $0x1c8] ss:$16 sps:$4 sm:$0xff]   ;;  %v19469_v33 = vld [vmem:[#allocation11 + $0x200] ss:$16 sps:$4 sm:$0xff]  }
 0x60d   :  { %4743 = vmatprep.subr.bf16.mxu0 %v19414_v38  ;;  %4788 = vmatprep.subr.bf16.mxu1 %v19417_v39  ;;  %v19474_v38 = vld [vmem:[#allocation12 + $0x1ec] ss:$16 sps:$4 sm:$0xff]   ;;  %v19477_v39 = vld [vmem:[#allocation11 + $0x224] ss:$16 sps:$4 sm:$0xff]  }
 0x610   :  { %4744 = vmatpush1.bf16.msra.mxu0 %v19412_v40  ;;  %4789 = vmatpush1.bf16.msra.mxu1 %v19415_v41  ;;  %v23253_v40 = vpack.c.bf16 %v23245_v59, %v23245_v59  ;;  %v19472_v41 = vld [vmem:[#allocation12 + $0x1e8] ss:$16 sps:$4 sm:$0xff]   ;;  %v19486_v59 = vld [vmem:[#allocation11 + $0x24] ss:$16 sps:$4 sm:$0xff]  }
 0x611   :  { %4745 = vmatprep.subr.bf16.mxu0 %v19420_v42  ;;  %4790 = vmatprep.subr.bf16.mxu1 %v19423_v43  ;;  %v19475_v42 = vld [vmem:[#allocation11 + $0x220] ss:$16 sps:$4 sm:$0xff]   ;;  %v19480_v43 = vld [vmem:[#allocation11 + $0x4] ss:$16 sps:$4 sm:$0xff]  }
 0x614   :  { %4746 = vmatpush1.bf16.msra.mxu0 %v19418_v44  ;;  %4791 = vmatpush1.bf16.msra.mxu1 %v19421_v45  ;;  %v19483_v44 = vld [vmem:[#allocation11 + $0x244] ss:$16 sps:$4 sm:$0xff]   ;;  %v19478_v45 = vld [vmem:[#allocation11] ss:$16 sps:$4 sm:$0xff]  }
 0x615   :  { %4747 = vmatprep.subr.bf16.mxu0 %v19426_v46  ;;  %4792 = vmatprep.subr.bf16.mxu1 %v19429_v47  ;;  %v19481_v46 = vld [vmem:[#allocation11 + $0x240] ss:$16 sps:$4 sm:$0xff]   ;;  %v19489_v47 = vld [vmem:[#allocation11 + $0x264] ss:$16 sps:$4 sm:$0xff]  }
 0x618   :  { %4748 = vmatpush1.bf16.msra.mxu0 %v19424_v16  ;;  %4793 = vmatpush1.bf16.msra.mxu1 %v19427_v48  ;;  %v19484_v16 = vld [vmem:[#allocation11 + $0x20] ss:$16 sps:$4 sm:$0xff]  }
 0x619   :  { %4749 = vmatprep.subr.bf16.mxu0 %v19432_v50  ;;  %4794 = vmatprep.subr.bf16.mxu1 %v19435_v53  ;;  %v19487_v48 = vld [vmem:[#allocation11 + $0x260] ss:$16 sps:$4 sm:$0xff]   ;;  %v19492_v50 = vld [vmem:[#allocation11 + $0x44] ss:$16 sps:$4 sm:$0xff]  }
 0x61a   :  { %v19495_v53 = vld [vmem:[#allocation11 + $0x284] ss:$16 sps:$4 sm:$0xff]  }
 0x61c   :  { %4750 = vmatpush1.bf16.msra.mxu0 %v19430_v54  ;;  %4795 = vmatpush1.bf16.msra.mxu1 %v19433_v55  ;;  %v19490_v54 = vld [vmem:[#allocation11 + $0x40] ss:$16 sps:$4 sm:$0xff]  }
 0x61d   :  { %4751 = vmatprep.subr.bf16.mxu0 %v19438_v57  ;;  %4796 = vmatprep.subr.bf16.mxu1 %v19441_v60  ;;  %v19493_v55 = vld [vmem:[#allocation11 + $0x280] ss:$16 sps:$4 sm:$0xff]   ;;  %v19501_v57 = vld [vmem:[#allocation11 + $0x2a4] ss:$16 sps:$4 sm:$0xff]  }
 0x61e   :  { %v19499_v60 = vld [vmem:[#allocation11 + $0x2a0] ss:$16 sps:$4 sm:$0xff]  }
 0x620   :  { %4752 = vmatpush1.bf16.msra.mxu0 %v19436_v61  ;;  %4797 = vmatpush1.bf16.msra.mxu1 %v19439_v62  ;;  %v19504_v61 = vld [vmem:[#allocation11 + $0x84] ss:$16 sps:$4 sm:$0xff]  }
 0x621   :  { %4753 = vmatprep.subr.bf16.mxu0 %v19444_v63  ;;  %4798 = vmatprep.subr.bf16.mxu1 %v19447_v0  ;;  %v19507_v62 = vld [vmem:[#allocation11 + $0x2c4] ss:$16 sps:$4 sm:$0xff]   ;;  %v19502_v63 = vld [vmem:[#allocation11 + $0x80] ss:$16 sps:$4 sm:$0xff]  }
 0x622   :  { %v19505_v0 = vld [vmem:[#allocation11 + $0x2c0] ss:$16 sps:$4 sm:$0xff]  }
 0x624   :  { %4754 = vmatpush1.bf16.msra.mxu0 %v19442_v2  ;;  %4799 = vmatpush1.bf16.msra.mxu1 %v19445_v3  ;;  %v19510_v2 = vld [vmem:[#allocation11 + $0xa4] ss:$16 sps:$4 sm:$0xff]  }
 0x625   :  { %4755 = vmatprep.subr.bf16.mxu0 %v19450_v5  ;;  %4800 = vmatprep.subr.bf16.mxu1 %v19453_v6  ;;  %v19513_v3 = vld [vmem:[#allocation11 + $0x2e4] ss:$16 sps:$4 sm:$0xff]   ;;  %v19508_v5 = vld [vmem:[#allocation11 + $0xa0] ss:$16 sps:$4 sm:$0xff]  }
 0x626   :  { %v19511_v6 = vld [vmem:[#allocation11 + $0x2e0] ss:$16 sps:$4 sm:$0xff]  }
 0x628   :  { %4756 = vmatpush1.bf16.msra.mxu0 %v19448_v20  ;;  %4801 = vmatpush1.bf16.msra.mxu1 %v19451_v7  ;;  %v19516_v20 = vld [vmem:[#allocation11 + $0xc4] ss:$16 sps:$4 sm:$0xff]  }
 0x629   :  { %4757 = vmatprep.subr.bf16.mxu0 %v19456_v8  ;;  %4802 = vmatprep.subr.bf16.mxu1 %v19459_v9  ;;  %v19519_v7 = vld [vmem:[#allocation11 + $0x304] ss:$16 sps:$4 sm:$0xff]   ;;  %v19514_v8 = vld [vmem:[#allocation11 + $0xc0] ss:$16 sps:$4 sm:$0xff]  }
 0x62a   :  { %v19517_v9 = vld [vmem:[#allocation11 + $0x300] ss:$16 sps:$4 sm:$0xff]  }
 0x62c   :  { %4758 = vmatpush1.bf16.msra.mxu0 %v19454_v10  ;;  %4803 = vmatpush1.bf16.msra.mxu1 %v19457_v13  ;;  %v19522_v10 = vld [vmem:[#allocation11 + $0xe4] ss:$16 sps:$4 sm:$0xff]  }
 0x62d   :  { %4759 = vmatprep.subr.bf16.mxu0 %v19462_v14  ;;  %4804 = vmatprep.subr.bf16.mxu1 %v19465_v18  ;;  %v19525_v13 = vld [vmem:[#allocation11 + $0x324] ss:$16 sps:$4 sm:$0xff]   ;;  %v19520_v14 = vld [vmem:[#allocation11 + $0xe0] ss:$16 sps:$4 sm:$0xff]  }
 0x62e   :  { %v19523_v18 = vld [vmem:[#allocation11 + $0x320] ss:$16 sps:$4 sm:$0xff]  }
 0x630   :  { %4760 = vmatpush1.bf16.msra.mxu0 %v19460_v23  ;;  %4805 = vmatpush1.bf16.msra.mxu1 %v19463_v24  ;;  %v19528_v23 = vld [vmem:[#allocation11 + $0x104] ss:$16 sps:$4 sm:$0xff]  }
 0x631   :  { %4761 = vmatprep.subr.bf16.mxu0 %v19468_v27  ;;  %5496 = vmatprep.subr.bf16.mxu1 %v19471_v29  ;;  %v19531_v24 = vld [vmem:[#allocation11 + $0x344] ss:$16 sps:$4 sm:$0xff]   ;;  %v19526_v27 = vld [vmem:[#allocation11 + $0x100] ss:$16 sps:$4 sm:$0xff]  }
 0x632   :  { %v19529_v29 = vld [vmem:[#allocation11 + $0x340] ss:$16 sps:$4 sm:$0xff]  }
 0x633   :  { %4807 = vmatmul.mubr.bf16.vlgmr.msra.gmra.mrb[16].mxu1 %v23239_v51  ;;  %v23259_v51 = vpack.c.bf16 %v23241_v52, %v23241_v52  ;;  %v19498_v52 = vld [vmem:[#allocation11 + $0x64] ss:$16 sps:$4 sm:$0xff]  }
 0x634   :  { %4762 = vmatpush1.bf16.msra.mxu0 %v19466_v31  ;;  %5497 = vmatpush1.bf16.msra.mxu1 %v19469_v33  ;;  %v19534_v31 = vld [vmem:[#allocation11 + $0x124] ss:$16 sps:$4 sm:$0xff]  }
 0x635   :  { %5528 = vmatprep.mubr.bf16.mxu1 %v23253_v40  ;;  %4763 = vmatprep.subr.bf16.mxu0 %v19474_v38  ;;  %v19537_v33 = vld [vmem:[#allocation11 + $0x364] ss:$16 sps:$4 sm:$0xff]   ;;  %v19532_v38 = vld [vmem:[#allocation11 + $0x120] ss:$16 sps:$4 sm:$0xff]  }
 0x636   :  { %5498 = vmatprep.subr.bf16.mxu1 %v19477_v39  ;;  %v19535_v39 = vld [vmem:[#allocation11 + $0x360] ss:$16 sps:$4 sm:$0xff]  }
 0x638   :  { %4764 = vmatpush1.bf16.msra.mxu0 %v19472_v41  ;;  %5499 = vmatpush1.bf16.msra.mxu1 %v19475_v42  ;;  %v19540_v41 = vld [vmem:[#allocation11 + $0x144] ss:$16 sps:$4 sm:$0xff]  }
 0x639   :  { %5455 = vmatprep.subr.bf16.mxu0 %v19480_v43  ;;  %5500 = vmatprep.subr.bf16.mxu1 %v19483_v44  ;;  %v19543_v42 = vld [vmem:[#allocation11 + $0x384] ss:$16 sps:$4 sm:$0xff]   ;;  %v19538_v43 = vld [vmem:[#allocation11 + $0x140] ss:$16 sps:$4 sm:$0xff]  }
 0x63a   :  { %v19541_v44 = vld [vmem:[#allocation11 + $0x380] ss:$16 sps:$4 sm:$0xff]  }
 0x63b   :  { %4766 = vmatmul.mubr.bf16.vlgmr.msra.gmra.mrb[20].mxu0 %v23248_v4  ;;  %v19496_v4 = vld [vmem:[#allocation11 + $0x60] ss:$16 sps:$4 sm:$0xff]  }
 0x63c   :  { %5456 = vmatpush1.bf16.msra.mxu0 %v19478_v45  ;;  %5487 = vmatprep.mubr.bf16.mxu0 %v23259_v51  ;;  %v19546_v45 = vld [vmem:[#allocation11 + $0x164] ss:$16 sps:$4 sm:$0xff]  }
 0x63d   :  { %5501 = vmatpush1.bf16.msra.mxu1 %v19481_v46  ;;  %5457 = vmatprep.subr.bf16.mxu0 %v19486_v59  ;;  %v19549_v46 = vld [vmem:[#allocation11 + $0x3a4] ss:$16 sps:$4 sm:$0xff]   ;;  %v19544_v59 = vld [vmem:[#allocation11 + $0x160] ss:$16 sps:$4 sm:$0xff]  }
 0x63e   :  { %5502 = vmatprep.subr.bf16.mxu1 %v19489_v47  ;;  %v19547_v47 = vld [vmem:[#allocation11 + $0x3a0] ss:$16 sps:$4 sm:$0xff]  }
 0x640   :  { %5458 = vmatpush1.bf16.msra.mxu0 %v19484_v16  ;;  %v19552_v16 = vld [vmem:[#allocation11 + $0x184] ss:$16 sps:$4 sm:$0xff]  }
 0x641   :  { %5503 = vmatpush1.bf16.msra.mxu1 %v19487_v48  ;;  %5459 = vmatprep.subr.bf16.mxu0 %v19492_v50  ;;  %v19555_v48 = vld [vmem:[#allocation11 + $0x3c4] ss:$16 sps:$4 sm:$0xff]   ;;  %v19550_v50 = vld [vmem:[#allocation11 + $0x180] ss:$16 sps:$4 sm:$0xff]  }
 0x642   :  { %5504 = vmatprep.subr.bf16.mxu1 %v19495_v53  ;;  %v19553_v53 = vld [vmem:[#allocation11 + $0x3c0] ss:$16 sps:$4 sm:$0xff]  }
 0x644   :  { %5460 = vmatpush1.bf16.msra.mxu0 %v19490_v54  ;;  %v19558_v54 = vld [vmem:[#allocation11 + $0x1a4] ss:$16 sps:$4 sm:$0xff]  }
 0x645   :  { %5505 = vmatpush1.bf16.msra.mxu1 %v19493_v55  ;;  %5461 = vmatprep.subr.bf16.mxu0 %v19498_v52  ;;  %v19561_v55 = vld [vmem:[#allocation11 + $0x3e4] ss:$16 sps:$4 sm:$0xff]   ;;  %v19556_v52 = vld [vmem:[#allocation11 + $0x1a0] ss:$16 sps:$4 sm:$0xff]  }
 0x646   :  { %5506 = vmatprep.subr.bf16.mxu1 %v19501_v57  ;;  %v19559_v57 = vld [vmem:[#allocation11 + $0x3e0] ss:$16 sps:$4 sm:$0xff]  }
 0x648   :  { %5462 = vmatpush1.bf16.msra.mxu0 %v19496_v4  ;;  %v19564_v4 = vld [vmem:[#allocation11 + $0x1c4] ss:$16 sps:$4 sm:$0xff]  }
 0x649   :  { %5507 = vmatpush1.bf16.msra.mxu1 %v19499_v60  ;;  %5463 = vmatprep.subr.bf16.mxu0 %v19504_v61  ;;  %v19567_v60 = vld [vmem:[#allocation11 + $0x20c] ss:$16 sps:$4 sm:$0xff]   ;;  %v19562_v61 = vld [vmem:[#allocation11 + $0x1c0] ss:$16 sps:$4 sm:$0xff]  }
 0x64a   :  { %5508 = vmatprep.subr.bf16.mxu1 %v19507_v62  ;;  %v19565_v62 = vld [vmem:[#allocation11 + $0x208] ss:$16 sps:$4 sm:$0xff]  }
 0x64c   :  { %5464 = vmatpush1.bf16.msra.mxu0 %v19502_v63  ;;  %v23265_v63 = vpack.c.bf16 %v23243_v58, %v23243_v58  ;;  %v23271_v58 = vpack.c.bf16 %v23237_v49, %v23237_v49  ;;  %v19586_v49 = vld [vmem:[#allocation11 + $0x48] ss:$16 sps:$4 sm:$0xff]  }
 0x64d   :  { %5509 = vmatpush1.bf16.msra.mxu1 %v19505_v0  ;;  %5465 = vmatprep.subr.bf16.mxu0 %v19510_v2  ;;  %v19570_v0 = vld [vmem:[#allocation11 + $0x1e4] ss:$16 sps:$4 sm:$0xff]   ;;  %v19573_v2 = vld [vmem:[#allocation11 + $0x22c] ss:$16 sps:$4 sm:$0xff]  }
 0x64e   :  { %5510 = vmatprep.subr.bf16.mxu1 %v19513_v3  ;;  %v19568_v3 = vld [vmem:[#allocation11 + $0x1e0] ss:$16 sps:$4 sm:$0xff]  }
 0x650   :  { %5466 = vmatpush1.bf16.msra.mxu0 %v19508_v5  ;;  %v19571_v5 = vld [vmem:[#allocation11 + $0x228] ss:$16 sps:$4 sm:$0xff]  }
 0x651   :  { %5511 = vmatpush1.bf16.msra.mxu1 %v19511_v6  ;;  %5467 = vmatprep.subr.bf16.mxu0 %v19516_v20  ;;  %v19576_v6 = vld [vmem:[#allocation11 + $0xc] ss:$16 sps:$4 sm:$0xff]  }
 0x652   :  { %5512 = vmatprep.subr.bf16.mxu1 %v19519_v7  ;;  %v19579_v20 = vld [vmem:[#allocation11 + $0x24c] ss:$16 sps:$4 sm:$0xff]   ;;  %v19574_v7 = vld [vmem:[#allocation11 + $0x8] ss:$16 sps:$4 sm:$0xff]  }
 0x654   :  { %5468 = vmatpush1.bf16.msra.mxu0 %v19514_v8  ;;  %v19577_v8 = vld [vmem:[#allocation11 + $0x248] ss:$16 sps:$4 sm:$0xff]  }
 0x655   :  { %5513 = vmatpush1.bf16.msra.mxu1 %v19517_v9  ;;  %5469 = vmatprep.subr.bf16.mxu0 %v19522_v10  ;;  %v19582_v9 = vld [vmem:[#allocation11 + $0x2c] ss:$16 sps:$4 sm:$0xff]  }
 0x656   :  { %5514 = vmatprep.subr.bf16.mxu1 %v19525_v13  ;;  %v19585_v10 = vld [vmem:[#allocation11 + $0x26c] ss:$16 sps:$4 sm:$0xff]   ;;  %v19583_v13 = vld [vmem:[#allocation11 + $0x268] ss:$16 sps:$4 sm:$0xff]  }
 0x658   :  { %5470 = vmatpush1.bf16.msra.mxu0 %v19520_v14  ;;  %v19588_v14 = vld [vmem:[#allocation11 + $0x4c] ss:$16 sps:$4 sm:$0xff]  }
 0x659   :  { %5515 = vmatpush1.bf16.msra.mxu1 %v19523_v18  ;;  %5471 = vmatprep.subr.bf16.mxu0 %v19528_v23  ;;  %v19591_v18 = vld [vmem:[#allocation11 + $0x28c] ss:$16 sps:$4 sm:$0xff]   ;;  %v19589_v23 = vld [vmem:[#allocation11 + $0x288] ss:$16 sps:$4 sm:$0xff]  }
 0x65a   :  { %5516 = vmatprep.subr.bf16.mxu1 %v19531_v24  ;;  %v19594_v24 = vld [vmem:[#allocation11 + $0x6c] ss:$16 sps:$4 sm:$0xff]  }
 0x65c   :  { %5472 = vmatpush1.bf16.msra.mxu0 %v19526_v27  ;;  %v19597_v27 = vld [vmem:[#allocation11 + $0x2ac] ss:$16 sps:$4 sm:$0xff]  }
 0x65d   :  { %5517 = vmatpush1.bf16.msra.mxu1 %v19529_v29  ;;  %5473 = vmatprep.subr.bf16.mxu0 %v19534_v31  ;;  %v19592_v29 = vld [vmem:[#allocation11 + $0x68] ss:$16 sps:$4 sm:$0xff]   ;;  %v19600_v31 = vld [vmem:[#allocation11 + $0x8c] ss:$16 sps:$4 sm:$0xff]  }
 0x65e   :  { %5518 = vmatprep.subr.bf16.mxu1 %v19537_v33  ;;  %v19603_v33 = vld [vmem:[#allocation11 + $0x2cc] ss:$16 sps:$4 sm:$0xff]  }
 0x660   :  { %5474 = vmatpush1.bf16.msra.mxu0 %v19532_v38  ;;  %v19598_v38 = vld [vmem:[#allocation11 + $0x88] ss:$16 sps:$4 sm:$0xff]  }
 0x661   :  { %5519 = vmatpush1.bf16.msra.mxu1 %v19535_v39  ;;  %5475 = vmatprep.subr.bf16.mxu0 %v19540_v41  ;;  %v19601_v39 = vld [vmem:[#allocation11 + $0x2c8] ss:$16 sps:$4 sm:$0xff]   ;;  %v19606_v41 = vld [vmem:[#allocation11 + $0xac] ss:$16 sps:$4 sm:$0xff]  }
 0x662   :  { %5520 = vmatprep.subr.bf16.mxu1 %v19543_v42  ;;  %v19609_v42 = vld [vmem:[#allocation11 + $0x2ec] ss:$16 sps:$4 sm:$0xff]  }
 0x664   :  { %5476 = vmatpush1.bf16.msra.mxu0 %v19538_v43  ;;  %v19604_v43 = vld [vmem:[#allocation11 + $0xa8] ss:$16 sps:$4 sm:$0xff]  }
 0x665   :  { %5521 = vmatpush1.bf16.msra.mxu1 %v19541_v44  ;;  %5477 = vmatprep.subr.bf16.mxu0 %v19546_v45  ;;  %v19607_v44 = vld [vmem:[#allocation11 + $0x2e8] ss:$16 sps:$4 sm:$0xff]   ;;  %v19612_v45 = vld [vmem:[#allocation11 + $0xcc] ss:$16 sps:$4 sm:$0xff]  }
 0x666   :  { %5522 = vmatprep.subr.bf16.mxu1 %v19549_v46  ;;  %v19615_v46 = vld [vmem:[#allocation11 + $0x30c] ss:$16 sps:$4 sm:$0xff]  }
 0x668   :  { %5478 = vmatpush1.bf16.msra.mxu0 %v19544_v59  ;;  %v19610_v59 = vld [vmem:[#allocation11 + $0xc8] ss:$16 sps:$4 sm:$0xff]  }
 0x669   :  { %5523 = vmatpush1.bf16.msra.mxu1 %v19547_v47  ;;  %5479 = vmatprep.subr.bf16.mxu0 %v19552_v16  ;;  %v19613_v47 = vld [vmem:[#allocation11 + $0x308] ss:$16 sps:$4 sm:$0xff]   ;;  %v19618_v16 = vld [vmem:[#allocation11 + $0xec] ss:$16 sps:$4 sm:$0xff]  }
 0x66a   :  { %5524 = vmatprep.subr.bf16.mxu1 %v19555_v48  ;;  %v19621_v48 = vld [vmem:[#allocation11 + $0x32c] ss:$16 sps:$4 sm:$0xff]  }
 0x66c   :  { %5480 = vmatpush1.bf16.msra.mxu0 %v19550_v50  ;;  %v19616_v50 = vld [vmem:[#allocation11 + $0xe8] ss:$16 sps:$4 sm:$0xff]  }
 0x66d   :  { %5525 = vmatpush1.bf16.msra.mxu1 %v19553_v53  ;;  %5481 = vmatprep.subr.bf16.mxu0 %v19558_v54  ;;  %v19619_v53 = vld [vmem:[#allocation11 + $0x328] ss:$16 sps:$4 sm:$0xff]   ;;  %v19624_v54 = vld [vmem:[#allocation11 + $0x10c] ss:$16 sps:$4 sm:$0xff]  }
 0x66e   :  { %5526 = vmatprep.subr.bf16.mxu1 %v19561_v55  ;;  %v19627_v55 = vld [vmem:[#allocation11 + $0x34c] ss:$16 sps:$4 sm:$0xff]  }
 0x670   :  { %5482 = vmatpush1.bf16.msra.mxu0 %v19556_v52  ;;  %v19622_v52 = vld [vmem:[#allocation11 + $0x108] ss:$16 sps:$4 sm:$0xff]  }
 0x671   :  { %5527 = vmatpush1.bf16.msra.mxu1 %v19559_v57  ;;  %5483 = vmatprep.subr.bf16.mxu0 %v19564_v4  ;;  %v19625_v57 = vld [vmem:[#allocation11 + $0x348] ss:$16 sps:$4 sm:$0xff]   ;;  %v19630_v4 = vld [vmem:[#allocation11 + $0x12c] ss:$16 sps:$4 sm:$0xff]  }
 0x672   :  { %5578 = vmatprep.subr.bf16.mxu1 %v19567_v60  ;;  %v19633_v60 = vld [vmem:[#allocation11 + $0x36c] ss:$16 sps:$4 sm:$0xff]  }
 0x674   :  { %5529 = vmatmul.mubr.bf16.vlgmr.msra.gmra.mrb[20].mxu1 %v23265_v63  ;;  %5484 = vmatpush1.bf16.msra.mxu0 %v19562_v61  ;;  %v19628_v61 = vld [vmem:[#allocation11 + $0x128] ss:$16 sps:$4 sm:$0xff]  }
 0x675   :  { %5579 = vmatpush1.bf16.msra.mxu1 %v19565_v62  ;;  %5610 = vmatprep.mubr.bf16.mxu1 %v23253_v40  ;;  %v19580_v40 = vld [vmem:[#allocation11 + $0x28] ss:$16 sps:$4 sm:$0xff]  }
 0x676   :  { %5485 = vmatprep.subr.bf16.mxu0 %v19570_v0  ;;  %5580 = vmatprep.subr.bf16.mxu1 %v19573_v2  ;;  %v19631_v62 = vld [vmem:[#allocation11 + $0x368] ss:$16 sps:$4 sm:$0xff]   ;;  %v19636_v0 = vld [vmem:[#allocation11 + $0x14c] ss:$16 sps:$4 sm:$0xff]  }
 0x677   :  { %v19639_v2 = vld [vmem:[#allocation11 + $0x38c] ss:$16 sps:$4 sm:$0xff]  }
 0x678   :  { %5486 = vmatpush1.bf16.msra.mxu0 %v19568_v3  ;;  %v19634_v3 = vld [vmem:[#allocation11 + $0x148] ss:$16 sps:$4 sm:$0xff]  }
 0x679   :  { %5581 = vmatpush1.bf16.msra.mxu1 %v19571_v5  ;;  %5537 = vmatprep.subr.bf16.mxu0 %v19576_v6  ;;  %v19637_v5 = vld [vmem:[#allocation11 + $0x388] ss:$16 sps:$4 sm:$0xff]   ;;  %v19642_v6 = vld [vmem:[#allocation11 + $0x16c] ss:$16 sps:$4 sm:$0xff]  }
 0x67a   :  { %5582 = vmatprep.subr.bf16.mxu1 %v19579_v20  ;;  %v19645_v20 = vld [vmem:[#allocation11 + $0x3ac] ss:$16 sps:$4 sm:$0xff]  }
 0x67b   :  { %5488 = vmatmul.mubr.bf16.vlgmr.msra.gmra.mrb[24].mxu0 %v23271_v58 }
 0x67c   :  { %5538 = vmatpush1.bf16.msra.mxu0 %v19574_v7  ;;  %5569 = vmatprep.mubr.bf16.mxu0 %v23259_v51  ;;  %v19595_v51 = vld [vmem:[#allocation11 + $0x2a8] ss:$16 sps:$4 sm:$0xff]  }
 0x67d   :  { %5583 = vmatpush1.bf16.msra.mxu1 %v19577_v8  ;;  %5539 = vmatprep.subr.bf16.mxu0 %v19582_v9  ;;  %v19640_v7 = vld [vmem:[#allocation11 + $0x168] ss:$16 sps:$4 sm:$0xff]   ;;  %v19648_v9 = vld [vmem:[#allocation11 + $0x18c] ss:$16 sps:$4 sm:$0xff]  }
 0x67e   :  { %5584 = vmatprep.subr.bf16.mxu1 %v19585_v10  ;;  %v19643_v8 = vld [vmem:[#allocation11 + $0x3a8] ss:$16 sps:$4 sm:$0xff]   ;;  %v19651_v10 = vld [vmem:[#allocation11 + $0x3cc] ss:$16 sps:$4 sm:$0xff]  }
 0x680   :  { %5540 = vmatpush1.bf16.msra.mxu0 %v19580_v40  ;;  %v19646_v40 = vld [vmem:[#allocation11 + $0x188] ss:$16 sps:$4 sm:$0xff]  }
 0x681   :  { %5585 = vmatpush1.bf16.msra.mxu1 %v19583_v13  ;;  %5541 = vmatprep.subr.bf16.mxu0 %v19588_v14  ;;  %v19649_v13 = vld [vmem:[#allocation11 + $0x3c8] ss:$16 sps:$4 sm:$0xff]   ;;  %v19654_v14 = vld [vmem:[#allocation11 + $0x1ac] ss:$16 sps:$4 sm:$0xff]  }
 0x682   :  { %5586 = vmatprep.subr.bf16.mxu1 %v19591_v18  ;;  %v19657_v18 = vld [vmem:[#allocation11 + $0x3ec] ss:$16 sps:$4 sm:$0xff]  }
 0x684   :  { %5542 = vmatpush1.bf16.msra.mxu0 %v19586_v49  ;;  %v19652_v49 = vld [vmem:[#allocation11 + $0x1a8] ss:$16 sps:$4 sm:$0xff]  }
 0x685   :  { %5587 = vmatpush1.bf16.msra.mxu1 %v19589_v23  ;;  %5543 = vmatprep.subr.bf16.mxu0 %v19594_v24  ;;  %v19655_v23 = vld [vmem:[#allocation11 + $0x3e8] ss:$16 sps:$4 sm:$0xff]   ;;  %v19660_v24 = vld [vmem:[#allocation11 + $0x1cc] ss:$16 sps:$4 sm:$0xff]  }
 0x686   :  { %5588 = vmatprep.subr.bf16.mxu1 %v19597_v27  ;;  %v19658_v27 = vld [vmem:[#allocation11 + $0x1c8] ss:$16 sps:$4 sm:$0xff]  }
 0x688   :  { %5544 = vmatpush1.bf16.msra.mxu0 %v19592_v29  ;;  %v19663_v29 = vld [vmem:[#allocation11 + $0x1ec] ss:$16 sps:$4 sm:$0xff]  }
 0x689   :  { %5589 = vmatpush1.bf16.msra.mxu1 %v19595_v51  ;;  %5545 = vmatprep.subr.bf16.mxu0 %v19600_v31  ;;  %v19661_v51 = vld [vmem:[#allocation11 + $0x1e8] ss:$16 sps:$4 sm:$0xff]  }
 0x68a   :  { %5590 = vmatprep.subr.bf16.mxu1 %v19603_v33 }
 0x68c   :  { %5546 = vmatpush1.bf16.msra.mxu0 %v19598_v38 }
 0x68d   :  { %5591 = vmatpush1.bf16.msra.mxu1 %v19601_v39  ;;  %5547 = vmatprep.subr.bf16.mxu0 %v19606_v41 }
 0x68e   :  { %5592 = vmatprep.subr.bf16.mxu1 %v19609_v42 }
 0x690   :  { %5548 = vmatpush1.bf16.msra.mxu0 %v19604_v43 }
 0x691   :  { %5593 = vmatpush1.bf16.msra.mxu1 %v19607_v44  ;;  %5549 = vmatprep.subr.bf16.mxu0 %v19612_v45 }
 0x692   :  { %5594 = vmatprep.subr.bf16.mxu1 %v19615_v46 }
 0x694   :  { %5550 = vmatpush1.bf16.msra.mxu0 %v19610_v59 }
 0x695   :  { %5595 = vmatpush1.bf16.msra.mxu1 %v19613_v47  ;;  %5551 = vmatprep.subr.bf16.mxu0 %v19618_v16 }
 0x696   :  { %5596 = vmatprep.subr.bf16.mxu1 %v19621_v48 }
 0x698   :  { %5552 = vmatpush1.bf16.msra.mxu0 %v19616_v50 }
 0x699   :  { %5597 = vmatpush1.bf16.msra.mxu1 %v19619_v53  ;;  %5553 = vmatprep.subr.bf16.mxu0 %v19624_v54 }
 0x69a   :  { %5598 = vmatprep.subr.bf16.mxu1 %v19627_v55 }
 0x69c   :  { %5554 = vmatpush1.bf16.msra.mxu0 %v19622_v52  ;;  %v3559_v52 = vpop.xlane.xlu1 %3558 }
 0x69d   :  { %5599 = vmatpush1.bf16.msra.mxu1 %v19625_v57  ;;  %5555 = vmatprep.subr.bf16.mxu0 %v19630_v4  ;;  %v1047_v57 = vld [vmem:[#allocation14] sm:$0x77]  ;;  %v23284_v4 = vsub.s32 4, %v23148_v21 }
 0x69e   :  { %5600 = vmatprep.subr.bf16.mxu1 %v19633_v60  ;;  %v23287_v60 = vsub.s32 5, %v23148_v21 }
 0x6a0   :  { %5556 = vmatpush1.bf16.msra.mxu0 %v19628_v61  ;;  %v3562_v61 = vpop.xlane.xlu1 %3561 }
 0x6a1   :  { %5601 = vmatpush1.bf16.msra.mxu1 %v19631_v62  ;;  %5557 = vmatprep.subr.bf16.mxu0 %v19636_v0  ;;  %v3870_v62 = vrot.slane %v1047_v57, %v23172_v34  ;;  %v3914_v0 = vrot.slane %v1047_v57, %v23175_v35 }
 0x6a2   :  { %5602 = vmatprep.subr.bf16.mxu1 %v19639_v2  ;;  %v3874_v2 = vrot.slane %v1047_v57, %v23284_v4 }
 0x6a4   :  { %5558 = vmatpush1.bf16.msra.mxu0 %v19634_v3  ;;  %v3918_v3 = vrot.slane %v1047_v57, %v23287_v60 }
 0x6a5   :  { %5603 = vmatpush1.bf16.msra.mxu1 %v19637_v5  ;;  %5559 = vmatprep.subr.bf16.mxu0 %v19642_v6  ;;  %v23294_v5 = vsub.s32 6, %v23148_v21  ;;  %v23296_v6 = vpop.permute.xlu0 %3908 }
 0x6a6   :  { %5604 = vmatprep.subr.bf16.mxu1 %v19645_v20  ;;  %v3890_v20 = vrot.slane %v3870_v62, %v23172_v34 }
 0x6a8   :  { %5560 = vmatpush1.bf16.msra.mxu0 %v19640_v7  ;;  %v3934_v7 = vrot.slane %v3914_v0, %v23175_v35 }
 0x6a9   :  { %5605 = vmatpush1.bf16.msra.mxu1 %v19643_v8  ;;  %5561 = vmatprep.subr.bf16.mxu0 %v19648_v9  ;;  %v3962_v8 = vrot.slane %v1047_v57, %v23178_v36  ;;  %v23301_v9 = vpop.permute.xlu1 %3862 }
 0x6aa   :  { %5606 = vmatprep.subr.bf16.mxu1 %v19651_v10  ;;  %v3894_v10 = vrot.slane %v3874_v2, %v23172_v34 }
 0x6ac   :  { %5562 = vmatpush1.bf16.msra.mxu0 %v19646_v40  ;;  %v3938_v40 = vrot.slane %v3918_v3, %v23175_v35 }
 0x6ad   :  { %5607 = vmatpush1.bf16.msra.mxu1 %v19649_v13  ;;  %5563 = vmatprep.subr.bf16.mxu0 %v19654_v14  ;;  %v3966_v13 = vrot.slane %v1047_v57, %v23294_v5  ;;  %v3563_v14 = vmax.f32 %v3559_v52, 1.0 }
 0x6ae   :  { %5608 = vmatprep.subr.bf16.mxu1 %v19657_v18 }
 0x6af   :  { %21682 = vrcp.f32 %v3563_v14 }
 0x6b0   :  { %5564 = vmatpush1.bf16.msra.mxu0 %v19652_v49 }
 0x6b1   :  { %5609 = vmatpush1.bf16.msra.mxu1 %v19655_v23  ;;  %5565 = vmatprep.subr.bf16.mxu0 %v19660_v24  ;;  %v3903_v24 = vmul.f32 %v3890_v20, %v23301_v9 }
 0x6b4   :  { %5611 = vmatmul.mubr.bf16.vlgmr.msra.gmra.mrb[24].mxu1 %v23265_v63  ;;  %5566 = vmatpush1.bf16.msra.mxu0 %v19658_v27  ;;  %v3947_v27 = vmul.f32 %v3934_v7, %v23296_v6 }
 0x6b5   :  { %5567 = vmatprep.subr.bf16.mxu0 %v19663_v29  ;;  %5799 = vmatprep.mubr.f32.mxu1 %v22620_v1  ;;  %v3982_v29 = vrot.slane %v3962_v8, %v23178_v36 }
 0x6b8   :  { %5568 = vmatpush1.bf16.msra.mxu0 %v19661_v51  ;;  %v23309_v51 = vpop.permute.xlu0 %3956 }
 0x6b9   :  { %v21683_v7 = vpop.eup %21682 }
 0x6bb   :  { %5570 = vmatmul.mubr.bf16.vlgmr.msra.gmra.mrb[28].mxu0 %v23271_v58 }
 0x6bc   :  { %5722 = vmatprep.mubr.f32.mxu0 %v22620_v1 }
 0x6c6   :  { %v4726_v31 = vpop.f32.mrb[12].mxu1 }
 0x6c7   :  { %v4728_v33 = vpop.f32.mrb[13].mxu1 }
 0x6c8   :  { %v4730_v38 = vpop.f32.mrb[14].mxu1 }
 0x6c9   :  { %v4731_v39 = vpop.f32.mrb[15].mxu1  ;;  %v3948_v38 = vmul.f32 %v3938_v40, %v23296_v6 }
 0x6ca   :  { %v3986_v39 = vrot.slane %v3966_v13, %v23178_v36 }
 0x6ce   :  { %v4685_v41 = vpop.f32.mrb[16].mxu0 }
 0x6cf   :  { %v4727_v42 = vadd.f32 %v4726_v31, %v4685_v41  ;;  %v4687_v43 = vpop.f32.mrb[17].mxu0  ;;  %v3564_v41 = vmax.f32 %v3562_v61, 1.0 }
 0x6d0   :  { %v4729_v44 = vadd.f32 %v4728_v33, %v4687_v43  ;;  %v4689_v45 = vpop.f32.mrb[18].mxu0  ;;  %v3904_v33 = vmul.f32 %v3894_v10, %v23301_v9  ;;  %v3951_v43 = vadd.f32 %v3947_v27, %v3903_v24 }
 0x6d1   :  { %v4690_v63 = vpop.f32.mrb[19].mxu0  ;;  %v3995_v45 = vmul.f32 %v3982_v29, %v23309_v51  ;;  %21684 = vrcp.f32 %v3564_v41 }
 0x6d2   :  { %v23315_v63 = vld [vmem:[#allocation15] sm:$0xf] }
 0x6d3   :  { %v5627_v57 = vrot.slane %v23315_v63, %v23172_v34  ;;  %v5631_v2 = vrot.slane %v23315_v63, %v23175_v35 }
 0x6db   :  { %v21685_v40 = vpop.eup %21684 }
 0x6dc   :  { %v23328_v14 = vmul.f32 %v21685_v40, %v23162_v28 }
 0x706   :  { %v4808_v46 = vpop.f32.mrb[16].mxu1 }
 0x707   :  { %v4810_v59 = vpop.f32.mrb[17].mxu1 }
 0x708   :  { %v4812_v47 = vpop.f32.mrb[18].mxu1 }
 0x709   :  { %v4813_v16 = vpop.f32.mrb[19].mxu1  ;;  %v3996_v47 = vmul.f32 %v3986_v39, %v23309_v51 }
 0x70e   :  { %v4767_v48 = vpop.f32.mrb[20].mxu0 }
 0x70f   :  { %v23279_v50 = vadd.f32 %v4808_v46, %v4767_v48  ;;  %v4769_v58 = vpop.f32.mrb[21].mxu0 }
 0x710   :  { %v23281_v53 = vadd.f32 %v4810_v59, %v4769_v58  ;;  %v4771_v54 = vpop.f32.mrb[22].mxu0  ;;  %v3952_v59 = vadd.f32 %v3948_v38, %v3904_v33 }
 0x711   :  { %v4772_v55 = vpop.f32.mrb[23].mxu0 }
 0x712   :  { %v3999_v55 = vadd.f32 %v3995_v45, %v3951_v43  ;;  %v4000_v62 = vadd.f32 %v3996_v47, %v3952_v59 }
 0x747   :  { %v5530_v18 = vpop.f32.mrb[20].mxu1 }
 0x748   :  { %v5532_v49 = vpop.f32.mrb[21].mxu1 }
 0x749   :  { %v5534_v23 = vpop.f32.mrb[22].mxu1 }
 0x74a   :  { %v5535_v31 = vpop.f32.mrb[23].mxu1 }
 0x74e   :  { %v5489_v46 = vpop.f32.mrb[24].mxu0 }
 0x74f   :  { %v5490_v16 = vadd.f32 %v5489_v46, %v4727_v42  ;;  %v5491_v48 = vpop.f32.mrb[25].mxu0 }
 0x750   :  { %v5492_v58 = vadd.f32 %v5491_v48, %v4729_v44  ;;  %v5493_v54 = vpop.f32.mrb[26].mxu0  ;;  %v23323_v44 = vmul.f32 %v21683_v7, %v23157_v26 }
 0x751   :  { %v5531_v52 = vadd.f32 %v5530_v18, %v5490_v16  ;;  %v5494_v61 = vpop.f32.mrb[27].mxu0  ;;  %v1048_v18 = vld [vmem:[#allocation14 + $0x8] sm:$0x77] }
 0x752   :  { %v5533_v0 = vadd.f32 %v5532_v49, %v5492_v58  ;;  %v3878_v26 = vrot.slane %v1048_v18, %v23172_v34  ;;  %v3922_v49 = vrot.slane %v1048_v18, %v23175_v35  ;;  %v3882_v23 = vrot.slane %v1048_v18, %v23284_v4 }
 0x753   :  { %v5619_v3 = vadd.f32 %v5531_v52, %v3999_v55  ;;  %v3926_v24 = vrot.slane %v1048_v18, %v23287_v60  ;;  %v3970_v29 = vrot.slane %v1048_v18, %v23178_v36  ;;  %v3974_v38 = vrot.slane %v1048_v18, %v23294_v5 }
 0x754   :  { %v5620_v20 = vadd.f32 %v5533_v0, %v4000_v62  ;;  %v3898_v27 = vrot.slane %v3878_v26, %v23172_v34  ;;  %v3942_v28 = vrot.slane %v3922_v49, %v23175_v35  ;;  %v3902_v31 = vrot.slane %v3882_v23, %v23172_v34 }
 0x755   :  { %v5644_v8 = vadd.f32 %v5627_v57, %v5619_v3  ;;  %v3946_v33 = vrot.slane %v3926_v24, %v23175_v35  ;;  %v3990_v59 = vrot.slane %v3970_v29, %v23178_v36  ;;  %v3994_v58 = vrot.slane %v3974_v38, %v23178_v36  ;;  %v19664_v38 = vld [vmem:[#allocation18] ss:$16 sps:$4 sm:$0xff]  }
 0x756   :  { %v5645_v10 = vadd.f32 %v5631_v2, %v5620_v20  ;;  %v3905_v45 = vmul.f32 %v3898_v27, %v23301_v9  ;;  %v3949_v46 = vmul.f32 %v3942_v28, %v23296_v6  ;;  %v3906_v16 = vmul.f32 %v3902_v31, %v23301_v9 }
 0x757   :  { %v5648_v13 = vmax.f32 %v5644_v8, 0.0  ;;  %v3950_v48 = vmul.f32 %v3946_v33, %v23296_v6  ;;  %v3997_v55 = vmul.f32 %v3990_v59, %v23309_v51  ;;  %v3998_v61 = vmul.f32 %v3994_v58, %v23309_v51  ;;  %v19666_v33 = vld [vmem:[#allocation18 + $0x4] ss:$16 sps:$4 sm:$0xff]   ;;  %v19673_v59 = vld [vmem:[#allocation18 + $0x60] ss:$16 sps:$4 sm:$0xff]  }
 0x758   :  { %v5649_v42 = vmax.f32 %v5645_v10, 0.0  ;;  %v3953_v54 = vadd.f32 %v3949_v46, %v3905_v45  ;;  %v5635_v8 = vrot.slane %v23315_v63, %v23178_v36  ;;  %v19670_v45 = vld [vmem:[#allocation18 + $0x40] ss:$16 sps:$4 sm:$0xff]   ;;  %v19675_v46 = vld [vmem:[#allocation18 + $0x64] ss:$16 sps:$4 sm:$0xff]  }
 0x759   :  { %v3954_v57 = vadd.f32 %v3950_v48, %v3906_v16  ;;  %v19676_v16 = vld [vmem:[#allocation18 + $0x80] ss:$16 sps:$4 sm:$0xff]   ;;  %v19681_v48 = vld [vmem:[#allocation18 + $0xa4] ss:$16 sps:$4 sm:$0xff]  }
 0x75a   :  { %5658 = vmatprep.subr.mxu0 %v5649_v42  ;;  %v4001_v20 = vadd.f32 %v3997_v55, %v3953_v54  ;;  %v19679_v58 = vld [vmem:[#allocation18 + $0xa0] ss:$16 sps:$4 sm:$0xff]   ;;  %v19684_v54 = vld [vmem:[#allocation18 + $0xc4] ss:$16 sps:$4 sm:$0xff]  }
 0x75b   :  { %5659 = vmatpush1.msra.mxu0 %v5648_v13  ;;  %v4002_v42 = vadd.f32 %v3998_v61, %v3954_v57  ;;  %v5639_v13 = vrot.slane %v23315_v63, %v23181_v37  ;;  %v19682_v55 = vld [vmem:[#allocation18 + $0xc0] ss:$16 sps:$4 sm:$0xff]   ;;  %v19690_v61 = vld [vmem:[#allocation18 + $0x104] ss:$16 sps:$4 sm:$0xff]  }
 0x75c   :  { %17369 = vmatmul.mubr.msk.f32.vlgmr.msra.gmra.mrb[14].mxu0 %vm3556_vm4, %v23323_v44  ;;  %v19685_v57 = vld [vmem:[#allocation18 + $0xe0] ss:$16 sps:$4 sm:$0xff]  }
 0x75d   :  { %5728 = vmatprep.mubr.f32.mxu0 %v22620_v1 }
 0x760   :  { %17370 = vmatmul.mubr.msk.f32.gmra.mrb[32].mxu0 %vm3556_vm4, %v23328_v14 }
 0x761   :  { %5876 = vmatprep.mubr.f32.mxu0 %v22620_v1 }
 0x787   :  { %v5612_v39 = vpop.f32.mrb[24].mxu1 }
 0x788   :  { %v5614_v41 = vpop.f32.mrb[25].mxu1 }
 0x789   :  { %v5616_v43 = vpop.f32.mrb[26].mxu1 }
 0x78a   :  { %v5617_v47 = vpop.f32.mrb[27].mxu1  ;;  %v19672_v43 = vld [vmem:[#allocation18 + $0x44] ss:$16 sps:$4 sm:$0xff]  }
 0x78b   :  { %v19678_v47 = vld [vmem:[#allocation18 + $0x84] ss:$16 sps:$4 sm:$0xff]  }
 0x78e   :  { %v5571_v52 = vpop.f32.mrb[28].mxu0 }
 0x78f   :  { %v5572_v62 = vadd.f32 %v5571_v52, %v23279_v50  ;;  %v5573_v0 = vpop.f32.mrb[29].mxu0  ;;  %v19687_v52 = vld [vmem:[#allocation18 + $0xe4] ss:$16 sps:$4 sm:$0xff]  }
 0x790   :  { %v5574_v2 = vadd.f32 %v5573_v0, %v23281_v53  ;;  %v5575_v3 = vpop.f32.mrb[30].mxu0  ;;  %v19693_v0 = vld [vmem:[#allocation18 + $0x124] ss:$16 sps:$4 sm:$0xff]  }
 0x791   :  { %v5613_v7 = vadd.f32 %v5612_v39, %v5572_v62  ;;  %v5576_v10 = vpop.f32.mrb[31].mxu0  ;;  %v19669_v39 = vld [vmem:[#allocation18 + $0x24] ss:$16 sps:$4 sm:$0xff]   ;;  %v19688_v62 = vld [vmem:[#allocation18 + $0x100] ss:$16 sps:$4 sm:$0xff]  }
 0x792   :  { %v5615_v40 = vadd.f32 %v5614_v41, %v5574_v2  ;;  %v19667_v41 = vld [vmem:[#allocation18 + $0x20] ss:$16 sps:$4 sm:$0xff]   ;;  %v19696_v3 = vld [vmem:[#allocation18 + $0x144] ss:$16 sps:$4 sm:$0xff]  }
 0x793   :  { %v5621_v18 = vadd.f32 %v5613_v7, %v4001_v20  ;;  %v19691_v2 = vld [vmem:[#allocation18 + $0x120] ss:$16 sps:$4 sm:$0xff]   ;;  %v19699_v7 = vld [vmem:[#allocation18 + $0x164] ss:$16 sps:$4 sm:$0xff]  }
 0x794   :  { %v5622_v26 = vadd.f32 %v5615_v40, %v4002_v42  ;;  %v19694_v20 = vld [vmem:[#allocation18 + $0x140] ss:$16 sps:$4 sm:$0xff]   ;;  %v19702_v10 = vld [vmem:[#allocation18 + $0x184] ss:$16 sps:$4 sm:$0xff]  }
 0x795   :  { %v5646_v49 = vadd.f32 %v5635_v8, %v5621_v18  ;;  %v19697_v8 = vld [vmem:[#allocation18 + $0x160] ss:$16 sps:$4 sm:$0xff]   ;;  %v19705_v40 = vld [vmem:[#allocation18 + $0x1a4] ss:$16 sps:$4 sm:$0xff]  }
 0x796   :  { %v5647_v23 = vadd.f32 %v5639_v13, %v5622_v26  ;;  %v19700_v42 = vld [vmem:[#allocation18 + $0x180] ss:$16 sps:$4 sm:$0xff]  }
 0x797   :  { %v5650_v24 = vmax.f32 %v5646_v49, 0.0  ;;  %v19703_v26 = vld [vmem:[#allocation18 + $0x1a0] ss:$16 sps:$4 sm:$0xff]  }
 0x798   :  { %v5651_v50 = vmax.f32 %v5647_v23, 0.0 }
 0x79a   :  { %5735 = vmatprep.subr.mxu1 %v5651_v50 }
 0x79b   :  { %5736 = vmatpush1.msra.mxu1 %v5650_v24 }
 0x79c   :  { %17371 = vmatmul.mubr.msk.f32.vlgmr.msra.gmra.mrb[10].mxu1 %vm3556_vm4, %v23323_v44 }
 0x79d   :  { %5805 = vmatprep.mubr.f32.mxu1 %v22620_v1 }
 0x7a0   :  { %17372 = vmatmul.mubr.msk.f32.gmra.mrb[28].mxu1 %vm3556_vm4, %v23328_v14 }
 0x7a1   :  { %5947 = vmatprep.mubr.f32.mxu1 %v22620_v1 }
 0x82f   :  { %v5724_v53 = vpop.f32.mrb[14].mxu0 }
 0x830   :  { %v5726_v63 = vpop.f32.mrb[15].mxu0 }
 0x833   :  { %v5730_v27 = vpop.f32.mrb[32].mxu0 }
 0x834   :  { %v23364_v28 = vpack.c.bf16 %v5730_v27, %v5724_v53  ;;  %v5732_v29 = vpop.f32.mrb[33].mxu0  ;;  %v19708_v53 = vld [vmem:[#allocation18 + $0x1c4] ss:$16 sps:$4 sm:$0xff]  }
 0x835   :  { %v23366_v31 = vpack.c.bf16 %v5732_v29, %v5726_v63  ;;  %v19706_v63 = vld [vmem:[#allocation18 + $0x1c0] ss:$16 sps:$4 sm:$0xff]   ;;  %v19711_v27 = vld [vmem:[#allocation18 + $0x1e4] ss:$16 sps:$4 sm:$0xff]  }
 0x836   :  { %v19709_v29 = vld [vmem:[#allocation18 + $0x1e0] ss:$16 sps:$4 sm:$0xff]  }
 0x837   :  { %18876 = vmatprep.subr.bf16.mxu0 %v23366_v31 }
 0x838   :  { %18878 = vmatpush1.bf16.msra.mxu0 %v23364_v28 }
 0x839   :  { %18884 = vmatprep.subr.bf16.mxu0 %v23366_v31 }
 0x83b   :  { %17373 = vmatmul.mubr.msk.f32.vlgmr.msra.gmra.mrb[34].mxu0 %vm3569_vm10, %v23216_v19 }
 0x83c   :  { %18886 = vmatpush1.bf16.msra.mxu0 %v23364_v28  ;;  %6018 = vmatprep.mubr.f32.mxu0 %v22620_v1 }
 0x83d   :  { %6874 = vmatprep.subr.bf16.mxu0 %v19666_v33  ;;  %v19714_v33 = vld [vmem:[#allocation18 + $0x204] ss:$16 sps:$4 sm:$0xff]  }
 0x83f   :  { %17375 = vmatmul.mubr.msk.f32.vlgmr.msra.gmra.mrb[36].mxu0 %vm3569_vm10, %v23219_v22 }
 0x840   :  { %6875 = vmatpush1.bf16.msra.mxu0 %v19664_v38  ;;  %v19717_v38 = vld [vmem:[#allocation18 + $0xc] ss:$16 sps:$4 sm:$0xff]  }
 0x841   :  { %6876 = vmatprep.subr.bf16.mxu0 %v19669_v39  ;;  %v19712_v39 = vld [vmem:[#allocation18 + $0x200] ss:$16 sps:$4 sm:$0xff]  }
 0x844   :  { %6877 = vmatpush1.bf16.msra.mxu0 %v19667_v41  ;;  %v19720_v41 = vld [vmem:[#allocation18 + $0x224] ss:$16 sps:$4 sm:$0xff]  }
 0x845   :  { %6878 = vmatprep.subr.bf16.mxu0 %v19672_v43  ;;  %v19724_v43 = vld [vmem:[#allocation18 + $0x240] ss:$16 sps:$4 sm:$0xff]  }
 0x848   :  { %6879 = vmatpush1.bf16.msra.mxu0 %v19670_v45  ;;  %v19730_v45 = vld [vmem:[#allocation18 + $0x260] ss:$16 sps:$4 sm:$0xff]  }
 0x849   :  { %6880 = vmatprep.subr.bf16.mxu0 %v19675_v46  ;;  %v19732_v46 = vld [vmem:[#allocation18 + $0x264] ss:$16 sps:$4 sm:$0xff]  }
 0x84c   :  { %6881 = vmatpush1.bf16.msra.mxu0 %v19673_v59  ;;  %v19736_v59 = vld [vmem:[#allocation18 + $0x280] ss:$16 sps:$4 sm:$0xff]  }
 0x84d   :  { %6882 = vmatprep.subr.bf16.mxu0 %v19678_v47  ;;  %v19738_v47 = vld [vmem:[#allocation18 + $0x284] ss:$16 sps:$4 sm:$0xff]  }
 0x850   :  { %6883 = vmatpush1.bf16.msra.mxu0 %v19676_v16  ;;  %v19742_v16 = vld [vmem:[#allocation18 + $0x2a0] ss:$16 sps:$4 sm:$0xff]  }
 0x851   :  { %6884 = vmatprep.subr.bf16.mxu0 %v19681_v48  ;;  %v19744_v48 = vld [vmem:[#allocation18 + $0x2a4] ss:$16 sps:$4 sm:$0xff]  }
 0x854   :  { %6885 = vmatpush1.bf16.msra.mxu0 %v19679_v58  ;;  %v19748_v58 = vld [vmem:[#allocation18 + $0x2c0] ss:$16 sps:$4 sm:$0xff]  }
 0x855   :  { %6886 = vmatprep.subr.bf16.mxu0 %v19684_v54  ;;  %v19750_v54 = vld [vmem:[#allocation18 + $0x2c4] ss:$16 sps:$4 sm:$0xff]  }
 0x858   :  { %6887 = vmatpush1.bf16.msra.mxu0 %v19682_v55  ;;  %v19754_v55 = vld [vmem:[#allocation18 + $0x2e0] ss:$16 sps:$4 sm:$0xff]  }
 0x859   :  { %6888 = vmatprep.subr.bf16.mxu0 %v19687_v52  ;;  %v19756_v52 = vld [vmem:[#allocation18 + $0x2e4] ss:$16 sps:$4 sm:$0xff]  }
 0x85c   :  { %6889 = vmatpush1.bf16.msra.mxu0 %v19685_v57  ;;  %v19760_v57 = vld [vmem:[#allocation18 + $0x300] ss:$16 sps:$4 sm:$0xff]  }
 0x85d   :  { %6890 = vmatprep.subr.bf16.mxu0 %v19690_v61  ;;  %v19762_v61 = vld [vmem:[#allocation18 + $0x304] ss:$16 sps:$4 sm:$0xff]  }
 0x860   :  { %6891 = vmatpush1.bf16.msra.mxu0 %v19688_v62  ;;  %v19766_v62 = vld [vmem:[#allocation18 + $0x320] ss:$16 sps:$4 sm:$0xff]  }
 0x861   :  { %6892 = vmatprep.subr.bf16.mxu0 %v19693_v0  ;;  %v19768_v0 = vld [vmem:[#allocation18 + $0x324] ss:$16 sps:$4 sm:$0xff]  }
 0x864   :  { %6893 = vmatpush1.bf16.msra.mxu0 %v19691_v2  ;;  %v19772_v2 = vld [vmem:[#allocation18 + $0x340] ss:$16 sps:$4 sm:$0xff]  }
 0x865   :  { %6894 = vmatprep.subr.bf16.mxu0 %v19696_v3  ;;  %v19774_v3 = vld [vmem:[#allocation18 + $0x344] ss:$16 sps:$4 sm:$0xff]  }
 0x868   :  { %6895 = vmatpush1.bf16.msra.mxu0 %v19694_v20  ;;  %v19778_v20 = vld [vmem:[#allocation18 + $0x360] ss:$16 sps:$4 sm:$0xff]  }
 0x869   :  { %6896 = vmatprep.subr.bf16.mxu0 %v19699_v7  ;;  %v19780_v7 = vld [vmem:[#allocation18 + $0x364] ss:$16 sps:$4 sm:$0xff]  }
 0x86c   :  { %6897 = vmatpush1.bf16.msra.mxu0 %v19697_v8  ;;  %v19784_v8 = vld [vmem:[#allocation18 + $0x380] ss:$16 sps:$4 sm:$0xff]  }
 0x86d   :  { %6898 = vmatprep.subr.bf16.mxu0 %v19702_v10  ;;  %v19786_v10 = vld [vmem:[#allocation18 + $0x384] ss:$16 sps:$4 sm:$0xff]  }
 0x86f   :  { %v5801_v13 = vpop.f32.mrb[10].mxu1 }
 0x870   :  { %v5803_v18 = vpop.f32.mrb[11].mxu1  ;;  %6899 = vmatpush1.bf16.msra.mxu0 %v19700_v42  ;;  %v19790_v42 = vld [vmem:[#allocation18 + $0x3a0] ss:$16 sps:$4 sm:$0xff]  }
 0x871   :  { %6900 = vmatprep.subr.bf16.mxu0 %v19705_v40  ;;  %v19792_v40 = vld [vmem:[#allocation18 + $0x3a4] ss:$16 sps:$4 sm:$0xff]  }
 0x873   :  { %v5807_v49 = vpop.f32.mrb[28].mxu1 }
 0x874   :  { %v23377_v23 = vpack.c.bf16 %v5807_v49, %v5801_v13  ;;  %v5809_v50 = vpop.f32.mrb[29].mxu1  ;;  %6901 = vmatpush1.bf16.msra.mxu0 %v19703_v26  ;;  %v19798_v13 = vld [vmem:[#allocation18 + $0x3c4] ss:$16 sps:$4 sm:$0xff]   ;;  %v19802_v49 = vld [vmem:[#allocation18 + $0x3e0] ss:$16 sps:$4 sm:$0xff]  }
 0x875   :  { %v23379_v24 = vpack.c.bf16 %v5809_v50, %v5803_v18  ;;  %6902 = vmatprep.subr.bf16.mxu0 %v19708_v53  ;;  %v19796_v18 = vld [vmem:[#allocation18 + $0x3c0] ss:$16 sps:$4 sm:$0xff]   ;;  %v19804_v26 = vld [vmem:[#allocation18 + $0x3e4] ss:$16 sps:$4 sm:$0xff]   ;;  %v19810_v50 = vld [vmem:[#allocation18 + $0x20c] ss:$16 sps:$4 sm:$0xff]  }
 0x877   :  { %18880 = vmatprep.subr.bf16.mxu1 %v23379_v24 }
 0x878   :  { %18882 = vmatpush1.bf16.msra.mxu1 %v23377_v23  ;;  %6903 = vmatpush1.bf16.msra.mxu0 %v19706_v63 }
 0x879   :  { %18888 = vmatprep.subr.bf16.mxu1 %v23379_v24  ;;  %6904 = vmatprep.subr.bf16.mxu0 %v19711_v27 }
 0x87b   :  { %17374 = vmatmul.mubr.msk.f32.vlgmr.msra.gmra.mrb[30].mxu1 %vm3569_vm10, %v23216_v19  ;;  %v19718_v19 = vld [vmem:[#allocation18 + $0x220] ss:$16 sps:$4 sm:$0xff]  }
 0x87c   :  { %18890 = vmatpush1.bf16.msra.mxu1 %v23377_v23  ;;  %6089 = vmatprep.mubr.f32.mxu1 %v22620_v1 }
 0x87d   :  { %6905 = vmatpush1.bf16.msra.mxu0 %v19709_v29  ;;  %6915 = vmatprep.subr.bf16.mxu1 %v19714_v33 }
 0x87e   :  { %6956 = vmatprep.subr.bf16.mxu0 %v19717_v38  ;;  %v19715_v38 = vld [vmem:[#allocation18 + $0x8] ss:$16 sps:$4 sm:$0xff]  }
 0x87f   :  { %17376 = vmatmul.mubr.msk.f32.vlgmr.msra.gmra.mrb[32].mxu1 %vm3569_vm10, %v23219_v22  ;;  %v19726_v22 = vld [vmem:[#allocation18 + $0x244] ss:$16 sps:$4 sm:$0xff]  }
 0x880   :  { %6916 = vmatpush1.bf16.msra.mxu1 %v19712_v39 }
 0x881   :  { %6917 = vmatprep.subr.bf16.mxu1 %v19720_v41  ;;  %v19721_v41 = vld [vmem:[#allocation18 + $0x28] ss:$16 sps:$4 sm:$0xff]  }
 0x884   :  { %6918 = vmatpush1.bf16.msra.mxu1 %v19718_v19  ;;  %v19723_v19 = vld [vmem:[#allocation18 + $0x2c] ss:$16 sps:$4 sm:$0xff]  }
 0x885   :  { %6919 = vmatprep.subr.bf16.mxu1 %v19726_v22  ;;  %v19727_v22 = vld [vmem:[#allocation18 + $0x48] ss:$16 sps:$4 sm:$0xff]  }
 0x888   :  { %6920 = vmatpush1.bf16.msra.mxu1 %v19724_v43  ;;  %v19729_v43 = vld [vmem:[#allocation18 + $0x4c] ss:$16 sps:$4 sm:$0xff]  }
 0x889   :  { %6921 = vmatprep.subr.bf16.mxu1 %v19732_v46  ;;  %v19733_v46 = vld [vmem:[#allocation18 + $0x68] ss:$16 sps:$4 sm:$0xff]  }
 0x88c   :  { %6922 = vmatpush1.bf16.msra.mxu1 %v19730_v45  ;;  %v19735_v45 = vld [vmem:[#allocation18 + $0x6c] ss:$16 sps:$4 sm:$0xff]  }
 0x88d   :  { %6923 = vmatprep.subr.bf16.mxu1 %v19738_v47  ;;  %v19739_v47 = vld [vmem:[#allocation18 + $0x88] ss:$16 sps:$4 sm:$0xff]  }
 0x890   :  { %6924 = vmatpush1.bf16.msra.mxu1 %v19736_v59  ;;  %v19741_v59 = vld [vmem:[#allocation18 + $0x8c] ss:$16 sps:$4 sm:$0xff]  }
 0x891   :  { %6925 = vmatprep.subr.bf16.mxu1 %v19744_v48  ;;  %v19745_v48 = vld [vmem:[#allocation18 + $0xa8] ss:$16 sps:$4 sm:$0xff]  }
 0x894   :  { %6926 = vmatpush1.bf16.msra.mxu1 %v19742_v16  ;;  %v19747_v16 = vld [vmem:[#allocation18 + $0xac] ss:$16 sps:$4 sm:$0xff]  }
 0x895   :  { %6927 = vmatprep.subr.bf16.mxu1 %v19750_v54  ;;  %v19751_v54 = vld [vmem:[#allocation18 + $0xc8] ss:$16 sps:$4 sm:$0xff]  }
 0x898   :  { %6928 = vmatpush1.bf16.msra.mxu1 %v19748_v58  ;;  %v19753_v58 = vld [vmem:[#allocation18 + $0xcc] ss:$16 sps:$4 sm:$0xff]  }
 0x899   :  { %6929 = vmatprep.subr.bf16.mxu1 %v19756_v52  ;;  %v19757_v52 = vld [vmem:[#allocation18 + $0xe8] ss:$16 sps:$4 sm:$0xff]  }
 0x89c   :  { %6930 = vmatpush1.bf16.msra.mxu1 %v19754_v55  ;;  %v19759_v55 = vld [vmem:[#allocation18 + $0xec] ss:$16 sps:$4 sm:$0xff]  }
 0x89d   :  { %6931 = vmatprep.subr.bf16.mxu1 %v19762_v61  ;;  %v19763_v61 = vld [vmem:[#allocation18 + $0x108] ss:$16 sps:$4 sm:$0xff]  }
 0x8a0   :  { %6932 = vmatpush1.bf16.msra.mxu1 %v19760_v57  ;;  %v19765_v57 = vld [vmem:[#allocation18 + $0x10c] ss:$16 sps:$4 sm:$0xff]  }
 0x8a1   :  { %6933 = vmatprep.subr.bf16.mxu1 %v19768_v0  ;;  %v19769_v0 = vld [vmem:[#allocation18 + $0x128] ss:$16 sps:$4 sm:$0xff]  }
 0x8a4   :  { %6934 = vmatpush1.bf16.msra.mxu1 %v19766_v62  ;;  %v19771_v62 = vld [vmem:[#allocation18 + $0x12c] ss:$16 sps:$4 sm:$0xff]  }
 0x8a5   :  { %6935 = vmatprep.subr.bf16.mxu1 %v19774_v3  ;;  %v19775_v3 = vld [vmem:[#allocation18 + $0x148] ss:$16 sps:$4 sm:$0xff]  }
 0x8a8   :  { %6936 = vmatpush1.bf16.msra.mxu1 %v19772_v2  ;;  %v19777_v2 = vld [vmem:[#allocation18 + $0x14c] ss:$16 sps:$4 sm:$0xff]  }
 0x8a9   :  { %6937 = vmatprep.subr.bf16.mxu1 %v19780_v7  ;;  %v19781_v7 = vld [vmem:[#allocation18 + $0x168] ss:$16 sps:$4 sm:$0xff]  }
 0x8ac   :  { %6938 = vmatpush1.bf16.msra.mxu1 %v19778_v20  ;;  %v19783_v20 = vld [vmem:[#allocation18 + $0x16c] ss:$16 sps:$4 sm:$0xff]  }
 0x8ad   :  { %6939 = vmatprep.subr.bf16.mxu1 %v19786_v10  ;;  %v19787_v10 = vld [vmem:[#allocation18 + $0x188] ss:$16 sps:$4 sm:$0xff]  }
 0x8b0   :  { %6940 = vmatpush1.bf16.msra.mxu1 %v19784_v8  ;;  %v19789_v8 = vld [vmem:[#allocation18 + $0x18c] ss:$16 sps:$4 sm:$0xff]  }
 0x8b1   :  { %6941 = vmatprep.subr.bf16.mxu1 %v19792_v40  ;;  %v19793_v40 = vld [vmem:[#allocation18 + $0x1a8] ss:$16 sps:$4 sm:$0xff]  }
 0x8b4   :  { %6942 = vmatpush1.bf16.msra.mxu1 %v19790_v42  ;;  %v19795_v42 = vld [vmem:[#allocation18 + $0x1ac] ss:$16 sps:$4 sm:$0xff]  }
 0x8b5   :  { %6943 = vmatprep.subr.bf16.mxu1 %v19798_v13  ;;  %v19801_v13 = vld [vmem:[#allocation18 + $0x1cc] ss:$16 sps:$4 sm:$0xff]  }
 0x8b8   :  { %6944 = vmatpush1.bf16.msra.mxu1 %v19796_v18  ;;  %v19799_v18 = vld [vmem:[#allocation18 + $0x1c8] ss:$16 sps:$4 sm:$0xff]  }
 0x8b9   :  { %6945 = vmatprep.subr.bf16.mxu1 %v19804_v26  ;;  %v19807_v26 = vld [vmem:[#allocation18 + $0x1ec] ss:$16 sps:$4 sm:$0xff]  }
 0x8bc   :  { %6946 = vmatpush1.bf16.msra.mxu1 %v19802_v49 }
 0x8bd   :  { %6997 = vmatprep.subr.bf16.mxu1 %v19810_v50 }
 0x90e   :  { %v23390_v53 = vpop.f32.mrb[34].mxu0 }
 0x90f   :  { %v23392_v63 = vpop.f32.mrb[35].mxu0 }
 0x912   :  { %v6020_v27 = vpop.f32.mrb[36].mxu0 }
 0x913   :  { %v6022_v29 = vpop.f32.mrb[37].mxu0  ;;  %v23394_v39 = vpack.c.bf16 %v6020_v27, %v6020_v27  ;;  %v19805_v27 = vld [vmem:[#allocation18 + $0x1e8] ss:$16 sps:$4 sm:$0xff]  }
 0x914   :  { %v6231_v33 = vpack.c.bf16 %v6022_v29, %v6022_v29  ;;  %v19813_v29 = vld [vmem:[#allocation17 + $0x4] ss:$16 sps:$4 sm:$0xff]  }
 0x916   :  { %6906 = vmatprep.mubr.bf16.mxu0 %v6231_v33 }
 0x917   :  { %6907 = vmatmul.mubr.bf16.vlgmr.msra.gmra.mrb[40].mxu0 %v23394_v39 }
 0x918   :  { %6957 = vmatpush1.bf16.msra.mxu0 %v19715_v38  ;;  %6988 = vmatprep.mubr.bf16.mxu0 %v6231_v33 }
 0x919   :  { %6958 = vmatprep.subr.bf16.mxu0 %v19723_v19 }
 0x91c   :  { %6959 = vmatpush1.bf16.msra.mxu0 %v19721_v41  ;;  %v19808_v41 = vld [vmem:[#allocation18 + $0x208] ss:$16 sps:$4 sm:$0xff]  }
 0x91d   :  { %6960 = vmatprep.subr.bf16.mxu0 %v19729_v43  ;;  %v19811_v43 = vld [vmem:[#allocation17] ss:$16 sps:$4 sm:$0xff]  }
 0x920   :  { %6961 = vmatpush1.bf16.msra.mxu0 %v19727_v22 }
 0x921   :  { %6962 = vmatprep.subr.bf16.mxu0 %v19735_v45  ;;  %v19816_v45 = vld [vmem:[#allocation18 + $0x22c] ss:$16 sps:$4 sm:$0xff]  }
 0x924   :  { %6963 = vmatpush1.bf16.msra.mxu0 %v19733_v46  ;;  %v19819_v46 = vld [vmem:[#allocation17 + $0x24] ss:$16 sps:$4 sm:$0xff]  }
 0x925   :  { %6964 = vmatprep.subr.bf16.mxu0 %v19741_v59  ;;  %v23405_v59 = vpack.c.bf16 %v23392_v63, %v23392_v63  ;;  %v19823_v63 = vld [vmem:[#allocation17 + $0x40] ss:$16 sps:$4 sm:$0xff]  }
 0x928   :  { %6965 = vmatpush1.bf16.msra.mxu0 %v19739_v47  ;;  %v19814_v47 = vld [vmem:[#allocation18 + $0x228] ss:$16 sps:$4 sm:$0xff]  }
 0x929   :  { %6966 = vmatprep.subr.bf16.mxu0 %v19747_v16  ;;  %v19817_v16 = vld [vmem:[#allocation17 + $0x20] ss:$16 sps:$4 sm:$0xff]  }
 0x92c   :  { %6967 = vmatpush1.bf16.msra.mxu0 %v19745_v48  ;;  %v19822_v48 = vld [vmem:[#allocation18 + $0x24c] ss:$16 sps:$4 sm:$0xff]  }
 0x92d   :  { %6968 = vmatprep.subr.bf16.mxu0 %v19753_v58  ;;  %v19825_v58 = vld [vmem:[#allocation17 + $0x44] ss:$16 sps:$4 sm:$0xff]  }
 0x930   :  { %6969 = vmatpush1.bf16.msra.mxu0 %v19751_v54  ;;  %v19820_v54 = vld [vmem:[#allocation18 + $0x248] ss:$16 sps:$4 sm:$0xff]  }
 0x931   :  { %6970 = vmatprep.subr.bf16.mxu0 %v19759_v55  ;;  %v19831_v55 = vld [vmem:[#allocation17 + $0x64] ss:$16 sps:$4 sm:$0xff]  }
 0x934   :  { %6971 = vmatpush1.bf16.msra.mxu0 %v19757_v52  ;;  %v19826_v52 = vld [vmem:[#allocation18 + $0x268] ss:$16 sps:$4 sm:$0xff]  }
 0x935   :  { %6972 = vmatprep.subr.bf16.mxu0 %v19765_v57  ;;  %v19829_v57 = vld [vmem:[#allocation17 + $0x60] ss:$16 sps:$4 sm:$0xff]  }
 0x938   :  { %6973 = vmatpush1.bf16.msra.mxu0 %v19763_v61  ;;  %v19834_v61 = vld [vmem:[#allocation18 + $0x28c] ss:$16 sps:$4 sm:$0xff]  }
 0x939   :  { %6974 = vmatprep.subr.bf16.mxu0 %v19771_v62  ;;  %v19837_v62 = vld [vmem:[#allocation17 + $0x84] ss:$16 sps:$4 sm:$0xff]  }
 0x93c   :  { %6975 = vmatpush1.bf16.msra.mxu0 %v19769_v0  ;;  %v19832_v0 = vld [vmem:[#allocation18 + $0x288] ss:$16 sps:$4 sm:$0xff]  }
 0x93d   :  { %6976 = vmatprep.subr.bf16.mxu0 %v19777_v2  ;;  %v19835_v2 = vld [vmem:[#allocation17 + $0x80] ss:$16 sps:$4 sm:$0xff]  }
 0x940   :  { %6977 = vmatpush1.bf16.msra.mxu0 %v19775_v3  ;;  %v19840_v3 = vld [vmem:[#allocation18 + $0x2ac] ss:$16 sps:$4 sm:$0xff]  }
 0x941   :  { %6978 = vmatprep.subr.bf16.mxu0 %v19783_v20  ;;  %v19843_v20 = vld [vmem:[#allocation17 + $0xa4] ss:$16 sps:$4 sm:$0xff]  }
 0x944   :  { %6979 = vmatpush1.bf16.msra.mxu0 %v19781_v7  ;;  %v19838_v7 = vld [vmem:[#allocation18 + $0x2a8] ss:$16 sps:$4 sm:$0xff]  }
 0x945   :  { %6980 = vmatprep.subr.bf16.mxu0 %v19789_v8  ;;  %v19841_v8 = vld [vmem:[#allocation17 + $0xa0] ss:$16 sps:$4 sm:$0xff]  }
 0x948   :  { %6981 = vmatpush1.bf16.msra.mxu0 %v19787_v10  ;;  %v19846_v10 = vld [vmem:[#allocation18 + $0x2cc] ss:$16 sps:$4 sm:$0xff]  }
 0x949   :  { %6982 = vmatprep.subr.bf16.mxu0 %v19795_v42  ;;  %v19849_v42 = vld [vmem:[#allocation17 + $0xc4] ss:$16 sps:$4 sm:$0xff]  }
 0x94c   :  { %6983 = vmatpush1.bf16.msra.mxu0 %v19793_v40  ;;  %v19844_v40 = vld [vmem:[#allocation18 + $0x2c8] ss:$16 sps:$4 sm:$0xff]  }
 0x94d   :  { %6984 = vmatprep.subr.bf16.mxu0 %v19801_v13  ;;  %v19847_v13 = vld [vmem:[#allocation17 + $0xc0] ss:$16 sps:$4 sm:$0xff]  }
 0x94e   :  { %v23397_v49 = vpop.f32.mrb[30].mxu1 }
 0x94f   :  { %v23399_v50 = vpop.f32.mrb[31].mxu1 }
 0x950   :  { %6985 = vmatpush1.bf16.msra.mxu0 %v19799_v18  ;;  %v19852_v18 = vld [vmem:[#allocation18 + $0x2ec] ss:$16 sps:$4 sm:$0xff]  }
 0x951   :  { %6986 = vmatprep.subr.bf16.mxu0 %v19807_v26  ;;  %v19855_v26 = vld [vmem:[#allocation17 + $0xe4] ss:$16 sps:$4 sm:$0xff]  }
 0x952   :  { %v6091_v33 = vpop.f32.mrb[32].mxu1 }
 0x953   :  { %v6093_v38 = vpop.f32.mrb[33].mxu1  ;;  %v23401_v22 = vpack.c.bf16 %v6091_v33, %v6091_v33  ;;  %v19858_v33 = vld [vmem:[#allocation18 + $0x30c] ss:$16 sps:$4 sm:$0xff]  }
 0x954   :  { %v6233_v19 = vpack.c.bf16 %v6093_v38, %v6093_v38  ;;  %6987 = vmatpush1.bf16.msra.mxu0 %v19805_v27  ;;  %v19850_v27 = vld [vmem:[#allocation18 + $0x2e8] ss:$16 sps:$4 sm:$0xff]   ;;  %v19861_v38 = vld [vmem:[#allocation17 + $0x104] ss:$16 sps:$4 sm:$0xff]  }
 0x955   :  { %7678 = vmatprep.subr.bf16.mxu0 %v19813_v29  ;;  %v19853_v29 = vld [vmem:[#allocation17 + $0xe0] ss:$16 sps:$4 sm:$0xff]  }
 0x956   :  { %6947 = vmatprep.mubr.bf16.mxu1 %v6233_v19 }
 0x957   :  { %6989 = vmatmul.mubr.bf16.vlgmr.msra.gmra.mrb[44].mxu0 %v23394_v39  ;;  %6948 = vmatmul.mubr.bf16.vlgmr.msra.gmra.mrb[36].mxu1 %v23401_v22  ;;  %v19828_v39 = vld [vmem:[#allocation18 + $0x26c] ss:$16 sps:$4 sm:$0xff]  }
 0x958   :  { %6998 = vmatpush1.bf16.msra.mxu1 %v19808_v41  ;;  %7679 = vmatpush1.bf16.msra.mxu0 %v19811_v43  ;;  %v19859_v41 = vld [vmem:[#allocation17 + $0x100] ss:$16 sps:$4 sm:$0xff]   ;;  %v19864_v43 = vld [vmem:[#allocation18 + $0x32c] ss:$16 sps:$4 sm:$0xff]  }
 0x959   :  { %7710 = vmatprep.mubr.bf16.mxu0 %v23405_v59  ;;  %7029 = vmatprep.mubr.bf16.mxu1 %v6233_v19  ;;  %v19856_v19 = vld [vmem:[#allocation18 + $0x308] ss:$16 sps:$4 sm:$0xff]  }
 0x95a   :  { %6999 = vmatprep.subr.bf16.mxu1 %v19816_v45  ;;  %7680 = vmatprep.subr.bf16.mxu0 %v19819_v46  ;;  %v19867_v45 = vld [vmem:[#allocation17 + $0x124] ss:$16 sps:$4 sm:$0xff]   ;;  %v19862_v46 = vld [vmem:[#allocation18 + $0x328] ss:$16 sps:$4 sm:$0xff]  }
 0x95c   :  { %7000 = vmatpush1.bf16.msra.mxu1 %v19814_v47  ;;  %7681 = vmatpush1.bf16.msra.mxu0 %v19817_v16  ;;  %v19865_v47 = vld [vmem:[#allocation17 + $0x120] ss:$16 sps:$4 sm:$0xff]   ;;  %v19870_v16 = vld [vmem:[#allocation18 + $0x34c] ss:$16 sps:$4 sm:$0xff]  }
 0x95d   :  { %7001 = vmatprep.subr.bf16.mxu1 %v19822_v48  ;;  %7682 = vmatprep.subr.bf16.mxu0 %v19825_v58  ;;  %v19873_v48 = vld [vmem:[#allocation17 + $0x144] ss:$16 sps:$4 sm:$0xff]   ;;  %v19868_v58 = vld [vmem:[#allocation18 + $0x348] ss:$16 sps:$4 sm:$0xff]  }
 0x960   :  { %7002 = vmatpush1.bf16.msra.mxu1 %v19820_v54  ;;  %7683 = vmatpush1.bf16.msra.mxu0 %v19823_v63  ;;  %v19871_v54 = vld [vmem:[#allocation17 + $0x140] ss:$16 sps:$4 sm:$0xff]   ;;  %v19876_v63 = vld [vmem:[#allocation18 + $0x36c] ss:$16 sps:$4 sm:$0xff]  }
 0x961   :  { %7003 = vmatprep.subr.bf16.mxu1 %v19828_v39  ;;  %7684 = vmatprep.subr.bf16.mxu0 %v19831_v55  ;;  %v19879_v39 = vld [vmem:[#allocation17 + $0x164] ss:$16 sps:$4 sm:$0xff]   ;;  %v19874_v55 = vld [vmem:[#allocation18 + $0x368] ss:$16 sps:$4 sm:$0xff]  }
 0x964   :  { %7004 = vmatpush1.bf16.msra.mxu1 %v19826_v52  ;;  %7685 = vmatpush1.bf16.msra.mxu0 %v19829_v57  ;;  %v19877_v52 = vld [vmem:[#allocation17 + $0x160] ss:$16 sps:$4 sm:$0xff]   ;;  %v19882_v57 = vld [vmem:[#allocation18 + $0x38c] ss:$16 sps:$4 sm:$0xff]  }
 0x965   :  { %7005 = vmatprep.subr.bf16.mxu1 %v19834_v61  ;;  %7686 = vmatprep.subr.bf16.mxu0 %v19837_v62  ;;  %v19885_v61 = vld [vmem:[#allocation17 + $0x184] ss:$16 sps:$4 sm:$0xff]   ;;  %v19880_v62 = vld [vmem:[#allocation18 + $0x388] ss:$16 sps:$4 sm:$0xff]  }
 0x968   :  { %7006 = vmatpush1.bf16.msra.mxu1 %v19832_v0  ;;  %7687 = vmatpush1.bf16.msra.mxu0 %v19835_v2  ;;  %v19883_v0 = vld [vmem:[#allocation17 + $0x180] ss:$16 sps:$4 sm:$0xff]   ;;  %v19888_v2 = vld [vmem:[#allocation18 + $0x3ac] ss:$16 sps:$4 sm:$0xff]  }
 0x969   :  { %7007 = vmatprep.subr.bf16.mxu1 %v19840_v3  ;;  %7688 = vmatprep.subr.bf16.mxu0 %v19843_v20  ;;  %v19891_v3 = vld [vmem:[#allocation17 + $0x1a4] ss:$16 sps:$4 sm:$0xff]   ;;  %v19886_v20 = vld [vmem:[#allocation18 + $0x3a8] ss:$16 sps:$4 sm:$0xff]  }
 0x96c   :  { %7008 = vmatpush1.bf16.msra.mxu1 %v19838_v7  ;;  %7689 = vmatpush1.bf16.msra.mxu0 %v19841_v8  ;;  %v19889_v7 = vld [vmem:[#allocation17 + $0x1a0] ss:$16 sps:$4 sm:$0xff]   ;;  %v19894_v8 = vld [vmem:[#allocation18 + $0x3cc] ss:$16 sps:$4 sm:$0xff]  }
 0x96d   :  { %7009 = vmatprep.subr.bf16.mxu1 %v19846_v10  ;;  %7690 = vmatprep.subr.bf16.mxu0 %v19849_v42  ;;  %v19897_v10 = vld [vmem:[#allocation17 + $0x1c4] ss:$16 sps:$4 sm:$0xff]   ;;  %v19892_v42 = vld [vmem:[#allocation18 + $0x3c8] ss:$16 sps:$4 sm:$0xff]  }
 0x970   :  { %7010 = vmatpush1.bf16.msra.mxu1 %v19844_v40  ;;  %7691 = vmatpush1.bf16.msra.mxu0 %v19847_v13  ;;  %v19895_v40 = vld [vmem:[#allocation17 + $0x1c0] ss:$16 sps:$4 sm:$0xff]   ;;  %v19900_v13 = vld [vmem:[#allocation18 + $0x3ec] ss:$16 sps:$4 sm:$0xff]  }
 0x971   :  { %7011 = vmatprep.subr.bf16.mxu1 %v19852_v18  ;;  %7692 = vmatprep.subr.bf16.mxu0 %v19855_v26  ;;  %v19903_v18 = vld [vmem:[#allocation17 + $0x1e4] ss:$16 sps:$4 sm:$0xff]   ;;  %v19898_v26 = vld [vmem:[#allocation18 + $0x3e8] ss:$16 sps:$4 sm:$0xff]  }
 0x974   :  { %7012 = vmatpush1.bf16.msra.mxu1 %v19850_v27  ;;  %7693 = vmatpush1.bf16.msra.mxu0 %v19853_v29  ;;  %v19901_v27 = vld [vmem:[#allocation17 + $0x1e0] ss:$16 sps:$4 sm:$0xff]   ;;  %v19906_v29 = vld [vmem:[#allocation17 + $0x204] ss:$16 sps:$4 sm:$0xff]  }
 0x975   :  { %7013 = vmatprep.subr.bf16.mxu1 %v19858_v33  ;;  %7694 = vmatprep.subr.bf16.mxu0 %v19861_v38  ;;  %v19909_v33 = vld [vmem:[#allocation17 + $0xc] ss:$16 sps:$4 sm:$0xff]   ;;  %v19904_v38 = vld [vmem:[#allocation17 + $0x200] ss:$16 sps:$4 sm:$0xff]  }
 0x978   :  { %7014 = vmatpush1.bf16.msra.mxu1 %v19856_v19  ;;  %7695 = vmatpush1.bf16.msra.mxu0 %v19859_v41  ;;  %v23412_v19 = vpack.c.bf16 %v23390_v53, %v23390_v53  ;;  %v19907_v41 = vld [vmem:[#allocation17 + $0x8] ss:$16 sps:$4 sm:$0xff]  }
 0x979   :  { %7015 = vmatprep.subr.bf16.mxu1 %v19864_v43  ;;  %7696 = vmatprep.subr.bf16.mxu0 %v19867_v45  ;;  %v23416_v43 = vpack.c.bf16 %v23399_v50, %v23399_v50  ;;  %v19912_v45 = vld [vmem:[#allocation17 + $0x224] ss:$16 sps:$4 sm:$0xff]   ;;  %v19913_v53 = vld [vmem:[#allocation17 + $0x28] ss:$16 sps:$4 sm:$0xff]   ;;  %v19916_v50 = vld [vmem:[#allocation17 + $0x240] ss:$16 sps:$4 sm:$0xff]  }
 0x97c   :  { %7016 = vmatpush1.bf16.msra.mxu1 %v19862_v46  ;;  %7697 = vmatpush1.bf16.msra.mxu0 %v19865_v47  ;;  %v19915_v46 = vld [vmem:[#allocation17 + $0x2c] ss:$16 sps:$4 sm:$0xff]   ;;  %v19910_v47 = vld [vmem:[#allocation17 + $0x220] ss:$16 sps:$4 sm:$0xff]  }
 0x97d   :  { %7017 = vmatprep.subr.bf16.mxu1 %v19870_v16  ;;  %7698 = vmatprep.subr.bf16.mxu0 %v19873_v48  ;;  %v19918_v16 = vld [vmem:[#allocation17 + $0x244] ss:$16 sps:$4 sm:$0xff]   ;;  %v19921_v48 = vld [vmem:[#allocation17 + $0x4c] ss:$16 sps:$4 sm:$0xff]  }
 0x980   :  { %7018 = vmatpush1.bf16.msra.mxu1 %v19868_v58  ;;  %7699 = vmatpush1.bf16.msra.mxu0 %v19871_v54  ;;  %v19919_v58 = vld [vmem:[#allocation17 + $0x48] ss:$16 sps:$4 sm:$0xff]   ;;  %v19927_v54 = vld [vmem:[#allocation17 + $0x6c] ss:$16 sps:$4 sm:$0xff]  }
 0x981   :  { %7019 = vmatprep.subr.bf16.mxu1 %v19876_v63  ;;  %7700 = vmatprep.subr.bf16.mxu0 %v19879_v39  ;;  %v19922_v63 = vld [vmem:[#allocation17 + $0x260] ss:$16 sps:$4 sm:$0xff]   ;;  %v19925_v39 = vld [vmem:[#allocation17 + $0x68] ss:$16 sps:$4 sm:$0xff]  }
 0x984   :  { %7020 = vmatpush1.bf16.msra.mxu1 %v19874_v55  ;;  %7701 = vmatpush1.bf16.msra.mxu0 %v19877_v52  ;;  %v19930_v55 = vld [vmem:[#allocation17 + $0x284] ss:$16 sps:$4 sm:$0xff]   ;;  %v19928_v52 = vld [vmem:[#allocation17 + $0x280] ss:$16 sps:$4 sm:$0xff]  }
 0x985   :  { %7021 = vmatprep.subr.bf16.mxu1 %v19882_v57  ;;  %7702 = vmatprep.subr.bf16.mxu0 %v19885_v61  ;;  %v19931_v57 = vld [vmem:[#allocation17 + $0x88] ss:$16 sps:$4 sm:$0xff]   ;;  %v19936_v61 = vld [vmem:[#allocation17 + $0x2a4] ss:$16 sps:$4 sm:$0xff]  }
 0x988   :  { %7022 = vmatpush1.bf16.msra.mxu1 %v19880_v62  ;;  %7703 = vmatpush1.bf16.msra.mxu0 %v19883_v0  ;;  %v19939_v62 = vld [vmem:[#allocation17 + $0xac] ss:$16 sps:$4 sm:$0xff]   ;;  %v19934_v0 = vld [vmem:[#allocation17 + $0x2a0] ss:$16 sps:$4 sm:$0xff]  }
 0x989   :  { %7023 = vmatprep.subr.bf16.mxu1 %v19888_v2  ;;  %7704 = vmatprep.subr.bf16.mxu0 %v19891_v3  ;;  %v19937_v2 = vld [vmem:[#allocation17 + $0xa8] ss:$16 sps:$4 sm:$0xff]   ;;  %v19942_v3 = vld [vmem:[#allocation17 + $0x2c4] ss:$16 sps:$4 sm:$0xff]  }
 0x98c   :  { %7024 = vmatpush1.bf16.msra.mxu1 %v19886_v20  ;;  %7705 = vmatpush1.bf16.msra.mxu0 %v19889_v7  ;;  %v19945_v20 = vld [vmem:[#allocation17 + $0xcc] ss:$16 sps:$4 sm:$0xff]   ;;  %v19940_v7 = vld [vmem:[#allocation17 + $0x2c0] ss:$16 sps:$4 sm:$0xff]  }
 0x98d   :  { %7025 = vmatprep.subr.bf16.mxu1 %v19894_v8  ;;  %7706 = vmatprep.subr.bf16.mxu0 %v19897_v10  ;;  %v19943_v8 = vld [vmem:[#allocation17 + $0xc8] ss:$16 sps:$4 sm:$0xff]   ;;  %v19948_v10 = vld [vmem:[#allocation17 + $0x2e4] ss:$16 sps:$4 sm:$0xff]  }
 0x990   :  { %7026 = vmatpush1.bf16.msra.mxu1 %v19892_v42  ;;  %7707 = vmatpush1.bf16.msra.mxu0 %v19895_v40  ;;  %v19951_v42 = vld [vmem:[#allocation17 + $0xec] ss:$16 sps:$4 sm:$0xff]   ;;  %v19946_v40 = vld [vmem:[#allocation17 + $0x2e0] ss:$16 sps:$4 sm:$0xff]  }
 0x991   :  { %7027 = vmatprep.subr.bf16.mxu1 %v19900_v13  ;;  %7708 = vmatprep.subr.bf16.mxu0 %v19903_v18  ;;  %v19949_v13 = vld [vmem:[#allocation17 + $0xe8] ss:$16 sps:$4 sm:$0xff]   ;;  %v19954_v18 = vld [vmem:[#allocation17 + $0x304] ss:$16 sps:$4 sm:$0xff]  }
 0x994   :  { %7028 = vmatpush1.bf16.msra.mxu1 %v19898_v26  ;;  %7709 = vmatpush1.bf16.msra.mxu0 %v19901_v27  ;;  %v19957_v26 = vld [vmem:[#allocation17 + $0x10c] ss:$16 sps:$4 sm:$0xff]   ;;  %v19952_v27 = vld [vmem:[#allocation17 + $0x300] ss:$16 sps:$4 sm:$0xff]  }
 0x995   :  { %7719 = vmatprep.subr.bf16.mxu1 %v19906_v29  ;;  %7760 = vmatprep.subr.bf16.mxu0 %v19909_v33  ;;  %v19955_v29 = vld [vmem:[#allocation17 + $0x108] ss:$16 sps:$4 sm:$0xff]   ;;  %v19960_v33 = vld [vmem:[#allocation17 + $0x324] ss:$16 sps:$4 sm:$0xff]  }
 0x997   :  { %7030 = vmatmul.mubr.bf16.vlgmr.msra.gmra.mrb[40].mxu1 %v23401_v22  ;;  %7711 = vmatmul.mubr.bf16.vlgmr.msra.gmra.mrb[48].mxu0 %v23412_v19  ;;  %v19924_v22 = vld [vmem:[#allocation17 + $0x264] ss:$16 sps:$4 sm:$0xff]  }
 0x998   :  { %7720 = vmatpush1.bf16.msra.mxu1 %v19904_v38  ;;  %7751 = vmatprep.mubr.bf16.mxu1 %v23416_v43  ;;  %v19963_v38 = vld [vmem:[#allocation17 + $0x12c] ss:$16 sps:$4 sm:$0xff]  }
 0x999   :  { %7761 = vmatpush1.bf16.msra.mxu0 %v19907_v41  ;;  %7792 = vmatprep.mubr.bf16.mxu0 %v23405_v59  ;;  %v19933_v59 = vld [vmem:[#allocation17 + $0x8c] ss:$16 sps:$4 sm:$0xff]   ;;  %v19958_v41 = vld [vmem:[#allocation17 + $0x320] ss:$16 sps:$4 sm:$0xff]  }
 0x99a   :  { %7721 = vmatprep.subr.bf16.mxu1 %v19912_v45  ;;  %7762 = vmatprep.subr.bf16.mxu0 %v19915_v46  ;;  %v19961_v45 = vld [vmem:[#allocation17 + $0x128] ss:$16 sps:$4 sm:$0xff]   ;;  %v19966_v46 = vld [vmem:[#allocation17 + $0x344] ss:$16 sps:$4 sm:$0xff]  }
 0x99c   :  { %7722 = vmatpush1.bf16.msra.mxu1 %v19910_v47  ;;  %v19969_v47 = vld [vmem:[#allocation17 + $0x14c] ss:$16 sps:$4 sm:$0xff]  }
 0x99d   :  { %7763 = vmatpush1.bf16.msra.mxu0 %v19913_v53  ;;  %7723 = vmatprep.subr.bf16.mxu1 %v19918_v16  ;;  %v19964_v53 = vld [vmem:[#allocation17 + $0x340] ss:$16 sps:$4 sm:$0xff]   ;;  %v19967_v16 = vld [vmem:[#allocation17 + $0x148] ss:$16 sps:$4 sm:$0xff]  }
 0x99e   :  { %7764 = vmatprep.subr.bf16.mxu0 %v19921_v48  ;;  %v19972_v48 = vld [vmem:[#allocation17 + $0x364] ss:$16 sps:$4 sm:$0xff]  }
 0x9a0   :  { %7724 = vmatpush1.bf16.msra.mxu1 %v19916_v50  ;;  %v19975_v50 = vld [vmem:[#allocation17 + $0x16c] ss:$16 sps:$4 sm:$0xff]  }
 0x9a1   :  { %7765 = vmatpush1.bf16.msra.mxu0 %v19919_v58  ;;  %7725 = vmatprep.subr.bf16.mxu1 %v19924_v22  ;;  %v19970_v58 = vld [vmem:[#allocation17 + $0x360] ss:$16 sps:$4 sm:$0xff]   ;;  %v19973_v22 = vld [vmem:[#allocation17 + $0x168] ss:$16 sps:$4 sm:$0xff]  }
 0x9a2   :  { %7766 = vmatprep.subr.bf16.mxu0 %v19927_v54  ;;  %v19978_v54 = vld [vmem:[#allocation17 + $0x384] ss:$16 sps:$4 sm:$0xff]  }
 0x9a4   :  { %7726 = vmatpush1.bf16.msra.mxu1 %v19922_v63  ;;  %v19981_v63 = vld [vmem:[#allocation17 + $0x18c] ss:$16 sps:$4 sm:$0xff]  }
 0x9a5   :  { %7767 = vmatpush1.bf16.msra.mxu0 %v19925_v39  ;;  %7727 = vmatprep.subr.bf16.mxu1 %v19930_v55  ;;  %v19976_v39 = vld [vmem:[#allocation17 + $0x380] ss:$16 sps:$4 sm:$0xff]   ;;  %v19979_v55 = vld [vmem:[#allocation17 + $0x188] ss:$16 sps:$4 sm:$0xff]  }
 0x9a6   :  { %7768 = vmatprep.subr.bf16.mxu0 %v19933_v59  ;;  %v19984_v59 = vld [vmem:[#allocation17 + $0x3a4] ss:$16 sps:$4 sm:$0xff]  }
 0x9a8   :  { %7728 = vmatpush1.bf16.msra.mxu1 %v19928_v52  ;;  %v19987_v52 = vld [vmem:[#allocation17 + $0x1ac] ss:$16 sps:$4 sm:$0xff]  }
 0x9a9   :  { %7769 = vmatpush1.bf16.msra.mxu0 %v19931_v57  ;;  %7729 = vmatprep.subr.bf16.mxu1 %v19936_v61  ;;  %v19982_v57 = vld [vmem:[#allocation17 + $0x3a0] ss:$16 sps:$4 sm:$0xff]   ;;  %v19985_v61 = vld [vmem:[#allocation17 + $0x1a8] ss:$16 sps:$4 sm:$0xff]  }
 0x9aa   :  { %7770 = vmatprep.subr.bf16.mxu0 %v19939_v62  ;;  %v19990_v62 = vld [vmem:[#allocation17 + $0x3c4] ss:$16 sps:$4 sm:$0xff]  }
 0x9ac   :  { %7730 = vmatpush1.bf16.msra.mxu1 %v19934_v0  ;;  %v19993_v0 = vld [vmem:[#allocation17 + $0x1cc] ss:$16 sps:$4 sm:$0xff]  }
 0x9ad   :  { %7771 = vmatpush1.bf16.msra.mxu0 %v19937_v2  ;;  %7731 = vmatprep.subr.bf16.mxu1 %v19942_v3  ;;  %v19988_v2 = vld [vmem:[#allocation17 + $0x3c0] ss:$16 sps:$4 sm:$0xff]   ;;  %v19991_v3 = vld [vmem:[#allocation17 + $0x1c8] ss:$16 sps:$4 sm:$0xff]  }
 0x9ae   :  { %7772 = vmatprep.subr.bf16.mxu0 %v19945_v20  ;;  %v19996_v20 = vld [vmem:[#allocation17 + $0x3e4] ss:$16 sps:$4 sm:$0xff]  }
 0x9b0   :  { %7732 = vmatpush1.bf16.msra.mxu1 %v19940_v7  ;;  %v19999_v7 = vld [vmem:[#allocation17 + $0x1ec] ss:$16 sps:$4 sm:$0xff]  }
 0x9b1   :  { %7773 = vmatpush1.bf16.msra.mxu0 %v19943_v8  ;;  %7733 = vmatprep.subr.bf16.mxu1 %v19948_v10  ;;  %v19994_v8 = vld [vmem:[#allocation17 + $0x3e0] ss:$16 sps:$4 sm:$0xff]   ;;  %v19997_v10 = vld [vmem:[#allocation17 + $0x1e8] ss:$16 sps:$4 sm:$0xff]  }
 0x9b2   :  { %7774 = vmatprep.subr.bf16.mxu0 %v19951_v42  ;;  %v20002_v42 = vld [vmem:[#allocation17 + $0x20c] ss:$16 sps:$4 sm:$0xff]  }
 0x9b4   :  { %7734 = vmatpush1.bf16.msra.mxu1 %v19946_v40  ;;  %v20000_v40 = vld [vmem:[#allocation17 + $0x208] ss:$16 sps:$4 sm:$0xff]  }
 0x9b5   :  { %7775 = vmatpush1.bf16.msra.mxu0 %v19949_v13  ;;  %7735 = vmatprep.subr.bf16.mxu1 %v19954_v18  ;;  %v23424_v13 = vpack.c.bf16 %v23397_v49, %v23397_v49  ;;  %v20005_v18 = vld [vmem:[#allocation17 + $0x22c] ss:$16 sps:$4 sm:$0xff]  }
 0x9b6   :  { %7776 = vmatprep.subr.bf16.mxu0 %v19957_v26  ;;  %v20003_v26 = vld [vmem:[#allocation17 + $0x228] ss:$16 sps:$4 sm:$0xff]   ;;  %v20011_v49 = vld [vmem:[#allocation17 + $0x26c] ss:$16 sps:$4 sm:$0xff]  }
 0x9b8   :  { %7736 = vmatpush1.bf16.msra.mxu1 %v19952_v27  ;;  %v20008_v27 = vld [vmem:[#allocation17 + $0x24c] ss:$16 sps:$4 sm:$0xff]  }
 0x9b9   :  { %7777 = vmatpush1.bf16.msra.mxu0 %v19955_v29  ;;  %7737 = vmatprep.subr.bf16.mxu1 %v19960_v33  ;;  %v20006_v29 = vld [vmem:[#allocation17 + $0x248] ss:$16 sps:$4 sm:$0xff]  }
 0x9ba   :  { %7778 = vmatprep.subr.bf16.mxu0 %v19963_v38  ;;  %v20009_v33 = vld [vmem:[#allocation17 + $0x268] ss:$16 sps:$4 sm:$0xff]   ;;  %v20014_v38 = vld [vmem:[#allocation17 + $0x28c] ss:$16 sps:$4 sm:$0xff]  }
 0x9bc   :  { %7738 = vmatpush1.bf16.msra.mxu1 %v19958_v41  ;;  %v20012_v41 = vld [vmem:[#allocation17 + $0x288] ss:$16 sps:$4 sm:$0xff]  }
 0x9bd   :  { %7779 = vmatpush1.bf16.msra.mxu0 %v19961_v45  ;;  %7739 = vmatprep.subr.bf16.mxu1 %v19966_v46  ;;  %v20015_v45 = vld [vmem:[#allocation17 + $0x2a8] ss:$16 sps:$4 sm:$0xff]  }
 0x9be   :  { %7780 = vmatprep.subr.bf16.mxu0 %v19969_v47 }
 0x9c0   :  { %7740 = vmatpush1.bf16.msra.mxu1 %v19964_v53 }
 0x9c1   :  { %7781 = vmatpush1.bf16.msra.mxu0 %v19967_v16  ;;  %7741 = vmatprep.subr.bf16.mxu1 %v19972_v48  ;;  %v20018_v16 = vld [vmem:[#allocation17 + $0x2c8] ss:$16 sps:$4 sm:$0xff]  }
 0x9c2   :  { %7782 = vmatprep.subr.bf16.mxu0 %v19975_v50  ;;  %v20023_v50 = vld [vmem:[#allocation17 + $0x2ec] ss:$16 sps:$4 sm:$0xff]  }
 0x9c4   :  { %7742 = vmatpush1.bf16.msra.mxu1 %v19970_v58  ;;  %v20021_v58 = vld [vmem:[#allocation17 + $0x2e8] ss:$16 sps:$4 sm:$0xff]  }
 0x9c5   :  { %7783 = vmatpush1.bf16.msra.mxu0 %v19973_v22  ;;  %7743 = vmatprep.subr.bf16.mxu1 %v19978_v54  ;;  %v20026_v22 = vld [vmem:[#allocation17 + $0x30c] ss:$16 sps:$4 sm:$0xff]   ;;  %v20024_v54 = vld [vmem:[#allocation17 + $0x308] ss:$16 sps:$4 sm:$0xff]  }
 0x9c6   :  { %7784 = vmatprep.subr.bf16.mxu0 %v19981_v63  ;;  %v20029_v63 = vld [vmem:[#allocation17 + $0x32c] ss:$16 sps:$4 sm:$0xff]  }
 0x9c8   :  { %7744 = vmatpush1.bf16.msra.mxu1 %v19976_v39  ;;  %v20027_v39 = vld [vmem:[#allocation17 + $0x328] ss:$16 sps:$4 sm:$0xff]  }
 0x9c9   :  { %7785 = vmatpush1.bf16.msra.mxu0 %v19979_v55  ;;  %7745 = vmatprep.subr.bf16.mxu1 %v19984_v59  ;;  %v20032_v55 = vld [vmem:[#allocation17 + $0x34c] ss:$16 sps:$4 sm:$0xff]   ;;  %v20030_v59 = vld [vmem:[#allocation17 + $0x348] ss:$16 sps:$4 sm:$0xff]  }
 0x9ca   :  { %7786 = vmatprep.subr.bf16.mxu0 %v19987_v52  ;;  %v20035_v52 = vld [vmem:[#allocation17 + $0x36c] ss:$16 sps:$4 sm:$0xff]  }
 0x9cc   :  { %7746 = vmatpush1.bf16.msra.mxu1 %v19982_v57  ;;  %v20033_v57 = vld [vmem:[#allocation17 + $0x368] ss:$16 sps:$4 sm:$0xff]  }
 0x9cd   :  { %7787 = vmatpush1.bf16.msra.mxu0 %v19985_v61  ;;  %7747 = vmatprep.subr.bf16.mxu1 %v19990_v62  ;;  %v20038_v61 = vld [vmem:[#allocation17 + $0x38c] ss:$16 sps:$4 sm:$0xff]   ;;  %v20036_v62 = vld [vmem:[#allocation17 + $0x388] ss:$16 sps:$4 sm:$0xff]  }
 0x9ce   :  { %7788 = vmatprep.subr.bf16.mxu0 %v19993_v0  ;;  %v20041_v0 = vld [vmem:[#allocation17 + $0x3ac] ss:$16 sps:$4 sm:$0xff]  }
 0x9d0   :  { %7748 = vmatpush1.bf16.msra.mxu1 %v19988_v2  ;;  %v20039_v2 = vld [vmem:[#allocation17 + $0x3a8] ss:$16 sps:$4 sm:$0xff]  }
 0x9d1   :  { %7789 = vmatpush1.bf16.msra.mxu0 %v19991_v3  ;;  %7749 = vmatprep.subr.bf16.mxu1 %v19996_v20  ;;  %v20044_v3 = vld [vmem:[#allocation17 + $0x3cc] ss:$16 sps:$4 sm:$0xff]   ;;  %v20042_v20 = vld [vmem:[#allocation17 + $0x3c8] ss:$16 sps:$4 sm:$0xff]  }
 0x9d2   :  { %7790 = vmatprep.subr.bf16.mxu0 %v19999_v7  ;;  %v20047_v7 = vld [vmem:[#allocation17 + $0x3ec] ss:$16 sps:$4 sm:$0xff]  }
 0x9d4   :  { %7750 = vmatpush1.bf16.msra.mxu1 %v19994_v8  ;;  %v20045_v8 = vld [vmem:[#allocation17 + $0x3e8] ss:$16 sps:$4 sm:$0xff]  }
 0x9d5   :  { %7791 = vmatpush1.bf16.msra.mxu0 %v19997_v10  ;;  %7801 = vmatprep.subr.bf16.mxu1 %v20002_v42 }
 0x9d7   :  { %7752 = vmatmul.mubr.bf16.vlgmr.msra.gmra.mrb[44].mxu1 %v23424_v13 }
 0x9d8   :  { %7793 = vmatmul.mubr.bf16.vlgmr.msra.gmra.mrb[52].mxu0 %v23412_v19  ;;  %7802 = vmatpush1.bf16.msra.mxu1 %v20000_v40  ;;  %v20017_v19 = vld [vmem:[#allocation17 + $0x2ac] ss:$16 sps:$4 sm:$0xff]  }
 0x9d9   :  { %7833 = vmatprep.mubr.bf16.mxu1 %v23416_v43  ;;  %7803 = vmatprep.subr.bf16.mxu1 %v20005_v18  ;;  %v20020_v43 = vld [vmem:[#allocation17 + $0x2cc] ss:$16 sps:$4 sm:$0xff]  }
 0x9da   :  { %7939 = vmatprep.mubr.f32.mxu0 %v22620_v1 }
 0x9dc   :  { %7804 = vmatpush1.bf16.msra.mxu1 %v20003_v26 }
 0x9dd   :  { %7805 = vmatprep.subr.bf16.mxu1 %v20008_v27 }
 0x9e0   :  { %7806 = vmatpush1.bf16.msra.mxu1 %v20006_v29 }
 0x9e1   :  { %7807 = vmatprep.subr.bf16.mxu1 %v20011_v49 }
 0x9e4   :  { %7808 = vmatpush1.bf16.msra.mxu1 %v20009_v33 }
 0x9e5   :  { %7809 = vmatprep.subr.bf16.mxu1 %v20014_v38 }
 0x9e8   :  { %7810 = vmatpush1.bf16.msra.mxu1 %v20012_v41 }
 0x9e9   :  { %7811 = vmatprep.subr.bf16.mxu1 %v20017_v19 }
 0x9ea   :  { %v6908_v46 = vpop.f32.mrb[40].mxu0 }
 0x9eb   :  { %v6910_v47 = vpop.f32.mrb[41].mxu0 }
 0x9ec   :  { %7812 = vmatpush1.bf16.msra.mxu1 %v20015_v45  ;;  %v6912_v53 = vpop.f32.mrb[42].mxu0 }
 0x9ed   :  { %v6913_v48 = vpop.f32.mrb[43].mxu0  ;;  %7813 = vmatprep.subr.bf16.mxu1 %v20020_v43 }
 0x9f0   :  { %7814 = vmatpush1.bf16.msra.mxu1 %v20018_v16 }
 0x9f1   :  { %7815 = vmatprep.subr.bf16.mxu1 %v20023_v50 }
 0x9f4   :  { %7816 = vmatpush1.bf16.msra.mxu1 %v20021_v58 }
 0x9f5   :  { %7817 = vmatprep.subr.bf16.mxu1 %v20026_v22 }
 0x9f8   :  { %7818 = vmatpush1.bf16.msra.mxu1 %v20024_v54 }
 0x9f9   :  { %7819 = vmatprep.subr.bf16.mxu1 %v20029_v63 }
 0x9fc   :  { %7820 = vmatpush1.bf16.msra.mxu1 %v20027_v39 }
 0x9fd   :  { %7821 = vmatprep.subr.bf16.mxu1 %v20032_v55 }
 0xa00   :  { %7822 = vmatpush1.bf16.msra.mxu1 %v20030_v59 }
 0xa01   :  { %7823 = vmatprep.subr.bf16.mxu1 %v20035_v52 }
 0xa04   :  { %7824 = vmatpush1.bf16.msra.mxu1 %v20033_v57 }
 0xa05   :  { %7825 = vmatprep.subr.bf16.mxu1 %v20038_v61 }
 0xa08   :  { %7826 = vmatpush1.bf16.msra.mxu1 %v20036_v62 }
 0xa09   :  { %7827 = vmatprep.subr.bf16.mxu1 %v20041_v0 }
 0xa0c   :  { %7828 = vmatpush1.bf16.msra.mxu1 %v20039_v2 }
 0xa0d   :  { %7829 = vmatprep.subr.bf16.mxu1 %v20044_v3 }
 0xa10   :  { %7830 = vmatpush1.bf16.msra.mxu1 %v20042_v20 }
 0xa11   :  { %7831 = vmatprep.subr.bf16.mxu1 %v20047_v7 }
 0xa14   :  { %7832 = vmatpush1.bf16.msra.mxu1 %v20045_v8 }
 0xa17   :  { %7834 = vmatmul.mubr.bf16.vlgmr.msra.gmra.mrb[48].mxu1 %v23424_v13 }
 0xa18   :  { %8016 = vmatprep.mubr.f32.mxu1 %v22620_v1 }
 0xa2a   :  { %v6990_v10 = vpop.f32.mrb[44].mxu0  ;;  %v6949_v42 = vpop.f32.mrb[36].mxu1 }
 0xa2b   :  { %v6950_v40 = vadd.f32 %v6949_v42, %v6908_v46  ;;  %v6992_v18 = vpop.f32.mrb[45].mxu0  ;;  %v6951_v26 = vpop.f32.mrb[37].mxu1  ;;  %v1306_v46 = vld [vmem:[#allocation20] sm:$0x77] }
 0xa2c   :  { %v6952_v27 = vadd.f32 %v6951_v26, %v6910_v47  ;;  %v6994_v29 = vpop.f32.mrb[46].mxu0  ;;  %v6953_v49 = vpop.f32.mrb[38].mxu1  ;;  %v6101_v63 = vrot.slane %v1306_v46, %v23172_v34  ;;  %v6141_v47 = vrot.slane %v1306_v46, %v23175_v35  ;;  %v6105_v39 = vrot.slane %v1306_v46, %v23284_v4 }
 0xa2d   :  { %v6995_v33 = vpop.f32.mrb[47].mxu0  ;;  %v6954_v38 = vpop.f32.mrb[39].mxu1  ;;  %v6145_v55 = vrot.slane %v1306_v46, %v23287_v60  ;;  %v6185_v57 = vrot.slane %v1306_v46, %v23178_v36  ;;  %v6189_v0 = vrot.slane %v1306_v46, %v23294_v5 }
 0xa2e   :  { %v6121_v59 = vrot.slane %v6101_v63, %v23172_v34  ;;  %v6161_v52 = vrot.slane %v6141_v47, %v23175_v35  ;;  %v6125_v61 = vrot.slane %v6105_v39, %v23172_v34 }
 0xa2f   :  { %v6165_v62 = vrot.slane %v6145_v55, %v23175_v35  ;;  %v6205_v20 = vrot.slane %v6185_v57, %v23178_v36 }
 0xa30   :  { %v6134_v2 = vmul.f32 %v6121_v59, %v23301_v9  ;;  %v6174_v3 = vmul.f32 %v6161_v52, %v23296_v6  ;;  %v6135_v7 = vmul.f32 %v6125_v61, %v23301_v9  ;;  %v20050_v61 = vld [vmem:[#allocation24 + $0x4] ss:$8 sps:$4 sm:$0xff]  }
 0xa31   :  { %v6175_v8 = vmul.f32 %v6165_v62, %v23296_v6  ;;  %v20048_v62 = vld [vmem:[#allocation24] ss:$8 sps:$4 sm:$0xff]  }
 0xa32   :  { %v6178_v42 = vadd.f32 %v6174_v3, %v6134_v2  ;;  %v20054_v2 = vld [vmem:[#allocation24 + $0x20] ss:$8 sps:$4 sm:$0xff]   ;;  %v20059_v3 = vld [vmem:[#allocation24 + $0x34] ss:$8 sps:$4 sm:$0xff]  }
 0xa33   :  { %v6179_v26 = vadd.f32 %v6175_v8, %v6135_v7  ;;  %v20062_v7 = vld [vmem:[#allocation24 + $0x44] ss:$8 sps:$4 sm:$0xff]   ;;  %v20060_v8 = vld [vmem:[#allocation24 + $0x40] ss:$8 sps:$4 sm:$0xff]  }
 0xa6a   :  { %v7031_v41 = vpop.f32.mrb[40].mxu1  ;;  %v7712_v19 = vpop.f32.mrb[48].mxu0 }
 0xa6b   :  { %v7032_v45 = vadd.f32 %v7031_v41, %v6990_v10  ;;  %v7713_v43 = vadd.f32 %v7712_v19, %v6950_v40  ;;  %v7033_v53 = vpop.f32.mrb[41].mxu1  ;;  %v7714_v16 = vpop.f32.mrb[49].mxu0  ;;  %v6209_v10 = vrot.slane %v6189_v0, %v23178_v36  ;;  %v6218_v40 = vmul.f32 %v6205_v20, %v23309_v51  ;;  %v20056_v0 = vld [vmem:[#allocation24 + $0x24] ss:$8 sps:$4 sm:$0xff]   ;;  %v20057_v20 = vld [vmem:[#allocation24 + $0x30] ss:$8 sps:$4 sm:$0xff]  }
 0xa6c   :  { %v7034_v48 = vadd.f32 %v7033_v53, %v6992_v18  ;;  %v7715_v13 = vadd.f32 %v7714_v16, %v6952_v27  ;;  %v7035_v50 = vpop.f32.mrb[42].mxu1  ;;  %v7716_v58 = vpop.f32.mrb[50].mxu0  ;;  %v23449_v18 = vld [vmem:[#allocation21] sm:$0xf] }
 0xa6d   :  { %v7036_v22 = vpop.f32.mrb[43].mxu1  ;;  %v7717_v54 = vpop.f32.mrb[51].mxu0  ;;  %v6219_v27 = vmul.f32 %v6209_v10, %v23309_v51  ;;  %v6222_v49 = vadd.f32 %v6218_v40, %v6178_v42  ;;  %v7850_v38 = vrot.slane %v23449_v18, %v23172_v34  ;;  %v20065_v10 = vld [vmem:[#allocation24 + $0x54] ss:$8 sps:$4 sm:$0xff]   ;;  %v20063_v42 = vld [vmem:[#allocation24 + $0x50] ss:$8 sps:$4 sm:$0xff]  }
 0xa6e   :  { %v7854_v54 = vrot.slane %v23449_v18, %v23175_v35  ;;  %v20068_v40 = vld [vmem:[#allocation24 + $0x64] ss:$8 sps:$4 sm:$0xff]  }
 0xa6f   :  { %v6223_v16 = vadd.f32 %v6219_v27, %v6179_v26  ;;  %v20066_v26 = vld [vmem:[#allocation24 + $0x60] ss:$8 sps:$4 sm:$0xff]   ;;  %v20071_v27 = vld [vmem:[#allocation24 + $0x74] ss:$8 sps:$4 sm:$0xff]  }
 0xaaa   :  { %v7753_v29 = vpop.f32.mrb[44].mxu1 }
 0xaab   :  { %v7754_v33 = vadd.f32 %v7753_v29, %v7713_v43  ;;  %v7794_v41 = vpop.f32.mrb[52].mxu0  ;;  %v7755_v19 = vpop.f32.mrb[45].mxu1  ;;  %v20074_v29 = vld [vmem:[#allocation24 + $0x84] ss:$8 sps:$4 sm:$0xff]  }
 0xaac   :  { %v23454_v53 = vadd.f32 %v7794_v41, %v7032_v45  ;;  %v7756_v50 = vadd.f32 %v7755_v19, %v7715_v13  ;;  %v7796_v58 = vpop.f32.mrb[53].mxu0  ;;  %v7757_v22 = vpop.f32.mrb[46].mxu1  ;;  %v20053_v13 = vld [vmem:[#allocation24 + $0x14] ss:$8 sps:$4 sm:$0xff]   ;;  %v20080_v41 = vld [vmem:[#allocation24 + $0xa4] ss:$8 sps:$4 sm:$0xff]  }
 0xaad   :  { %v7842_v46 = vadd.f32 %v7754_v33, %v6222_v49  ;;  %v23458_v63 = vadd.f32 %v7796_v58, %v7034_v48  ;;  %v7798_v47 = vpop.f32.mrb[54].mxu0  ;;  %v7758_v39 = vpop.f32.mrb[47].mxu1  ;;  %v20051_v48 = vld [vmem:[#allocation24 + $0x10] ss:$8 sps:$4 sm:$0xff]   ;;  %v20072_v49 = vld [vmem:[#allocation24 + $0x80] ss:$8 sps:$4 sm:$0xff]  }
 0xaae   :  { %v7843_v43 = vadd.f32 %v7756_v50, %v6223_v16  ;;  %v7799_v55 = vpop.f32.mrb[55].mxu0  ;;  %v20077_v33 = vld [vmem:[#allocation24 + $0x94] ss:$8 sps:$4 sm:$0xff]   ;;  %v20078_v16 = vld [vmem:[#allocation24 + $0xa0] ss:$8 sps:$4 sm:$0xff]  }
 0xaaf   :  { %v7867_v59 = vadd.f32 %v7850_v38, %v7842_v46  ;;  %v20075_v38 = vld [vmem:[#allocation24 + $0x90] ss:$8 sps:$4 sm:$0xff]   ;;  %v20083_v22 = vld [vmem:[#allocation24 + $0xb4] ss:$8 sps:$4 sm:$0xff]  }
 0xab0   :  { %v7868_v52 = vadd.f32 %v7854_v54, %v7843_v43  ;;  %v1307_v19 = vld [vmem:[#allocation20 + $0x8] sm:$0x77] }
 0xab1   :  { %v7871_v45 = vmax.f32 %v7867_v59, 0.0  ;;  %v6109_v50 = vrot.slane %v1307_v19, %v23172_v34  ;;  %v6149_v58 = vrot.slane %v1307_v19, %v23175_v35  ;;  %v6113_v54 = vrot.slane %v1307_v19, %v23284_v4  ;;  %v20081_v47 = vld [vmem:[#allocation24 + $0xb0] ss:$8 sps:$4 sm:$0xff]   ;;  %v20086_v59 = vld [vmem:[#allocation24 + $0xc4] ss:$8 sps:$4 sm:$0xff]  }
 0xab2   :  { %v7872_v57 = vmax.f32 %v7868_v52, 0.0  ;;  %v6153_v46 = vrot.slane %v1307_v19, %v23287_v60  ;;  %v6193_v55 = vrot.slane %v1307_v19, %v23178_v36 }
 0xab3   :  { %v6129_v39 = vrot.slane %v6109_v50, %v23172_v34  ;;  %v6169_v43 = vrot.slane %v6149_v58, %v23175_v35  ;;  %v6133_v52 = vrot.slane %v6113_v54, %v23172_v34 }
 0xab4   :  { %7875 = vmatprep.subr.mxu0 %v7872_v57  ;;  %v6173_v57 = vrot.slane %v6153_v46, %v23175_v35  ;;  %v20098_v46 = vld [vmem:[#allocation24 + $0x104] ss:$8 sps:$4 sm:$0xff]  }
 0xab5   :  { %7876 = vmatpush1.msra.mxu0 %v7871_v45  ;;  %v20084_v45 = vld [vmem:[#allocation24 + $0xc0] ss:$8 sps:$4 sm:$0xff]  }
 0xab6   :  { %17633 = vmatmul.mubr.msk.f32.vlgmr.msra.gmra.mrb[38].mxu0 %vm3556_vm4, %v23323_v44  ;;  %8357 = vmatprep.subr.bf16.mxu0 %v20050_v61  ;;  %v6197_v61 = vrot.slane %v1307_v19, %v23294_v5  ;;  %v20095_v19 = vld [vmem:[#allocation24 + $0xf4] ss:$8 sps:$4 sm:$0xff]  }
 0xab7   :  { %8358 = vmatpush1.bf16.msra.mxu0 %v20048_v62  ;;  %7945 = vmatprep.mubr.f32.mxu0 %v22620_v1  ;;  %v6136_v62 = vmul.f32 %v6129_v39, %v23301_v9 }
 0xab8   :  { %8359 = vmatprep.subr.bf16.mxu0 %v20053_v13  ;;  %v6176_v13 = vmul.f32 %v6169_v43, %v23296_v6  ;;  %v20096_v43 = vld [vmem:[#allocation24 + $0x100] ss:$8 sps:$4 sm:$0xff]  }
 0xaba   :  { %17634 = vmatmul.mubr.msk.f32.gmra.mrb[56].mxu0 %vm3556_vm4, %v23328_v14 }
 0xabb   :  { %8360 = vmatpush1.bf16.msra.mxu0 %v20051_v48  ;;  %8389 = vmatprep.mubr.bf16.mxu0 %v23366_v31  ;;  %v20069_v31 = vld [vmem:[#allocation24 + $0x70] ss:$8 sps:$4 sm:$0xff]   ;;  %v6213_v48 = vrot.slane %v6193_v55, %v23178_v36  ;;  %v20104_v55 = vld [vmem:[#allocation24 + $0x124] ss:$8 sps:$4 sm:$0xff]  }
 0xabc   :  { %8361 = vmatprep.subr.bf16.mxu0 %v20056_v0  ;;  %v20089_v0 = vld [vmem:[#allocation24 + $0xd4] ss:$8 sps:$4 sm:$0xff]  }
 0xabf   :  { %8362 = vmatpush1.bf16.msra.mxu0 %v20054_v2  ;;  %v6137_v2 = vmul.f32 %v6133_v52, %v23301_v9  ;;  %v7858_v9 = vrot.slane %v23449_v18, %v23178_v36  ;;  %v20107_v52 = vld [vmem:[#allocation24 + $0x134] ss:$8 sps:$4 sm:$0xff]  }
 0xac0   :  { %8363 = vmatprep.subr.bf16.mxu0 %v20059_v3  ;;  %v6177_v3 = vmul.f32 %v6173_v57, %v23296_v6  ;;  %v20113_v57 = vld [vmem:[#allocation24 + $0x154] ss:$8 sps:$4 sm:$0xff]  }
 0xac3   :  { %8364 = vmatpush1.bf16.msra.mxu0 %v20057_v20  ;;  %v6217_v20 = vrot.slane %v6197_v61, %v23178_v36  ;;  %v20111_v61 = vld [vmem:[#allocation24 + $0x150] ss:$8 sps:$4 sm:$0xff]  }
 0xac4   :  { %8365 = vmatprep.subr.bf16.mxu0 %v20062_v7  ;;  %v6180_v7 = vadd.f32 %v6176_v13, %v6136_v62  ;;  %v20119_v62 = vld [vmem:[#allocation24 + $0x174] ss:$8 sps:$4 sm:$0xff]   ;;  %v20117_v13 = vld [vmem:[#allocation24 + $0x170] ss:$8 sps:$4 sm:$0xff]  }
 0xac7   :  { %8366 = vmatpush1.bf16.msra.mxu0 %v20060_v8  ;;  %v6220_v8 = vmul.f32 %v6213_v48, %v23309_v51  ;;  %v20122_v48 = vld [vmem:[#allocation24 + $0x184] ss:$8 sps:$4 sm:$0xff]  }
 0xac8   :  { %8367 = vmatprep.subr.bf16.mxu0 %v20065_v10  ;;  %v20087_v10 = vld [vmem:[#allocation24 + $0xd0] ss:$8 sps:$4 sm:$0xff]  }
 0xacb   :  { %8368 = vmatpush1.bf16.msra.mxu0 %v20063_v42  ;;  %v6181_v42 = vadd.f32 %v6177_v3, %v6137_v2  ;;  %v20125_v2 = vld [vmem:[#allocation24 + $0x194] ss:$8 sps:$4 sm:$0xff]   ;;  %v20123_v3 = vld [vmem:[#allocation24 + $0x190] ss:$8 sps:$4 sm:$0xff]  }
 0xacc   :  { %8369 = vmatprep.subr.bf16.mxu0 %v20068_v40  ;;  %v6221_v40 = vmul.f32 %v6217_v20, %v23309_v51  ;;  %v7862_v51 = vrot.slane %v23449_v18, %v23181_v37  ;;  %v20099_v18 = vld [vmem:[#allocation24 + $0x110] ss:$8 sps:$4 sm:$0xff]   ;;  %v20128_v20 = vld [vmem:[#allocation24 + $0x1a4] ss:$8 sps:$4 sm:$0xff]  }
 0xacf   :  { %8370 = vmatpush1.bf16.msra.mxu0 %v20066_v26  ;;  %v20092_v26 = vld [vmem:[#allocation24 + $0xe4] ss:$8 sps:$4 sm:$0xff]  }
 0xad0   :  { %8371 = vmatprep.subr.bf16.mxu0 %v20071_v27 }
 0xad3   :  { %8372 = vmatpush1.bf16.msra.mxu0 %v20069_v31  ;;  %v6224_v31 = vadd.f32 %v6220_v8, %v6180_v7  ;;  %v20126_v7 = vld [vmem:[#allocation24 + $0x1a0] ss:$8 sps:$4 sm:$0xff]   ;;  %v20131_v8 = vld [vmem:[#allocation24 + $0x1b4] ss:$8 sps:$4 sm:$0xff]  }
 0xad4   :  { %8373 = vmatprep.subr.bf16.mxu0 %v20074_v29 }
 0xad7   :  { %8374 = vmatpush1.bf16.msra.mxu0 %v20072_v49  ;;  %v20090_v49 = vld [vmem:[#allocation24 + $0xe0] ss:$8 sps:$4 sm:$0xff]  }
 0xad8   :  { %8375 = vmatprep.subr.bf16.mxu0 %v20077_v33  ;;  %v6225_v33 = vadd.f32 %v6221_v40, %v6181_v42  ;;  %v20134_v42 = vld [vmem:[#allocation24 + $0x1c4] ss:$8 sps:$4 sm:$0xff]   ;;  %v20132_v40 = vld [vmem:[#allocation24 + $0x1c0] ss:$8 sps:$4 sm:$0xff]  }
 0xadb   :  { %8376 = vmatpush1.bf16.msra.mxu0 %v20075_v38 }
 0xadc   :  { %8377 = vmatprep.subr.bf16.mxu0 %v20080_v41 }
 0xadf   :  { %8378 = vmatpush1.bf16.msra.mxu0 %v20078_v16 }
 0xae0   :  { %8379 = vmatprep.subr.bf16.mxu0 %v20083_v22 }
 0xae3   :  { %8380 = vmatpush1.bf16.msra.mxu0 %v20081_v47 }
 0xae4   :  { %8381 = vmatprep.subr.bf16.mxu0 %v20086_v59  ;;  %v20102_v59 = vld [vmem:[#allocation24 + $0x120] ss:$8 sps:$4 sm:$0xff]  }
 0xae7   :  { %8382 = vmatpush1.bf16.msra.mxu0 %v20084_v45  ;;  %v20116_v45 = vld [vmem:[#allocation24 + $0x164] ss:$8 sps:$4 sm:$0xff]  }
 0xae8   :  { %8383 = vmatprep.subr.bf16.mxu0 %v20089_v0  ;;  %v20120_v0 = vld [vmem:[#allocation24 + $0x180] ss:$8 sps:$4 sm:$0xff]  }
 0xaea   :  { %v7835_v27 = vpop.f32.mrb[48].mxu1 }
 0xaeb   :  { %v7836_v29 = vadd.f32 %v7835_v27, %v23454_v53  ;;  %v7837_v6 = vpop.f32.mrb[49].mxu1  ;;  %8384 = vmatpush1.bf16.msra.mxu0 %v20087_v10  ;;  %v20093_v53 = vld [vmem:[#allocation24 + $0xf0] ss:$8 sps:$4 sm:$0xff]  }
 0xaec   :  { %v7838_v38 = vadd.f32 %v7837_v6, %v23458_v63  ;;  %v7839_v41 = vpop.f32.mrb[50].mxu1  ;;  %8385 = vmatprep.subr.bf16.mxu0 %v20092_v26  ;;  %v20101_v63 = vld [vmem:[#allocation24 + $0x114] ss:$8 sps:$4 sm:$0xff]   ;;  %v20129_v10 = vld [vmem:[#allocation24 + $0x1b0] ss:$8 sps:$4 sm:$0xff]  }
 0xaed   :  { %v7844_v16 = vadd.f32 %v7836_v29, %v6224_v31  ;;  %v7840_v50 = vpop.f32.mrb[51].mxu1  ;;  %v20137_v26 = vld [vmem:[#allocation24 + $0x1d4] ss:$8 sps:$4 sm:$0xff]   ;;  %v20135_v27 = vld [vmem:[#allocation24 + $0x1d0] ss:$8 sps:$4 sm:$0xff]  }
 0xaee   :  { %v7845_v58 = vadd.f32 %v7838_v38, %v6225_v33  ;;  %v20140_v31 = vld [vmem:[#allocation24 + $0x1e4] ss:$8 sps:$4 sm:$0xff]   ;;  %v20138_v29 = vld [vmem:[#allocation24 + $0x1e0] ss:$8 sps:$4 sm:$0xff]   ;;  %v20141_v6 = vld [vmem:[#allocation24 + $0x1f0] ss:$8 sps:$4 sm:$0xff]  }
 0xaef   :  { %v7869_v22 = vadd.f32 %v7858_v9, %v7844_v16  ;;  %8386 = vmatpush1.bf16.msra.mxu0 %v20090_v49  ;;  %v20143_v9 = vld [vmem:[#allocation24 + $0x1f4] ss:$8 sps:$4 sm:$0xff]   ;;  %v20146_v49 = vld [vmem:[#allocation23 + $0x4] ss:$8 sps:$4 sm:$0xff]   ;;  %v20144_v33 = vld [vmem:[#allocation23] ss:$8 sps:$4 sm:$0xff]  }
 0xaf0   :  { %8387 = vmatprep.subr.bf16.mxu0 %v20095_v19  ;;  %v7870_v54 = vadd.f32 %v7862_v51, %v7845_v58  ;;  %v20149_v38 = vld [vmem:[#allocation23 + $0x14] ss:$8 sps:$4 sm:$0xff]   ;;  %v20147_v41 = vld [vmem:[#allocation23 + $0x10] ss:$8 sps:$4 sm:$0xff]   ;;  %v20152_v19 = vld [vmem:[#allocation23 + $0x24] ss:$8 sps:$4 sm:$0xff]  }
 0xaf1   :  { %v7873_v39 = vmax.f32 %v7869_v22, 0.0  ;;  %v20150_v51 = vld [vmem:[#allocation23 + $0x20] ss:$8 sps:$4 sm:$0xff]   ;;  %v20155_v16 = vld [vmem:[#allocation23 + $0x34] ss:$8 sps:$4 sm:$0xff]  }
 0xaf2   :  { %v7874_v47 = vmax.f32 %v7870_v54, 0.0  ;;  %v20153_v50 = vld [vmem:[#allocation23 + $0x30] ss:$8 sps:$4 sm:$0xff]   ;;  %v20158_v58 = vld [vmem:[#allocation23 + $0x44] ss:$8 sps:$4 sm:$0xff]  }
 0xaf3   :  { %8388 = vmatpush1.bf16.msra.mxu0 %v20093_v53  ;;  %v20156_v22 = vld [vmem:[#allocation23 + $0x40] ss:$8 sps:$4 sm:$0xff]   ;;  %v20161_v53 = vld [vmem:[#allocation23 + $0x54] ss:$8 sps:$4 sm:$0xff]   ;;  %v20164_v54 = vld [vmem:[#allocation23 + $0x64] ss:$8 sps:$4 sm:$0xff]  }
 0xaf4   :  { %7952 = vmatprep.subr.mxu1 %v7874_v47  ;;  %8400 = vmatprep.subr.bf16.mxu0 %v20098_v46  ;;  %v20167_v46 = vld [vmem:[#allocation23 + $0x74] ss:$8 sps:$4 sm:$0xff]   ;;  %v20165_v47 = vld [vmem:[#allocation23 + $0x70] ss:$8 sps:$4 sm:$0xff]  }
 0xaf5   :  { %7953 = vmatpush1.msra.mxu1 %v7873_v39  ;;  %v20170_v39 = vld [vmem:[#allocation23 + $0x84] ss:$8 sps:$4 sm:$0xff]  }
 0xaf6   :  { %17635 = vmatmul.mubr.msk.f32.vlgmr.msra.gmra.mrb[34].mxu1 %vm3556_vm4, %v23323_v44  ;;  %8390 = vmatmul.mubr.bf16.vlgmr.msra.gmra.mrb[60].mxu0 %v23364_v28  ;;  %v20105_v44 = vld [vmem:[#allocation24 + $0x130] ss:$8 sps:$4 sm:$0xff]   ;;  %v20110_v28 = vld [vmem:[#allocation24 + $0x144] ss:$8 sps:$4 sm:$0xff]  }
 0xaf7   :  { %8401 = vmatpush1.bf16.msra.mxu0 %v20096_v43  ;;  %8432 = vmatprep.mubr.bf16.mxu0 %v23379_v24  ;;  %v20108_v24 = vld [vmem:[#allocation24 + $0x140] ss:$8 sps:$4 sm:$0xff]  }
 0xaf8   :  { %8022 = vmatprep.mubr.f32.mxu1 %v22620_v1  ;;  %8402 = vmatprep.subr.bf16.mxu0 %v20101_v63  ;;  %v20168_v43 = vld [vmem:[#allocation23 + $0x80] ss:$8 sps:$4 sm:$0xff]   ;;  %v20173_v63 = vld [vmem:[#allocation23 + $0x94] ss:$8 sps:$4 sm:$0xff]  }
 0xafa   :  { %17636 = vmatmul.mubr.msk.f32.gmra.mrb[52].mxu1 %vm3556_vm4, %v23328_v14  ;;  %v20114_v14 = vld [vmem:[#allocation24 + $0x160] ss:$8 sps:$4 sm:$0xff]  }
 0xafb   :  { %8403 = vmatpush1.bf16.msra.mxu0 %v20099_v18  ;;  %9357 = vmatprep.mubr.f32.mxu1 %v22620_v1  ;;  %v20171_v18 = vld [vmem:[#allocation23 + $0x90] ss:$8 sps:$4 sm:$0xff]  }
 0xafc   :  { %8404 = vmatprep.subr.bf16.mxu0 %v20104_v55  ;;  %v20176_v55 = vld [vmem:[#allocation23 + $0xa4] ss:$8 sps:$4 sm:$0xff]  }
 0xaff   :  { %8405 = vmatpush1.bf16.msra.mxu0 %v20102_v59  ;;  %v20174_v59 = vld [vmem:[#allocation23 + $0xa0] ss:$8 sps:$4 sm:$0xff]  }
 0xb00   :  { %8406 = vmatprep.subr.bf16.mxu0 %v20107_v52  ;;  %v20179_v52 = vld [vmem:[#allocation23 + $0xb4] ss:$8 sps:$4 sm:$0xff]  }
 0xb03   :  { %8407 = vmatpush1.bf16.msra.mxu0 %v20105_v44  ;;  %v20177_v44 = vld [vmem:[#allocation23 + $0xb0] ss:$8 sps:$4 sm:$0xff]  }
 0xb04   :  { %8408 = vmatprep.subr.bf16.mxu0 %v20110_v28  ;;  %v20182_v28 = vld [vmem:[#allocation23 + $0xc4] ss:$8 sps:$4 sm:$0xff]  }
 0xb07   :  { %8409 = vmatpush1.bf16.msra.mxu0 %v20108_v24  ;;  %v20180_v24 = vld [vmem:[#allocation23 + $0xc0] ss:$8 sps:$4 sm:$0xff]  }
 0xb08   :  { %8410 = vmatprep.subr.bf16.mxu0 %v20113_v57  ;;  %v20185_v57 = vld [vmem:[#allocation23 + $0xd4] ss:$8 sps:$4 sm:$0xff]  }
 0xb0b   :  { %8411 = vmatpush1.bf16.msra.mxu0 %v20111_v61  ;;  %v20183_v61 = vld [vmem:[#allocation23 + $0xd0] ss:$8 sps:$4 sm:$0xff]  }
 0xb0c   :  { %8412 = vmatprep.subr.bf16.mxu0 %v20116_v45  ;;  %v20188_v45 = vld [vmem:[#allocation23 + $0xe4] ss:$8 sps:$4 sm:$0xff]  }
 0xb0f   :  { %8413 = vmatpush1.bf16.msra.mxu0 %v20114_v14  ;;  %v20186_v14 = vld [vmem:[#allocation23 + $0xe0] ss:$8 sps:$4 sm:$0xff]  }
 0xb10   :  { %8414 = vmatprep.subr.bf16.mxu0 %v20119_v62  ;;  %v20191_v62 = vld [vmem:[#allocation23 + $0xf4] ss:$8 sps:$4 sm:$0xff]  }
 0xb13   :  { %8415 = vmatpush1.bf16.msra.mxu0 %v20117_v13  ;;  %v20189_v13 = vld [vmem:[#allocation23 + $0xf0] ss:$8 sps:$4 sm:$0xff]  }
 0xb14   :  { %8416 = vmatprep.subr.bf16.mxu0 %v20122_v48  ;;  %v20194_v48 = vld [vmem:[#allocation23 + $0x104] ss:$8 sps:$4 sm:$0xff]  }
 0xb17   :  { %8417 = vmatpush1.bf16.msra.mxu0 %v20120_v0  ;;  %v20192_v0 = vld [vmem:[#allocation23 + $0x100] ss:$8 sps:$4 sm:$0xff]  }
 0xb18   :  { %8418 = vmatprep.subr.bf16.mxu0 %v20125_v2  ;;  %v20197_v2 = vld [vmem:[#allocation23 + $0x114] ss:$8 sps:$4 sm:$0xff]  }
 0xb1b   :  { %8419 = vmatpush1.bf16.msra.mxu0 %v20123_v3  ;;  %v20195_v3 = vld [vmem:[#allocation23 + $0x110] ss:$8 sps:$4 sm:$0xff]  }
 0xb1c   :  { %8420 = vmatprep.subr.bf16.mxu0 %v20128_v20  ;;  %v20200_v20 = vld [vmem:[#allocation23 + $0x124] ss:$8 sps:$4 sm:$0xff]  }
 0xb1f   :  { %8421 = vmatpush1.bf16.msra.mxu0 %v20126_v7  ;;  %v20198_v7 = vld [vmem:[#allocation23 + $0x120] ss:$8 sps:$4 sm:$0xff]  }
 0xb20   :  { %8422 = vmatprep.subr.bf16.mxu0 %v20131_v8  ;;  %v20203_v8 = vld [vmem:[#allocation23 + $0x134] ss:$8 sps:$4 sm:$0xff]  }
 0xb23   :  { %8423 = vmatpush1.bf16.msra.mxu0 %v20129_v10  ;;  %v20201_v10 = vld [vmem:[#allocation23 + $0x130] ss:$8 sps:$4 sm:$0xff]  }
 0xb24   :  { %8424 = vmatprep.subr.bf16.mxu0 %v20134_v42  ;;  %v20206_v42 = vld [vmem:[#allocation23 + $0x144] ss:$8 sps:$4 sm:$0xff]  }
 0xb27   :  { %8425 = vmatpush1.bf16.msra.mxu0 %v20132_v40  ;;  %v20204_v40 = vld [vmem:[#allocation23 + $0x140] ss:$8 sps:$4 sm:$0xff]  }
 0xb28   :  { %8426 = vmatprep.subr.bf16.mxu0 %v20137_v26  ;;  %v20209_v26 = vld [vmem:[#allocation23 + $0x154] ss:$8 sps:$4 sm:$0xff]  }
 0xb2b   :  { %8427 = vmatpush1.bf16.msra.mxu0 %v20135_v27  ;;  %v20212_v27 = vld [vmem:[#allocation23 + $0x164] ss:$8 sps:$4 sm:$0xff]  }
 0xb2c   :  { %8428 = vmatprep.subr.bf16.mxu0 %v20140_v31 }
 0xb2f   :  { %8429 = vmatpush1.bf16.msra.mxu0 %v20138_v29  ;;  %v20210_v29 = vld [vmem:[#allocation23 + $0x160] ss:$8 sps:$4 sm:$0xff]  }
 0xb30   :  { %8430 = vmatprep.subr.bf16.mxu0 %v20143_v9  ;;  %v20215_v9 = vld [vmem:[#allocation23 + $0x174] ss:$8 sps:$4 sm:$0xff]  }
 0xb33   :  { %8431 = vmatpush1.bf16.msra.mxu0 %v20141_v6 }
 0xb34   :  { %8763 = vmatprep.subr.bf16.mxu0 %v20146_v49 }
 0xb36   :  { %8433 = vmatmul.mubr.bf16.vlgmr.msra.gmra.mrb[60].mxu0 %v23377_v23  ;;  %v20159_v23 = vld [vmem:[#allocation23 + $0x50] ss:$8 sps:$4 sm:$0xff]  }
 0xb37   :  { %8764 = vmatpush1.bf16.msra.mxu0 %v20144_v33  ;;  %8795 = vmatprep.mubr.bf16.mxu0 %v23208_v15  ;;  %v20162_v15 = vld [vmem:[#allocation23 + $0x60] ss:$8 sps:$4 sm:$0xff]  }
 0xb38   :  { %8765 = vmatprep.subr.bf16.mxu0 %v20149_v38 }
 0xb3b   :  { %8766 = vmatpush1.bf16.msra.mxu0 %v20147_v41  ;;  %v20213_v41 = vld [vmem:[#allocation23 + $0x170] ss:$8 sps:$4 sm:$0xff]  }
 0xb3c   :  { %8767 = vmatprep.subr.bf16.mxu0 %v20152_v19  ;;  %v20218_v19 = vld [vmem:[#allocation23 + $0x184] ss:$8 sps:$4 sm:$0xff]  }
 0xb3f   :  { %8768 = vmatpush1.bf16.msra.mxu0 %v20150_v51  ;;  %v20216_v51 = vld [vmem:[#allocation23 + $0x180] ss:$8 sps:$4 sm:$0xff]  }
 0xb40   :  { %8769 = vmatprep.subr.bf16.mxu0 %v20155_v16  ;;  %v20221_v16 = vld [vmem:[#allocation23 + $0x194] ss:$8 sps:$4 sm:$0xff]  }
 0xb43   :  { %8770 = vmatpush1.bf16.msra.mxu0 %v20153_v50  ;;  %v20219_v50 = vld [vmem:[#allocation23 + $0x190] ss:$8 sps:$4 sm:$0xff]  }
 0xb44   :  { %8771 = vmatprep.subr.bf16.mxu0 %v20158_v58  ;;  %v20224_v58 = vld [vmem:[#allocation23 + $0x1a4] ss:$8 sps:$4 sm:$0xff]  }
 0xb47   :  { %8772 = vmatpush1.bf16.msra.mxu0 %v20156_v22  ;;  %v20222_v22 = vld [vmem:[#allocation23 + $0x1a0] ss:$8 sps:$4 sm:$0xff]  }
 0xb48   :  { %8773 = vmatprep.subr.bf16.mxu0 %v20161_v53  ;;  %v20227_v53 = vld [vmem:[#allocation23 + $0x1b4] ss:$8 sps:$4 sm:$0xff]  }
 0xb4b   :  { %8774 = vmatpush1.bf16.msra.mxu0 %v20159_v23  ;;  %v20225_v23 = vld [vmem:[#allocation23 + $0x1b0] ss:$8 sps:$4 sm:$0xff]  }
 0xb4c   :  { %8775 = vmatprep.subr.bf16.mxu0 %v20164_v54  ;;  %v20230_v54 = vld [vmem:[#allocation23 + $0x1c4] ss:$8 sps:$4 sm:$0xff]  }
 0xb4f   :  { %8776 = vmatpush1.bf16.msra.mxu0 %v20162_v15  ;;  %v20228_v15 = vld [vmem:[#allocation23 + $0x1c0] ss:$8 sps:$4 sm:$0xff]  }
 0xb50   :  { %8777 = vmatprep.subr.bf16.mxu0 %v20167_v46  ;;  %v20233_v46 = vld [vmem:[#allocation23 + $0x1d4] ss:$8 sps:$4 sm:$0xff]  }
 0xb53   :  { %8778 = vmatpush1.bf16.msra.mxu0 %v20165_v47  ;;  %v20231_v47 = vld [vmem:[#allocation23 + $0x1d0] ss:$8 sps:$4 sm:$0xff]  }
 0xb54   :  { %8779 = vmatprep.subr.bf16.mxu0 %v20170_v39  ;;  %v20236_v39 = vld [vmem:[#allocation23 + $0x1e4] ss:$8 sps:$4 sm:$0xff]  }
 0xb57   :  { %8780 = vmatpush1.bf16.msra.mxu0 %v20168_v43  ;;  %v20234_v43 = vld [vmem:[#allocation23 + $0x1e0] ss:$8 sps:$4 sm:$0xff]  }
 0xb58   :  { %8781 = vmatprep.subr.bf16.mxu0 %v20173_v63  ;;  %v20239_v63 = vld [vmem:[#allocation23 + $0x1f4] ss:$8 sps:$4 sm:$0xff]  }
 0xb5b   :  { %8782 = vmatpush1.bf16.msra.mxu0 %v20171_v18  ;;  %v20237_v18 = vld [vmem:[#allocation23 + $0x1f0] ss:$8 sps:$4 sm:$0xff]  }
 0xb5c   :  { %8783 = vmatprep.subr.bf16.mxu0 %v20176_v55  ;;  %v20242_v55 = vld [vmem:[%s24107_s12 + $0x4] ss:$8 sps:$4 sm:$0xff]  }
 0xb5f   :  { %8784 = vmatpush1.bf16.msra.mxu0 %v20174_v59  ;;  %v20240_v59 = vld [vmem:[%s24107_s12] ss:$8 sps:$4 sm:$0xff]  }
 0xb60   :  { %8785 = vmatprep.subr.bf16.mxu0 %v20179_v52  ;;  %v20245_v52 = vld [vmem:[%s24107_s12 + $0x14] ss:$8 sps:$4 sm:$0xff]  }
 0xb63   :  { %8786 = vmatpush1.bf16.msra.mxu0 %v20177_v44  ;;  %v20243_v44 = vld [vmem:[%s24107_s12 + $0x10] ss:$8 sps:$4 sm:$0xff]  }
 0xb64   :  { %8787 = vmatprep.subr.bf16.mxu0 %v20182_v28  ;;  %v20248_v28 = vld [vmem:[%s24107_s12 + $0x24] ss:$8 sps:$4 sm:$0xff]  }
 0xb67   :  { %8788 = vmatpush1.bf16.msra.mxu0 %v20180_v24  ;;  %v20246_v24 = vld [vmem:[%s24107_s12 + $0x20] ss:$8 sps:$4 sm:$0xff]  }
 0xb68   :  { %8789 = vmatprep.subr.bf16.mxu0 %v20185_v57  ;;  %v20251_v57 = vld [vmem:[%s24107_s12 + $0x34] ss:$8 sps:$4 sm:$0xff]  }
 0xb6b   :  { %8790 = vmatpush1.bf16.msra.mxu0 %v20183_v61  ;;  %v20249_v61 = vld [vmem:[%s24107_s12 + $0x30] ss:$8 sps:$4 sm:$0xff]  }
 0xb6c   :  { %8791 = vmatprep.subr.bf16.mxu0 %v20188_v45  ;;  %v20254_v45 = vld [vmem:[%s24107_s12 + $0x44] ss:$8 sps:$4 sm:$0xff]  }
 0xb6f   :  { %8792 = vmatpush1.bf16.msra.mxu0 %v20186_v14  ;;  %v20257_v14 = vld [vmem:[%s24107_s12 + $0x54] ss:$8 sps:$4 sm:$0xff]  }
 0xb70   :  { %8793 = vmatprep.subr.bf16.mxu0 %v20191_v62  ;;  %v20255_v62 = vld [vmem:[%s24107_s12 + $0x50] ss:$8 sps:$4 sm:$0xff]  }
 0xb73   :  { %8794 = vmatpush1.bf16.msra.mxu0 %v20189_v13  ;;  %v20260_v13 = vld [vmem:[%s24107_s12 + $0x64] ss:$8 sps:$4 sm:$0xff]  }
 0xb74   :  { %8806 = vmatprep.subr.bf16.mxu0 %v20194_v48 }
 0xb76   :  { %8796 = vmatmul.mubr.bf16.vlgmr.msra.gmra.mrb[60].mxu0 %v23203_v11  ;;  %v20207_v11 = vld [vmem:[#allocation23 + $0x150] ss:$8 sps:$4 sm:$0xff]  }
 0xb77   :  { %8807 = vmatpush1.bf16.msra.mxu0 %v20192_v0  ;;  %8838 = vmatprep.mubr.bf16.mxu0 %v23210_v17 }
 0xb78   :  { %8808 = vmatprep.subr.bf16.mxu0 %v20197_v2  ;;  %v20258_v2 = vld [vmem:[%s24107_s12 + $0x60] ss:$8 sps:$4 sm:$0xff]  }
 0xb7b   :  { %8809 = vmatpush1.bf16.msra.mxu0 %v20195_v3  ;;  %v20263_v3 = vld [vmem:[%s24107_s12 + $0x74] ss:$8 sps:$4 sm:$0xff]  }
 0xb7c   :  { %8810 = vmatprep.subr.bf16.mxu0 %v20200_v20 }
 0xb7f   :  { %8811 = vmatpush1.bf16.msra.mxu0 %v20198_v7 }
 0xb80   :  { %8812 = vmatprep.subr.bf16.mxu0 %v20203_v8 }
 0xb83   :  { %8813 = vmatpush1.bf16.msra.mxu0 %v20201_v10 }
 0xb84   :  { %8814 = vmatprep.subr.bf16.mxu0 %v20206_v42  ;;  %v20261_v42 = vld [vmem:[%s24107_s12 + $0x70] ss:$8 sps:$4 sm:$0xff]  }
 0xb87   :  { %8815 = vmatpush1.bf16.msra.mxu0 %v20204_v40  ;;  %v20266_v40 = vld [vmem:[%s24107_s12 + $0x84] ss:$8 sps:$4 sm:$0xff]  }
 0xb88   :  { %8816 = vmatprep.subr.bf16.mxu0 %v20209_v26  ;;  %v20264_v26 = vld [vmem:[%s24107_s12 + $0x80] ss:$8 sps:$4 sm:$0xff]  }
 0xb89   :  { %v23502_v17 = vpop.f32.mrb[38].mxu0 }
 0xb8a   :  { %v7943_v31 = vpop.f32.mrb[39].mxu0 }
 0xb8b   :  { %8817 = vmatpush1.bf16.msra.mxu0 %v20207_v11  ;;  %v20269_v11 = vld [vmem:[%s24107_s12 + $0x94] ss:$8 sps:$4 sm:$0xff]  }
 0xb8c   :  { %8818 = vmatprep.subr.bf16.mxu0 %v20212_v27  ;;  %v20267_v27 = vld [vmem:[%s24107_s12 + $0x90] ss:$8 sps:$4 sm:$0xff]  }
 0xb8d   :  { %v23504_v6 = vpop.f32.mrb[56].mxu0 }
 0xb8e   :  { %v8849_v49 = vpack.c.bf16 %v23504_v6, %v23502_v17  ;;  %v7949_v33 = vpop.f32.mrb[57].mxu0  ;;  %v20302_v17 = vld [vmem:[%s24107_s12 + $0x144] ss:$8 sps:$4 sm:$0xff]   ;;  %v20300_v6 = vld [vmem:[%s24107_s12 + $0x140] ss:$8 sps:$4 sm:$0xff]  }
 0xb8f   :  { %v8850_v38 = vpack.c.bf16 %v7949_v33, %v7943_v31  ;;  %8819 = vmatpush1.bf16.msra.mxu0 %v20210_v29  ;;  %v20272_v31 = vld [vmem:[%s24107_s12 + $0xa4] ss:$8 sps:$4 sm:$0xff]   ;;  %v20270_v29 = vld [vmem:[%s24107_s12 + $0xa0] ss:$8 sps:$4 sm:$0xff]   ;;  %v20273_v33 = vld [vmem:[%s24107_s12 + $0xb0] ss:$8 sps:$4 sm:$0xff]  }
 0xb90   :  { %8820 = vmatprep.subr.bf16.mxu0 %v20215_v9  ;;  %v20275_v9 = vld [vmem:[%s24107_s12 + $0xb4] ss:$8 sps:$4 sm:$0xff]  }
 0xb93   :  { %8821 = vmatpush1.bf16.msra.mxu0 %v20213_v41  ;;  %v20276_v41 = vld [vmem:[%s24107_s12 + $0xc0] ss:$8 sps:$4 sm:$0xff]  }
 0xb94   :  { %8822 = vmatprep.subr.bf16.mxu0 %v20218_v19  ;;  %v20281_v19 = vld [vmem:[%s24107_s12 + $0xd4] ss:$8 sps:$4 sm:$0xff]  }
 0xb97   :  { %8823 = vmatpush1.bf16.msra.mxu0 %v20216_v51  ;;  %v20279_v51 = vld [vmem:[%s24107_s12 + $0xd0] ss:$8 sps:$4 sm:$0xff]  }
 0xb98   :  { %8824 = vmatprep.subr.bf16.mxu0 %v20221_v16  ;;  %v20284_v16 = vld [vmem:[%s24107_s12 + $0xe4] ss:$8 sps:$4 sm:$0xff]  }
 0xb9b   :  { %8825 = vmatpush1.bf16.msra.mxu0 %v20219_v50  ;;  %v20282_v50 = vld [vmem:[%s24107_s12 + $0xe0] ss:$8 sps:$4 sm:$0xff]  }
 0xb9c   :  { %8826 = vmatprep.subr.bf16.mxu0 %v20224_v58  ;;  %v20287_v58 = vld [vmem:[%s24107_s12 + $0xf4] ss:$8 sps:$4 sm:$0xff]  }
 0xb9f   :  { %8827 = vmatpush1.bf16.msra.mxu0 %v20222_v22  ;;  %v20285_v22 = vld [vmem:[%s24107_s12 + $0xf0] ss:$8 sps:$4 sm:$0xff]  }
 0xba0   :  { %8828 = vmatprep.subr.bf16.mxu0 %v20227_v53  ;;  %v20290_v53 = vld [vmem:[%s24107_s12 + $0x104] ss:$8 sps:$4 sm:$0xff]  }
 0xba3   :  { %8829 = vmatpush1.bf16.msra.mxu0 %v20225_v23  ;;  %v20288_v23 = vld [vmem:[%s24107_s12 + $0x100] ss:$8 sps:$4 sm:$0xff]  }
 0xba4   :  { %8830 = vmatprep.subr.bf16.mxu0 %v20230_v54  ;;  %v20293_v54 = vld [vmem:[%s24107_s12 + $0x114] ss:$8 sps:$4 sm:$0xff]  }
 0xba7   :  { %8831 = vmatpush1.bf16.msra.mxu0 %v20228_v15  ;;  %v20291_v15 = vld [vmem:[%s24107_s12 + $0x110] ss:$8 sps:$4 sm:$0xff]  }
 0xba8   :  { %8832 = vmatprep.subr.bf16.mxu0 %v20233_v46  ;;  %v20296_v46 = vld [vmem:[%s24107_s12 + $0x124] ss:$8 sps:$4 sm:$0xff]  }
 0xbab   :  { %8833 = vmatpush1.bf16.msra.mxu0 %v20231_v47  ;;  %v20294_v47 = vld [vmem:[%s24107_s12 + $0x120] ss:$8 sps:$4 sm:$0xff]  }
 0xbac   :  { %8834 = vmatprep.subr.bf16.mxu0 %v20236_v39  ;;  %v20299_v39 = vld [vmem:[%s24107_s12 + $0x134] ss:$8 sps:$4 sm:$0xff]  }
 0xbaf   :  { %8835 = vmatpush1.bf16.msra.mxu0 %v20234_v43  ;;  %v20297_v43 = vld [vmem:[%s24107_s12 + $0x130] ss:$8 sps:$4 sm:$0xff]  }
 0xbb0   :  { %8836 = vmatprep.subr.bf16.mxu0 %v20239_v63  ;;  %v20303_v63 = vld [vmem:[%s24107_s12 + $0x150] ss:$8 sps:$4 sm:$0xff]  }
 0xbb3   :  { %8837 = vmatpush1.bf16.msra.mxu0 %v20237_v18  ;;  %v20308_v18 = vld [vmem:[%s24107_s12 + $0x164] ss:$8 sps:$4 sm:$0xff]  }
 0xbb4   :  { %9173 = vmatprep.subr.bf16.mxu0 %v20242_v55  ;;  %v20306_v55 = vld [vmem:[%s24107_s12 + $0x160] ss:$8 sps:$4 sm:$0xff]  }
 0xbb6   :  { %8839 = vmatmul.mubr.bf16.vlgmr.msra.gmra.mrb[60].mxu0 %v23205_v12  ;;  %v20252_v12 = vld [vmem:[%s24107_s12 + $0x40] ss:$8 sps:$4 sm:$0xff]  }
 0xbb7   :  { %9174 = vmatpush1.bf16.msra.mxu0 %v20240_v59  ;;  %9205 = vmatprep.mubr.bf16.mxu0 %v8850_v38  ;;  %v20278_v38 = vld [vmem:[%s24107_s12 + $0xc4] ss:$8 sps:$4 sm:$0xff]   ;;  %v20311_v59 = vld [vmem:[%s24107_s12 + $0x174] ss:$8 sps:$4 sm:$0xff]  }
 0xbb8   :  { %9175 = vmatprep.subr.bf16.mxu0 %v20245_v52  ;;  %v20309_v52 = vld [vmem:[%s24107_s12 + $0x170] ss:$8 sps:$4 sm:$0xff]  }
 0xbbb   :  { %9176 = vmatpush1.bf16.msra.mxu0 %v20243_v44  ;;  %v20314_v44 = vld [vmem:[%s24107_s12 + $0x184] ss:$8 sps:$4 sm:$0xff]  }
 0xbbc   :  { %9177 = vmatprep.subr.bf16.mxu0 %v20248_v28  ;;  %v20312_v28 = vld [vmem:[%s24107_s12 + $0x180] ss:$8 sps:$4 sm:$0xff]  }
 0xbbf   :  { %9178 = vmatpush1.bf16.msra.mxu0 %v20246_v24  ;;  %v20317_v24 = vld [vmem:[%s24107_s12 + $0x194] ss:$8 sps:$4 sm:$0xff]  }
 0xbc0   :  { %9179 = vmatprep.subr.bf16.mxu0 %v20251_v57  ;;  %v20315_v57 = vld [vmem:[%s24107_s12 + $0x190] ss:$8 sps:$4 sm:$0xff]  }
 0xbc3   :  { %9180 = vmatpush1.bf16.msra.mxu0 %v20249_v61  ;;  %v20320_v61 = vld [vmem:[%s24107_s12 + $0x1a4] ss:$8 sps:$4 sm:$0xff]  }
 0xbc4   :  { %9181 = vmatprep.subr.bf16.mxu0 %v20254_v45  ;;  %v20318_v45 = vld [vmem:[%s24107_s12 + $0x1a0] ss:$8 sps:$4 sm:$0xff]  }
 0xbc7   :  { %9182 = vmatpush1.bf16.msra.mxu0 %v20252_v12  ;;  %v20323_v12 = vld [vmem:[%s24107_s12 + $0x1b4] ss:$8 sps:$4 sm:$0xff]  }
 0xbc8   :  { %9183 = vmatprep.subr.bf16.mxu0 %v20257_v14  ;;  %v20321_v14 = vld [vmem:[%s24107_s12 + $0x1b0] ss:$8 sps:$4 sm:$0xff]  }
 0xbc9   :  { %v23522_v48 = vpop.f32.mrb[34].mxu1 }
 0xbca   :  { %v8020_v0 = vpop.f32.mrb[35].mxu1 }
 0xbcb   :  { %9184 = vmatpush1.bf16.msra.mxu0 %v20255_v62  ;;  %v20326_v62 = vld [vmem:[%s24107_s12 + $0x1c4] ss:$8 sps:$4 sm:$0xff]  }
 0xbcc   :  { %9185 = vmatprep.subr.bf16.mxu0 %v20260_v13  ;;  %v20324_v13 = vld [vmem:[%s24107_s12 + $0x1c0] ss:$8 sps:$4 sm:$0xff]  }
 0xbcd   :  { %v23526_v20 = vpop.f32.mrb[52].mxu1 }
 0xbce   :  { %v8851_v7 = vpack.c.bf16 %v23526_v20, %v23522_v48  ;;  %v8026_v8 = vpop.f32.mrb[53].mxu1 }
 0xbcf   :  { %v8852_v10 = vpack.c.bf16 %v8026_v8, %v8020_v0  ;;  %9186 = vmatpush1.bf16.msra.mxu0 %v20258_v2  ;;  %v20329_v0 = vld [vmem:[%s24107_s12 + $0x1d4] ss:$8 sps:$4 sm:$0xff]   ;;  %v20327_v2 = vld [vmem:[%s24107_s12 + $0x1d0] ss:$8 sps:$4 sm:$0xff]   ;;  %v20330_v8 = vld [vmem:[%s24107_s12 + $0x1e0] ss:$8 sps:$4 sm:$0xff]  }
 0xbd0   :  { %9187 = vmatprep.subr.bf16.mxu0 %v20263_v3  ;;  %v20332_v3 = vld [vmem:[%s24107_s12 + $0x1e4] ss:$8 sps:$4 sm:$0xff]  }
 0xbd3   :  { %9188 = vmatpush1.bf16.msra.mxu0 %v20261_v42  ;;  %v20333_v42 = vld [vmem:[%s24107_s12 + $0x1f0] ss:$8 sps:$4 sm:$0xff]  }
 0xbd4   :  { %9189 = vmatprep.subr.bf16.mxu0 %v20266_v40  ;;  %v1501_v40 = vld [vmem:[#allocation26] sm:$0x3] }
 0xbd7   :  { %9190 = vmatpush1.bf16.msra.mxu0 %v20264_v26  ;;  %v9267_v26 = vrot.slane %v1501_v40, %v23172_v34 }
 0xbd8   :  { %9191 = vmatprep.subr.bf16.mxu0 %v20269_v11  ;;  %v9271_v11 = vrot.slane %v1501_v40, %v23175_v35  ;;  %v20376_v40 = vld [vmem:[#allocation27 + $0x184] ss:$16 sps:$4 sm:$0xff]  }
 0xbdb   :  { %9192 = vmatpush1.bf16.msra.mxu0 %v20267_v27 }
 0xbdc   :  { %9193 = vmatprep.subr.bf16.mxu0 %v20272_v31 }
 0xbdf   :  { %9194 = vmatpush1.bf16.msra.mxu0 %v20270_v29 }
 0xbe0   :  { %9195 = vmatprep.subr.bf16.mxu0 %v20275_v9 }
 0xbe3   :  { %9196 = vmatpush1.bf16.msra.mxu0 %v20273_v33 }
 0xbe4   :  { %9197 = vmatprep.subr.bf16.mxu0 %v20278_v38 }
 0xbe7   :  { %9198 = vmatpush1.bf16.msra.mxu0 %v20276_v41 }
 0xbe8   :  { %9199 = vmatprep.subr.bf16.mxu0 %v20281_v19 }
 0xbeb   :  { %9200 = vmatpush1.bf16.msra.mxu0 %v20279_v51 }
 0xbec   :  { %9201 = vmatprep.subr.bf16.mxu0 %v20284_v16 }
 0xbef   :  { %9202 = vmatpush1.bf16.msra.mxu0 %v20282_v50 }
 0xbf0   :  { %9203 = vmatprep.subr.bf16.mxu0 %v20287_v58 }
 0xbf3   :  { %9204 = vmatpush1.bf16.msra.mxu0 %v20285_v22 }
 0xbf4   :  { %9216 = vmatprep.subr.bf16.mxu0 %v20290_v53 }
 0xbf6   :  { %9206 = vmatmul.mubr.bf16.vlgmr.msra.gmra.mrb[60].mxu0 %v8849_v49  ;;  %v20305_v49 = vld [vmem:[%s24107_s12 + $0x154] ss:$8 sps:$4 sm:$0xff]  }
 0xbf7   :  { %9217 = vmatpush1.bf16.msra.mxu0 %v20288_v23  ;;  %9248 = vmatprep.mubr.bf16.mxu0 %v8852_v10  ;;  %v20335_v10 = vld [vmem:[%s24107_s12 + $0x1f4] ss:$8 sps:$4 sm:$0xff]  }
 0xbf8   :  { %9218 = vmatprep.subr.bf16.mxu0 %v20293_v54 }
 0xbfb   :  { %9219 = vmatpush1.bf16.msra.mxu0 %v20291_v15 }
 0xbfc   :  { %9220 = vmatprep.subr.bf16.mxu0 %v20296_v46  ;;  %v1567_v46 = vld [vmem:[#allocation29 + $0x8] sm:$0xff] }
 0xbff   :  { %9221 = vmatpush1.bf16.msra.mxu0 %v20294_v47  ;;  %v647_v47 = vld [vmem:[%s24108_s4] sm:$0xf] }
 0xc00   :  { %9222 = vmatprep.subr.bf16.mxu0 %v20299_v39  ;;  %v9369_v39 = vcombine.high %v1567_v46, %v1567_v46 }
 0xc03   :  { %9223 = vmatpush1.bf16.msra.mxu0 %v20297_v43  ;;  %v648_v43 = vld [vmem:[%s24109_s18] sm:$0xf] }
 0xc04   :  { %9224 = vmatprep.subr.bf16.mxu0 %v20302_v17  ;;  %v20340_v17 = vld [vmem:[#allocation27 + $0x4] ss:$16 sps:$4 sm:$0xff]  }
 0xc07   :  { %9225 = vmatpush1.bf16.msra.mxu0 %v20300_v6  ;;  %v20338_v6 = vld [vmem:[#allocation27] ss:$16 sps:$4 sm:$0xff]  }
 0xc08   :  { %9226 = vmatprep.subr.bf16.mxu0 %v20305_v49  ;;  %v20343_v49 = vld [vmem:[#allocation27 + $0x24] ss:$16 sps:$4 sm:$0xff]  }
 0xc0b   :  { %9227 = vmatpush1.bf16.msra.mxu0 %v20303_v63  ;;  %v20341_v63 = vld [vmem:[#allocation27 + $0x20] ss:$16 sps:$4 sm:$0xff]  }
 0xc0c   :  { %9228 = vmatprep.subr.bf16.mxu0 %v20308_v18  ;;  %v20346_v18 = vld [vmem:[#allocation27 + $0x44] ss:$16 sps:$4 sm:$0xff]  }
 0xc0f   :  { %9229 = vmatpush1.bf16.msra.mxu0 %v20306_v55  ;;  %v20344_v55 = vld [vmem:[#allocation27 + $0x40] ss:$16 sps:$4 sm:$0xff]  }
 0xc10   :  { %9230 = vmatprep.subr.bf16.mxu0 %v20311_v59  ;;  %v20349_v59 = vld [vmem:[#allocation27 + $0x64] ss:$16 sps:$4 sm:$0xff]  }
 0xc13   :  { %9231 = vmatpush1.bf16.msra.mxu0 %v20309_v52  ;;  %v20347_v52 = vld [vmem:[#allocation27 + $0x60] ss:$16 sps:$4 sm:$0xff]  }
 0xc14   :  { %9232 = vmatprep.subr.bf16.mxu0 %v20314_v44  ;;  %v20352_v44 = vld [vmem:[#allocation27 + $0x84] ss:$16 sps:$4 sm:$0xff]  }
 0xc17   :  { %9233 = vmatpush1.bf16.msra.mxu0 %v20312_v28  ;;  %v20350_v28 = vld [vmem:[#allocation27 + $0x80] ss:$16 sps:$4 sm:$0xff]  }
 0xc18   :  { %9234 = vmatprep.subr.bf16.mxu0 %v20317_v24  ;;  %v20355_v24 = vld [vmem:[#allocation27 + $0xa4] ss:$16 sps:$4 sm:$0xff]  }
 0xc1b   :  { %9235 = vmatpush1.bf16.msra.mxu0 %v20315_v57  ;;  %v20353_v57 = vld [vmem:[#allocation27 + $0xa0] ss:$16 sps:$4 sm:$0xff]  }
 0xc1c   :  { %9236 = vmatprep.subr.bf16.mxu0 %v20320_v61  ;;  %v20358_v61 = vld [vmem:[#allocation27 + $0xc4] ss:$16 sps:$4 sm:$0xff]  }
 0xc1f   :  { %9237 = vmatpush1.bf16.msra.mxu0 %v20318_v45  ;;  %v20356_v45 = vld [vmem:[#allocation27 + $0xc0] ss:$16 sps:$4 sm:$0xff]  }
 0xc20   :  { %9238 = vmatprep.subr.bf16.mxu0 %v20323_v12  ;;  %v20361_v12 = vld [vmem:[#allocation27 + $0xe4] ss:$16 sps:$4 sm:$0xff]  }
 0xc23   :  { %9239 = vmatpush1.bf16.msra.mxu0 %v20321_v14  ;;  %v20359_v14 = vld [vmem:[#allocation27 + $0xe0] ss:$16 sps:$4 sm:$0xff]  }
 0xc24   :  { %9240 = vmatprep.subr.bf16.mxu0 %v20326_v62  ;;  %v20364_v62 = vld [vmem:[#allocation27 + $0x104] ss:$16 sps:$4 sm:$0xff]  }
 0xc27   :  { %9241 = vmatpush1.bf16.msra.mxu0 %v20324_v13  ;;  %v20362_v13 = vld [vmem:[#allocation27 + $0x100] ss:$16 sps:$4 sm:$0xff]  }
 0xc28   :  { %9242 = vmatprep.subr.bf16.mxu0 %v20329_v0  ;;  %v20367_v0 = vld [vmem:[#allocation27 + $0x124] ss:$16 sps:$4 sm:$0xff]  }
 0xc2b   :  { %9243 = vmatpush1.bf16.msra.mxu0 %v20327_v2  ;;  %v20365_v2 = vld [vmem:[#allocation27 + $0x120] ss:$16 sps:$4 sm:$0xff]  }
 0xc2c   :  { %9244 = vmatprep.subr.bf16.mxu0 %v20332_v3  ;;  %v20370_v3 = vld [vmem:[#allocation27 + $0x144] ss:$16 sps:$4 sm:$0xff]  }
 0xc2f   :  { %9245 = vmatpush1.bf16.msra.mxu0 %v20330_v8  ;;  %v20368_v8 = vld [vmem:[#allocation27 + $0x140] ss:$16 sps:$4 sm:$0xff]  }
 0xc30   :  { %9246 = vmatprep.subr.bf16.mxu0 %v20335_v10  ;;  %v20373_v10 = vld [vmem:[#allocation27 + $0x164] ss:$16 sps:$4 sm:$0xff]  }
 0xc33   :  { %9247 = vmatpush1.bf16.msra.mxu0 %v20333_v42  ;;  %v20371_v42 = vld [vmem:[#allocation27 + $0x160] ss:$16 sps:$4 sm:$0xff]  }
 0xc36   :  { %9249 = vmatmul.mubr.bf16.vlgmr.msra.gmra.mrb[60].mxu0 %v8851_v7  ;;  %v1566_v7 = vld [vmem:[#allocation29] sm:$0xff] }
 0xc37   :  { %10910 = vmatprep.mubr.f32.mxu0 %v22620_v1  ;;  %v9368_v15 = vcombine.high %v1566_v7, %v1566_v7 }
 0xd09   :  { %v9250_v27 = vpop.f32.mrb[60].mxu0 }
 0xd0a   :  { %v9274_v31 = vadd.f32 %v9267_v26, %v9250_v27  ;;  %v9252_v29 = vpop.f32.mrb[61].mxu0  ;;  %v20377_v27 = vld [vmem:[#allocation27 + $0x1a0] ss:$16 sps:$4 sm:$0xff]  }
 0xd0b   :  { %v9275_v9 = vadd.f32 %v9271_v11, %v9252_v29  ;;  %v9254_v33 = vpop.f32.mrb[62].mxu0  ;;  %v20380_v29 = vld [vmem:[#allocation27 + $0x1c0] ss:$16 sps:$4 sm:$0xff]  }
 0xd0c   :  { %v9282_v38 = vmul.f32 0.1, %v9274_v31  ;;  %v9276_v41 = vadd.f32 %v9267_v26, %v9254_v33  ;;  %v9256_v19 = vpop.f32.mrb[63].mxu0  ;;  %vm9278_vm4 = vcmp.gt.f32.partialorder %v9274_v31, 0.0  ;;  %v20374_v26 = vld [vmem:[#allocation27 + $0x180] ss:$16 sps:$4 sm:$0xff]  }
 0xd0d   :  { %v9283_v51 = vmul.f32 0.1, %v9275_v9  ;;  %v9277_v16 = vadd.f32 %v9271_v11, %v9256_v19  ;;  %vm9279_vm11 = vcmp.gt.f32.partialorder %v9275_v9, 0.0  ;;  %v20379_v11 = vld [vmem:[#allocation27 + $0x1a4] ss:$16 sps:$4 sm:$0xff]  }
 0xd0e   :  { %vm9280_vm12 = vcmp.gt.f32.partialorder %v9276_v41, 0.0  ;;  %v9284_v48 = vmul.f32 0.1, %v9276_v41  ;;  %v9286_v50 = vsel %vm9278_vm4, %v9274_v31, %v9282_v38  ;;  %v20382_v31 = vld [vmem:[#allocation27 + $0x1c4] ss:$16 sps:$4 sm:$0xff]  }
 0xd0f   :  { %vm9281_vm13 = vcmp.gt.f32.partialorder %v9277_v16, 0.0  ;;  %v9285_v20 = vmul.f32 0.1, %v9277_v16  ;;  %v9287_v53 = vsel %vm9279_vm11, %v9275_v9, %v9283_v51  ;;  %v20385_v9 = vld [vmem:[#allocation27 + $0x1e4] ss:$16 sps:$4 sm:$0xff]  }
 0xd10   :  { %v9288_v58 = vsel %vm9280_vm12, %v9276_v41, %v9284_v48  ;;  %v20383_v33 = vld [vmem:[#allocation27 + $0x1e0] ss:$16 sps:$4 sm:$0xff]   ;;  %v20388_v38 = vld [vmem:[#allocation27 + $0xc] ss:$16 sps:$4 sm:$0xff]   ;;  %vm10824_vm12 = vcmask 27648  }
 0xd11   :  { %v18893_v22 = vpack.c.bf16 %v9288_v58, %v9286_v50  ;;  %v9289_v23 = vsel %vm9281_vm13, %v9277_v16, %v9285_v20  ;;  %v20386_v16 = vld [vmem:[#allocation27 + $0x8] ss:$16 sps:$4 sm:$0xff]   ;;  %v20391_v20 = vld [vmem:[#allocation27 + $0x2c] ss:$16 sps:$4 sm:$0xff]  }
 0xd12   :  { %v18891_v54 = vpack.c.bf16 %v9289_v23, %v9287_v53  ;;  %v20389_v58 = vld [vmem:[#allocation27 + $0x28] ss:$16 sps:$4 sm:$0xff]  }
 0xd14   :  { %18892 = vmatprep.subr.bf16.mxu1 %v18891_v54  ;;  %v20392_v54 = vld [vmem:[#allocation27 + $0x48] ss:$16 sps:$4 sm:$0xff]  }
 0xd15   :  { %18894 = vmatpush1.bf16.msra.mxu1 %v18893_v22  ;;  %v20394_v22 = vld [vmem:[#allocation27 + $0x4c] ss:$16 sps:$4 sm:$0xff]  }
 0xd16   :  { %17830 = vmatprep.subr.msk.mxu1 %vm9374_vm14, %v9368_v15  ;;  %v20397_v15 = vld [vmem:[#allocation27 + $0x6c] ss:$16 sps:$4 sm:$0xff]  }
 0xd18   :  { %17829 = vmatmul.mubr.msk.f32.vlgmr.msra.gmra.mrb[54].mxu1 %vm3569_vm10, %v647_v47  ;;  %v20400_v47 = vld [vmem:[#allocation27 + $0x8c] ss:$16 sps:$4 sm:$0xff]  }
 0xd19   :  { %17831 = vmatpush1.msk.msra.mxu1 %vm9374_vm14, %v1566_v7  ;;  %9447 = vmatprep.mubr.f32.mxu1 %v22620_v1 }
 0xd1a   :  { %17833 = vmatprep.subr.msk.mxu1 %vm9374_vm14, %v9369_v39  ;;  %v20398_v39 = vld [vmem:[#allocation27 + $0x88] ss:$16 sps:$4 sm:$0xff]  }
 0xd1c   :  { %17832 = vmatmul.mubr.msk.f32.vlgmr.msra.gmra.mrb[56].mxu1 %vm9370_vm15, %v648_v43 }
 0xd1d   :  { %17834 = vmatpush1.msk.msra.mxu1 %vm9374_vm14, %v1567_v46  ;;  %9518 = vmatprep.mubr.f32.mxu1 %v22620_v1  ;;  %v20395_v46 = vld [vmem:[#allocation27 + $0x68] ss:$16 sps:$4 sm:$0xff]  }
 0xd1e   :  { %9845 = vmatprep.subr.bf16.mxu1 %v20340_v17  ;;  %v20401_v17 = vld [vmem:[#allocation27 + $0xa8] ss:$16 sps:$4 sm:$0xff]  }
 0xd20   :  { %17835 = vmatmul.mubr.msk.f32.vlgmr.msra.gmra.mrb[58].mxu1 %vm9370_vm15, %v648_v43  ;;  %v20403_v43 = vld [vmem:[#allocation27 + $0xac] ss:$16 sps:$4 sm:$0xff]  }
 0xd21   :  { %9846 = vmatpush1.bf16.msra.mxu1 %v20338_v6  ;;  %v20406_v6 = vld [vmem:[#allocation27 + $0xcc] ss:$16 sps:$4 sm:$0xff]  }
 0xd22   :  { %9847 = vmatprep.subr.bf16.mxu1 %v20343_v49  ;;  %v20404_v49 = vld [vmem:[#allocation27 + $0xc8] ss:$16 sps:$4 sm:$0xff]  }
 0xd25   :  { %9848 = vmatpush1.bf16.msra.mxu1 %v20341_v63  ;;  %v20409_v63 = vld [vmem:[#allocation27 + $0xec] ss:$16 sps:$4 sm:$0xff]  }
 0xd26   :  { %9849 = vmatprep.subr.bf16.mxu1 %v20346_v18  ;;  %v20407_v18 = vld [vmem:[#allocation27 + $0xe8] ss:$16 sps:$4 sm:$0xff]  }
 0xd29   :  { %9850 = vmatpush1.bf16.msra.mxu1 %v20344_v55  ;;  %v20412_v55 = vld [vmem:[#allocation27 + $0x10c] ss:$16 sps:$4 sm:$0xff]  }
 0xd2a   :  { %9851 = vmatprep.subr.bf16.mxu1 %v20349_v59  ;;  %v20410_v59 = vld [vmem:[#allocation27 + $0x108] ss:$16 sps:$4 sm:$0xff]  }
 0xd2d   :  { %9852 = vmatpush1.bf16.msra.mxu1 %v20347_v52  ;;  %v20415_v52 = vld [vmem:[#allocation27 + $0x12c] ss:$16 sps:$4 sm:$0xff]  }
 0xd2e   :  { %9853 = vmatprep.subr.bf16.mxu1 %v20352_v44  ;;  %v20413_v44 = vld [vmem:[#allocation27 + $0x128] ss:$16 sps:$4 sm:$0xff]  }
 0xd31   :  { %9854 = vmatpush1.bf16.msra.mxu1 %v20350_v28  ;;  %v20418_v28 = vld [vmem:[#allocation27 + $0x14c] ss:$16 sps:$4 sm:$0xff]  }
 0xd32   :  { %9855 = vmatprep.subr.bf16.mxu1 %v20355_v24  ;;  %v20416_v24 = vld [vmem:[#allocation27 + $0x148] ss:$16 sps:$4 sm:$0xff]  }
 0xd35   :  { %9856 = vmatpush1.bf16.msra.mxu1 %v20353_v57  ;;  %v20421_v57 = vld [vmem:[#allocation27 + $0x16c] ss:$16 sps:$4 sm:$0xff]  }
 0xd36   :  { %9857 = vmatprep.subr.bf16.mxu1 %v20358_v61  ;;  %v20419_v61 = vld [vmem:[#allocation27 + $0x168] ss:$16 sps:$4 sm:$0xff]  }
 0xd39   :  { %9858 = vmatpush1.bf16.msra.mxu1 %v20356_v45  ;;  %v20424_v45 = vld [vmem:[#allocation27 + $0x18c] ss:$16 sps:$4 sm:$0xff]  }
 0xd3a   :  { %9859 = vmatprep.subr.bf16.mxu1 %v20361_v12  ;;  %v20422_v12 = vld [vmem:[#allocation27 + $0x188] ss:$16 sps:$4 sm:$0xff]  }
 0xd3d   :  { %9860 = vmatpush1.bf16.msra.mxu1 %v20359_v14  ;;  %v20427_v14 = vld [vmem:[#allocation27 + $0x1ac] ss:$16 sps:$4 sm:$0xff]  }
 0xd3e   :  { %9861 = vmatprep.subr.bf16.mxu1 %v20364_v62  ;;  %v20425_v62 = vld [vmem:[#allocation27 + $0x1a8] ss:$16 sps:$4 sm:$0xff]  }
 0xd41   :  { %9862 = vmatpush1.bf16.msra.mxu1 %v20362_v13  ;;  %v20430_v13 = vld [vmem:[#allocation27 + $0x1cc] ss:$16 sps:$4 sm:$0xff]  }
 0xd42   :  { %9863 = vmatprep.subr.bf16.mxu1 %v20367_v0  ;;  %v20428_v0 = vld [vmem:[#allocation27 + $0x1c8] ss:$16 sps:$4 sm:$0xff]  }
 0xd45   :  { %9864 = vmatpush1.bf16.msra.mxu1 %v20365_v2  ;;  %v20433_v2 = vld [vmem:[#allocation27 + $0x1ec] ss:$16 sps:$4 sm:$0xff]  }
 0xd46   :  { %9865 = vmatprep.subr.bf16.mxu1 %v20370_v3  ;;  %v20431_v3 = vld [vmem:[#allocation27 + $0x1e8] ss:$16 sps:$4 sm:$0xff]  }
 0xd49   :  { %9866 = vmatpush1.bf16.msra.mxu1 %v20368_v8  ;;  %v20436_v8 = vld [vmem:[#allocation32 + $0x4] ss:$16 sps:$4 sm:$0xff]  }
 0xd4a   :  { %9867 = vmatprep.subr.bf16.mxu1 %v20373_v10  ;;  %v20434_v10 = vld [vmem:[#allocation32] ss:$16 sps:$4 sm:$0xff]  }
 0xd4d   :  { %9868 = vmatpush1.bf16.msra.mxu1 %v20371_v42  ;;  %v20439_v42 = vld [vmem:[#allocation32 + $0x24] ss:$16 sps:$4 sm:$0xff]  }
 0xd4e   :  { %9869 = vmatprep.subr.bf16.mxu1 %v20376_v40  ;;  %v20437_v40 = vld [vmem:[#allocation32 + $0x20] ss:$16 sps:$4 sm:$0xff]  }
 0xd51   :  { %9870 = vmatpush1.bf16.msra.mxu1 %v20374_v26  ;;  %v20442_v26 = vld [vmem:[#allocation32 + $0x44] ss:$16 sps:$4 sm:$0xff]  }
 0xd52   :  { %9871 = vmatprep.subr.bf16.mxu1 %v20379_v11  ;;  %v20440_v11 = vld [vmem:[#allocation32 + $0x40] ss:$16 sps:$4 sm:$0xff]  }
 0xd55   :  { %9872 = vmatpush1.bf16.msra.mxu1 %v20377_v27  ;;  %v20445_v27 = vld [vmem:[#allocation32 + $0x64] ss:$16 sps:$4 sm:$0xff]  }
 0xd56   :  { %9873 = vmatprep.subr.bf16.mxu1 %v20382_v31  ;;  %v20443_v31 = vld [vmem:[#allocation32 + $0x60] ss:$16 sps:$4 sm:$0xff]  }
 0xd59   :  { %9874 = vmatpush1.bf16.msra.mxu1 %v20380_v29  ;;  %v20448_v29 = vld [vmem:[#allocation32 + $0x84] ss:$16 sps:$4 sm:$0xff]  }
 0xd5a   :  { %9875 = vmatprep.subr.bf16.mxu1 %v20385_v9  ;;  %v20446_v9 = vld [vmem:[#allocation32 + $0x80] ss:$16 sps:$4 sm:$0xff]  }
 0xd5d   :  { %9876 = vmatpush1.bf16.msra.mxu1 %v20383_v33  ;;  %v20451_v33 = vld [vmem:[#allocation32 + $0xa4] ss:$16 sps:$4 sm:$0xff]  }
 0xd5e   :  { %9886 = vmatprep.subr.bf16.mxu1 %v20388_v38  ;;  %v20449_v38 = vld [vmem:[#allocation32 + $0xa0] ss:$16 sps:$4 sm:$0xff]  }
 0xdeb   :  { %v9359_v41 = vpop.f32.mrb[54].mxu1 }
 0xdec   :  { %v9361_v19 = vpop.f32.mrb[55].mxu1  ;;  %v23599_v48 = vpack.c.bf16 %v9359_v41, %v9359_v41  ;;  %v20454_v41 = vld [vmem:[#allocation32 + $0xc4] ss:$16 sps:$4 sm:$0xff]  }
 0xded   :  { %v9365_v51 = vpack.c.bf16 %v9361_v19, %v9361_v19  ;;  %v20452_v19 = vld [vmem:[#allocation32 + $0xc0] ss:$16 sps:$4 sm:$0xff]  }
 0xdef   :  { %9877 = vmatprep.mubr.bf16.mxu1 %v9365_v51  ;;  %v23601_v7 = vpop.f32.mrb[56].mxu1 }
 0xdf0   :  { %9878 = vmatmul.mubr.bf16.vlgmr.msra.gmra.mrb[60].mxu1 %v23599_v48  ;;  %v23604_v50 = vpop.f32.mrb[57].mxu1 }
 0xdf1   :  { %9887 = vmatpush1.bf16.msra.mxu1 %v20386_v16  ;;  %9918 = vmatprep.mubr.bf16.mxu1 %v9365_v51  ;;  %v20457_v51 = vld [vmem:[#allocation32 + $0xe4] ss:$16 sps:$4 sm:$0xff]   ;;  %v20455_v16 = vld [vmem:[#allocation32 + $0xe0] ss:$16 sps:$4 sm:$0xff]  }
 0xdf2   :  { %9888 = vmatprep.subr.bf16.mxu1 %v20391_v20  ;;  %v20458_v20 = vld [vmem:[#allocation32 + $0x100] ss:$16 sps:$4 sm:$0xff]  }
 0xdf3   :  { %v23606_v53 = vpop.f32.mrb[58].mxu1 }
 0xdf4   :  { %v23608_v23 = vpop.f32.mrb[59].mxu1 }
 0xdf5   :  { %9889 = vmatpush1.bf16.msra.mxu1 %v20389_v58  ;;  %v20463_v58 = vld [vmem:[#allocation32 + $0x124] ss:$16 sps:$4 sm:$0xff]  }
 0xdf6   :  { %9890 = vmatprep.subr.bf16.mxu1 %v20394_v22  ;;  %v20461_v22 = vld [vmem:[#allocation32 + $0x120] ss:$16 sps:$4 sm:$0xff]  }
 0xdf9   :  { %9891 = vmatpush1.bf16.msra.mxu1 %v20392_v54  ;;  %v20466_v54 = vld [vmem:[#allocation32 + $0x144] ss:$16 sps:$4 sm:$0xff]  }
 0xdfa   :  { %9892 = vmatprep.subr.bf16.mxu1 %v20397_v15  ;;  %v20464_v15 = vld [vmem:[#allocation32 + $0x140] ss:$16 sps:$4 sm:$0xff]  }
 0xdfd   :  { %9893 = vmatpush1.bf16.msra.mxu1 %v20395_v46  ;;  %v20469_v46 = vld [vmem:[#allocation32 + $0x164] ss:$16 sps:$4 sm:$0xff]  }
 0xdfe   :  { %9894 = vmatprep.subr.bf16.mxu1 %v20400_v47  ;;  %v20467_v47 = vld [vmem:[#allocation32 + $0x160] ss:$16 sps:$4 sm:$0xff]  }
 0xe01   :  { %9895 = vmatpush1.bf16.msra.mxu1 %v20398_v39  ;;  %v20472_v39 = vld [vmem:[#allocation32 + $0x184] ss:$16 sps:$4 sm:$0xff]  }
 0xe02   :  { %9896 = vmatprep.subr.bf16.mxu1 %v20403_v43  ;;  %v20470_v43 = vld [vmem:[#allocation32 + $0x180] ss:$16 sps:$4 sm:$0xff]  }
 0xe05   :  { %9897 = vmatpush1.bf16.msra.mxu1 %v20401_v17  ;;  %v20475_v17 = vld [vmem:[#allocation32 + $0x1a4] ss:$16 sps:$4 sm:$0xff]  }
 0xe06   :  { %9898 = vmatprep.subr.bf16.mxu1 %v20406_v6  ;;  %v20473_v6 = vld [vmem:[#allocation32 + $0x1a0] ss:$16 sps:$4 sm:$0xff]  }
 0xe09   :  { %9899 = vmatpush1.bf16.msra.mxu1 %v20404_v49  ;;  %v20478_v49 = vld [vmem:[#allocation32 + $0x1c4] ss:$16 sps:$4 sm:$0xff]  }
 0xe0a   :  { %9900 = vmatprep.subr.bf16.mxu1 %v20409_v63  ;;  %v20476_v63 = vld [vmem:[#allocation32 + $0x1c0] ss:$16 sps:$4 sm:$0xff]  }
 0xe0d   :  { %9901 = vmatpush1.bf16.msra.mxu1 %v20407_v18  ;;  %v20481_v18 = vld [vmem:[#allocation32 + $0x1e4] ss:$16 sps:$4 sm:$0xff]  }
 0xe0e   :  { %9902 = vmatprep.subr.bf16.mxu1 %v20412_v55  ;;  %v20479_v55 = vld [vmem:[#allocation32 + $0x1e0] ss:$16 sps:$4 sm:$0xff]  }
 0xe11   :  { %9903 = vmatpush1.bf16.msra.mxu1 %v20410_v59  ;;  %v20484_v59 = vld [vmem:[#allocation32 + $0x204] ss:$16 sps:$4 sm:$0xff]  }
 0xe12   :  { %9904 = vmatprep.subr.bf16.mxu1 %v20415_v52  ;;  %v23611_v52 = vld [vmem:[#allocation30] sm:$0xf] }
 0xe15   :  { %9905 = vmatpush1.bf16.msra.mxu1 %v20413_v44  ;;  %v9931_v44 = vrot.slane %v23611_v52, %v23172_v34 }
 0xe16   :  { %9906 = vmatprep.subr.bf16.mxu1 %v20418_v28 }
 0xe19   :  { %9907 = vmatpush1.bf16.msra.mxu1 %v20416_v24  ;;  %v9935_v24 = vrot.slane %v23611_v52, %v23175_v35 }
 0xe1a   :  { %9908 = vmatprep.subr.bf16.mxu1 %v20421_v57 }
 0xe1d   :  { %9909 = vmatpush1.bf16.msra.mxu1 %v20419_v61 }
 0xe1e   :  { %9910 = vmatprep.subr.bf16.mxu1 %v20424_v45 }
 0xe21   :  { %9911 = vmatpush1.bf16.msra.mxu1 %v20422_v12 }
 0xe22   :  { %9912 = vmatprep.subr.bf16.mxu1 %v20427_v14 }
 0xe25   :  { %9913 = vmatpush1.bf16.msra.mxu1 %v20425_v62 }
 0xe26   :  { %9914 = vmatprep.subr.bf16.mxu1 %v20430_v13 }
 0xe29   :  { %9915 = vmatpush1.bf16.msra.mxu1 %v20428_v0 }
 0xe2a   :  { %9916 = vmatprep.subr.bf16.mxu1 %v20433_v2 }
 0xe2d   :  { %9917 = vmatpush1.bf16.msra.mxu1 %v20431_v3 }
 0xe2e   :  { %10629 = vmatprep.subr.bf16.mxu1 %v20436_v8 }
 0xe30   :  { %9919 = vmatmul.mubr.bf16.vlgmr.msra.gmra.mrb[64].mxu1 %v23599_v48  ;;  %v20460_v48 = vld [vmem:[#allocation32 + $0x104] ss:$16 sps:$4 sm:$0xff]  }
 0xe31   :  { %10630 = vmatpush1.bf16.msra.mxu1 %v20434_v10 }
 0xe32   :  { %10631 = vmatprep.subr.bf16.mxu1 %v20439_v42  ;;  %v20482_v42 = vld [vmem:[#allocation32 + $0x200] ss:$16 sps:$4 sm:$0xff]  }
 0xe35   :  { %10632 = vmatpush1.bf16.msra.mxu1 %v20437_v40 }
 0xe36   :  { %10633 = vmatprep.subr.bf16.mxu1 %v20442_v26  ;;  %v20487_v26 = vld [vmem:[#allocation32 + $0x224] ss:$16 sps:$4 sm:$0xff]  }
 0xe39   :  { %10634 = vmatpush1.bf16.msra.mxu1 %v20440_v11  ;;  %v20488_v11 = vld [vmem:[#allocation32 + $0x240] ss:$16 sps:$4 sm:$0xff]  }
 0xe3a   :  { %10635 = vmatprep.subr.bf16.mxu1 %v20445_v27  ;;  %v20493_v27 = vld [vmem:[#allocation32 + $0x264] ss:$16 sps:$4 sm:$0xff]  }
 0xe3d   :  { %10636 = vmatpush1.bf16.msra.mxu1 %v20443_v31  ;;  %v20491_v31 = vld [vmem:[#allocation32 + $0x260] ss:$16 sps:$4 sm:$0xff]  }
 0xe3e   :  { %10637 = vmatprep.subr.bf16.mxu1 %v20448_v29  ;;  %v20496_v29 = vld [vmem:[#allocation32 + $0x284] ss:$16 sps:$4 sm:$0xff]  }
 0xe41   :  { %10638 = vmatpush1.bf16.msra.mxu1 %v20446_v9  ;;  %v20494_v9 = vld [vmem:[#allocation32 + $0x280] ss:$16 sps:$4 sm:$0xff]  }
 0xe42   :  { %10639 = vmatprep.subr.bf16.mxu1 %v20451_v33  ;;  %v20499_v33 = vld [vmem:[#allocation32 + $0x2a4] ss:$16 sps:$4 sm:$0xff]  }
 0xe45   :  { %10640 = vmatpush1.bf16.msra.mxu1 %v20449_v38  ;;  %v20497_v38 = vld [vmem:[#allocation32 + $0x2a0] ss:$16 sps:$4 sm:$0xff]  }
 0xe46   :  { %10641 = vmatprep.subr.bf16.mxu1 %v20454_v41  ;;  %v20502_v41 = vld [vmem:[#allocation32 + $0x2c4] ss:$16 sps:$4 sm:$0xff]  }
 0xe49   :  { %10642 = vmatpush1.bf16.msra.mxu1 %v20452_v19  ;;  %v20500_v19 = vld [vmem:[#allocation32 + $0x2c0] ss:$16 sps:$4 sm:$0xff]  }
 0xe4a   :  { %10643 = vmatprep.subr.bf16.mxu1 %v20457_v51  ;;  %v20505_v51 = vld [vmem:[#allocation32 + $0x2e4] ss:$16 sps:$4 sm:$0xff]  }
 0xe4d   :  { %10644 = vmatpush1.bf16.msra.mxu1 %v20455_v16  ;;  %v20503_v16 = vld [vmem:[#allocation32 + $0x2e0] ss:$16 sps:$4 sm:$0xff]  }
 0xe4e   :  { %10645 = vmatprep.subr.bf16.mxu1 %v20460_v48  ;;  %v20508_v48 = vld [vmem:[#allocation32 + $0x304] ss:$16 sps:$4 sm:$0xff]  }
 0xe51   :  { %10646 = vmatpush1.bf16.msra.mxu1 %v20458_v20  ;;  %v20506_v20 = vld [vmem:[#allocation32 + $0x300] ss:$16 sps:$4 sm:$0xff]  }
 0xe52   :  { %10647 = vmatprep.subr.bf16.mxu1 %v20463_v58  ;;  %v20511_v58 = vld [vmem:[#allocation32 + $0x324] ss:$16 sps:$4 sm:$0xff]  }
 0xe55   :  { %10648 = vmatpush1.bf16.msra.mxu1 %v20461_v22  ;;  %v20509_v22 = vld [vmem:[#allocation32 + $0x320] ss:$16 sps:$4 sm:$0xff]  }
 0xe56   :  { %10649 = vmatprep.subr.bf16.mxu1 %v20466_v54  ;;  %v20514_v54 = vld [vmem:[#allocation32 + $0x344] ss:$16 sps:$4 sm:$0xff]  }
 0xe59   :  { %10650 = vmatpush1.bf16.msra.mxu1 %v20464_v15  ;;  %v20512_v15 = vld [vmem:[#allocation32 + $0x340] ss:$16 sps:$4 sm:$0xff]  }
 0xe5a   :  { %10651 = vmatprep.subr.bf16.mxu1 %v20469_v46  ;;  %v20517_v46 = vld [vmem:[#allocation32 + $0x364] ss:$16 sps:$4 sm:$0xff]  }
 0xe5d   :  { %10652 = vmatpush1.bf16.msra.mxu1 %v20467_v47  ;;  %v20515_v47 = vld [vmem:[#allocation32 + $0x360] ss:$16 sps:$4 sm:$0xff]  }
 0xe5e   :  { %10653 = vmatprep.subr.bf16.mxu1 %v20472_v39  ;;  %v20520_v39 = vld [vmem:[#allocation32 + $0x384] ss:$16 sps:$4 sm:$0xff]  }
 0xe61   :  { %10654 = vmatpush1.bf16.msra.mxu1 %v20470_v43  ;;  %v20518_v43 = vld [vmem:[#allocation32 + $0x380] ss:$16 sps:$4 sm:$0xff]  }
 0xe62   :  { %10655 = vmatprep.subr.bf16.mxu1 %v20475_v17  ;;  %v20523_v17 = vld [vmem:[#allocation32 + $0x3a4] ss:$16 sps:$4 sm:$0xff]  }
 0xe65   :  { %10656 = vmatpush1.bf16.msra.mxu1 %v20473_v6  ;;  %v20521_v6 = vld [vmem:[#allocation32 + $0x3a0] ss:$16 sps:$4 sm:$0xff]  }
 0xe66   :  { %10657 = vmatprep.subr.bf16.mxu1 %v20478_v49  ;;  %v20526_v49 = vld [vmem:[#allocation32 + $0x3c4] ss:$16 sps:$4 sm:$0xff]  }
 0xe69   :  { %10658 = vmatpush1.bf16.msra.mxu1 %v20476_v63  ;;  %v9939_v63 = vrot.slane %v23611_v52, %v23178_v36 }
 0xe6a   :  { %10659 = vmatprep.subr.bf16.mxu1 %v20481_v18 }
 0xe6d   :  { %10660 = vmatpush1.bf16.msra.mxu1 %v20479_v55  ;;  %v9943_v55 = vrot.slane %v23611_v52, %v23181_v37 }
 0xe6e   :  { %10670 = vmatprep.subr.bf16.mxu1 %v20484_v59 }
 0xec3   :  { %v9879_v28 = vpop.f32.mrb[60].mxu1 }
 0xec4   :  { %v9880_v57 = vadd.f32 %v9879_v28, %v23601_v7  ;;  %v9881_v61 = vpop.f32.mrb[61].mxu1  ;;  %v20485_v7 = vld [vmem:[#allocation32 + $0x220] ss:$16 sps:$4 sm:$0xff]  }
 0xec5   :  { %v9882_v45 = vadd.f32 %v9881_v61, %v23604_v50  ;;  %v9883_v12 = vpop.f32.mrb[62].mxu1  ;;  %v20490_v50 = vld [vmem:[#allocation32 + $0x244] ss:$16 sps:$4 sm:$0xff]   ;;  %v20524_v28 = vld [vmem:[#allocation32 + $0x3c0] ss:$16 sps:$4 sm:$0xff]  }
 0xec6   :  { %v9948_v14 = vadd.f32 %v9931_v44, %v9880_v57  ;;  %v9884_v62 = vpop.f32.mrb[63].mxu1  ;;  %v20529_v61 = vld [vmem:[#allocation32 + $0x3e4] ss:$16 sps:$4 sm:$0xff]  }
 0xec7   :  { %v9949_v13 = vadd.f32 %v9935_v24, %v9882_v45 }
 0xec8   :  { %vm9952_vm0 = vcmp.gt.f32.partialorder %v9948_v14, 0.0  ;;  %v9956_v0 = vmul.f32 0.01, %v9948_v14 }
 0xec9   :  { %v9957_v2 = vmul.f32 0.01, %v9949_v13  ;;  %vm9953_vm1 = vcmp.gt.f32.partialorder %v9949_v13, 0.0 }
 0xeca   :  { %v9960_v3 = vsel %vm9952_vm0, %v9948_v14, %v9956_v0 }
 0xecb   :  { %v9961_v8 = vsel %vm9953_vm1, %v9949_v13, %v9957_v2  ;;  %v23621_v40 = vpack.c.bf16 %v9960_v3, %v9960_v3  ;;  %v20527_v13 = vld [vmem:[#allocation32 + $0x3e0] ss:$16 sps:$4 sm:$0xff]   ;;  %v20530_v3 = vld [vmem:[#allocation32 + $0x8] ss:$16 sps:$4 sm:$0xff]   ;;  %vm22625_vm1 = vmmov 0  }
 0xecc   :  { %v23619_v10 = vpack.c.bf16 %v9961_v8, %v9961_v8 }
 0xece   :  { %10661 = vmatprep.mubr.bf16.mxu1 %v23619_v10 }
 0xecf   :  { %10662 = vmatmul.mubr.bf16.vlgmr.msra.gmra.mrb[68].mxu1 %v23621_v40 }
 0xed0   :  { %10671 = vmatpush1.bf16.msra.mxu1 %v20482_v42  ;;  %v20535_v42 = vld [vmem:[#allocation32 + $0x2c] ss:$16 sps:$4 sm:$0xff]  }
 0xed1   :  { %10672 = vmatprep.subr.bf16.mxu1 %v20487_v26  ;;  %v649_v26 = vld [vmem:[%s24110_s17] sm:$0xf] }
 0xed2   :  { %10806 = vperm.xlu0 %19083, %v649_v26   ;;  %10812 = vperm.xlu1 %19084, %v649_v26   ;;  %v20613_v26 = vld [vmem:[#allocation32 + $0x36c] ss:$16 sps:$4 sm:$0xff]  }
 0xed4   :  { %10673 = vmatpush1.bf16.msra.mxu1 %v20485_v7  ;;  %v20533_v7 = vld [vmem:[#allocation32 + $0x28] ss:$16 sps:$4 sm:$0xff]  }
 0xed5   :  { %10674 = vmatprep.subr.bf16.mxu1 %v20490_v50  ;;  %v20538_v50 = vld [vmem:[#allocation32 + $0x4c] ss:$16 sps:$4 sm:$0xff]  }
 0xed8   :  { %10675 = vmatpush1.bf16.msra.mxu1 %v20488_v11  ;;  %v651_v11 = vld [vmem:[%s24111_s22] sm:$0xf] }
 0xed9   :  { %10676 = vmatprep.subr.bf16.mxu1 %v20493_v27  ;;  %v20536_v27 = vld [vmem:[#allocation32 + $0x48] ss:$16 sps:$4 sm:$0xff]   ;;  %11135 = vperm.xlu0 %19083, %v651_v11  }
 0xedc   :  { %10677 = vmatpush1.bf16.msra.mxu1 %v20491_v31  ;;  %v20541_v31 = vld [vmem:[#allocation32 + $0x6c] ss:$16 sps:$4 sm:$0xff]  }
 0xedd   :  { %10678 = vmatprep.subr.bf16.mxu1 %v20496_v29  ;;  %v20539_v29 = vld [vmem:[#allocation32 + $0x68] ss:$16 sps:$4 sm:$0xff]   ;;  %19085 = vset.pattern.permute.xlu0 %v22623_v30 }
 0xede   :  { %11181 = vperm.xlu0 %19085, %v651_v11   ;;  %v20551_v30 = vld [vmem:[#allocation32 + $0xe8] ss:$16 sps:$4 sm:$0xff]  }
 0xee0   :  { %10679 = vmatpush1.bf16.msra.mxu1 %v20494_v9  ;;  %v20544_v9 = vld [vmem:[#allocation32 + $0x8c] ss:$16 sps:$4 sm:$0xff]  }
 0xee1   :  { %10680 = vmatprep.subr.bf16.mxu1 %v20499_v33  ;;  %v20547_v33 = vld [vmem:[#allocation32 + $0xac] ss:$16 sps:$4 sm:$0xff]  }
 0xee2   :  { %19086 = vset.pattern.permute.xlu0 %v22624_v32  ;;  %v20557_v32 = vld [vmem:[#allocation32 + $0x128] ss:$16 sps:$4 sm:$0xff]  }
 0xee3   :  { %11229 = vperm.xlu0 %19086, %v651_v11   ;;  %v20614_v11 = vld [vmem:[#allocation32 + $0x388] ss:$16 sps:$4 sm:$0xff]  }
 0xee4   :  { %10681 = vmatpush1.bf16.msra.mxu1 %v20497_v38  ;;  %v20545_v38 = vld [vmem:[#allocation32 + $0xa8] ss:$16 sps:$4 sm:$0xff]  }
 0xee5   :  { %10682 = vmatprep.subr.bf16.mxu1 %v20502_v41  ;;  %v20550_v41 = vld [vmem:[#allocation32 + $0xcc] ss:$16 sps:$4 sm:$0xff]  }
 0xee7   :  { %19087 = vset.pattern.permute.xlu0 %v22622_v25  ;;  %v20565_v25 = vld [vmem:[#allocation32 + $0x16c] ss:$16 sps:$4 sm:$0xff]  }
 0xee8   :  { %10683 = vmatpush1.bf16.msra.mxu1 %v20500_v19  ;;  %v20548_v19 = vld [vmem:[#allocation32 + $0xc8] ss:$16 sps:$4 sm:$0xff]  }
 0xee9   :  { %10684 = vmatprep.subr.bf16.mxu1 %v20505_v51  ;;  %v20553_v51 = vld [vmem:[#allocation32 + $0xec] ss:$16 sps:$4 sm:$0xff]  }
 0xeec   :  { %10685 = vmatpush1.bf16.msra.mxu1 %v20503_v16  ;;  %v20556_v16 = vld [vmem:[#allocation32 + $0x10c] ss:$16 sps:$4 sm:$0xff]  }
 0xeed   :  { %10686 = vmatprep.subr.bf16.mxu1 %v20508_v48  ;;  %v20554_v48 = vld [vmem:[#allocation32 + $0x108] ss:$16 sps:$4 sm:$0xff]  }
 0xef0   :  { %10687 = vmatpush1.bf16.msra.mxu1 %v20506_v20  ;;  %v20559_v20 = vld [vmem:[#allocation32 + $0x12c] ss:$16 sps:$4 sm:$0xff]  }
 0xef1   :  { %10688 = vmatprep.subr.bf16.mxu1 %v20511_v58  ;;  %v20562_v58 = vld [vmem:[#allocation32 + $0x14c] ss:$16 sps:$4 sm:$0xff]  }
 0xef4   :  { %10689 = vmatpush1.bf16.msra.mxu1 %v20509_v22  ;;  %v20560_v22 = vld [vmem:[#allocation32 + $0x148] ss:$16 sps:$4 sm:$0xff]  }
 0xef5   :  { %10690 = vmatprep.subr.bf16.mxu1 %v20514_v54  ;;  %v20563_v54 = vld [vmem:[#allocation32 + $0x168] ss:$16 sps:$4 sm:$0xff]  }
 0xef8   :  { %10691 = vmatpush1.bf16.msra.mxu1 %v20512_v15  ;;  %v20568_v15 = vld [vmem:[#allocation32 + $0x18c] ss:$16 sps:$4 sm:$0xff]  }
 0xef9   :  { %10692 = vmatprep.subr.bf16.mxu1 %v20517_v46  ;;  %v20566_v46 = vld [vmem:[#allocation32 + $0x188] ss:$16 sps:$4 sm:$0xff]  }
 0xefc   :  { %10693 = vmatpush1.bf16.msra.mxu1 %v20515_v47  ;;  %v20571_v47 = vld [vmem:[#allocation32 + $0x1ac] ss:$16 sps:$4 sm:$0xff]  }
 0xefd   :  { %10694 = vmatprep.subr.bf16.mxu1 %v20520_v39  ;;  %v20569_v39 = vld [vmem:[#allocation32 + $0x1a8] ss:$16 sps:$4 sm:$0xff]  }
 0xf00   :  { %10695 = vmatpush1.bf16.msra.mxu1 %v20518_v43  ;;  %v20574_v43 = vld [vmem:[#allocation32 + $0x1cc] ss:$16 sps:$4 sm:$0xff]  }
 0xf01   :  { %10696 = vmatprep.subr.bf16.mxu1 %v20523_v17  ;;  %v20572_v17 = vld [vmem:[#allocation32 + $0x1c8] ss:$16 sps:$4 sm:$0xff]  }
 0xf03   :  { %v9920_v18 = vpop.f32.mrb[64].mxu1 }
 0xf04   :  { %v9921_v59 = vadd.f32 %v9920_v18, %v23606_v53  ;;  %v9922_v44 = vpop.f32.mrb[65].mxu1  ;;  %10697 = vmatpush1.bf16.msra.mxu1 %v20521_v6  ;;  %v20532_v53 = vld [vmem:[#allocation32 + $0xc] ss:$16 sps:$4 sm:$0xff]   ;;  %v20578_v18 = vld [vmem:[#allocation32 + $0x208] ss:$16 sps:$4 sm:$0xff]  }
 0xf05   :  { %v9923_v24 = vadd.f32 %v9922_v44, %v23608_v23  ;;  %v9924_v57 = vpop.f32.mrb[66].mxu1  ;;  %10698 = vmatprep.subr.bf16.mxu1 %v20526_v49  ;;  %v20577_v6 = vld [vmem:[#allocation32 + $0x1ec] ss:$16 sps:$4 sm:$0xff]   ;;  %v20575_v49 = vld [vmem:[#allocation32 + $0x1e8] ss:$16 sps:$4 sm:$0xff]  }
 0xf06   :  { %v9950_v45 = vadd.f32 %v9939_v63, %v9921_v59  ;;  %v9925_v12 = vpop.f32.mrb[67].mxu1  ;;  %v20580_v63 = vld [vmem:[#allocation32 + $0x20c] ss:$16 sps:$4 sm:$0xff]   ;;  %v20581_v59 = vld [vmem:[#allocation32 + $0x228] ss:$16 sps:$4 sm:$0xff]  }
 0xf07   :  { %v9951_v14 = vadd.f32 %v9943_v55, %v9923_v24  ;;  %v20583_v55 = vld [vmem:[#allocation32 + $0x22c] ss:$16 sps:$4 sm:$0xff]   ;;  %v20587_v57 = vld [vmem:[#allocation32 + $0x268] ss:$16 sps:$4 sm:$0xff]  }
 0xf08   :  { %vm9954_vm2 = vcmp.gt.f32.partialorder %v9950_v45, 0.0  ;;  %v9958_v62 = vmul.f32 0.01, %v9950_v45  ;;  %10699 = vmatpush1.bf16.msra.mxu1 %v20524_v28  ;;  %v20586_v44 = vld [vmem:[#allocation32 + $0x24c] ss:$16 sps:$4 sm:$0xff]  }
 0xf09   :  { %v9959_v0 = vmul.f32 0.01, %v9951_v14  ;;  %10700 = vmatprep.subr.bf16.mxu1 %v20529_v61  ;;  %vm9955_vm3 = vcmp.gt.f32.partialorder %v9951_v14, 0.0  ;;  %v20584_v28 = vld [vmem:[#allocation32 + $0x248] ss:$16 sps:$4 sm:$0xff]  }
 0xf0a   :  { %v9962_v52 = vsel %vm9954_vm2, %v9950_v45, %v9958_v62  ;;  %v20589_v24 = vld [vmem:[#allocation32 + $0x26c] ss:$16 sps:$4 sm:$0xff]   ;;  %v20590_v45 = vld [vmem:[#allocation32 + $0x288] ss:$16 sps:$4 sm:$0xff]  }
 0xf0b   :  { %v9963_v2 = vsel %vm9955_vm3, %v9951_v14, %v9959_v0  ;;  %v23633_v8 = vpack.c.bf16 %v9962_v52, %v9962_v52  ;;  %v20592_v61 = vld [vmem:[#allocation32 + $0x28c] ss:$16 sps:$4 sm:$0xff]   ;;  %v20596_v62 = vld [vmem:[#allocation32 + $0x2c8] ss:$16 sps:$4 sm:$0xff]  }
 0xf0c   :  { %10701 = vmatpush1.bf16.msra.mxu1 %v20527_v13  ;;  %v23631_v23 = vpack.c.bf16 %v9963_v2, %v9963_v2  ;;  %v20595_v12 = vld [vmem:[#allocation32 + $0x2ac] ss:$16 sps:$4 sm:$0xff]   ;;  %v20599_v0 = vld [vmem:[#allocation32 + $0x2e8] ss:$16 sps:$4 sm:$0xff]  }
 0xf0d   :  { %10711 = vmatprep.subr.bf16.mxu1 %v20532_v53  ;;  %v20598_v14 = vld [vmem:[#allocation32 + $0x2cc] ss:$16 sps:$4 sm:$0xff]   ;;  %v20602_v52 = vld [vmem:[#allocation32 + $0x308] ss:$16 sps:$4 sm:$0xff]  }
 0xf0e   :  { %10702 = vmatprep.mubr.bf16.mxu1 %v23631_v23  ;;  %v20601_v13 = vld [vmem:[#allocation32 + $0x2ec] ss:$16 sps:$4 sm:$0xff]  }
 0xf0f   :  { %10703 = vmatmul.mubr.bf16.vlgmr.msra.gmra.mrb[68].mxu1 %v23633_v8  ;;  %v20604_v53 = vld [vmem:[#allocation32 + $0x30c] ss:$16 sps:$4 sm:$0xff]  }
 0xf10   :  { %10712 = vmatpush1.bf16.msra.mxu1 %v20530_v3  ;;  %10743 = vmatprep.mubr.bf16.mxu1 %v23619_v10  ;;  %v20542_v10 = vld [vmem:[#allocation32 + $0x88] ss:$16 sps:$4 sm:$0xff]   ;;  %v20607_v2 = vld [vmem:[#allocation32 + $0x32c] ss:$16 sps:$4 sm:$0xff]  }
 0xf11   :  { %10713 = vmatprep.subr.bf16.mxu1 %v20535_v42  ;;  %v20610_v3 = vld [vmem:[#allocation32 + $0x34c] ss:$16 sps:$4 sm:$0xff]   ;;  %v20608_v42 = vld [vmem:[#allocation32 + $0x348] ss:$16 sps:$4 sm:$0xff]  }
 0xf14   :  { %10714 = vmatpush1.bf16.msra.mxu1 %v20533_v7  ;;  %v20611_v7 = vld [vmem:[#allocation32 + $0x368] ss:$16 sps:$4 sm:$0xff]  }
 0xf15   :  { %10715 = vmatprep.subr.bf16.mxu1 %v20538_v50  ;;  %v20616_v50 = vld [vmem:[#allocation32 + $0x38c] ss:$16 sps:$4 sm:$0xff]  }
 0xf18   :  { %10716 = vmatpush1.bf16.msra.mxu1 %v20536_v27  ;;  %v20619_v27 = vld [vmem:[#allocation32 + $0x3ac] ss:$16 sps:$4 sm:$0xff]  }
 0xf19   :  { %10717 = vmatprep.subr.bf16.mxu1 %v20541_v31  ;;  %v20617_v31 = vld [vmem:[#allocation32 + $0x3a8] ss:$16 sps:$4 sm:$0xff]  }
 0xf1c   :  { %10718 = vmatpush1.bf16.msra.mxu1 %v20539_v29  ;;  %v20622_v29 = vld [vmem:[#allocation32 + $0x3cc] ss:$16 sps:$4 sm:$0xff]  }
 0xf1d   :  { %10719 = vmatprep.subr.bf16.mxu1 %v20544_v9  ;;  %v20620_v9 = vld [vmem:[#allocation32 + $0x3c8] ss:$16 sps:$4 sm:$0xff]  }
 0xf20   :  { %10720 = vmatpush1.bf16.msra.mxu1 %v20542_v10  ;;  %v20625_v10 = vld [vmem:[#allocation32 + $0x3ec] ss:$16 sps:$4 sm:$0xff]  }
 0xf21   :  { %10721 = vmatprep.subr.bf16.mxu1 %v20547_v33  ;;  %v20623_v33 = vld [vmem:[#allocation32 + $0x3e8] ss:$16 sps:$4 sm:$0xff]  }
 0xf24   :  { %10722 = vmatpush1.bf16.msra.mxu1 %v20545_v38  ;;  %v23646_v38 = vld [vmem:[#allocation33] sm:$0xf] }
 0xf25   :  { %10723 = vmatprep.subr.bf16.mxu1 %v20550_v41  ;;  %v9972_v41 = vrot.slane %v23646_v38, %v23172_v34 }
 0xf28   :  { %10724 = vmatpush1.bf16.msra.mxu1 %v20548_v19  ;;  %v9976_v19 = vrot.slane %v23646_v38, %v23175_v35 }
 0xf29   :  { %10725 = vmatprep.subr.bf16.mxu1 %v20553_v51 }
 0xf2c   :  { %10726 = vmatpush1.bf16.msra.mxu1 %v20551_v30 }
 0xf2d   :  { %10727 = vmatprep.subr.bf16.mxu1 %v20556_v16 }
 0xf30   :  { %10728 = vmatpush1.bf16.msra.mxu1 %v20554_v48 }
 0xf31   :  { %10729 = vmatprep.subr.bf16.mxu1 %v20559_v20 }
 0xf34   :  { %10730 = vmatpush1.bf16.msra.mxu1 %v20557_v32 }
 0xf35   :  { %10731 = vmatprep.subr.bf16.mxu1 %v20562_v58 }
 0xf38   :  { %10732 = vmatpush1.bf16.msra.mxu1 %v20560_v22 }
 0xf39   :  { %10733 = vmatprep.subr.bf16.mxu1 %v20565_v25 }
 0xf3c   :  { %10734 = vmatpush1.bf16.msra.mxu1 %v20563_v54 }
 0xf3d   :  { %10735 = vmatprep.subr.bf16.mxu1 %v20568_v15 }
 0xf40   :  { %10736 = vmatpush1.bf16.msra.mxu1 %v20566_v46  ;;  %v20626_v46 = vld [vmem:[#allocation36] ss:$16 sps:$4 sm:$0xff]  }
 0xf41   :  { %10737 = vmatprep.subr.bf16.mxu1 %v20571_v47  ;;  %v20628_v47 = vld [vmem:[#allocation36 + $0x4] ss:$16 sps:$4 sm:$0xff]  }
 0xf44   :  { %10738 = vmatpush1.bf16.msra.mxu1 %v20569_v39  ;;  %v20631_v39 = vld [vmem:[#allocation36 + $0x24] ss:$16 sps:$4 sm:$0xff]  }
 0xf45   :  { %10739 = vmatprep.subr.bf16.mxu1 %v20574_v43  ;;  %v20629_v43 = vld [vmem:[#allocation36 + $0x20] ss:$16 sps:$4 sm:$0xff]  }
 0xf48   :  { %10740 = vmatpush1.bf16.msra.mxu1 %v20572_v17  ;;  %v20637_v17 = vld [vmem:[#allocation36 + $0x44] ss:$16 sps:$4 sm:$0xff]  }
 0xf49   :  { %10741 = vmatprep.subr.bf16.mxu1 %v20577_v6  ;;  %v20635_v6 = vld [vmem:[#allocation36 + $0x40] ss:$16 sps:$4 sm:$0xff]  }
 0xf4c   :  { %10742 = vmatpush1.bf16.msra.mxu1 %v20575_v49  ;;  %v20643_v49 = vld [vmem:[#allocation36 + $0x64] ss:$16 sps:$4 sm:$0xff]  }
 0xf4d   :  { %10752 = vmatprep.subr.bf16.mxu1 %v20580_v63  ;;  %v20641_v63 = vld [vmem:[#allocation36 + $0x60] ss:$16 sps:$4 sm:$0xff]  }
 0xf4f   :  { %10744 = vmatmul.mubr.bf16.vlgmr.msra.gmra.mrb[72].mxu1 %v23621_v40  ;;  %v20593_v40 = vld [vmem:[#allocation32 + $0x2a8] ss:$16 sps:$4 sm:$0xff]  }
 0xf50   :  { %10753 = vmatpush1.bf16.msra.mxu1 %v20578_v18  ;;  %10784 = vmatprep.mubr.bf16.mxu1 %v23631_v23  ;;  %v20605_v23 = vld [vmem:[#allocation32 + $0x328] ss:$16 sps:$4 sm:$0xff]  }
 0xf51   :  { %10754 = vmatprep.subr.bf16.mxu1 %v20583_v55  ;;  %v10807_v32 = vpop.permute.xlu0 %10806  ;;  %v20649_v18 = vld [vmem:[#allocation36 + $0x84] ss:$16 sps:$4 sm:$0xff]   ;;  %v20647_v55 = vld [vmem:[#allocation36 + $0x80] ss:$16 sps:$4 sm:$0xff]  }
 0xf52   :  { %vm10808_vm5 = vcmp.eq.s32.totalorder %v10807_v32, %v23199_v56  ;;  %v20652_v32 = vld [vmem:[#allocation36 + $0x264] ss:$16 sps:$4 sm:$0xff]  }
 0xf53   :  { %v23656_v54 = vsel %vm10808_vm5, 1.0, %v22620_v1 }
 0xf54   :  { %10755 = vmatpush1.bf16.msra.mxu1 %v20581_v59  ;;  %v20655_v59 = vld [vmem:[#allocation36 + $0xa4] ss:$16 sps:$4 sm:$0xff]  }
 0xf55   :  { %10756 = vmatprep.subr.bf16.mxu1 %v20586_v44  ;;  %v20653_v44 = vld [vmem:[#allocation36 + $0xa0] ss:$16 sps:$4 sm:$0xff]  }
 0xf58   :  { %10757 = vmatpush1.bf16.msra.mxu1 %v20584_v28  ;;  %v20661_v28 = vld [vmem:[#allocation36 + $0xc4] ss:$16 sps:$4 sm:$0xff]  }
 0xf59   :  { %10758 = vmatprep.subr.bf16.mxu1 %v20589_v24  ;;  %v20659_v24 = vld [vmem:[#allocation36 + $0xc0] ss:$16 sps:$4 sm:$0xff]  }
 0xf5c   :  { %10759 = vmatpush1.bf16.msra.mxu1 %v20587_v57  ;;  %v20667_v57 = vld [vmem:[#allocation36 + $0xe4] ss:$16 sps:$4 sm:$0xff]  }
 0xf5d   :  { %10760 = vmatprep.subr.bf16.mxu1 %v20592_v61  ;;  %v20665_v61 = vld [vmem:[#allocation36 + $0xe0] ss:$16 sps:$4 sm:$0xff]  }
 0xf60   :  { %10761 = vmatpush1.bf16.msra.mxu1 %v20590_v45  ;;  %v20673_v45 = vld [vmem:[#allocation36 + $0x104] ss:$16 sps:$4 sm:$0xff]  }
 0xf61   :  { %10762 = vmatprep.subr.bf16.mxu1 %v20595_v12  ;;  %v20671_v12 = vld [vmem:[#allocation36 + $0x100] ss:$16 sps:$4 sm:$0xff]  }
 0xf64   :  { %10763 = vmatpush1.bf16.msra.mxu1 %v20593_v40  ;;  %v20679_v40 = vld [vmem:[#allocation36 + $0x124] ss:$16 sps:$4 sm:$0xff]  }
 0xf65   :  { %10764 = vmatprep.subr.bf16.mxu1 %v20598_v14  ;;  %v20677_v14 = vld [vmem:[#allocation36 + $0x120] ss:$16 sps:$4 sm:$0xff]  }
 0xf68   :  { %10765 = vmatpush1.bf16.msra.mxu1 %v20596_v62  ;;  %v20685_v62 = vld [vmem:[#allocation36 + $0x144] ss:$16 sps:$4 sm:$0xff]  }
 0xf69   :  { %10766 = vmatprep.subr.bf16.mxu1 %v20601_v13  ;;  %v20683_v13 = vld [vmem:[#allocation36 + $0x140] ss:$16 sps:$4 sm:$0xff]  }
 0xf6c   :  { %10767 = vmatpush1.bf16.msra.mxu1 %v20599_v0  ;;  %v20691_v0 = vld [vmem:[#allocation36 + $0x164] ss:$16 sps:$4 sm:$0xff]  }
 0xf6d   :  { %10768 = vmatprep.subr.bf16.mxu1 %v20604_v53  ;;  %v20689_v53 = vld [vmem:[#allocation36 + $0x160] ss:$16 sps:$4 sm:$0xff]  }
 0xf70   :  { %10769 = vmatpush1.bf16.msra.mxu1 %v20602_v52  ;;  %v20697_v52 = vld [vmem:[#allocation36 + $0x184] ss:$16 sps:$4 sm:$0xff]  }
 0xf71   :  { %10770 = vmatprep.subr.bf16.mxu1 %v20607_v2  ;;  %v20695_v2 = vld [vmem:[#allocation36 + $0x180] ss:$16 sps:$4 sm:$0xff]  }
 0xf74   :  { %10771 = vmatpush1.bf16.msra.mxu1 %v20605_v23  ;;  %v20701_v23 = vld [vmem:[#allocation36 + $0x1a0] ss:$16 sps:$4 sm:$0xff]  }
 0xf75   :  { %10772 = vmatprep.subr.bf16.mxu1 %v20610_v3  ;;  %v20703_v3 = vld [vmem:[#allocation36 + $0x1a4] ss:$16 sps:$4 sm:$0xff]  }
 0xf78   :  { %10773 = vmatpush1.bf16.msra.mxu1 %v20608_v42  ;;  %v9980_v42 = vrot.slane %v23646_v38, %v23178_v36 }
 0xf79   :  { %10774 = vmatprep.subr.bf16.mxu1 %v20613_v26  ;;  %v9984_v26 = vrot.slane %v23646_v38, %v23181_v37 }
 0xf7c   :  { %10775 = vmatpush1.bf16.msra.mxu1 %v20611_v7 }
 0xf7d   :  { %10776 = vmatprep.subr.bf16.mxu1 %v20616_v50 }
 0xf80   :  { %10777 = vmatpush1.bf16.msra.mxu1 %v20614_v11 }
 0xf81   :  { %10778 = vmatprep.subr.bf16.mxu1 %v20619_v27 }
 0xf84   :  { %10779 = vmatpush1.bf16.msra.mxu1 %v20617_v31 }
 0xf85   :  { %10780 = vmatprep.subr.bf16.mxu1 %v20622_v29 }
 0xf88   :  { %10781 = vmatpush1.bf16.msra.mxu1 %v20620_v9 }
 0xf89   :  { %10782 = vmatprep.subr.bf16.mxu1 %v20625_v10 }
 0xf8c   :  { %10783 = vmatpush1.bf16.msra.mxu1 %v20623_v33  ;;  %v10813_v33 = vpop.permute.xlu1 %10812 }
 0xf8d   :  { %11924 = vmatprep.subr.bf16.mxu1 %v20628_v47  ;;  %vm10814_vm4 = vcmp.eq.s32.totalorder %v10813_v33, %v23199_v56  ;;  %v20634_v56 = vld [vmem:[#allocation36 + $0x204] ss:$16 sps:$4 sm:$0xff]   ;;  %v20662_v47 = vld [vmem:[#allocation36 + $0x2a0] ss:$16 sps:$4 sm:$0xff]  }
 0xf8e   :  { %v23685_v38 = vsel %vm10814_vm4, 1.0, %v22620_v1 }
 0xf8f   :  { %10785 = vmatmul.mubr.bf16.vlgmr.msra.gmra.mrb[72].mxu1 %v23633_v8 }
 0xf90   :  { %11925 = vmatpush1.bf16.msra.mxu1 %v20626_v46  ;;  %v20664_v46 = vld [vmem:[#allocation36 + $0x2a4] ss:$16 sps:$4 sm:$0xff]  }
 0xf91   :  { %11926 = vmatprep.subr.bf16.mxu1 %v20631_v39  ;;  %v20670_v39 = vld [vmem:[#allocation36 + $0x2c4] ss:$16 sps:$4 sm:$0xff]  }
 0xf94   :  { %11927 = vmatpush1.bf16.msra.mxu1 %v20629_v43  ;;  %v20668_v43 = vld [vmem:[#allocation36 + $0x2c0] ss:$16 sps:$4 sm:$0xff]  }
 0xf95   :  { %11928 = vmatprep.subr.bf16.mxu1 %v20637_v17  ;;  %v20676_v17 = vld [vmem:[#allocation36 + $0x2e4] ss:$16 sps:$4 sm:$0xff]  }
 0xf98   :  { %11929 = vmatpush1.bf16.msra.mxu1 %v20635_v6  ;;  %v20674_v6 = vld [vmem:[#allocation36 + $0x2e0] ss:$16 sps:$4 sm:$0xff]  }
 0xf99   :  { %11930 = vmatprep.subr.bf16.mxu1 %v20643_v49  ;;  %v20682_v49 = vld [vmem:[#allocation36 + $0x304] ss:$16 sps:$4 sm:$0xff]  }
 0xf9c   :  { %11931 = vmatpush1.bf16.msra.mxu1 %v20641_v63  ;;  %v20680_v63 = vld [vmem:[#allocation36 + $0x300] ss:$16 sps:$4 sm:$0xff]  }
 0xf9d   :  { %11932 = vmatprep.subr.bf16.mxu1 %v20649_v18  ;;  %v20688_v18 = vld [vmem:[#allocation36 + $0x324] ss:$16 sps:$4 sm:$0xff]  }
 0xfa0   :  { %11933 = vmatpush1.bf16.msra.mxu1 %v20647_v55  ;;  %v20686_v55 = vld [vmem:[#allocation36 + $0x320] ss:$16 sps:$4 sm:$0xff]  }
 0xfa1   :  { %11934 = vmatprep.subr.bf16.mxu1 %v20655_v59  ;;  %v20694_v59 = vld [vmem:[#allocation36 + $0x344] ss:$16 sps:$4 sm:$0xff]  }
 0xfa4   :  { %11935 = vmatpush1.bf16.msra.mxu1 %v20653_v44  ;;  %v20692_v44 = vld [vmem:[#allocation36 + $0x340] ss:$16 sps:$4 sm:$0xff]  }
 0xfa5   :  { %11936 = vmatprep.subr.bf16.mxu1 %v20661_v28  ;;  %v20700_v28 = vld [vmem:[#allocation36 + $0x364] ss:$16 sps:$4 sm:$0xff]  }
 0xfa8   :  { %11937 = vmatpush1.bf16.msra.mxu1 %v20659_v24  ;;  %v20698_v24 = vld [vmem:[#allocation36 + $0x360] ss:$16 sps:$4 sm:$0xff]  }
 0xfa9   :  { %11938 = vmatprep.subr.bf16.mxu1 %v20667_v57  ;;  %v20706_v57 = vld [vmem:[#allocation36 + $0x384] ss:$16 sps:$4 sm:$0xff]  }
 0xfac   :  { %11939 = vmatpush1.bf16.msra.mxu1 %v20665_v61  ;;  %v20704_v61 = vld [vmem:[#allocation36 + $0x380] ss:$16 sps:$4 sm:$0xff]  }
 0xfad   :  { %11940 = vmatprep.subr.bf16.mxu1 %v20673_v45  ;;  %v20709_v45 = vld [vmem:[#allocation36 + $0x1c4] ss:$16 sps:$4 sm:$0xff]  }
 0xfb0   :  { %11941 = vmatpush1.bf16.msra.mxu1 %v20671_v12  ;;  %v20712_v12 = vld [vmem:[#allocation36 + $0x3a4] ss:$16 sps:$4 sm:$0xff]  }
 0xfb1   :  { %11942 = vmatprep.subr.bf16.mxu1 %v20679_v40 }
 0xfb4   :  { %11943 = vmatpush1.bf16.msra.mxu1 %v20677_v14  ;;  %v20707_v14 = vld [vmem:[#allocation36 + $0x1c0] ss:$16 sps:$4 sm:$0xff]  }
 0xfb5   :  { %11944 = vmatprep.subr.bf16.mxu1 %v20685_v62  ;;  %v20710_v62 = vld [vmem:[#allocation36 + $0x3a0] ss:$16 sps:$4 sm:$0xff]  }
 0xfb8   :  { %11945 = vmatpush1.bf16.msra.mxu1 %v20683_v13 }
 0xfb9   :  { %11946 = vmatprep.subr.bf16.mxu1 %v20691_v0  ;;  %v20715_v0 = vld [vmem:[#allocation36 + $0x1e4] ss:$16 sps:$4 sm:$0xff]  }
 0xfbc   :  { %11947 = vmatpush1.bf16.msra.mxu1 %v20689_v53  ;;  %v20718_v53 = vld [vmem:[#allocation36 + $0x3c4] ss:$16 sps:$4 sm:$0xff]  }
 0xfbd   :  { %11948 = vmatprep.subr.bf16.mxu1 %v20697_v52  ;;  %v20713_v52 = vld [vmem:[#allocation36 + $0x1e0] ss:$16 sps:$4 sm:$0xff]  }
 0xfc0   :  { %11949 = vmatpush1.bf16.msra.mxu1 %v20695_v2  ;;  %v20716_v2 = vld [vmem:[#allocation36 + $0x3c0] ss:$16 sps:$4 sm:$0xff]  }
 0xfc1   :  { %11950 = vmatprep.subr.bf16.mxu1 %v20703_v3  ;;  %v20724_v3 = vld [vmem:[#allocation36 + $0xc] ss:$16 sps:$4 sm:$0xff]  }
 0xfc4   :  { %11951 = vmatpush1.bf16.msra.mxu1 %v20701_v23  ;;  %v20721_v23 = vld [vmem:[#allocation36 + $0x3e4] ss:$16 sps:$4 sm:$0xff]  }
 0xfc5   :  { %11952 = vmatprep.subr.bf16.mxu1 %v20709_v45  ;;  %v20766_v45 = vld [vmem:[#allocation36 + $0x2cc] ss:$16 sps:$4 sm:$0xff]  }
 0xfc8   :  { %11953 = vmatpush1.bf16.msra.mxu1 %v20707_v14  ;;  %v20764_v14 = vld [vmem:[#allocation36 + $0x2c8] ss:$16 sps:$4 sm:$0xff]  }
 0xfc9   :  { %11954 = vmatprep.subr.bf16.mxu1 %v20715_v0  ;;  %v20772_v0 = vld [vmem:[#allocation36 + $0x2ec] ss:$16 sps:$4 sm:$0xff]  }
 0xfcc   :  { %11955 = vmatpush1.bf16.msra.mxu1 %v20713_v52  ;;  %v20770_v52 = vld [vmem:[#allocation36 + $0x2e8] ss:$16 sps:$4 sm:$0xff]  }
 0xfcd   :  { %12006 = vmatprep.subr.bf16.mxu1 %v20724_v3  ;;  %v20773_v3 = vld [vmem:[#allocation36 + $0x128] ss:$16 sps:$4 sm:$0xff]  }
 0xfe2   :  { %v10704_v51 = vpop.f32.mrb[68].mxu1 }
 0xfe3   :  { %v18941_v30 = vadd.f32 %v10704_v51, %v9972_v41  ;;  %v10706_v16 = vpop.f32.mrb[69].mxu1  ;;  %v20632_v51 = vld [vmem:[#allocation36 + $0x200] ss:$16 sps:$4 sm:$0xff]  }
 0xfe4   :  { %v18942_v48 = vadd.f32 %v10706_v16, %v9976_v19  ;;  %v10708_v20 = vpop.f32.mrb[70].mxu1  ;;  %v20638_v16 = vld [vmem:[#allocation36 + $0x220] ss:$16 sps:$4 sm:$0xff]  }
 0xfe5   :  { %v10797_v58 = vmul.f32 0.1, %v18941_v30  ;;  %v10709_v22 = vpop.f32.mrb[71].mxu1  ;;  %vm10793_vm6 = vcmp.gt.f32.partialorder %v18941_v30, 0.0  ;;  %v20644_v20 = vld [vmem:[#allocation36 + $0x240] ss:$16 sps:$4 sm:$0xff]  }
 0xfe6   :  { %vm10794_vm7 = vcmp.gt.f32.partialorder %v18942_v48, 0.0  ;;  %v10798_v8 = vmul.f32 0.1, %v18942_v48  ;;  %v20658_v22 = vld [vmem:[#allocation36 + $0x284] ss:$16 sps:$4 sm:$0xff]  }
 0xfe7   :  { %v23658_v15 = vsel %vm10793_vm6, %v18941_v30, %v10797_v58  ;;  %v20640_v30 = vld [vmem:[#allocation36 + $0x224] ss:$16 sps:$4 sm:$0xff]   ;;  %v20650_v58 = vld [vmem:[#allocation36 + $0x260] ss:$16 sps:$4 sm:$0xff]  }
 0xfe8   :  { %v23653_v25 = vsel %vm10794_vm7, %v18942_v48, %v10798_v8  ;;  %v20646_v48 = vld [vmem:[#allocation36 + $0x244] ss:$16 sps:$4 sm:$0xff]   ;;  %v20656_v8 = vld [vmem:[#allocation36 + $0x280] ss:$16 sps:$4 sm:$0xff]  }
 0xfe9   :  { %18032 = vmatprep.subr.msk.mxu0 %vm9374_vm14, %v23653_v25 }
 0xfea   :  { %18033 = vmatpush1.msk.msra.mxu0 %vm9374_vm14, %v23658_v15 }
 0xfeb   :  { %18034 = vmatmul.mubr.msk.f32.vlgmr.msra.gmra.mrb[58].mxu0 %vm9370_vm15, %v23656_v54 }
 0xfec   :  { %10981 = vmatprep.mubr.f32.mxu0 %v22620_v1 }
0x1062   :  { %v10786_v7 = vpop.f32.mrb[72].mxu1 }
0x1063   :  { %v18943_v50 = vadd.f32 %v10786_v7, %v9980_v42  ;;  %v10788_v11 = vpop.f32.mrb[73].mxu1  ;;  %v20719_v42 = vld [vmem:[#allocation36 + $0x3e0] ss:$16 sps:$4 sm:$0xff]  }
0x1064   :  { %v18944_v27 = vadd.f32 %v10788_v11, %v9984_v26  ;;  %v10790_v31 = vpop.f32.mrb[74].mxu1  ;;  %v20730_v26 = vld [vmem:[#allocation36 + $0x20c] ss:$16 sps:$4 sm:$0xff]  }
0x1065   :  { %v10799_v29 = vmul.f32 0.1, %v18943_v50  ;;  %v10791_v9 = vpop.f32.mrb[75].mxu1  ;;  %vm10795_vm8 = vcmp.gt.f32.partialorder %v18943_v50, 0.0 }
0x1066   :  { %vm10796_vm9 = vcmp.gt.f32.partialorder %v18944_v27, 0.0  ;;  %v10800_v10 = vmul.f32 0.1, %v18944_v27 }
0x1067   :  { %v23673_v19 = vsel %vm10795_vm8, %v18943_v50, %v10799_v29  ;;  %v20722_v29 = vld [vmem:[#allocation36 + $0x8] ss:$16 sps:$4 sm:$0xff]  }
0x1068   :  { %v23671_v41 = vsel %vm10796_vm9, %v18944_v27, %v10800_v10  ;;  %v20727_v10 = vld [vmem:[#allocation36 + $0x2c] ss:$16 sps:$4 sm:$0xff]  }
0x1069   :  { %18035 = vmatprep.subr.msk.mxu0 %vm9374_vm14, %v23671_v41 }
0x106a   :  { %18036 = vmatpush1.msk.msra.mxu0 %vm9374_vm14, %v23673_v19 }
0x106b   :  { %18037 = vmatmul.mubr.msk.f32.vlgmr.msra.gmra.mrb[64].mxu0 %vm9370_vm15, %v23656_v54  ;;  %18038 = vmatprep.subr.msk.mxu0 %vm9374_vm14, %v23653_v25 }
0x106c   :  { %18039 = vmatpush1.msk.msra.mxu0 %vm9374_vm14, %v23658_v15  ;;  %11055 = vmatprep.mubr.f32.mxu0 %v22620_v1 }
0x106d   :  { %18041 = vmatprep.subr.msk.mxu0 %vm9374_vm14, %v23671_v41 }
0x106f   :  { %18040 = vmatmul.mubr.msk.f32.vlgmr.msra.gmra.mrb[66].mxu0 %vm9370_vm15, %v23685_v38 }
0x1070   :  { %18042 = vmatpush1.msk.msra.mxu0 %vm9374_vm14, %v23673_v19  ;;  %11126 = vmatprep.mubr.f32.mxu0 %v22620_v1 }
0x1071   :  { %11965 = vmatprep.subr.bf16.mxu0 %v20634_v56 }
0x1073   :  { %18043 = vmatmul.mubr.msk.f32.vlgmr.msra.gmra.mrb[68].mxu0 %vm9370_vm15, %v23685_v38 }
0x1074   :  { %11966 = vmatpush1.bf16.msra.mxu0 %v20632_v51 }
0x1075   :  { %11967 = vmatprep.subr.bf16.mxu0 %v20640_v30  ;;  %v20725_v30 = vld [vmem:[#allocation36 + $0x28] ss:$16 sps:$4 sm:$0xff]  }
0x1078   :  { %11968 = vmatpush1.bf16.msra.mxu0 %v20638_v16  ;;  %v20728_v16 = vld [vmem:[#allocation36 + $0x208] ss:$16 sps:$4 sm:$0xff]  }
0x1079   :  { %11969 = vmatprep.subr.bf16.mxu0 %v20646_v48 }
0x107c   :  { %11970 = vmatpush1.bf16.msra.mxu0 %v20644_v20  ;;  %v20733_v20 = vld [vmem:[#allocation36 + $0x4c] ss:$16 sps:$4 sm:$0xff]  }
0x107d   :  { %11971 = vmatprep.subr.bf16.mxu0 %v20652_v32  ;;  %v20736_v32 = vld [vmem:[#allocation36 + $0x22c] ss:$16 sps:$4 sm:$0xff]  }
0x1080   :  { %11972 = vmatpush1.bf16.msra.mxu0 %v20650_v58  ;;  %v20731_v58 = vld [vmem:[#allocation36 + $0x48] ss:$16 sps:$4 sm:$0xff]  }
0x1081   :  { %11973 = vmatprep.subr.bf16.mxu0 %v20658_v22  ;;  %v20734_v22 = vld [vmem:[#allocation36 + $0x228] ss:$16 sps:$4 sm:$0xff]  }
0x1084   :  { %11974 = vmatpush1.bf16.msra.mxu0 %v20656_v8  ;;  %v20739_v8 = vld [vmem:[#allocation36 + $0x6c] ss:$16 sps:$4 sm:$0xff]  }
0x1085   :  { %11975 = vmatprep.subr.bf16.mxu0 %v20664_v46  ;;  %v20742_v46 = vld [vmem:[#allocation36 + $0x24c] ss:$16 sps:$4 sm:$0xff]  }
0x1088   :  { %11976 = vmatpush1.bf16.msra.mxu0 %v20662_v47  ;;  %v20737_v47 = vld [vmem:[#allocation36 + $0x68] ss:$16 sps:$4 sm:$0xff]  }
0x1089   :  { %11977 = vmatprep.subr.bf16.mxu0 %v20670_v39  ;;  %v20740_v39 = vld [vmem:[#allocation36 + $0x248] ss:$16 sps:$4 sm:$0xff]  }
0x108c   :  { %11978 = vmatpush1.bf16.msra.mxu0 %v20668_v43  ;;  %v20745_v43 = vld [vmem:[#allocation36 + $0x8c] ss:$16 sps:$4 sm:$0xff]  }
0x108d   :  { %11979 = vmatprep.subr.bf16.mxu0 %v20676_v17  ;;  %v20748_v17 = vld [vmem:[#allocation36 + $0x26c] ss:$16 sps:$4 sm:$0xff]  }
0x1090   :  { %11980 = vmatpush1.bf16.msra.mxu0 %v20674_v6  ;;  %v20743_v6 = vld [vmem:[#allocation36 + $0x88] ss:$16 sps:$4 sm:$0xff]  }
0x1091   :  { %11981 = vmatprep.subr.bf16.mxu0 %v20682_v49  ;;  %v20746_v49 = vld [vmem:[#allocation36 + $0x268] ss:$16 sps:$4 sm:$0xff]  }
0x1094   :  { %11982 = vmatpush1.bf16.msra.mxu0 %v20680_v63  ;;  %v20751_v63 = vld [vmem:[#allocation36 + $0xac] ss:$16 sps:$4 sm:$0xff]  }
0x1095   :  { %11983 = vmatprep.subr.bf16.mxu0 %v20688_v18  ;;  %v20754_v18 = vld [vmem:[#allocation36 + $0x28c] ss:$16 sps:$4 sm:$0xff]  }
0x1098   :  { %11984 = vmatpush1.bf16.msra.mxu0 %v20686_v55  ;;  %v20749_v55 = vld [vmem:[#allocation36 + $0xa8] ss:$16 sps:$4 sm:$0xff]  }
0x1099   :  { %11985 = vmatprep.subr.bf16.mxu0 %v20694_v59  ;;  %v20752_v59 = vld [vmem:[#allocation36 + $0x288] ss:$16 sps:$4 sm:$0xff]  }
0x109c   :  { %11986 = vmatpush1.bf16.msra.mxu0 %v20692_v44  ;;  %v20757_v44 = vld [vmem:[#allocation36 + $0xcc] ss:$16 sps:$4 sm:$0xff]  }
0x109d   :  { %11987 = vmatprep.subr.bf16.mxu0 %v20700_v28  ;;  %v20760_v28 = vld [vmem:[#allocation36 + $0x2ac] ss:$16 sps:$4 sm:$0xff]  }
0x10a0   :  { %11988 = vmatpush1.bf16.msra.mxu0 %v20698_v24  ;;  %v20755_v24 = vld [vmem:[#allocation36 + $0xc8] ss:$16 sps:$4 sm:$0xff]  }
0x10a1   :  { %11989 = vmatprep.subr.bf16.mxu0 %v20706_v57  ;;  %v20758_v57 = vld [vmem:[#allocation36 + $0x2a8] ss:$16 sps:$4 sm:$0xff]  }
0x10a4   :  { %11990 = vmatpush1.bf16.msra.mxu0 %v20704_v61  ;;  %v20763_v61 = vld [vmem:[#allocation36 + $0xec] ss:$16 sps:$4 sm:$0xff]  }
0x10a5   :  { %11991 = vmatprep.subr.bf16.mxu0 %v20712_v12  ;;  %v20761_v12 = vld [vmem:[#allocation36 + $0xe8] ss:$16 sps:$4 sm:$0xff]  }
0x10a8   :  { %11992 = vmatpush1.bf16.msra.mxu0 %v20710_v62  ;;  %v20769_v62 = vld [vmem:[#allocation36 + $0x10c] ss:$16 sps:$4 sm:$0xff]  }
0x10a9   :  { %11993 = vmatprep.subr.bf16.mxu0 %v20718_v53  ;;  %v20767_v53 = vld [vmem:[#allocation36 + $0x108] ss:$16 sps:$4 sm:$0xff]  }
0x10ac   :  { %11994 = vmatpush1.bf16.msra.mxu0 %v20716_v2  ;;  %v20775_v2 = vld [vmem:[#allocation36 + $0x12c] ss:$16 sps:$4 sm:$0xff]  }
0x10ad   :  { %11995 = vmatprep.subr.bf16.mxu0 %v20721_v23  ;;  %v20778_v23 = vld [vmem:[#allocation36 + $0x30c] ss:$16 sps:$4 sm:$0xff]  }
0x10b0   :  { %11996 = vmatpush1.bf16.msra.mxu0 %v20719_v42  ;;  %v20776_v42 = vld [vmem:[#allocation36 + $0x308] ss:$16 sps:$4 sm:$0xff]  }
0x10b1   :  { %12047 = vmatprep.subr.bf16.mxu0 %v20730_v26  ;;  %v20781_v26 = vld [vmem:[#allocation36 + $0x14c] ss:$16 sps:$4 sm:$0xff]  }
0x10be   :  { %v23699_v40 = vpop.f32.mrb[58].mxu0 }
0x10bf   :  { %v23701_v13 = vpop.f32.mrb[59].mxu0 }
0x113e   :  { %v23703_v7 = vpop.f32.mrb[64].mxu0 }
0x113f   :  { %v23705_v50 = vpop.f32.mrb[65].mxu0 }
0x1142   :  { %v11057_v11 = vpop.f32.mrb[66].mxu0 }
0x1143   :  { %v11059_v27 = vpop.f32.mrb[67].mxu0  ;;  %v23707_v9 = vpack.c.bf16 %v11057_v11, %v11057_v11  ;;  %v20784_v11 = vld [vmem:[#allocation36 + $0x32c] ss:$16 sps:$4 sm:$0xff]  }
0x1144   :  { %v11281_v31 = vpack.c.bf16 %v11059_v27, %v11059_v27  ;;  %v20779_v27 = vld [vmem:[#allocation36 + $0x148] ss:$16 sps:$4 sm:$0xff]  }
0x1146   :  { %v11128_v33 = vpop.f32.mrb[68].mxu0  ;;  %11956 = vmatprep.mubr.bf16.mxu1 %v11281_v31 }
0x1147   :  { %v11130_v56 = vpop.f32.mrb[69].mxu0  ;;  %11957 = vmatmul.mubr.bf16.vlgmr.msra.gmra.mrb[76].mxu1 %v23707_v9  ;;  %v23710_v48 = vpack.c.bf16 %v11128_v33, %v11128_v33  ;;  %v20785_v33 = vld [vmem:[#allocation36 + $0x168] ss:$16 sps:$4 sm:$0xff]  }
0x1148   :  { %v11283_v51 = vpack.c.bf16 %v11130_v56, %v11130_v56  ;;  %12007 = vmatpush1.bf16.msra.mxu1 %v20722_v29  ;;  %12038 = vmatprep.mubr.bf16.mxu1 %v11281_v31  ;;  %v20782_v31 = vld [vmem:[#allocation36 + $0x328] ss:$16 sps:$4 sm:$0xff]   ;;  %v20787_v29 = vld [vmem:[#allocation36 + $0x16c] ss:$16 sps:$4 sm:$0xff]  }
0x1149   :  { %12008 = vmatprep.subr.bf16.mxu1 %v20727_v10  ;;  %v20790_v10 = vld [vmem:[#allocation36 + $0x34c] ss:$16 sps:$4 sm:$0xff]   ;;  %v20788_v56 = vld [vmem:[#allocation36 + $0x348] ss:$16 sps:$4 sm:$0xff]  }
0x114a   :  { %11997 = vmatprep.mubr.bf16.mxu0 %v11283_v51 }
0x114b   :  { %11998 = vmatmul.mubr.bf16.vlgmr.msra.gmra.mrb[72].mxu0 %v23710_v48 }
0x114c   :  { %12009 = vmatpush1.bf16.msra.mxu1 %v20725_v30  ;;  %12048 = vmatpush1.bf16.msra.mxu0 %v20728_v16  ;;  %v20796_v30 = vld [vmem:[#allocation36 + $0x36c] ss:$16 sps:$4 sm:$0xff]   ;;  %v20791_v16 = vld [vmem:[#allocation36 + $0x188] ss:$16 sps:$4 sm:$0xff]  }
0x114d   :  { %12079 = vmatprep.mubr.bf16.mxu0 %v11283_v51  ;;  %12010 = vmatprep.subr.bf16.mxu1 %v20733_v20  ;;  %v20793_v51 = vld [vmem:[#allocation36 + $0x18c] ss:$16 sps:$4 sm:$0xff]   ;;  %v20794_v20 = vld [vmem:[#allocation36 + $0x368] ss:$16 sps:$4 sm:$0xff]  }
0x114e   :  { %12049 = vmatprep.subr.bf16.mxu0 %v20736_v32  ;;  %v20799_v32 = vld [vmem:[#allocation36 + $0x1ac] ss:$16 sps:$4 sm:$0xff]  }
0x1150   :  { %12011 = vmatpush1.bf16.msra.mxu1 %v20731_v58  ;;  %12050 = vmatpush1.bf16.msra.mxu0 %v20734_v22  ;;  %v20802_v58 = vld [vmem:[#allocation36 + $0x38c] ss:$16 sps:$4 sm:$0xff]   ;;  %v20797_v22 = vld [vmem:[#allocation36 + $0x1a8] ss:$16 sps:$4 sm:$0xff]  }
0x1151   :  { %12012 = vmatprep.subr.bf16.mxu1 %v20739_v8  ;;  %12051 = vmatprep.subr.bf16.mxu0 %v20742_v46  ;;  %v20800_v8 = vld [vmem:[#allocation36 + $0x388] ss:$16 sps:$4 sm:$0xff]   ;;  %v20805_v46 = vld [vmem:[#allocation36 + $0x1cc] ss:$16 sps:$4 sm:$0xff]  }
0x1154   :  { %12013 = vmatpush1.bf16.msra.mxu1 %v20737_v47  ;;  %12052 = vmatpush1.bf16.msra.mxu0 %v20740_v39  ;;  %v20808_v47 = vld [vmem:[#allocation36 + $0x3ac] ss:$16 sps:$4 sm:$0xff]   ;;  %v20803_v39 = vld [vmem:[#allocation36 + $0x1c8] ss:$16 sps:$4 sm:$0xff]  }
0x1155   :  { %12014 = vmatprep.subr.bf16.mxu1 %v20745_v43  ;;  %12053 = vmatprep.subr.bf16.mxu0 %v20748_v17  ;;  %v20806_v43 = vld [vmem:[#allocation36 + $0x3a8] ss:$16 sps:$4 sm:$0xff]   ;;  %v20811_v17 = vld [vmem:[#allocation36 + $0x1ec] ss:$16 sps:$4 sm:$0xff]  }
0x1158   :  { %12015 = vmatpush1.bf16.msra.mxu1 %v20743_v6  ;;  %12054 = vmatpush1.bf16.msra.mxu0 %v20746_v49  ;;  %v20814_v6 = vld [vmem:[#allocation36 + $0x3cc] ss:$16 sps:$4 sm:$0xff]   ;;  %v20809_v49 = vld [vmem:[#allocation36 + $0x1e8] ss:$16 sps:$4 sm:$0xff]  }
0x1159   :  { %12016 = vmatprep.subr.bf16.mxu1 %v20751_v63  ;;  %12055 = vmatprep.subr.bf16.mxu0 %v20754_v18  ;;  %v20812_v63 = vld [vmem:[#allocation36 + $0x3c8] ss:$16 sps:$4 sm:$0xff]   ;;  %v20817_v18 = vld [vmem:[#allocation36 + $0x3ec] ss:$16 sps:$4 sm:$0xff]  }
0x115c   :  { %12017 = vmatpush1.bf16.msra.mxu1 %v20749_v55  ;;  %12056 = vmatpush1.bf16.msra.mxu0 %v20752_v59  ;;  %v20820_v55 = vld [vmem:[#allocation35 + $0x4] ss:$16 sps:$4 sm:$0xff]   ;;  %v20815_v59 = vld [vmem:[#allocation36 + $0x3e8] ss:$16 sps:$4 sm:$0xff]  }
0x115d   :  { %12018 = vmatprep.subr.bf16.mxu1 %v20757_v44  ;;  %12057 = vmatprep.subr.bf16.mxu0 %v20760_v28  ;;  %v20818_v44 = vld [vmem:[#allocation35] ss:$16 sps:$4 sm:$0xff]   ;;  %v20823_v28 = vld [vmem:[#allocation35 + $0x24] ss:$16 sps:$4 sm:$0xff]  }
0x1160   :  { %12019 = vmatpush1.bf16.msra.mxu1 %v20755_v24  ;;  %12058 = vmatpush1.bf16.msra.mxu0 %v20758_v57  ;;  %v20826_v24 = vld [vmem:[#allocation35 + $0x204] ss:$16 sps:$4 sm:$0xff]   ;;  %v23715_v57 = vpack.c.bf16 %v23701_v13, %v23701_v13  ;;  %v20827_v13 = vld [vmem:[#allocation35 + $0x40] ss:$16 sps:$4 sm:$0xff]  }
0x1161   :  { %12020 = vmatprep.subr.bf16.mxu1 %v20763_v61  ;;  %12059 = vmatprep.subr.bf16.mxu0 %v20766_v45  ;;  %v20821_v61 = vld [vmem:[#allocation35 + $0x20] ss:$16 sps:$4 sm:$0xff]  }
0x1162   :  { %v20824_v45 = vld [vmem:[#allocation35 + $0x200] ss:$16 sps:$4 sm:$0xff]  }
0x1164   :  { %12021 = vmatpush1.bf16.msra.mxu1 %v20761_v12  ;;  %12060 = vmatpush1.bf16.msra.mxu0 %v20764_v14  ;;  %v20829_v12 = vld [vmem:[#allocation35 + $0x44] ss:$16 sps:$4 sm:$0xff]  }
0x1165   :  { %12022 = vmatprep.subr.bf16.mxu1 %v20769_v62  ;;  %12061 = vmatprep.subr.bf16.mxu0 %v20772_v0  ;;  %v20832_v14 = vld [vmem:[#allocation35 + $0x224] ss:$16 sps:$4 sm:$0xff]   ;;  %v23722_v0 = vpack.c.bf16 %v23705_v50, %v23705_v50 }
0x1166   :  { %v18030_v62 = vld [vmem:[%s24112_s23] ss:$0 sm:$0xff] }
0x1167   :  { %vm10821_vm11 = vcmp.eq.s32.totalorder %v18030_v62, %v23148_v21  ;;  %v20833_v21 = vld [vmem:[#allocation35 + $0x60] ss:$16 sps:$4 sm:$0xff]   ;;  %v20898_v62 = vld [vmem:[#allocation35 + $0x384] ss:$16 sps:$4 sm:$0xff]  }
0x1168   :  { %12023 = vmatpush1.bf16.msra.mxu1 %v20767_v53  ;;  %12062 = vmatpush1.bf16.msra.mxu0 %v20770_v52  ;;  %v23727_v53 = vsel %vm10821_vm11, 1.0, %v22620_v1  ;;  %v20835_v52 = vld [vmem:[#allocation35 + $0x64] ss:$16 sps:$4 sm:$0xff]  }
0x1169   :  { %12024 = vmatprep.subr.bf16.mxu1 %v20775_v2  ;;  %12063 = vmatprep.subr.bf16.mxu0 %v20778_v23  ;;  %v20838_v2 = vld [vmem:[#allocation35 + $0x244] ss:$16 sps:$4 sm:$0xff]   ;;  %v10825_v50 = vsel %vm10824_vm12, %v23727_v53, 0.0 }
0x116a   :  { %10826 = vadd.xlane.f32.xlu1 %v10825_v50  ;;  %v20841_v23 = vld [vmem:[#allocation35 + $0x84] ss:$16 sps:$4 sm:$0xff]   ;;  %v20899_v50 = vld [vmem:[#allocation35 + $0x1c0] ss:$16 sps:$4 sm:$0xff]  }
0x116c   :  { %12025 = vmatpush1.bf16.msra.mxu1 %v20773_v3  ;;  %12064 = vmatpush1.bf16.msra.mxu0 %v20776_v42  ;;  %v20844_v3 = vld [vmem:[#allocation35 + $0x264] ss:$16 sps:$4 sm:$0xff]   ;;  %v20839_v42 = vld [vmem:[#allocation35 + $0x80] ss:$16 sps:$4 sm:$0xff]  }
0x116d   :  { %12026 = vmatprep.subr.bf16.mxu1 %v20781_v26  ;;  %12065 = vmatprep.subr.bf16.mxu0 %v20784_v11  ;;  %v20842_v26 = vld [vmem:[#allocation35 + $0x260] ss:$16 sps:$4 sm:$0xff]   ;;  %v20847_v11 = vld [vmem:[#allocation35 + $0xa4] ss:$16 sps:$4 sm:$0xff]  }
0x1170   :  { %12027 = vmatpush1.bf16.msra.mxu1 %v20779_v27  ;;  %12066 = vmatpush1.bf16.msra.mxu0 %v20782_v31  ;;  %v20850_v27 = vld [vmem:[#allocation35 + $0x284] ss:$16 sps:$4 sm:$0xff]   ;;  %v20845_v31 = vld [vmem:[#allocation35 + $0xa0] ss:$16 sps:$4 sm:$0xff]  }
0x1171   :  { %12028 = vmatprep.subr.bf16.mxu1 %v20787_v29  ;;  %12067 = vmatprep.subr.bf16.mxu0 %v20790_v10  ;;  %v20848_v29 = vld [vmem:[#allocation35 + $0x280] ss:$16 sps:$4 sm:$0xff]   ;;  %v20853_v10 = vld [vmem:[#allocation35 + $0xc4] ss:$16 sps:$4 sm:$0xff]  }
0x1174   :  { %12029 = vmatpush1.bf16.msra.mxu1 %v20785_v33  ;;  %12068 = vmatpush1.bf16.msra.mxu0 %v20788_v56  ;;  %v20856_v33 = vld [vmem:[#allocation35 + $0x2a4] ss:$16 sps:$4 sm:$0xff]   ;;  %v20851_v56 = vld [vmem:[#allocation35 + $0xc0] ss:$16 sps:$4 sm:$0xff]  }
0x1175   :  { %12030 = vmatprep.subr.bf16.mxu1 %v20793_v51  ;;  %12069 = vmatprep.subr.bf16.mxu0 %v20796_v30  ;;  %v20854_v51 = vld [vmem:[#allocation35 + $0x2a0] ss:$16 sps:$4 sm:$0xff]   ;;  %v20859_v30 = vld [vmem:[#allocation35 + $0xe4] ss:$16 sps:$4 sm:$0xff]  }
0x1178   :  { %12031 = vmatpush1.bf16.msra.mxu1 %v20791_v16  ;;  %12070 = vmatpush1.bf16.msra.mxu0 %v20794_v20  ;;  %v20862_v16 = vld [vmem:[#allocation35 + $0x2c4] ss:$16 sps:$4 sm:$0xff]   ;;  %v20857_v20 = vld [vmem:[#allocation35 + $0xe0] ss:$16 sps:$4 sm:$0xff]  }
0x1179   :  { %12032 = vmatprep.subr.bf16.mxu1 %v20799_v32  ;;  %12071 = vmatprep.subr.bf16.mxu0 %v20802_v58  ;;  %v20860_v32 = vld [vmem:[#allocation35 + $0x2c0] ss:$16 sps:$4 sm:$0xff]   ;;  %v20865_v58 = vld [vmem:[#allocation35 + $0x104] ss:$16 sps:$4 sm:$0xff]  }
0x117c   :  { %12033 = vmatpush1.bf16.msra.mxu1 %v20797_v22  ;;  %12072 = vmatpush1.bf16.msra.mxu0 %v20800_v8  ;;  %v20868_v22 = vld [vmem:[#allocation35 + $0x2e4] ss:$16 sps:$4 sm:$0xff]   ;;  %v20863_v8 = vld [vmem:[#allocation35 + $0x100] ss:$16 sps:$4 sm:$0xff]  }
0x117d   :  { %12034 = vmatprep.subr.bf16.mxu1 %v20805_v46  ;;  %12073 = vmatprep.subr.bf16.mxu0 %v20808_v47  ;;  %v20866_v46 = vld [vmem:[#allocation35 + $0x2e0] ss:$16 sps:$4 sm:$0xff]   ;;  %v20871_v47 = vld [vmem:[#allocation35 + $0x124] ss:$16 sps:$4 sm:$0xff]  }
0x1180   :  { %12035 = vmatpush1.bf16.msra.mxu1 %v20803_v39  ;;  %12074 = vmatpush1.bf16.msra.mxu0 %v20806_v43  ;;  %v20874_v39 = vld [vmem:[#allocation35 + $0x304] ss:$16 sps:$4 sm:$0xff]   ;;  %v20869_v43 = vld [vmem:[#allocation35 + $0x120] ss:$16 sps:$4 sm:$0xff]  }
0x1181   :  { %12036 = vmatprep.subr.bf16.mxu1 %v20811_v17  ;;  %12075 = vmatprep.subr.bf16.mxu0 %v20814_v6  ;;  %v20872_v17 = vld [vmem:[#allocation35 + $0x300] ss:$16 sps:$4 sm:$0xff]   ;;  %v20877_v6 = vld [vmem:[#allocation35 + $0x144] ss:$16 sps:$4 sm:$0xff]  }
0x1184   :  { %12037 = vmatpush1.bf16.msra.mxu1 %v20809_v49  ;;  %12076 = vmatpush1.bf16.msra.mxu0 %v20812_v63  ;;  %v20880_v49 = vld [vmem:[#allocation35 + $0x324] ss:$16 sps:$4 sm:$0xff]   ;;  %v20875_v63 = vld [vmem:[#allocation35 + $0x140] ss:$16 sps:$4 sm:$0xff]  }
0x1185   :  { %12077 = vmatprep.subr.bf16.mxu0 %v20817_v18  ;;  %12728 = vmatprep.subr.bf16.mxu1 %v20820_v55  ;;  %v20878_v18 = vld [vmem:[#allocation35 + $0x320] ss:$16 sps:$4 sm:$0xff]   ;;  %v20883_v55 = vld [vmem:[#allocation35 + $0x164] ss:$16 sps:$4 sm:$0xff]  }
0x1187   :  { %12039 = vmatmul.mubr.bf16.vlgmr.msra.gmra.mrb[80].mxu1 %v23707_v9  ;;  %v20830_v9 = vld [vmem:[#allocation35 + $0x220] ss:$16 sps:$4 sm:$0xff]  }
0x1188   :  { %12078 = vmatpush1.bf16.msra.mxu0 %v20815_v59  ;;  %12729 = vmatpush1.bf16.msra.mxu1 %v20818_v44  ;;  %v20886_v59 = vld [vmem:[#allocation35 + $0x344] ss:$16 sps:$4 sm:$0xff]   ;;  %v20881_v44 = vld [vmem:[#allocation35 + $0x160] ss:$16 sps:$4 sm:$0xff]  }
0x1189   :  { %12760 = vmatprep.mubr.bf16.mxu1 %v23715_v57  ;;  %12730 = vmatprep.subr.bf16.mxu1 %v20823_v28  ;;  %v20884_v28 = vld [vmem:[#allocation35 + $0x340] ss:$16 sps:$4 sm:$0xff]  }
0x118a   :  { %12769 = vmatprep.subr.bf16.mxu0 %v20826_v24  ;;  %v20889_v24 = vld [vmem:[#allocation35 + $0x184] ss:$16 sps:$4 sm:$0xff]  }
0x118b   :  { %12080 = vmatmul.mubr.bf16.vlgmr.msra.gmra.mrb[76].mxu0 %v23710_v48  ;;  %v20836_v48 = vld [vmem:[#allocation35 + $0x240] ss:$16 sps:$4 sm:$0xff]  }
0x118c   :  { %12731 = vmatpush1.bf16.msra.mxu1 %v20821_v61  ;;  %12770 = vmatpush1.bf16.msra.mxu0 %v20824_v45  ;;  %v20892_v61 = vld [vmem:[#allocation35 + $0x364] ss:$16 sps:$4 sm:$0xff]   ;;  %v20887_v45 = vld [vmem:[#allocation35 + $0x180] ss:$16 sps:$4 sm:$0xff]  }
0x118d   :  { %12801 = vmatprep.mubr.bf16.mxu0 %v23722_v0  ;;  %12732 = vmatprep.subr.bf16.mxu1 %v20829_v12  ;;  %v20890_v12 = vld [vmem:[#allocation35 + $0x360] ss:$16 sps:$4 sm:$0xff]  }
0x118e   :  { %12771 = vmatprep.subr.bf16.mxu0 %v20832_v14  ;;  %v20895_v14 = vld [vmem:[#allocation35 + $0x1a4] ss:$16 sps:$4 sm:$0xff]  }
0x1190   :  { %12733 = vmatpush1.bf16.msra.mxu1 %v20827_v13  ;;  %12772 = vmatpush1.bf16.msra.mxu0 %v20830_v9  ;;  %v20893_v13 = vld [vmem:[#allocation35 + $0x1a0] ss:$16 sps:$4 sm:$0xff]  }
0x1191   :  { %12734 = vmatprep.subr.bf16.mxu1 %v20835_v52  ;;  %12773 = vmatprep.subr.bf16.mxu0 %v20838_v2  ;;  %v20896_v9 = vld [vmem:[#allocation35 + $0x380] ss:$16 sps:$4 sm:$0xff]   ;;  %v20901_v52 = vld [vmem:[#allocation35 + $0x1c4] ss:$16 sps:$4 sm:$0xff]  }
0x1192   :  { %v20904_v2 = vld [vmem:[#allocation35 + $0x3a4] ss:$16 sps:$4 sm:$0xff]  }
0x1194   :  { %12735 = vmatpush1.bf16.msra.mxu1 %v20833_v21  ;;  %12774 = vmatpush1.bf16.msra.mxu0 %v20836_v48  ;;  %v20902_v21 = vld [vmem:[#allocation35 + $0x3a0] ss:$16 sps:$4 sm:$0xff]   ;;  %v20907_v48 = vld [vmem:[#allocation35 + $0x1e4] ss:$16 sps:$4 sm:$0xff]  }
0x1195   :  { %12736 = vmatprep.subr.bf16.mxu1 %v20841_v23  ;;  %12775 = vmatprep.subr.bf16.mxu0 %v20844_v3  ;;  %v20910_v23 = vld [vmem:[#allocation35 + $0x3c4] ss:$16 sps:$4 sm:$0xff]   ;;  %v20905_v3 = vld [vmem:[#allocation35 + $0x1e0] ss:$16 sps:$4 sm:$0xff]  }
0x1198   :  { %12737 = vmatpush1.bf16.msra.mxu1 %v20839_v42  ;;  %12776 = vmatpush1.bf16.msra.mxu0 %v20842_v26  ;;  %v20908_v42 = vld [vmem:[#allocation35 + $0x3c0] ss:$16 sps:$4 sm:$0xff]   ;;  %v20913_v26 = vld [vmem:[#allocation35 + $0x3e4] ss:$16 sps:$4 sm:$0xff]  }
0x1199   :  { %12738 = vmatprep.subr.bf16.mxu1 %v20847_v11  ;;  %12777 = vmatprep.subr.bf16.mxu0 %v20850_v27  ;;  %v20916_v11 = vld [vmem:[#allocation35 + $0xc] ss:$16 sps:$4 sm:$0xff]   ;;  %v20911_v27 = vld [vmem:[#allocation35 + $0x3e0] ss:$16 sps:$4 sm:$0xff]  }
0x119c   :  { %12739 = vmatpush1.bf16.msra.mxu1 %v20845_v31  ;;  %12778 = vmatpush1.bf16.msra.mxu0 %v20848_v29  ;;  %v20914_v31 = vld [vmem:[#allocation35 + $0x8] ss:$16 sps:$4 sm:$0xff]   ;;  %v23733_v29 = vpack.c.bf16 %v23699_v40, %v23699_v40  ;;  %v20928_v40 = vld [vmem:[#allocation35 + $0x22c] ss:$16 sps:$4 sm:$0xff]  }
0x119d   :  { %12740 = vmatprep.subr.bf16.mxu1 %v20853_v10  ;;  %12779 = vmatprep.subr.bf16.mxu0 %v20856_v33  ;;  %v20919_v10 = vld [vmem:[#allocation35 + $0x2c] ss:$16 sps:$4 sm:$0xff]  }
0x119e   :  { %v20922_v33 = vld [vmem:[#allocation35 + $0x20c] ss:$16 sps:$4 sm:$0xff]  }
0x11a0   :  { %12741 = vmatpush1.bf16.msra.mxu1 %v20851_v56  ;;  %12780 = vmatpush1.bf16.msra.mxu0 %v20854_v51  ;;  %v20917_v56 = vld [vmem:[#allocation35 + $0x28] ss:$16 sps:$4 sm:$0xff]  }
0x11a1   :  { %12742 = vmatprep.subr.bf16.mxu1 %v20859_v30  ;;  %12781 = vmatprep.subr.bf16.mxu0 %v20862_v16  ;;  %v20920_v51 = vld [vmem:[#allocation35 + $0x208] ss:$16 sps:$4 sm:$0xff]   ;;  %v23738_v30 = vpack.c.bf16 %v23703_v7, %v23703_v7  ;;  %v20925_v16 = vld [vmem:[#allocation35 + $0x4c] ss:$16 sps:$4 sm:$0xff]  }
0x11a2   :  { %v20929_v7 = vld [vmem:[#allocation35 + $0x68] ss:$16 sps:$4 sm:$0xff]  }
0x11a4   :  { %12743 = vmatpush1.bf16.msra.mxu1 %v20857_v20  ;;  %12782 = vmatpush1.bf16.msra.mxu0 %v20860_v32  ;;  %v20923_v20 = vld [vmem:[#allocation35 + $0x48] ss:$16 sps:$4 sm:$0xff]  }
0x11a5   :  { %12744 = vmatprep.subr.bf16.mxu1 %v20865_v58  ;;  %12783 = vmatprep.subr.bf16.mxu0 %v20868_v22  ;;  %v20926_v32 = vld [vmem:[#allocation35 + $0x228] ss:$16 sps:$4 sm:$0xff]   ;;  %v20931_v58 = vld [vmem:[#allocation35 + $0x6c] ss:$16 sps:$4 sm:$0xff]  }
0x11a6   :  { %v20934_v22 = vld [vmem:[#allocation35 + $0x24c] ss:$16 sps:$4 sm:$0xff]  }
0x11a8   :  { %12745 = vmatpush1.bf16.msra.mxu1 %v20863_v8  ;;  %12784 = vmatpush1.bf16.msra.mxu0 %v20866_v46  ;;  %v20937_v8 = vld [vmem:[#allocation35 + $0x8c] ss:$16 sps:$4 sm:$0xff]  }
0x11a9   :  { %12746 = vmatprep.subr.bf16.mxu1 %v20871_v47  ;;  %12785 = vmatprep.subr.bf16.mxu0 %v20874_v39  ;;  %v20940_v46 = vld [vmem:[#allocation35 + $0x26c] ss:$16 sps:$4 sm:$0xff]   ;;  %v20935_v47 = vld [vmem:[#allocation35 + $0x88] ss:$16 sps:$4 sm:$0xff]  }
0x11aa   :  { %v20938_v39 = vld [vmem:[#allocation35 + $0x268] ss:$16 sps:$4 sm:$0xff]  }
0x11ac   :  { %12747 = vmatpush1.bf16.msra.mxu1 %v20869_v43  ;;  %12786 = vmatpush1.bf16.msra.mxu0 %v20872_v17  ;;  %v20943_v43 = vld [vmem:[#allocation35 + $0xac] ss:$16 sps:$4 sm:$0xff]   ;;  %v20941_v17 = vld [vmem:[#allocation35 + $0xa8] ss:$16 sps:$4 sm:$0xff]  }
0x11ad   :  { %12748 = vmatprep.subr.bf16.mxu1 %v20877_v6  ;;  %12787 = vmatprep.subr.bf16.mxu0 %v20880_v49  ;;  %v20944_v6 = vld [vmem:[#allocation35 + $0x288] ss:$16 sps:$4 sm:$0xff]   ;;  %v20949_v49 = vld [vmem:[#allocation35 + $0xcc] ss:$16 sps:$4 sm:$0xff]  }
0x11b0   :  { %12749 = vmatpush1.bf16.msra.mxu1 %v20875_v63  ;;  %12788 = vmatpush1.bf16.msra.mxu0 %v20878_v18  ;;  %v20952_v63 = vld [vmem:[#allocation35 + $0x2ac] ss:$16 sps:$4 sm:$0xff]   ;;  %v20947_v18 = vld [vmem:[#allocation35 + $0xc8] ss:$16 sps:$4 sm:$0xff]  }
0x11b1   :  { %12750 = vmatprep.subr.bf16.mxu1 %v20883_v55  ;;  %12789 = vmatprep.subr.bf16.mxu0 %v20886_v59  ;;  %v20950_v55 = vld [vmem:[#allocation35 + $0x2a8] ss:$16 sps:$4 sm:$0xff]   ;;  %v20955_v59 = vld [vmem:[#allocation35 + $0xec] ss:$16 sps:$4 sm:$0xff]  }
0x11b4   :  { %12751 = vmatpush1.bf16.msra.mxu1 %v20881_v44  ;;  %12790 = vmatpush1.bf16.msra.mxu0 %v20884_v28  ;;  %v20958_v44 = vld [vmem:[#allocation35 + $0x2cc] ss:$16 sps:$4 sm:$0xff]   ;;  %v20953_v28 = vld [vmem:[#allocation35 + $0xe8] ss:$16 sps:$4 sm:$0xff]  }
0x11b5   :  { %12752 = vmatprep.subr.bf16.mxu1 %v20889_v24  ;;  %12791 = vmatprep.subr.bf16.mxu0 %v20892_v61  ;;  %v20956_v24 = vld [vmem:[#allocation35 + $0x2c8] ss:$16 sps:$4 sm:$0xff]   ;;  %v20961_v61 = vld [vmem:[#allocation35 + $0x10c] ss:$16 sps:$4 sm:$0xff]  }
0x11b8   :  { %12753 = vmatpush1.bf16.msra.mxu1 %v20887_v45  ;;  %12792 = vmatpush1.bf16.msra.mxu0 %v20890_v12  ;;  %v20964_v45 = vld [vmem:[#allocation35 + $0x2ec] ss:$16 sps:$4 sm:$0xff]   ;;  %v20959_v12 = vld [vmem:[#allocation35 + $0x108] ss:$16 sps:$4 sm:$0xff]  }
0x11b9   :  { %12754 = vmatprep.subr.bf16.mxu1 %v20895_v14  ;;  %12793 = vmatprep.subr.bf16.mxu0 %v20898_v62  ;;  %v20962_v14 = vld [vmem:[#allocation35 + $0x2e8] ss:$16 sps:$4 sm:$0xff]   ;;  %v20967_v62 = vld [vmem:[#allocation35 + $0x12c] ss:$16 sps:$4 sm:$0xff]  }
0x11bc   :  { %12755 = vmatpush1.bf16.msra.mxu1 %v20893_v13  ;;  %12794 = vmatpush1.bf16.msra.mxu0 %v20896_v9  ;;  %v20970_v13 = vld [vmem:[#allocation35 + $0x30c] ss:$16 sps:$4 sm:$0xff]   ;;  %v20965_v9 = vld [vmem:[#allocation35 + $0x128] ss:$16 sps:$4 sm:$0xff]  }
0x11bd   :  { %12756 = vmatprep.subr.bf16.mxu1 %v20901_v52  ;;  %12795 = vmatprep.subr.bf16.mxu0 %v20904_v2  ;;  %v20968_v52 = vld [vmem:[#allocation35 + $0x308] ss:$16 sps:$4 sm:$0xff]   ;;  %v20973_v2 = vld [vmem:[#allocation35 + $0x14c] ss:$16 sps:$4 sm:$0xff]  }
0x11c0   :  { %12757 = vmatpush1.bf16.msra.mxu1 %v20899_v50  ;;  %12796 = vmatpush1.bf16.msra.mxu0 %v20902_v21  ;;  %v20976_v50 = vld [vmem:[#allocation35 + $0x32c] ss:$16 sps:$4 sm:$0xff]   ;;  %v20971_v21 = vld [vmem:[#allocation35 + $0x148] ss:$16 sps:$4 sm:$0xff]  }
0x11c1   :  { %12758 = vmatprep.subr.bf16.mxu1 %v20907_v48  ;;  %12797 = vmatprep.subr.bf16.mxu0 %v20910_v23  ;;  %v20974_v48 = vld [vmem:[#allocation35 + $0x328] ss:$16 sps:$4 sm:$0xff]   ;;  %v20979_v23 = vld [vmem:[#allocation35 + $0x16c] ss:$16 sps:$4 sm:$0xff]  }
0x11c4   :  { %12759 = vmatpush1.bf16.msra.mxu1 %v20905_v3  ;;  %12798 = vmatpush1.bf16.msra.mxu0 %v20908_v42  ;;  %v20982_v3 = vld [vmem:[#allocation35 + $0x34c] ss:$16 sps:$4 sm:$0xff]   ;;  %v20977_v42 = vld [vmem:[#allocation35 + $0x168] ss:$16 sps:$4 sm:$0xff]  }
0x11c5   :  { %12799 = vmatprep.subr.bf16.mxu0 %v20913_v26  ;;  %12810 = vmatprep.subr.bf16.mxu1 %v20916_v11  ;;  %v20980_v26 = vld [vmem:[#allocation35 + $0x348] ss:$16 sps:$4 sm:$0xff]   ;;  %v20985_v11 = vld [vmem:[#allocation35 + $0x18c] ss:$16 sps:$4 sm:$0xff]  }
0x11c7   :  { %12761 = vmatmul.mubr.bf16.vlgmr.msra.gmra.mrb[84].mxu1 %v23733_v29 }
0x11c8   :  { %12800 = vmatpush1.bf16.msra.mxu0 %v20911_v27  ;;  %12811 = vmatpush1.bf16.msra.mxu1 %v20914_v31  ;;  %v20988_v27 = vld [vmem:[#allocation35 + $0x36c] ss:$16 sps:$4 sm:$0xff]   ;;  %v20983_v31 = vld [vmem:[#allocation35 + $0x188] ss:$16 sps:$4 sm:$0xff]  }
0x11c9   :  { %12842 = vmatprep.mubr.bf16.mxu1 %v23715_v57  ;;  %12812 = vmatprep.subr.bf16.mxu1 %v20919_v10  ;;  %v20932_v57 = vld [vmem:[#allocation35 + $0x248] ss:$16 sps:$4 sm:$0xff]  }
0x11ca   :  { %12851 = vmatprep.subr.bf16.mxu0 %v20922_v33  ;;  %v20986_v10 = vld [vmem:[#allocation35 + $0x368] ss:$16 sps:$4 sm:$0xff]   ;;  %v20991_v33 = vld [vmem:[#allocation35 + $0x1ac] ss:$16 sps:$4 sm:$0xff]  }
0x11cb   :  { %12802 = vmatmul.mubr.bf16.vlgmr.msra.gmra.mrb[80].mxu0 %v23738_v30 }
0x11cc   :  { %12813 = vmatpush1.bf16.msra.mxu1 %v20917_v56  ;;  %12852 = vmatpush1.bf16.msra.mxu0 %v20920_v51  ;;  %v20994_v56 = vld [vmem:[#allocation35 + $0x38c] ss:$16 sps:$4 sm:$0xff]   ;;  %v20989_v51 = vld [vmem:[#allocation35 + $0x1a8] ss:$16 sps:$4 sm:$0xff]  }
0x11cd   :  { %12883 = vmatprep.mubr.bf16.mxu0 %v23722_v0  ;;  %12814 = vmatprep.subr.bf16.mxu1 %v20925_v16  ;;  %v20946_v0 = vld [vmem:[#allocation35 + $0x28c] ss:$16 sps:$4 sm:$0xff]   ;;  %v20992_v16 = vld [vmem:[#allocation35 + $0x388] ss:$16 sps:$4 sm:$0xff]  }
0x11ce   :  { %12853 = vmatprep.subr.bf16.mxu0 %v20928_v40  ;;  %v20997_v40 = vld [vmem:[#allocation35 + $0x1cc] ss:$16 sps:$4 sm:$0xff]  }
0x11d0   :  { %12815 = vmatpush1.bf16.msra.mxu1 %v20923_v20  ;;  %12854 = vmatpush1.bf16.msra.mxu0 %v20926_v32  ;;  %v21000_v20 = vld [vmem:[#allocation35 + $0x3ac] ss:$16 sps:$4 sm:$0xff]   ;;  %v20995_v32 = vld [vmem:[#allocation35 + $0x1c8] ss:$16 sps:$4 sm:$0xff]  }
0x11d1   :  { %12816 = vmatprep.subr.bf16.mxu1 %v20931_v58  ;;  %12855 = vmatprep.subr.bf16.mxu0 %v20934_v22  ;;  %v20998_v58 = vld [vmem:[#allocation35 + $0x3a8] ss:$16 sps:$4 sm:$0xff]   ;;  %v21003_v22 = vld [vmem:[#allocation35 + $0x1ec] ss:$16 sps:$4 sm:$0xff]  }
0x11d4   :  { %12817 = vmatpush1.bf16.msra.mxu1 %v20929_v7  ;;  %12856 = vmatpush1.bf16.msra.mxu0 %v20932_v57  ;;  %v21006_v7 = vld [vmem:[#allocation35 + $0x3cc] ss:$16 sps:$4 sm:$0xff]   ;;  %v21001_v57 = vld [vmem:[#allocation35 + $0x1e8] ss:$16 sps:$4 sm:$0xff]  }
0x11d5   :  { %12818 = vmatprep.subr.bf16.mxu1 %v20937_v8  ;;  %12857 = vmatprep.subr.bf16.mxu0 %v20940_v46  ;;  %v21004_v8 = vld [vmem:[#allocation35 + $0x3c8] ss:$16 sps:$4 sm:$0xff]   ;;  %v21009_v46 = vld [vmem:[#allocation35 + $0x3ec] ss:$16 sps:$4 sm:$0xff]  }
0x11d8   :  { %12819 = vmatpush1.bf16.msra.mxu1 %v20935_v47  ;;  %12858 = vmatpush1.bf16.msra.mxu0 %v20938_v39  ;;  %v21007_v47 = vld [vmem:[#allocation35 + $0x3e8] ss:$16 sps:$4 sm:$0xff]  }
0x11d9   :  { %12820 = vmatprep.subr.bf16.mxu1 %v20943_v43  ;;  %12859 = vmatprep.subr.bf16.mxu0 %v20946_v0 }
0x11dc   :  { %12821 = vmatpush1.bf16.msra.mxu1 %v20941_v17  ;;  %12860 = vmatpush1.bf16.msra.mxu0 %v20944_v6 }
0x11dd   :  { %12822 = vmatprep.subr.bf16.mxu1 %v20949_v49  ;;  %12861 = vmatprep.subr.bf16.mxu0 %v20952_v63 }
0x11e0   :  { %12823 = vmatpush1.bf16.msra.mxu1 %v20947_v18  ;;  %12862 = vmatpush1.bf16.msra.mxu0 %v20950_v55 }
0x11e1   :  { %12824 = vmatprep.subr.bf16.mxu1 %v20955_v59  ;;  %12863 = vmatprep.subr.bf16.mxu0 %v20958_v44 }
0x11e4   :  { %12825 = vmatpush1.bf16.msra.mxu1 %v20953_v28  ;;  %12864 = vmatpush1.bf16.msra.mxu0 %v20956_v24 }
0x11e5   :  { %12826 = vmatprep.subr.bf16.mxu1 %v20961_v61  ;;  %12865 = vmatprep.subr.bf16.mxu0 %v20964_v45 }
0x11e8   :  { %12827 = vmatpush1.bf16.msra.mxu1 %v20959_v12  ;;  %12866 = vmatpush1.bf16.msra.mxu0 %v20962_v14 }
0x11e9   :  { %12828 = vmatprep.subr.bf16.mxu1 %v20967_v62  ;;  %12867 = vmatprep.subr.bf16.mxu0 %v20970_v13  ;;  %v23751_v13 = vpop.permute.xlu0 %11135 }
0x11ec   :  { %12829 = vmatpush1.bf16.msra.mxu1 %v20965_v9  ;;  %12868 = vmatpush1.bf16.msra.mxu0 %v20968_v52  ;;  %v1954_v9 = vld [vmem:[#allocation38] sm:$0x77] }
0x11ed   :  { %12830 = vmatprep.subr.bf16.mxu1 %v20973_v2  ;;  %12869 = vmatprep.subr.bf16.mxu0 %v20976_v50  ;;  %v11143_v52 = vrot.slane %v1954_v9, %v23172_v34  ;;  %v11187_v2 = vrot.slane %v1954_v9, %v23175_v35  ;;  %v11147_v50 = vrot.slane %v1954_v9, %v23284_v4 }
0x11f0   :  { %12831 = vmatpush1.bf16.msra.mxu1 %v20971_v21  ;;  %12870 = vmatpush1.bf16.msra.mxu0 %v20974_v48  ;;  %v11191_v21 = vrot.slane %v1954_v9, %v23287_v60  ;;  %v23757_v48 = vpop.permute.xlu0 %11181 }
0x11f1   :  { %12832 = vmatprep.subr.bf16.mxu1 %v20979_v23  ;;  %12871 = vmatprep.subr.bf16.mxu0 %v20982_v3  ;;  %v11163_v3 = vrot.slane %v11143_v52, %v23172_v34 }
0x11f4   :  { %12833 = vmatpush1.bf16.msra.mxu1 %v20977_v42  ;;  %12872 = vmatpush1.bf16.msra.mxu0 %v20980_v26  ;;  %v11207_v42 = vrot.slane %v11187_v2, %v23175_v35  ;;  %v11235_v26 = vrot.slane %v1954_v9, %v23178_v36 }
0x11f5   :  { %12834 = vmatprep.subr.bf16.mxu1 %v20985_v11  ;;  %12873 = vmatprep.subr.bf16.mxu0 %v20988_v27  ;;  %v11167_v11 = vrot.slane %v11147_v50, %v23172_v34  ;;  %v11211_v27 = vrot.slane %v11191_v21, %v23175_v35  ;;  %v1955_v21 = vld [vmem:[#allocation38 + $0x8] sm:$0x77] }
0x11f7   :  { %v10827_v23 = vpop.xlane.xlu1 %10826 }
0x11f8   :  { %12835 = vmatpush1.bf16.msra.mxu1 %v20983_v31  ;;  %12874 = vmatpush1.bf16.msra.mxu0 %v20986_v10  ;;  %v11239_v31 = vrot.slane %v1954_v9, %v23294_v5  ;;  %v10828_v10 = vmax.f32 %v10827_v23, 1.0  ;;  %v11151_v23 = vrot.slane %v1955_v21, %v23172_v34 }
0x11f9   :  { %12836 = vmatprep.subr.bf16.mxu1 %v20991_v33  ;;  %12875 = vmatprep.subr.bf16.mxu0 %v20994_v56  ;;  %v11176_v33 = vmul.f32 %v11163_v3, %v23751_v13  ;;  %v11220_v56 = vmul.f32 %v11207_v42, %v23757_v48  ;;  %v11195_v3 = vrot.slane %v1955_v21, %v23175_v35 }
0x11fa   :  { %21686 = vrcp.f32 %v10828_v10  ;;  %v11155_v42 = vrot.slane %v1955_v21, %v23284_v4 }
0x11fc   :  { %12837 = vmatpush1.bf16.msra.mxu1 %v20989_v51  ;;  %12876 = vmatpush1.bf16.msra.mxu0 %v20992_v16  ;;  %v11255_v51 = vrot.slane %v11235_v26, %v23178_v36  ;;  %v23768_v16 = vpop.permute.xlu0 %11229  ;;  %v11171_v26 = vrot.slane %v11151_v23, %v23172_v34  ;;  %v21015_v23 = vld [vmem:[#allocation42 + $0x24] ss:$16 sps:$4 sm:$0xff]  }
0x11fd   :  { %12838 = vmatprep.subr.bf16.mxu1 %v20997_v40  ;;  %12877 = vmatprep.subr.bf16.mxu0 %v21000_v20  ;;  %v11177_v40 = vmul.f32 %v11167_v11, %v23751_v13  ;;  %v11221_v20 = vmul.f32 %v11211_v27, %v23757_v48  ;;  %v11215_v11 = vrot.slane %v11195_v3, %v23175_v35  ;;  %v21013_v3 = vld [vmem:[#allocation42 + $0x20] ss:$16 sps:$4 sm:$0xff]  }
0x11fe   :  { %v11243_v27 = vrot.slane %v1955_v21, %v23178_v36 }
0x1200   :  { %12839 = vmatpush1.bf16.msra.mxu1 %v20995_v32  ;;  %12878 = vmatpush1.bf16.msra.mxu0 %v20998_v58  ;;  %v11259_v32 = vrot.slane %v11239_v31, %v23178_v36  ;;  %v11175_v31 = vrot.slane %v11155_v42, %v23172_v34  ;;  %v21018_v42 = vld [vmem:[#allocation42 + $0x44] ss:$16 sps:$4 sm:$0xff]  }
0x1201   :  { %12840 = vmatprep.subr.bf16.mxu1 %v21003_v22  ;;  %12879 = vmatprep.subr.bf16.mxu0 %v21006_v7 }
0x1204   :  { %12841 = vmatpush1.bf16.msra.mxu1 %v21001_v57  ;;  %12880 = vmatpush1.bf16.msra.mxu0 %v21004_v8  ;;  %v11224_v57 = vadd.f32 %v11220_v56, %v11176_v33  ;;  %v11268_v8 = vmul.f32 %v11255_v51, %v23768_v16  ;;  %v11247_v33 = vrot.slane %v1955_v21, %v23294_v5 }
0x1205   :  { %12881 = vmatprep.subr.bf16.mxu0 %v21009_v46  ;;  %v11178_v56 = vmul.f32 %v11171_v26, %v23751_v13  ;;  %v11222_v51 = vmul.f32 %v11215_v11, %v23757_v48  ;;  %v21021_v26 = vld [vmem:[#allocation42 + $0x64] ss:$16 sps:$4 sm:$0xff]   ;;  %v21019_v11 = vld [vmem:[#allocation42 + $0x60] ss:$16 sps:$4 sm:$0xff]  }
0x1207   :  { %12843 = vmatmul.mubr.bf16.vlgmr.msra.gmra.mrb[88].mxu1 %v23733_v29 }
0x1208   :  { %12882 = vmatpush1.bf16.msra.mxu0 %v21007_v47  ;;  %13004 = vmatprep.mubr.f32.mxu1 %v22620_v1 }
0x120b   :  { %12884 = vmatmul.mubr.bf16.vlgmr.msra.gmra.mrb[84].mxu0 %v23738_v30 }
0x120c   :  { %13075 = vmatprep.mubr.f32.mxu0 %v22620_v1 }
0x121a   :  { %v11958_v39 = vpop.f32.mrb[76].mxu1 }
0x121b   :  { %v11960_v43 = vpop.f32.mrb[77].mxu1 }
0x121c   :  { %v11962_v0 = vpop.f32.mrb[78].mxu1 }
0x121d   :  { %v11963_v17 = vpop.f32.mrb[79].mxu1  ;;  %v11269_v0 = vmul.f32 %v11259_v32, %v23768_v16 }
0x121e   :  { %v11999_v6 = vpop.f32.mrb[72].mxu0 }
0x121f   :  { %v12000_v49 = vadd.f32 %v11999_v6, %v11958_v39  ;;  %v12001_v63 = vpop.f32.mrb[73].mxu0  ;;  %v23774_v39 = vld [vmem:[#allocation39] sm:$0xf] }
0x1220   :  { %v12002_v18 = vadd.f32 %v12001_v63, %v11960_v43  ;;  %v12003_v55 = vpop.f32.mrb[74].mxu0  ;;  %v11225_v43 = vadd.f32 %v11221_v20, %v11177_v40  ;;  %v11272_v63 = vadd.f32 %v11268_v8, %v11224_v57  ;;  %v11263_v40 = vrot.slane %v11243_v27, %v23178_v36  ;;  %v21024_v27 = vld [vmem:[#allocation42 + $0x84] ss:$16 sps:$4 sm:$0xff]  }
0x1221   :  { %v12004_v59 = vpop.f32.mrb[75].mxu0  ;;  %v11179_v20 = vmul.f32 %v11175_v31, %v23751_v13  ;;  %v11226_v8 = vadd.f32 %v11222_v51, %v11178_v56  ;;  %v21022_v31 = vld [vmem:[#allocation42 + $0x80] ss:$16 sps:$4 sm:$0xff]   ;;  %v21030_v56 = vld [vmem:[#allocation42 + $0xc4] ss:$16 sps:$4 sm:$0xff]  }
0x1222   :  { %v12900_v59 = vrot.slane %v23774_v39, %v23172_v34  ;;  %v21028_v51 = vld [vmem:[#allocation42 + $0xc0] ss:$16 sps:$4 sm:$0xff]  }
0x125a   :  { %v12040_v44 = vpop.f32.mrb[80].mxu1 }
0x125b   :  { %v12042_v28 = vpop.f32.mrb[81].mxu1 }
0x125c   :  { %v12044_v29 = vpop.f32.mrb[82].mxu1 }
0x125d   :  { %v12045_v24 = vpop.f32.mrb[83].mxu1  ;;  %v12904_v29 = vrot.slane %v23774_v39, %v23175_v35 }
0x125e   :  { %v12081_v61 = vpop.f32.mrb[76].mxu0 }
0x125f   :  { %v23747_v45 = vadd.f32 %v12081_v61, %v12040_v44  ;;  %v12083_v30 = vpop.f32.mrb[77].mxu0 }
0x1260   :  { %v23749_v12 = vadd.f32 %v12083_v30, %v12042_v28  ;;  %v12085_v14 = vpop.f32.mrb[78].mxu0 }
0x1261   :  { %v12086_v62 = vpop.f32.mrb[79].mxu0  ;;  %v21687_v14 = vpop.eup %21686 }
0x1262   :  { %v23782_v52 = vmul.f32 %v21687_v14, %v23727_v53  ;;  %v11199_v53 = vrot.slane %v1955_v21, %v23287_v60  ;;  %v21010_v21 = vld [vmem:[#allocation42] ss:$16 sps:$4 sm:$0xff]  }
0x1264   :  { %v11219_v10 = vrot.slane %v11199_v53, %v23175_v35  ;;  %v21016_v53 = vld [vmem:[#allocation42 + $0x40] ss:$16 sps:$4 sm:$0xff]  }
0x1266   :  { %v11223_v32 = vmul.f32 %v11219_v10, %v23757_v48  ;;  %v21027_v10 = vld [vmem:[#allocation42 + $0xa4] ss:$16 sps:$4 sm:$0xff]  }
0x129a   :  { %v12762_v58 = vpop.f32.mrb[84].mxu1 }
0x129b   :  { %v12763_v22 = vadd.f32 %v12762_v58, %v12000_v49  ;;  %v12764_v7 = vpop.f32.mrb[85].mxu1  ;;  %v11273_v49 = vadd.f32 %v11269_v0, %v11225_v43  ;;  %v11267_v58 = vrot.slane %v11247_v33, %v23178_v36  ;;  %v11227_v0 = vadd.f32 %v11223_v32, %v11179_v20  ;;  %v21025_v33 = vld [vmem:[#allocation42 + $0xa0] ss:$16 sps:$4 sm:$0xff]   ;;  %v21036_v32 = vld [vmem:[#allocation42 + $0x104] ss:$16 sps:$4 sm:$0xff]  }
0x129c   :  { %v12765_v46 = vadd.f32 %v12764_v7, %v12002_v18  ;;  %v12766_v47 = vpop.f32.mrb[86].mxu1  ;;  %v21031_v20 = vld [vmem:[#allocation42 + $0xe0] ss:$16 sps:$4 sm:$0xff]  }
0x129d   :  { %v12767_v17 = vpop.f32.mrb[87].mxu1 }
0x129e   :  { %v12803_v6 = vpop.f32.mrb[80].mxu0  ;;  %v11271_v17 = vmul.f32 %v11267_v58, %v23768_v16  ;;  %v21034_v58 = vld [vmem:[#allocation42 + $0x100] ss:$16 sps:$4 sm:$0xff]  }
0x129f   :  { %v12804_v55 = vadd.f32 %v12803_v6, %v12763_v22  ;;  %v12805_v44 = vpop.f32.mrb[81].mxu0 }
0x12a0   :  { %v12806_v28 = vadd.f32 %v12805_v44, %v12765_v46  ;;  %v12807_v18 = vpop.f32.mrb[82].mxu0  ;;  %v11270_v46 = vmul.f32 %v11263_v40, %v23768_v16  ;;  %v12908_v44 = vrot.slane %v23774_v39, %v23178_v36  ;;  %v21033_v40 = vld [vmem:[#allocation42 + $0xe4] ss:$16 sps:$4 sm:$0xff]  }
0x12a1   :  { %v12892_v24 = vadd.f32 %v12804_v55, %v11272_v63  ;;  %v12808_v61 = vpop.f32.mrb[83].mxu0 }
0x12a2   :  { %v12893_v30 = vadd.f32 %v12806_v28, %v11273_v49  ;;  %v11274_v55 = vadd.f32 %v11270_v46, %v11226_v8  ;;  %v11275_v28 = vadd.f32 %v11271_v17, %v11227_v0  ;;  %v21040_v8 = vld [vmem:[#allocation42 + $0x140] ss:$16 sps:$4 sm:$0xff]   ;;  %v21045_v46 = vld [vmem:[#allocation42 + $0x164] ss:$16 sps:$4 sm:$0xff]  }
0x12a3   :  { %v12917_v62 = vadd.f32 %v12900_v59, %v12892_v24  ;;  %v21046_v0 = vld [vmem:[#allocation42 + $0x180] ss:$16 sps:$4 sm:$0xff]   ;;  %v21051_v17 = vld [vmem:[#allocation42 + $0x1a4] ss:$16 sps:$4 sm:$0xff]  }
0x12a4   :  { %v12918_v9 = vadd.f32 %v12904_v29, %v12893_v30  ;;  %v12912_v29 = vrot.slane %v23774_v39, %v23181_v37 }
0x12a5   :  { %v12921_v50 = vmax.f32 %v12917_v62, 0.0 }
0x12a6   :  { %v12922_v2 = vmax.f32 %v12918_v9, 0.0 }
0x12a8   :  { %18300 = vmatprep.subr.msk.mxu1 %vm9374_vm14, %v12922_v2 }
0x12a9   :  { %18301 = vmatpush1.msk.msra.mxu1 %vm9374_vm14, %v12921_v50  ;;  %v21012_v50 = vld [vmem:[#allocation42 + $0x4] ss:$16 sps:$4 sm:$0xff]  }
0x12aa   :  { %18302 = vmatmul.mubr.msk.f32.vlgmr.msra.gmra.mrb[92].mxu1 %vm9370_vm15, %v23782_v52 }
0x12ab   :  { %13158 = vmatprep.mubr.f32.mxu1 %v22620_v1 }
0x12da   :  { %v12844_v22 = vpop.f32.mrb[88].mxu1 }
0x12db   :  { %v12845_v7 = vadd.f32 %v12844_v22, %v23747_v45  ;;  %v12846_v57 = vpop.f32.mrb[89].mxu1  ;;  %v21039_v22 = vld [vmem:[#allocation42 + $0x124] ss:$16 sps:$4 sm:$0xff]  }
0x12dc   :  { %v12847_v47 = vadd.f32 %v12846_v57, %v23749_v12  ;;  %v12848_v43 = vpop.f32.mrb[90].mxu1  ;;  %v21042_v57 = vld [vmem:[#allocation42 + $0x144] ss:$16 sps:$4 sm:$0xff]  }
0x12dd   :  { %v12849_v6 = vpop.f32.mrb[91].mxu1  ;;  %v21048_v43 = vld [vmem:[#allocation42 + $0x184] ss:$16 sps:$4 sm:$0xff]  }
0x12de   :  { %v12885_v63 = vpop.f32.mrb[84].mxu0  ;;  %v21049_v6 = vld [vmem:[#allocation42 + $0x1a0] ss:$16 sps:$4 sm:$0xff]  }
0x12df   :  { %v12886_v59 = vadd.f32 %v12885_v63, %v12845_v7  ;;  %v12887_v49 = vpop.f32.mrb[85].mxu0  ;;  %v21037_v7 = vld [vmem:[#allocation42 + $0x120] ss:$16 sps:$4 sm:$0xff]  }
0x12e0   :  { %v12888_v45 = vadd.f32 %v12887_v49, %v12847_v47  ;;  %v12889_v18 = vpop.f32.mrb[86].mxu0  ;;  %v21043_v47 = vld [vmem:[#allocation42 + $0x160] ss:$16 sps:$4 sm:$0xff]   ;;  %v21057_v49 = vld [vmem:[#allocation42 + $0x1e4] ss:$16 sps:$4 sm:$0xff]  }
0x12e1   :  { %v12894_v24 = vadd.f32 %v12886_v59, %v11274_v55  ;;  %v12890_v12 = vpop.f32.mrb[87].mxu0  ;;  %v21054_v59 = vld [vmem:[#allocation42 + $0x1c4] ss:$16 sps:$4 sm:$0xff]   ;;  %v21064_v18 = vld [vmem:[#allocation42 + $0x220] ss:$16 sps:$4 sm:$0xff]  }
0x12e2   :  { %v12895_v61 = vadd.f32 %v12888_v45, %v11275_v28  ;;  %v21055_v28 = vld [vmem:[#allocation42 + $0x1e0] ss:$16 sps:$4 sm:$0xff]   ;;  %v21063_v45 = vld [vmem:[#allocation42 + $0xc] ss:$16 sps:$4 sm:$0xff]  }
0x12e3   :  { %v12919_v30 = vadd.f32 %v12908_v44, %v12894_v24  ;;  %v21052_v44 = vld [vmem:[#allocation42 + $0x1c0] ss:$16 sps:$4 sm:$0xff]   ;;  %v21066_v24 = vld [vmem:[#allocation42 + $0x224] ss:$16 sps:$4 sm:$0xff]  }
0x12e4   :  { %v12920_v14 = vadd.f32 %v12912_v29, %v12895_v61  ;;  %v21058_v29 = vld [vmem:[#allocation42 + $0x200] ss:$16 sps:$4 sm:$0xff]  }
0x12e5   :  { %v12923_v9 = vmax.f32 %v12919_v30, 0.0  ;;  %v21070_v12 = vld [vmem:[#allocation42 + $0x240] ss:$16 sps:$4 sm:$0xff]   ;;  %v21078_v30 = vld [vmem:[#allocation42 + $0x264] ss:$16 sps:$4 sm:$0xff]  }
0x12e6   :  { %v12924_v62 = vmax.f32 %v12920_v14, 0.0  ;;  %v21076_v61 = vld [vmem:[#allocation42 + $0x260] ss:$16 sps:$4 sm:$0xff]  }
0x12e7   :  { %v21082_v14 = vld [vmem:[#allocation42 + $0x280] ss:$16 sps:$4 sm:$0xff]  }
0x12e8   :  { %18303 = vmatprep.subr.msk.mxu0 %vm9374_vm14, %v12924_v62  ;;  %v21084_v62 = vld [vmem:[#allocation42 + $0x284] ss:$16 sps:$4 sm:$0xff]  }
0x12e9   :  { %18304 = vmatpush1.msk.msra.mxu0 %vm9374_vm14, %v12923_v9  ;;  %v21088_v9 = vld [vmem:[#allocation42 + $0x2a0] ss:$16 sps:$4 sm:$0xff]  }
0x12ea   :  { %18305 = vmatmul.mubr.msk.f32.vlgmr.msra.gmra.mrb[70].mxu0 %vm9370_vm15, %v23782_v52 }
0x12eb   :  { %13229 = vmatprep.mubr.f32.mxu0 %v22620_v1 }
0x137d   :  { %v23818_v2 = vpop.f32.mrb[92].mxu1 }
0x137e   :  { %v23820_v39 = vpop.f32.mrb[93].mxu1 }
0x137f   :  { %18306 = vmatprep.subr.msk.mxu1 %vm9374_vm14, %v23820_v39 }
0x1380   :  { %18307 = vmatpush1.msk.msra.mxu1 %vm9374_vm14, %v23818_v2 }
0x1381   :  { %18308 = vmatmul.mubr.msk.f32.vlgmr.msra.gmra.mrb[94].mxu1 %vm9370_vm15, %v23656_v54  ;;  %18312 = vmatprep.subr.msk.mxu1 %vm9374_vm14, %v23820_v39 }
0x1382   :  { %18313 = vmatpush1.msk.msra.mxu1 %vm9374_vm14, %v23818_v2  ;;  %13300 = vmatprep.mubr.f32.mxu1 %v22620_v1 }
0x1383   :  { %14156 = vmatprep.subr.bf16.mxu1 %v21012_v50  ;;  %v21090_v50 = vld [vmem:[#allocation42 + $0x2a4] ss:$16 sps:$4 sm:$0xff]  }
0x1385   :  { %18314 = vmatmul.mubr.msk.f32.vlgmr.msra.gmra.mrb[96].mxu1 %vm9370_vm15, %v23685_v38 }
0x1386   :  { %14157 = vmatpush1.bf16.msra.mxu1 %v21010_v21  ;;  %v21094_v21 = vld [vmem:[#allocation42 + $0x2c0] ss:$16 sps:$4 sm:$0xff]  }
0x1387   :  { %14158 = vmatprep.subr.bf16.mxu1 %v21015_v23  ;;  %v21096_v23 = vld [vmem:[#allocation42 + $0x2c4] ss:$16 sps:$4 sm:$0xff]  }
0x138a   :  { %14159 = vmatpush1.bf16.msra.mxu1 %v21013_v3  ;;  %v21100_v3 = vld [vmem:[#allocation42 + $0x2e0] ss:$16 sps:$4 sm:$0xff]  }
0x138b   :  { %14160 = vmatprep.subr.bf16.mxu1 %v21018_v42  ;;  %v21102_v42 = vld [vmem:[#allocation42 + $0x2e4] ss:$16 sps:$4 sm:$0xff]  }
0x138e   :  { %14161 = vmatpush1.bf16.msra.mxu1 %v21016_v53  ;;  %v21106_v53 = vld [vmem:[#allocation42 + $0x300] ss:$16 sps:$4 sm:$0xff]  }
0x138f   :  { %14162 = vmatprep.subr.bf16.mxu1 %v21021_v26  ;;  %v21108_v26 = vld [vmem:[#allocation42 + $0x304] ss:$16 sps:$4 sm:$0xff]  }
0x1392   :  { %14163 = vmatpush1.bf16.msra.mxu1 %v21019_v11  ;;  %v21112_v11 = vld [vmem:[#allocation42 + $0x320] ss:$16 sps:$4 sm:$0xff]  }
0x1393   :  { %14164 = vmatprep.subr.bf16.mxu1 %v21024_v27  ;;  %v21114_v27 = vld [vmem:[#allocation42 + $0x324] ss:$16 sps:$4 sm:$0xff]  }
0x1396   :  { %14165 = vmatpush1.bf16.msra.mxu1 %v21022_v31  ;;  %v21118_v31 = vld [vmem:[#allocation42 + $0x340] ss:$16 sps:$4 sm:$0xff]  }
0x1397   :  { %14166 = vmatprep.subr.bf16.mxu1 %v21027_v10  ;;  %v21120_v10 = vld [vmem:[#allocation42 + $0x344] ss:$16 sps:$4 sm:$0xff]  }
0x139a   :  { %14167 = vmatpush1.bf16.msra.mxu1 %v21025_v33  ;;  %v21124_v33 = vld [vmem:[#allocation42 + $0x360] ss:$16 sps:$4 sm:$0xff]  }
0x139b   :  { %14168 = vmatprep.subr.bf16.mxu1 %v21030_v56  ;;  %v21126_v56 = vld [vmem:[#allocation42 + $0x364] ss:$16 sps:$4 sm:$0xff]  }
0x139e   :  { %14169 = vmatpush1.bf16.msra.mxu1 %v21028_v51  ;;  %v21130_v51 = vld [vmem:[#allocation42 + $0x380] ss:$16 sps:$4 sm:$0xff]  }
0x139f   :  { %14170 = vmatprep.subr.bf16.mxu1 %v21033_v40  ;;  %v21132_v40 = vld [vmem:[#allocation42 + $0x384] ss:$16 sps:$4 sm:$0xff]  }
0x13a2   :  { %14171 = vmatpush1.bf16.msra.mxu1 %v21031_v20  ;;  %v21136_v20 = vld [vmem:[#allocation42 + $0x3a0] ss:$16 sps:$4 sm:$0xff]  }
0x13a3   :  { %14172 = vmatprep.subr.bf16.mxu1 %v21036_v32  ;;  %v21138_v32 = vld [vmem:[#allocation42 + $0x3a4] ss:$16 sps:$4 sm:$0xff]  }
0x13a6   :  { %14173 = vmatpush1.bf16.msra.mxu1 %v21034_v58  ;;  %v21144_v58 = vld [vmem:[#allocation42 + $0x3c4] ss:$16 sps:$4 sm:$0xff]  }
0x13a7   :  { %14174 = vmatprep.subr.bf16.mxu1 %v21039_v22  ;;  %v21142_v22 = vld [vmem:[#allocation42 + $0x3c0] ss:$16 sps:$4 sm:$0xff]  }
0x13aa   :  { %14175 = vmatpush1.bf16.msra.mxu1 %v21037_v7  ;;  %v21150_v7 = vld [vmem:[#allocation42 + $0x3e4] ss:$16 sps:$4 sm:$0xff]  }
0x13ab   :  { %14176 = vmatprep.subr.bf16.mxu1 %v21042_v57  ;;  %v21148_v57 = vld [vmem:[#allocation42 + $0x3e0] ss:$16 sps:$4 sm:$0xff]  }
0x13ae   :  { %14177 = vmatpush1.bf16.msra.mxu1 %v21040_v8  ;;  %v21156_v8 = vld [vmem:[#allocation42 + $0x20c] ss:$16 sps:$4 sm:$0xff]  }
0x13af   :  { %14178 = vmatprep.subr.bf16.mxu1 %v21045_v46 }
0x13b2   :  { %14179 = vmatpush1.bf16.msra.mxu1 %v21043_v47 }
0x13b3   :  { %14180 = vmatprep.subr.bf16.mxu1 %v21048_v43 }
0x13b6   :  { %14181 = vmatpush1.bf16.msra.mxu1 %v21046_v0 }
0x13b7   :  { %14182 = vmatprep.subr.bf16.mxu1 %v21051_v17 }
0x13ba   :  { %14183 = vmatpush1.bf16.msra.mxu1 %v21049_v6  ;;  %v21061_v6 = vld [vmem:[#allocation42 + $0x8] ss:$16 sps:$4 sm:$0xff]  }
0x13bb   :  { %14184 = vmatprep.subr.bf16.mxu1 %v21054_v59 }
0x13bd   :  { %v23835_v63 = vpop.f32.mrb[70].mxu0 }
0x13be   :  { %v23837_v55 = vpop.f32.mrb[71].mxu0  ;;  %14185 = vmatpush1.bf16.msra.mxu1 %v21052_v44  ;;  %v21069_v44 = vld [vmem:[#allocation42 + $0x2c] ss:$16 sps:$4 sm:$0xff]  }
0x13bf   :  { %18309 = vmatprep.subr.msk.mxu0 %vm9374_vm14, %v23837_v55  ;;  %14186 = vmatprep.subr.bf16.mxu1 %v21057_v49  ;;  %v21067_v49 = vld [vmem:[#allocation42 + $0x28] ss:$16 sps:$4 sm:$0xff]  }
0x13c0   :  { %18310 = vmatpush1.msk.msra.mxu0 %vm9374_vm14, %v23835_v63 }
0x13c1   :  { %18311 = vmatmul.mubr.msk.f32.vlgmr.msra.gmra.mrb[88].mxu0 %vm9370_vm15, %v23656_v54  ;;  %18315 = vmatprep.subr.msk.mxu0 %vm9374_vm14, %v23837_v55  ;;  %v21060_v54 = vld [vmem:[#allocation42 + $0x204] ss:$16 sps:$4 sm:$0xff]  }
0x13c2   :  { %18316 = vmatpush1.msk.msra.mxu0 %vm9374_vm14, %v23835_v63  ;;  %13371 = vmatprep.mubr.f32.mxu0 %v22620_v1 }
0x13c3   :  { %14187 = vmatpush1.bf16.msra.mxu1 %v21055_v28  ;;  %14197 = vmatprep.subr.bf16.mxu0 %v21060_v54  ;;  %v21075_v28 = vld [vmem:[#allocation42 + $0x4c] ss:$16 sps:$4 sm:$0xff]   ;;  %v21073_v54 = vld [vmem:[#allocation42 + $0x48] ss:$16 sps:$4 sm:$0xff]  }
0x13c4   :  { %14238 = vmatprep.subr.bf16.mxu1 %v21063_v45  ;;  %v21081_v45 = vld [vmem:[#allocation42 + $0x6c] ss:$16 sps:$4 sm:$0xff]  }
0x13c5   :  { %18317 = vmatmul.mubr.msk.f32.vlgmr.msra.gmra.mrb[90].mxu0 %vm9370_vm15, %v23685_v38  ;;  %v21072_v38 = vld [vmem:[#allocation42 + $0x244] ss:$16 sps:$4 sm:$0xff]  }
0x13c6   :  { %14198 = vmatpush1.bf16.msra.mxu0 %v21058_v29  ;;  %v21079_v29 = vld [vmem:[#allocation42 + $0x68] ss:$16 sps:$4 sm:$0xff]  }
0x13c7   :  { %14199 = vmatprep.subr.bf16.mxu0 %v21066_v24  ;;  %v21085_v24 = vld [vmem:[#allocation42 + $0x88] ss:$16 sps:$4 sm:$0xff]  }
0x13ca   :  { %14200 = vmatpush1.bf16.msra.mxu0 %v21064_v18  ;;  %v21087_v18 = vld [vmem:[#allocation42 + $0x8c] ss:$16 sps:$4 sm:$0xff]  }
0x13cb   :  { %14201 = vmatprep.subr.bf16.mxu0 %v21072_v38  ;;  %v21091_v38 = vld [vmem:[#allocation42 + $0xa8] ss:$16 sps:$4 sm:$0xff]  }
0x13ce   :  { %14202 = vmatpush1.bf16.msra.mxu0 %v21070_v12  ;;  %v21093_v12 = vld [vmem:[#allocation42 + $0xac] ss:$16 sps:$4 sm:$0xff]  }
0x13cf   :  { %14203 = vmatprep.subr.bf16.mxu0 %v21078_v30  ;;  %v21097_v30 = vld [vmem:[#allocation42 + $0xc8] ss:$16 sps:$4 sm:$0xff]  }
0x13d2   :  { %14204 = vmatpush1.bf16.msra.mxu0 %v21076_v61  ;;  %v21099_v61 = vld [vmem:[#allocation42 + $0xcc] ss:$16 sps:$4 sm:$0xff]  }
0x13d3   :  { %14205 = vmatprep.subr.bf16.mxu0 %v21084_v62  ;;  %v21103_v62 = vld [vmem:[#allocation42 + $0xe8] ss:$16 sps:$4 sm:$0xff]  }
0x13d6   :  { %14206 = vmatpush1.bf16.msra.mxu0 %v21082_v14  ;;  %v21105_v14 = vld [vmem:[#allocation42 + $0xec] ss:$16 sps:$4 sm:$0xff]  }
0x13d7   :  { %14207 = vmatprep.subr.bf16.mxu0 %v21090_v50  ;;  %v21109_v50 = vld [vmem:[#allocation42 + $0x108] ss:$16 sps:$4 sm:$0xff]  }
0x13da   :  { %14208 = vmatpush1.bf16.msra.mxu0 %v21088_v9  ;;  %v21111_v9 = vld [vmem:[#allocation42 + $0x10c] ss:$16 sps:$4 sm:$0xff]  }
0x13db   :  { %14209 = vmatprep.subr.bf16.mxu0 %v21096_v23  ;;  %v21115_v23 = vld [vmem:[#allocation42 + $0x128] ss:$16 sps:$4 sm:$0xff]  }
0x13de   :  { %14210 = vmatpush1.bf16.msra.mxu0 %v21094_v21  ;;  %v21117_v21 = vld [vmem:[#allocation42 + $0x12c] ss:$16 sps:$4 sm:$0xff]  }
0x13df   :  { %14211 = vmatprep.subr.bf16.mxu0 %v21102_v42  ;;  %v21121_v42 = vld [vmem:[#allocation42 + $0x148] ss:$16 sps:$4 sm:$0xff]  }
0x13e2   :  { %14212 = vmatpush1.bf16.msra.mxu0 %v21100_v3  ;;  %v21123_v3 = vld [vmem:[#allocation42 + $0x14c] ss:$16 sps:$4 sm:$0xff]  }
0x13e3   :  { %14213 = vmatprep.subr.bf16.mxu0 %v21108_v26  ;;  %v21127_v26 = vld [vmem:[#allocation42 + $0x168] ss:$16 sps:$4 sm:$0xff]  }
0x13e6   :  { %14214 = vmatpush1.bf16.msra.mxu0 %v21106_v53  ;;  %v21129_v53 = vld [vmem:[#allocation42 + $0x16c] ss:$16 sps:$4 sm:$0xff]  }
0x13e7   :  { %14215 = vmatprep.subr.bf16.mxu0 %v21114_v27  ;;  %v21133_v27 = vld [vmem:[#allocation42 + $0x188] ss:$16 sps:$4 sm:$0xff]  }
0x13ea   :  { %14216 = vmatpush1.bf16.msra.mxu0 %v21112_v11  ;;  %v21135_v11 = vld [vmem:[#allocation42 + $0x18c] ss:$16 sps:$4 sm:$0xff]  }
0x13eb   :  { %14217 = vmatprep.subr.bf16.mxu0 %v21120_v10  ;;  %v21139_v10 = vld [vmem:[#allocation42 + $0x1a8] ss:$16 sps:$4 sm:$0xff]  }
0x13ee   :  { %14218 = vmatpush1.bf16.msra.mxu0 %v21118_v31  ;;  %v21141_v31 = vld [vmem:[#allocation42 + $0x1ac] ss:$16 sps:$4 sm:$0xff]  }
0x13ef   :  { %14219 = vmatprep.subr.bf16.mxu0 %v21126_v56  ;;  %v21145_v56 = vld [vmem:[#allocation42 + $0x1c8] ss:$16 sps:$4 sm:$0xff]  }
0x13f2   :  { %14220 = vmatpush1.bf16.msra.mxu0 %v21124_v33  ;;  %v21147_v33 = vld [vmem:[#allocation42 + $0x1cc] ss:$16 sps:$4 sm:$0xff]  }
0x13f3   :  { %14221 = vmatprep.subr.bf16.mxu0 %v21132_v40 }
0x13f6   :  { %14222 = vmatpush1.bf16.msra.mxu0 %v21130_v51  ;;  %v21153_v51 = vld [vmem:[#allocation42 + $0x1ec] ss:$16 sps:$4 sm:$0xff]  }
0x13f7   :  { %14223 = vmatprep.subr.bf16.mxu0 %v21138_v32  ;;  %v21151_v32 = vld [vmem:[#allocation42 + $0x1e8] ss:$16 sps:$4 sm:$0xff]  }
0x13fa   :  { %14224 = vmatpush1.bf16.msra.mxu0 %v21136_v20 }
0x13fb   :  { %14225 = vmatprep.subr.bf16.mxu0 %v21144_v58  ;;  %v21159_v58 = vld [vmem:[#allocation41 + $0x4] ss:$16 sps:$4 sm:$0xff]  }
0x13fe   :  { %14226 = vmatpush1.bf16.msra.mxu0 %v21142_v22 }
0x13ff   :  { %14227 = vmatprep.subr.bf16.mxu0 %v21150_v7 }
0x1402   :  { %14228 = vmatpush1.bf16.msra.mxu0 %v21148_v57 }
0x1403   :  { %14279 = vmatprep.subr.bf16.mxu0 %v21156_v8  ;;  %v21154_v8 = vld [vmem:[#allocation42 + $0x208] ss:$16 sps:$4 sm:$0xff]  }
0x1454   :  { %v23852_v46 = vpop.f32.mrb[94].mxu1 }
0x1455   :  { %v23854_v47 = vpop.f32.mrb[95].mxu1 }
0x1458   :  { %v13302_v43 = vpop.f32.mrb[96].mxu1 }
0x1459   :  { %v13304_v0 = vpop.f32.mrb[97].mxu1  ;;  %v23856_v59 = vpack.c.bf16 %v13302_v43, %v13302_v43  ;;  %v21157_v43 = vld [vmem:[#allocation41] ss:$16 sps:$4 sm:$0xff]  }
0x145a   :  { %v13513_v17 = vpack.c.bf16 %v13304_v0, %v13304_v0 }
0x145c   :  { %14188 = vmatprep.mubr.bf16.mxu1 %v13513_v17 }
0x145d   :  { %14189 = vmatmul.mubr.bf16.vlgmr.msra.gmra.mrb[100].mxu1 %v23856_v59 }
0x145e   :  { %14239 = vmatpush1.bf16.msra.mxu1 %v21061_v6  ;;  %14270 = vmatprep.mubr.bf16.mxu1 %v13513_v17  ;;  %v21162_v17 = vld [vmem:[#allocation42 + $0x22c] ss:$16 sps:$4 sm:$0xff]   ;;  %v21165_v6 = vld [vmem:[#allocation41 + $0x24] ss:$16 sps:$4 sm:$0xff]  }
0x145f   :  { %14240 = vmatprep.subr.bf16.mxu1 %v21069_v44  ;;  %v23867_v44 = vpack.c.bf16 %v23854_v47, %v23854_v47  ;;  %v21169_v47 = vld [vmem:[#allocation41 + $0x40] ss:$16 sps:$4 sm:$0xff]  }
0x1462   :  { %14241 = vmatpush1.bf16.msra.mxu1 %v21067_v49  ;;  %v21160_v49 = vld [vmem:[#allocation42 + $0x228] ss:$16 sps:$4 sm:$0xff]  }
0x1463   :  { %14242 = vmatprep.subr.bf16.mxu1 %v21075_v28  ;;  %v21163_v28 = vld [vmem:[#allocation41 + $0x20] ss:$16 sps:$4 sm:$0xff]  }
0x1466   :  { %14243 = vmatpush1.bf16.msra.mxu1 %v21073_v54  ;;  %v21168_v54 = vld [vmem:[#allocation42 + $0x24c] ss:$16 sps:$4 sm:$0xff]  }
0x1467   :  { %14244 = vmatprep.subr.bf16.mxu1 %v21081_v45  ;;  %v21171_v45 = vld [vmem:[#allocation41 + $0x44] ss:$16 sps:$4 sm:$0xff]  }
0x146a   :  { %14245 = vmatpush1.bf16.msra.mxu1 %v21079_v29  ;;  %v21166_v29 = vld [vmem:[#allocation42 + $0x248] ss:$16 sps:$4 sm:$0xff]  }
0x146b   :  { %14246 = vmatprep.subr.bf16.mxu1 %v21087_v18  ;;  %v21177_v18 = vld [vmem:[#allocation41 + $0x64] ss:$16 sps:$4 sm:$0xff]  }
0x146e   :  { %14247 = vmatpush1.bf16.msra.mxu1 %v21085_v24  ;;  %v21172_v24 = vld [vmem:[#allocation42 + $0x268] ss:$16 sps:$4 sm:$0xff]  }
0x146f   :  { %14248 = vmatprep.subr.bf16.mxu1 %v21093_v12  ;;  %v21175_v12 = vld [vmem:[#allocation41 + $0x60] ss:$16 sps:$4 sm:$0xff]  }
0x1472   :  { %14249 = vmatpush1.bf16.msra.mxu1 %v21091_v38  ;;  %v21180_v38 = vld [vmem:[#allocation42 + $0x28c] ss:$16 sps:$4 sm:$0xff]  }
0x1473   :  { %14250 = vmatprep.subr.bf16.mxu1 %v21099_v61  ;;  %v21183_v61 = vld [vmem:[#allocation41 + $0x84] ss:$16 sps:$4 sm:$0xff]  }
0x1476   :  { %14251 = vmatpush1.bf16.msra.mxu1 %v21097_v30  ;;  %v21178_v30 = vld [vmem:[#allocation42 + $0x288] ss:$16 sps:$4 sm:$0xff]  }
0x1477   :  { %14252 = vmatprep.subr.bf16.mxu1 %v21105_v14  ;;  %v21181_v14 = vld [vmem:[#allocation41 + $0x80] ss:$16 sps:$4 sm:$0xff]  }
0x147a   :  { %14253 = vmatpush1.bf16.msra.mxu1 %v21103_v62  ;;  %v21186_v62 = vld [vmem:[#allocation42 + $0x2ac] ss:$16 sps:$4 sm:$0xff]  }
0x147b   :  { %14254 = vmatprep.subr.bf16.mxu1 %v21111_v9  ;;  %v21189_v9 = vld [vmem:[#allocation41 + $0xa4] ss:$16 sps:$4 sm:$0xff]  }
0x147e   :  { %14255 = vmatpush1.bf16.msra.mxu1 %v21109_v50  ;;  %v21184_v50 = vld [vmem:[#allocation42 + $0x2a8] ss:$16 sps:$4 sm:$0xff]  }
0x147f   :  { %14256 = vmatprep.subr.bf16.mxu1 %v21117_v21  ;;  %v21187_v21 = vld [vmem:[#allocation41 + $0xa0] ss:$16 sps:$4 sm:$0xff]  }
0x1482   :  { %14257 = vmatpush1.bf16.msra.mxu1 %v21115_v23  ;;  %v21192_v23 = vld [vmem:[#allocation42 + $0x2cc] ss:$16 sps:$4 sm:$0xff]  }
0x1483   :  { %14258 = vmatprep.subr.bf16.mxu1 %v21123_v3  ;;  %v21195_v3 = vld [vmem:[#allocation41 + $0xc4] ss:$16 sps:$4 sm:$0xff]  }
0x1486   :  { %14259 = vmatpush1.bf16.msra.mxu1 %v21121_v42  ;;  %v21190_v42 = vld [vmem:[#allocation42 + $0x2c8] ss:$16 sps:$4 sm:$0xff]  }
0x1487   :  { %14260 = vmatprep.subr.bf16.mxu1 %v21129_v53  ;;  %v21193_v53 = vld [vmem:[#allocation41 + $0xc0] ss:$16 sps:$4 sm:$0xff]  }
0x148a   :  { %14261 = vmatpush1.bf16.msra.mxu1 %v21127_v26  ;;  %v21198_v26 = vld [vmem:[#allocation42 + $0x2ec] ss:$16 sps:$4 sm:$0xff]  }
0x148b   :  { %14262 = vmatprep.subr.bf16.mxu1 %v21135_v11  ;;  %v21201_v11 = vld [vmem:[#allocation41 + $0xe4] ss:$16 sps:$4 sm:$0xff]  }
0x148e   :  { %14263 = vmatpush1.bf16.msra.mxu1 %v21133_v27  ;;  %v21196_v27 = vld [vmem:[#allocation42 + $0x2e8] ss:$16 sps:$4 sm:$0xff]  }
0x148f   :  { %14264 = vmatprep.subr.bf16.mxu1 %v21141_v31  ;;  %v21199_v31 = vld [vmem:[#allocation41 + $0xe0] ss:$16 sps:$4 sm:$0xff]  }
0x1492   :  { %14265 = vmatpush1.bf16.msra.mxu1 %v21139_v10  ;;  %v21204_v10 = vld [vmem:[#allocation42 + $0x30c] ss:$16 sps:$4 sm:$0xff]  }
0x1493   :  { %14266 = vmatprep.subr.bf16.mxu1 %v21147_v33  ;;  %v21207_v33 = vld [vmem:[#allocation41 + $0x104] ss:$16 sps:$4 sm:$0xff]  }
0x1494   :  { %v23859_v40 = vpop.f32.mrb[88].mxu0 }
0x1495   :  { %v23861_v20 = vpop.f32.mrb[89].mxu0 }
0x1496   :  { %14267 = vmatpush1.bf16.msra.mxu1 %v21145_v56  ;;  %v21202_v56 = vld [vmem:[#allocation42 + $0x308] ss:$16 sps:$4 sm:$0xff]  }
0x1497   :  { %14268 = vmatprep.subr.bf16.mxu1 %v21153_v51  ;;  %v21205_v51 = vld [vmem:[#allocation41 + $0x100] ss:$16 sps:$4 sm:$0xff]  }
0x1498   :  { %v13373_v22 = vpop.f32.mrb[90].mxu0 }
0x1499   :  { %v13375_v7 = vpop.f32.mrb[91].mxu0  ;;  %v23863_v0 = vpack.c.bf16 %v13373_v22, %v13373_v22  ;;  %v21208_v22 = vld [vmem:[#allocation42 + $0x328] ss:$16 sps:$4 sm:$0xff]  }
0x149a   :  { %v13515_v57 = vpack.c.bf16 %v13375_v7, %v13375_v7  ;;  %14269 = vmatpush1.bf16.msra.mxu1 %v21151_v32  ;;  %v21210_v32 = vld [vmem:[#allocation42 + $0x32c] ss:$16 sps:$4 sm:$0xff]   ;;  %v21211_v7 = vld [vmem:[#allocation41 + $0x120] ss:$16 sps:$4 sm:$0xff]  }
0x149b   :  { %14960 = vmatprep.subr.bf16.mxu1 %v21159_v58  ;;  %v21213_v58 = vld [vmem:[#allocation41 + $0x124] ss:$16 sps:$4 sm:$0xff]  }
0x149c   :  { %14229 = vmatprep.mubr.bf16.mxu0 %v13515_v57 }
0x149d   :  { %14271 = vmatmul.mubr.bf16.vlgmr.msra.gmra.mrb[104].mxu1 %v23856_v59  ;;  %14230 = vmatmul.mubr.bf16.vlgmr.msra.gmra.mrb[92].mxu0 %v23863_v0  ;;  %v21174_v59 = vld [vmem:[#allocation42 + $0x26c] ss:$16 sps:$4 sm:$0xff]  }
0x149e   :  { %14280 = vmatpush1.bf16.msra.mxu0 %v21154_v8  ;;  %14961 = vmatpush1.bf16.msra.mxu1 %v21157_v43  ;;  %v21219_v8 = vld [vmem:[#allocation41 + $0x144] ss:$16 sps:$4 sm:$0xff]   ;;  %v21214_v43 = vld [vmem:[#allocation42 + $0x348] ss:$16 sps:$4 sm:$0xff]  }
0x149f   :  { %14992 = vmatprep.mubr.bf16.mxu1 %v23867_v44  ;;  %14311 = vmatprep.mubr.bf16.mxu0 %v13515_v57  ;;  %v21216_v57 = vld [vmem:[#allocation42 + $0x34c] ss:$16 sps:$4 sm:$0xff]  }
0x14a0   :  { %14281 = vmatprep.subr.bf16.mxu0 %v21162_v17  ;;  %14962 = vmatprep.subr.bf16.mxu1 %v21165_v6  ;;  %v21217_v17 = vld [vmem:[#allocation41 + $0x140] ss:$16 sps:$4 sm:$0xff]   ;;  %v21222_v6 = vld [vmem:[#allocation42 + $0x36c] ss:$16 sps:$4 sm:$0xff]  }
0x14a2   :  { %14282 = vmatpush1.bf16.msra.mxu0 %v21160_v49  ;;  %14963 = vmatpush1.bf16.msra.mxu1 %v21163_v28  ;;  %v21225_v49 = vld [vmem:[#allocation41 + $0x164] ss:$16 sps:$4 sm:$0xff]   ;;  %v21220_v28 = vld [vmem:[#allocation42 + $0x368] ss:$16 sps:$4 sm:$0xff]  }
0x14a3   :  { %14283 = vmatprep.subr.bf16.mxu0 %v21168_v54  ;;  %14964 = vmatprep.subr.bf16.mxu1 %v21171_v45  ;;  %v21223_v54 = vld [vmem:[#allocation41 + $0x160] ss:$16 sps:$4 sm:$0xff]   ;;  %v21228_v45 = vld [vmem:[#allocation42 + $0x38c] ss:$16 sps:$4 sm:$0xff]  }
0x14a6   :  { %14284 = vmatpush1.bf16.msra.mxu0 %v21166_v29  ;;  %14965 = vmatpush1.bf16.msra.mxu1 %v21169_v47  ;;  %v21231_v29 = vld [vmem:[#allocation41 + $0x184] ss:$16 sps:$4 sm:$0xff]   ;;  %v21226_v47 = vld [vmem:[#allocation42 + $0x388] ss:$16 sps:$4 sm:$0xff]  }
0x14a7   :  { %14285 = vmatprep.subr.bf16.mxu0 %v21174_v59  ;;  %14966 = vmatprep.subr.bf16.mxu1 %v21177_v18  ;;  %v21229_v59 = vld [vmem:[#allocation41 + $0x180] ss:$16 sps:$4 sm:$0xff]   ;;  %v21234_v18 = vld [vmem:[#allocation42 + $0x3ac] ss:$16 sps:$4 sm:$0xff]  }
0x14aa   :  { %14286 = vmatpush1.bf16.msra.mxu0 %v21172_v24  ;;  %14967 = vmatpush1.bf16.msra.mxu1 %v21175_v12  ;;  %v21237_v24 = vld [vmem:[#allocation41 + $0x1a4] ss:$16 sps:$4 sm:$0xff]   ;;  %v21232_v12 = vld [vmem:[#allocation42 + $0x3a8] ss:$16 sps:$4 sm:$0xff]  }
0x14ab   :  { %14287 = vmatprep.subr.bf16.mxu0 %v21180_v38  ;;  %14968 = vmatprep.subr.bf16.mxu1 %v21183_v61  ;;  %v21235_v38 = vld [vmem:[#allocation41 + $0x1a0] ss:$16 sps:$4 sm:$0xff]   ;;  %v21240_v61 = vld [vmem:[#allocation42 + $0x3cc] ss:$16 sps:$4 sm:$0xff]  }
0x14ae   :  { %14288 = vmatpush1.bf16.msra.mxu0 %v21178_v30  ;;  %14969 = vmatpush1.bf16.msra.mxu1 %v21181_v14  ;;  %v21243_v30 = vld [vmem:[#allocation41 + $0x1c4] ss:$16 sps:$4 sm:$0xff]   ;;  %v21238_v14 = vld [vmem:[#allocation42 + $0x3c8] ss:$16 sps:$4 sm:$0xff]  }
0x14af   :  { %14289 = vmatprep.subr.bf16.mxu0 %v21186_v62  ;;  %14970 = vmatprep.subr.bf16.mxu1 %v21189_v9  ;;  %v21241_v62 = vld [vmem:[#allocation41 + $0x1c0] ss:$16 sps:$4 sm:$0xff]   ;;  %v21246_v9 = vld [vmem:[#allocation42 + $0x3ec] ss:$16 sps:$4 sm:$0xff]  }
0x14b2   :  { %14290 = vmatpush1.bf16.msra.mxu0 %v21184_v50  ;;  %14971 = vmatpush1.bf16.msra.mxu1 %v21187_v21  ;;  %v21249_v50 = vld [vmem:[#allocation41 + $0x1e4] ss:$16 sps:$4 sm:$0xff]   ;;  %v21244_v21 = vld [vmem:[#allocation42 + $0x3e8] ss:$16 sps:$4 sm:$0xff]  }
0x14b3   :  { %14291 = vmatprep.subr.bf16.mxu0 %v21192_v23  ;;  %14972 = vmatprep.subr.bf16.mxu1 %v21195_v3  ;;  %v21247_v23 = vld [vmem:[#allocation41 + $0x1e0] ss:$16 sps:$4 sm:$0xff]   ;;  %v21252_v3 = vld [vmem:[#allocation41 + $0x204] ss:$16 sps:$4 sm:$0xff]  }
0x14b6   :  { %14292 = vmatpush1.bf16.msra.mxu0 %v21190_v42  ;;  %14973 = vmatpush1.bf16.msra.mxu1 %v21193_v53  ;;  %v21255_v42 = vld [vmem:[#allocation41 + $0xc] ss:$16 sps:$4 sm:$0xff]   ;;  %v21250_v53 = vld [vmem:[#allocation41 + $0x200] ss:$16 sps:$4 sm:$0xff]  }
0x14b7   :  { %14293 = vmatprep.subr.bf16.mxu0 %v21198_v26  ;;  %14974 = vmatprep.subr.bf16.mxu1 %v21201_v11  ;;  %v23874_v26 = vpack.c.bf16 %v23852_v46, %v23852_v46  ;;  %v21253_v11 = vld [vmem:[#allocation41 + $0x8] ss:$16 sps:$4 sm:$0xff]  }
0x14b8   :  { %v21259_v46 = vld [vmem:[#allocation41 + $0x28] ss:$16 sps:$4 sm:$0xff]  }
0x14ba   :  { %14294 = vmatpush1.bf16.msra.mxu0 %v21196_v27  ;;  %14975 = vmatpush1.bf16.msra.mxu1 %v21199_v31  ;;  %v23878_v27 = vpack.c.bf16 %v23861_v20, %v23861_v20  ;;  %v21258_v31 = vld [vmem:[#allocation41 + $0x224] ss:$16 sps:$4 sm:$0xff]   ;;  %v21262_v20 = vld [vmem:[#allocation41 + $0x240] ss:$16 sps:$4 sm:$0xff]  }
0x14bb   :  { %14295 = vmatprep.subr.bf16.mxu0 %v21204_v10  ;;  %14976 = vmatprep.subr.bf16.mxu1 %v21207_v33  ;;  %v21261_v10 = vld [vmem:[#allocation41 + $0x2c] ss:$16 sps:$4 sm:$0xff]   ;;  %v21256_v33 = vld [vmem:[#allocation41 + $0x220] ss:$16 sps:$4 sm:$0xff]  }
0x14be   :  { %14296 = vmatpush1.bf16.msra.mxu0 %v21202_v56  ;;  %14977 = vmatpush1.bf16.msra.mxu1 %v21205_v51  ;;  %v21264_v56 = vld [vmem:[#allocation41 + $0x244] ss:$16 sps:$4 sm:$0xff]   ;;  %v21267_v51 = vld [vmem:[#allocation41 + $0x4c] ss:$16 sps:$4 sm:$0xff]  }
0x14bf   :  { %14297 = vmatprep.subr.bf16.mxu0 %v21210_v32  ;;  %14978 = vmatprep.subr.bf16.mxu1 %v21213_v58  ;;  %v21265_v32 = vld [vmem:[#allocation41 + $0x48] ss:$16 sps:$4 sm:$0xff]   ;;  %v21273_v58 = vld [vmem:[#allocation41 + $0x6c] ss:$16 sps:$4 sm:$0xff]  }
0x14c2   :  { %14298 = vmatpush1.bf16.msra.mxu0 %v21208_v22  ;;  %14979 = vmatpush1.bf16.msra.mxu1 %v21211_v7  ;;  %v21268_v22 = vld [vmem:[#allocation41 + $0x260] ss:$16 sps:$4 sm:$0xff]   ;;  %v21271_v7 = vld [vmem:[#allocation41 + $0x68] ss:$16 sps:$4 sm:$0xff]  }
0x14c3   :  { %14299 = vmatprep.subr.bf16.mxu0 %v21216_v57  ;;  %14980 = vmatprep.subr.bf16.mxu1 %v21219_v8  ;;  %v21276_v57 = vld [vmem:[#allocation41 + $0x284] ss:$16 sps:$4 sm:$0xff]   ;;  %v21274_v8 = vld [vmem:[#allocation41 + $0x280] ss:$16 sps:$4 sm:$0xff]  }
0x14c6   :  { %14300 = vmatpush1.bf16.msra.mxu0 %v21214_v43  ;;  %14981 = vmatpush1.bf16.msra.mxu1 %v21217_v17  ;;  %v21277_v43 = vld [vmem:[#allocation41 + $0x88] ss:$16 sps:$4 sm:$0xff]   ;;  %v21282_v17 = vld [vmem:[#allocation41 + $0x2a4] ss:$16 sps:$4 sm:$0xff]  }
0x14c7   :  { %14301 = vmatprep.subr.bf16.mxu0 %v21222_v6  ;;  %14982 = vmatprep.subr.bf16.mxu1 %v21225_v49  ;;  %v21285_v6 = vld [vmem:[#allocation41 + $0xac] ss:$16 sps:$4 sm:$0xff]   ;;  %v21280_v49 = vld [vmem:[#allocation41 + $0x2a0] ss:$16 sps:$4 sm:$0xff]  }
0x14ca   :  { %14302 = vmatpush1.bf16.msra.mxu0 %v21220_v28  ;;  %14983 = vmatpush1.bf16.msra.mxu1 %v21223_v54  ;;  %v21283_v28 = vld [vmem:[#allocation41 + $0xa8] ss:$16 sps:$4 sm:$0xff]   ;;  %v21288_v54 = vld [vmem:[#allocation41 + $0x2c4] ss:$16 sps:$4 sm:$0xff]  }
0x14cb   :  { %14303 = vmatprep.subr.bf16.mxu0 %v21228_v45  ;;  %14984 = vmatprep.subr.bf16.mxu1 %v21231_v29  ;;  %v21291_v45 = vld [vmem:[#allocation41 + $0xcc] ss:$16 sps:$4 sm:$0xff]   ;;  %v21286_v29 = vld [vmem:[#allocation41 + $0x2c0] ss:$16 sps:$4 sm:$0xff]  }
0x14ce   :  { %14304 = vmatpush1.bf16.msra.mxu0 %v21226_v47  ;;  %14985 = vmatpush1.bf16.msra.mxu1 %v21229_v59  ;;  %v21289_v47 = vld [vmem:[#allocation41 + $0xc8] ss:$16 sps:$4 sm:$0xff]   ;;  %v21294_v59 = vld [vmem:[#allocation41 + $0x2e4] ss:$16 sps:$4 sm:$0xff]  }
0x14cf   :  { %14305 = vmatprep.subr.bf16.mxu0 %v21234_v18  ;;  %14986 = vmatprep.subr.bf16.mxu1 %v21237_v24  ;;  %v21297_v18 = vld [vmem:[#allocation41 + $0xec] ss:$16 sps:$4 sm:$0xff]   ;;  %v21292_v24 = vld [vmem:[#allocation41 + $0x2e0] ss:$16 sps:$4 sm:$0xff]  }
0x14d2   :  { %14306 = vmatpush1.bf16.msra.mxu0 %v21232_v12  ;;  %14987 = vmatpush1.bf16.msra.mxu1 %v21235_v38  ;;  %v21295_v12 = vld [vmem:[#allocation41 + $0xe8] ss:$16 sps:$4 sm:$0xff]   ;;  %v21300_v38 = vld [vmem:[#allocation41 + $0x304] ss:$16 sps:$4 sm:$0xff]  }
0x14d3   :  { %14307 = vmatprep.subr.bf16.mxu0 %v21240_v61  ;;  %14988 = vmatprep.subr.bf16.mxu1 %v21243_v30  ;;  %v21303_v61 = vld [vmem:[#allocation41 + $0x10c] ss:$16 sps:$4 sm:$0xff]   ;;  %v21298_v30 = vld [vmem:[#allocation41 + $0x300] ss:$16 sps:$4 sm:$0xff]  }
0x14d6   :  { %14308 = vmatpush1.bf16.msra.mxu0 %v21238_v14  ;;  %14989 = vmatpush1.bf16.msra.mxu1 %v21241_v62  ;;  %v21301_v14 = vld [vmem:[#allocation41 + $0x108] ss:$16 sps:$4 sm:$0xff]   ;;  %v21306_v62 = vld [vmem:[#allocation41 + $0x324] ss:$16 sps:$4 sm:$0xff]  }
0x14d7   :  { %14309 = vmatprep.subr.bf16.mxu0 %v21246_v9  ;;  %14990 = vmatprep.subr.bf16.mxu1 %v21249_v50  ;;  %v21309_v9 = vld [vmem:[#allocation41 + $0x12c] ss:$16 sps:$4 sm:$0xff]   ;;  %v21304_v50 = vld [vmem:[#allocation41 + $0x320] ss:$16 sps:$4 sm:$0xff]  }
0x14da   :  { %14310 = vmatpush1.bf16.msra.mxu0 %v21244_v21  ;;  %14991 = vmatpush1.bf16.msra.mxu1 %v21247_v23  ;;  %v21307_v21 = vld [vmem:[#allocation41 + $0x128] ss:$16 sps:$4 sm:$0xff]   ;;  %v21312_v23 = vld [vmem:[#allocation41 + $0x344] ss:$16 sps:$4 sm:$0xff]  }
0x14db   :  { %15001 = vmatprep.subr.bf16.mxu0 %v21252_v3  ;;  %15042 = vmatprep.subr.bf16.mxu1 %v21255_v42  ;;  %v21315_v3 = vld [vmem:[#allocation41 + $0x14c] ss:$16 sps:$4 sm:$0xff]   ;;  %v21310_v42 = vld [vmem:[#allocation41 + $0x340] ss:$16 sps:$4 sm:$0xff]  }
0x14dd   :  { %14312 = vmatmul.mubr.bf16.vlgmr.msra.gmra.mrb[96].mxu0 %v23863_v0  ;;  %14993 = vmatmul.mubr.bf16.vlgmr.msra.gmra.mrb[108].mxu1 %v23874_v26  ;;  %v21270_v0 = vld [vmem:[#allocation41 + $0x264] ss:$16 sps:$4 sm:$0xff]  }
0x14de   :  { %15002 = vmatpush1.bf16.msra.mxu0 %v21250_v53  ;;  %15033 = vmatprep.mubr.bf16.mxu0 %v23878_v27  ;;  %v21313_v53 = vld [vmem:[#allocation41 + $0x148] ss:$16 sps:$4 sm:$0xff]  }
0x14df   :  { %15043 = vmatpush1.bf16.msra.mxu1 %v21253_v11  ;;  %15074 = vmatprep.mubr.bf16.mxu1 %v23867_v44  ;;  %v21279_v44 = vld [vmem:[#allocation41 + $0x8c] ss:$16 sps:$4 sm:$0xff]   ;;  %v21318_v11 = vld [vmem:[#allocation41 + $0x364] ss:$16 sps:$4 sm:$0xff]  }
0x14e0   :  { %15003 = vmatprep.subr.bf16.mxu0 %v21258_v31  ;;  %15044 = vmatprep.subr.bf16.mxu1 %v21261_v10  ;;  %v21321_v31 = vld [vmem:[#allocation41 + $0x16c] ss:$16 sps:$4 sm:$0xff]   ;;  %v21316_v10 = vld [vmem:[#allocation41 + $0x360] ss:$16 sps:$4 sm:$0xff]  }
0x14e2   :  { %15004 = vmatpush1.bf16.msra.mxu0 %v21256_v33  ;;  %v21319_v33 = vld [vmem:[#allocation41 + $0x168] ss:$16 sps:$4 sm:$0xff]  }
0x14e3   :  { %15045 = vmatpush1.bf16.msra.mxu1 %v21259_v46  ;;  %15005 = vmatprep.subr.bf16.mxu0 %v21264_v56  ;;  %v21324_v46 = vld [vmem:[#allocation41 + $0x384] ss:$16 sps:$4 sm:$0xff]   ;;  %v21327_v56 = vld [vmem:[#allocation41 + $0x18c] ss:$16 sps:$4 sm:$0xff]  }
0x14e4   :  { %15046 = vmatprep.subr.bf16.mxu1 %v21267_v51  ;;  %v21322_v51 = vld [vmem:[#allocation41 + $0x380] ss:$16 sps:$4 sm:$0xff]  }
0x14e6   :  { %15006 = vmatpush1.bf16.msra.mxu0 %v21262_v20  ;;  %v21325_v20 = vld [vmem:[#allocation41 + $0x188] ss:$16 sps:$4 sm:$0xff]  }
0x14e7   :  { %15047 = vmatpush1.bf16.msra.mxu1 %v21265_v32  ;;  %15007 = vmatprep.subr.bf16.mxu0 %v21270_v0  ;;  %v21330_v32 = vld [vmem:[#allocation41 + $0x3a4] ss:$16 sps:$4 sm:$0xff]   ;;  %v21333_v0 = vld [vmem:[#allocation41 + $0x1ac] ss:$16 sps:$4 sm:$0xff]  }
0x14e8   :  { %15048 = vmatprep.subr.bf16.mxu1 %v21273_v58  ;;  %v21328_v58 = vld [vmem:[#allocation41 + $0x3a0] ss:$16 sps:$4 sm:$0xff]  }
0x14ea   :  { %15008 = vmatpush1.bf16.msra.mxu0 %v21268_v22  ;;  %v21331_v22 = vld [vmem:[#allocation41 + $0x1a8] ss:$16 sps:$4 sm:$0xff]  }
0x14eb   :  { %15049 = vmatpush1.bf16.msra.mxu1 %v21271_v7  ;;  %15009 = vmatprep.subr.bf16.mxu0 %v21276_v57  ;;  %v21336_v7 = vld [vmem:[#allocation41 + $0x3c4] ss:$16 sps:$4 sm:$0xff]   ;;  %v21339_v57 = vld [vmem:[#allocation41 + $0x1cc] ss:$16 sps:$4 sm:$0xff]  }
0x14ec   :  { %15050 = vmatprep.subr.bf16.mxu1 %v21279_v44  ;;  %v21334_v44 = vld [vmem:[#allocation41 + $0x3c0] ss:$16 sps:$4 sm:$0xff]  }
0x14ee   :  { %15010 = vmatpush1.bf16.msra.mxu0 %v21274_v8  ;;  %v21337_v8 = vld [vmem:[#allocation41 + $0x1c8] ss:$16 sps:$4 sm:$0xff]  }
0x14ef   :  { %15051 = vmatpush1.bf16.msra.mxu1 %v21277_v43  ;;  %15011 = vmatprep.subr.bf16.mxu0 %v21282_v17  ;;  %v21342_v43 = vld [vmem:[#allocation41 + $0x3e4] ss:$16 sps:$4 sm:$0xff]   ;;  %v21345_v17 = vld [vmem:[#allocation41 + $0x1ec] ss:$16 sps:$4 sm:$0xff]  }
0x14f0   :  { %15052 = vmatprep.subr.bf16.mxu1 %v21285_v6  ;;  %v21340_v6 = vld [vmem:[#allocation41 + $0x3e0] ss:$16 sps:$4 sm:$0xff]  }
0x14f2   :  { %15012 = vmatpush1.bf16.msra.mxu0 %v21280_v49  ;;  %v21343_v49 = vld [vmem:[#allocation41 + $0x1e8] ss:$16 sps:$4 sm:$0xff]  }
0x14f3   :  { %15053 = vmatpush1.bf16.msra.mxu1 %v21283_v28  ;;  %15013 = vmatprep.subr.bf16.mxu0 %v21288_v54  ;;  %v21348_v28 = vld [vmem:[#allocation41 + $0x20c] ss:$16 sps:$4 sm:$0xff]   ;;  %v21346_v54 = vld [vmem:[#allocation41 + $0x208] ss:$16 sps:$4 sm:$0xff]  }
0x14f4   :  { %15054 = vmatprep.subr.bf16.mxu1 %v21291_v45  ;;  %v23886_v45 = vpack.c.bf16 %v23859_v40, %v23859_v40  ;;  %v21357_v40 = vld [vmem:[#allocation41 + $0x26c] ss:$16 sps:$4 sm:$0xff]  }
0x14f6   :  { %15014 = vmatpush1.bf16.msra.mxu0 %v21286_v29  ;;  %v21351_v29 = vld [vmem:[#allocation41 + $0x22c] ss:$16 sps:$4 sm:$0xff]  }
0x14f7   :  { %15055 = vmatpush1.bf16.msra.mxu1 %v21289_v47  ;;  %15015 = vmatprep.subr.bf16.mxu0 %v21294_v59  ;;  %v21349_v47 = vld [vmem:[#allocation41 + $0x228] ss:$16 sps:$4 sm:$0xff]   ;;  %v21354_v59 = vld [vmem:[#allocation41 + $0x24c] ss:$16 sps:$4 sm:$0xff]  }
0x14f8   :  { %15056 = vmatprep.subr.bf16.mxu1 %v21297_v18  ;;  %v21352_v18 = vld [vmem:[#allocation41 + $0x248] ss:$16 sps:$4 sm:$0xff]  }
0x14fa   :  { %15016 = vmatpush1.bf16.msra.mxu0 %v21292_v24  ;;  %v21355_v24 = vld [vmem:[#allocation41 + $0x268] ss:$16 sps:$4 sm:$0xff]  }
0x14fb   :  { %15057 = vmatpush1.bf16.msra.mxu1 %v21295_v12  ;;  %15017 = vmatprep.subr.bf16.mxu0 %v21300_v38  ;;  %v21360_v12 = vld [vmem:[#allocation41 + $0x28c] ss:$16 sps:$4 sm:$0xff]   ;;  %v21358_v38 = vld [vmem:[#allocation41 + $0x288] ss:$16 sps:$4 sm:$0xff]  }
0x14fc   :  { %15058 = vmatprep.subr.bf16.mxu1 %v21303_v61  ;;  %v21361_v61 = vld [vmem:[#allocation41 + $0x2a8] ss:$16 sps:$4 sm:$0xff]  }
0x14fe   :  { %15018 = vmatpush1.bf16.msra.mxu0 %v21298_v30 }
0x14ff   :  { %15059 = vmatpush1.bf16.msra.mxu1 %v21301_v14  ;;  %15019 = vmatprep.subr.bf16.mxu0 %v21306_v62 }
0x1500   :  { %15060 = vmatprep.subr.bf16.mxu1 %v21309_v9  ;;  %v21364_v9 = vld [vmem:[#allocation41 + $0x2c8] ss:$16 sps:$4 sm:$0xff]  }
0x1502   :  { %15020 = vmatpush1.bf16.msra.mxu0 %v21304_v50 }
0x1503   :  { %15061 = vmatpush1.bf16.msra.mxu1 %v21307_v21  ;;  %15021 = vmatprep.subr.bf16.mxu0 %v21312_v23  ;;  %v21369_v21 = vld [vmem:[#allocation41 + $0x2ec] ss:$16 sps:$4 sm:$0xff]   ;;  %v21367_v23 = vld [vmem:[#allocation41 + $0x2e8] ss:$16 sps:$4 sm:$0xff]  }
0x1504   :  { %15062 = vmatprep.subr.bf16.mxu1 %v21315_v3  ;;  %v21372_v3 = vld [vmem:[#allocation41 + $0x30c] ss:$16 sps:$4 sm:$0xff]  }
0x1506   :  { %15022 = vmatpush1.bf16.msra.mxu0 %v21310_v42  ;;  %v21370_v42 = vld [vmem:[#allocation41 + $0x308] ss:$16 sps:$4 sm:$0xff]  }
0x1507   :  { %15063 = vmatpush1.bf16.msra.mxu1 %v21313_v53  ;;  %15023 = vmatprep.subr.bf16.mxu0 %v21318_v11  ;;  %v21375_v53 = vld [vmem:[#allocation41 + $0x32c] ss:$16 sps:$4 sm:$0xff]   ;;  %v21373_v11 = vld [vmem:[#allocation41 + $0x328] ss:$16 sps:$4 sm:$0xff]  }
0x1508   :  { %15064 = vmatprep.subr.bf16.mxu1 %v21321_v31  ;;  %v21378_v31 = vld [vmem:[#allocation41 + $0x34c] ss:$16 sps:$4 sm:$0xff]  }
0x150a   :  { %15024 = vmatpush1.bf16.msra.mxu0 %v21316_v10  ;;  %v21376_v10 = vld [vmem:[#allocation41 + $0x348] ss:$16 sps:$4 sm:$0xff]  }
0x150b   :  { %15065 = vmatpush1.bf16.msra.mxu1 %v21319_v33  ;;  %15025 = vmatprep.subr.bf16.mxu0 %v21324_v46  ;;  %v21381_v33 = vld [vmem:[#allocation41 + $0x36c] ss:$16 sps:$4 sm:$0xff]   ;;  %v21379_v46 = vld [vmem:[#allocation41 + $0x368] ss:$16 sps:$4 sm:$0xff]  }
0x150c   :  { %15066 = vmatprep.subr.bf16.mxu1 %v21327_v56  ;;  %v21384_v56 = vld [vmem:[#allocation41 + $0x38c] ss:$16 sps:$4 sm:$0xff]  }
0x150e   :  { %15026 = vmatpush1.bf16.msra.mxu0 %v21322_v51  ;;  %v21382_v51 = vld [vmem:[#allocation41 + $0x388] ss:$16 sps:$4 sm:$0xff]  }
0x150f   :  { %15067 = vmatpush1.bf16.msra.mxu1 %v21325_v20  ;;  %15027 = vmatprep.subr.bf16.mxu0 %v21330_v32  ;;  %v21387_v20 = vld [vmem:[#allocation41 + $0x3ac] ss:$16 sps:$4 sm:$0xff]   ;;  %v21385_v32 = vld [vmem:[#allocation41 + $0x3a8] ss:$16 sps:$4 sm:$0xff]  }
0x1510   :  { %15068 = vmatprep.subr.bf16.mxu1 %v21333_v0  ;;  %v21390_v0 = vld [vmem:[#allocation41 + $0x3cc] ss:$16 sps:$4 sm:$0xff]  }
0x1512   :  { %15028 = vmatpush1.bf16.msra.mxu0 %v21328_v58  ;;  %v21388_v58 = vld [vmem:[#allocation41 + $0x3c8] ss:$16 sps:$4 sm:$0xff]  }
0x1513   :  { %15069 = vmatpush1.bf16.msra.mxu1 %v21331_v22  ;;  %15029 = vmatprep.subr.bf16.mxu0 %v21336_v7  ;;  %v21393_v22 = vld [vmem:[#allocation41 + $0x3ec] ss:$16 sps:$4 sm:$0xff]   ;;  %v21391_v7 = vld [vmem:[#allocation41 + $0x3e8] ss:$16 sps:$4 sm:$0xff]  }
0x1514   :  { %15070 = vmatprep.subr.bf16.mxu1 %v21339_v57 }
0x1516   :  { %15030 = vmatpush1.bf16.msra.mxu0 %v21334_v44 }
0x1517   :  { %15071 = vmatpush1.bf16.msra.mxu1 %v21337_v8  ;;  %15031 = vmatprep.subr.bf16.mxu0 %v21342_v43 }
0x1518   :  { %15072 = vmatprep.subr.bf16.mxu1 %v21345_v17 }
0x151a   :  { %15032 = vmatpush1.bf16.msra.mxu0 %v21340_v6 }
0x151b   :  { %15073 = vmatpush1.bf16.msra.mxu1 %v21343_v49  ;;  %15083 = vmatprep.subr.bf16.mxu0 %v21348_v28 }
0x151d   :  { %15034 = vmatmul.mubr.bf16.vlgmr.msra.gmra.mrb[100].mxu0 %v23886_v45 }
0x151e   :  { %15075 = vmatmul.mubr.bf16.vlgmr.msra.gmra.mrb[112].mxu1 %v23874_v26  ;;  %15084 = vmatpush1.bf16.msra.mxu0 %v21346_v54  ;;  %v21363_v26 = vld [vmem:[#allocation41 + $0x2ac] ss:$16 sps:$4 sm:$0xff]  }
0x151f   :  { %15115 = vmatprep.mubr.bf16.mxu0 %v23878_v27  ;;  %15085 = vmatprep.subr.bf16.mxu0 %v21351_v29  ;;  %v21366_v27 = vld [vmem:[#allocation41 + $0x2cc] ss:$16 sps:$4 sm:$0xff]  }
0x1520   :  { %15233 = vmatprep.mubr.f32.mxu1 %v22620_v1 }
0x1522   :  { %15086 = vmatpush1.bf16.msra.mxu0 %v21349_v47 }
0x1523   :  { %15087 = vmatprep.subr.bf16.mxu0 %v21354_v59 }
0x1526   :  { %15088 = vmatpush1.bf16.msra.mxu0 %v21352_v18 }
0x1527   :  { %15089 = vmatprep.subr.bf16.mxu0 %v21357_v40 }
0x152a   :  { %15090 = vmatpush1.bf16.msra.mxu0 %v21355_v24 }
0x152b   :  { %15091 = vmatprep.subr.bf16.mxu0 %v21360_v12 }
0x152e   :  { %15092 = vmatpush1.bf16.msra.mxu0 %v21358_v38 }
0x152f   :  { %15093 = vmatprep.subr.bf16.mxu0 %v21363_v26 }
0x1530   :  { %v14190_v30 = vpop.f32.mrb[100].mxu1 }
0x1531   :  { %v14192_v14 = vpop.f32.mrb[101].mxu1 }
0x1532   :  { %15094 = vmatpush1.bf16.msra.mxu0 %v21361_v61  ;;  %v14194_v62 = vpop.f32.mrb[102].mxu1 }
0x1533   :  { %v14195_v50 = vpop.f32.mrb[103].mxu1  ;;  %15095 = vmatprep.subr.bf16.mxu0 %v21366_v27 }
0x1536   :  { %15096 = vmatpush1.bf16.msra.mxu0 %v21364_v9 }
0x1537   :  { %15097 = vmatprep.subr.bf16.mxu0 %v21369_v21 }
0x153a   :  { %15098 = vmatpush1.bf16.msra.mxu0 %v21367_v23 }
0x153b   :  { %15099 = vmatprep.subr.bf16.mxu0 %v21372_v3 }
0x153e   :  { %15100 = vmatpush1.bf16.msra.mxu0 %v21370_v42 }
0x153f   :  { %15101 = vmatprep.subr.bf16.mxu0 %v21375_v53 }
0x1542   :  { %15102 = vmatpush1.bf16.msra.mxu0 %v21373_v11 }
0x1543   :  { %15103 = vmatprep.subr.bf16.mxu0 %v21378_v31 }
0x1546   :  { %15104 = vmatpush1.bf16.msra.mxu0 %v21376_v10 }
0x1547   :  { %15105 = vmatprep.subr.bf16.mxu0 %v21381_v33 }
0x154a   :  { %15106 = vmatpush1.bf16.msra.mxu0 %v21379_v46 }
0x154b   :  { %15107 = vmatprep.subr.bf16.mxu0 %v21384_v56 }
0x154e   :  { %15108 = vmatpush1.bf16.msra.mxu0 %v21382_v51 }
0x154f   :  { %15109 = vmatprep.subr.bf16.mxu0 %v21387_v20 }
0x1552   :  { %15110 = vmatpush1.bf16.msra.mxu0 %v21385_v32 }
0x1553   :  { %15111 = vmatprep.subr.bf16.mxu0 %v21390_v0 }
0x1556   :  { %15112 = vmatpush1.bf16.msra.mxu0 %v21388_v58  ;;  %v23911_v58 = vld [vmem:[#allocation45] sm:$0xf] }
0x1557   :  { %15113 = vmatprep.subr.bf16.mxu0 %v21393_v22 }
0x155a   :  { %15114 = vmatpush1.bf16.msra.mxu0 %v21391_v7 }
0x155d   :  { %15116 = vmatmul.mubr.bf16.vlgmr.msra.gmra.mrb[104].mxu0 %v23886_v45 }
0x155e   :  { %15304 = vmatprep.mubr.f32.mxu0 %v22620_v1 }
0x1570   :  { %v14272_v57 = vpop.f32.mrb[104].mxu1  ;;  %v14231_v44 = vpop.f32.mrb[92].mxu0 }
0x1571   :  { %v14232_v8 = vadd.f32 %v14231_v44, %v14190_v30  ;;  %v14274_v43 = vpop.f32.mrb[105].mxu1  ;;  %v14233_v17 = vpop.f32.mrb[93].mxu0  ;;  %v2213_v30 = vld [vmem:[#allocation44] sm:$0x77] }
0x1572   :  { %v14234_v6 = vadd.f32 %v14233_v17, %v14192_v14  ;;  %v14276_v49 = vpop.f32.mrb[106].mxu1  ;;  %v14235_v28 = vpop.f32.mrb[94].mxu0  ;;  %v13383_v9 = vrot.slane %v2213_v30, %v23172_v34  ;;  %v13423_v14 = vrot.slane %v2213_v30, %v23175_v35  ;;  %v13387_v50 = vrot.slane %v2213_v30, %v23284_v4 }
0x1573   :  { %v14277_v54 = vpop.f32.mrb[107].mxu1  ;;  %v14236_v29 = vpop.f32.mrb[95].mxu0  ;;  %v13427_v21 = vrot.slane %v2213_v30, %v23287_v60  ;;  %v13467_v42 = vrot.slane %v2213_v30, %v23178_v36  ;;  %v13471_v31 = vrot.slane %v2213_v30, %v23294_v5 }
0x1574   :  { %v13403_v23 = vrot.slane %v13383_v9, %v23172_v34  ;;  %v13443_v3 = vrot.slane %v13423_v14, %v23175_v35  ;;  %v13407_v53 = vrot.slane %v13387_v50, %v23172_v34  ;;  %v15136_v29 = vrot.slane %v23911_v58, %v23175_v35  ;;  %v21396_v14 = vld [vmem:[#allocation48 + $0x4] ss:$8 sps:$4 sm:$0xff]   ;;  %v21394_v50 = vld [vmem:[#allocation48] ss:$8 sps:$4 sm:$0xff]  }
0x1575   :  { %v13447_v11 = vrot.slane %v13427_v21, %v23175_v35  ;;  %v13487_v46 = vrot.slane %v13467_v42, %v23178_v36  ;;  %v13491_v20 = vrot.slane %v13471_v31, %v23178_v36  ;;  %v15316_v21 = vpack.c.bf16 %v23820_v39, %v23820_v39  ;;  %v21405_v42 = vld [vmem:[#allocation48 + $0x34] ss:$8 sps:$4 sm:$0xff]   ;;  %v21406_v39 = vld [vmem:[#allocation48 + $0x40] ss:$8 sps:$4 sm:$0xff]  }
0x1576   :  { %v13416_v10 = vmul.f32 %v13403_v23, %v23751_v13  ;;  %v13456_v33 = vmul.f32 %v13443_v3, %v23757_v48  ;;  %v13417_v56 = vmul.f32 %v13407_v53, %v23751_v13  ;;  %v21402_v23 = vld [vmem:[#allocation48 + $0x24] ss:$8 sps:$4 sm:$0xff]   ;;  %v21400_v3 = vld [vmem:[#allocation48 + $0x20] ss:$8 sps:$4 sm:$0xff]   ;;  %v21403_v53 = vld [vmem:[#allocation48 + $0x30] ss:$8 sps:$4 sm:$0xff]  }
0x1577   :  { %v13457_v51 = vmul.f32 %v13447_v11, %v23757_v48  ;;  %v13500_v0 = vmul.f32 %v13487_v46, %v23768_v16  ;;  %v13501_v7 = vmul.f32 %v13491_v20, %v23768_v16  ;;  %v21408_v11 = vld [vmem:[#allocation48 + $0x44] ss:$8 sps:$4 sm:$0xff]   ;;  %v21411_v31 = vld [vmem:[#allocation48 + $0x54] ss:$8 sps:$4 sm:$0xff]   ;;  %v21412_v46 = vld [vmem:[#allocation48 + $0x60] ss:$8 sps:$4 sm:$0xff]  }
0x1578   :  { %v13460_v32 = vadd.f32 %v13456_v33, %v13416_v10  ;;  %v21409_v10 = vld [vmem:[#allocation48 + $0x50] ss:$8 sps:$4 sm:$0xff]   ;;  %v21414_v33 = vld [vmem:[#allocation48 + $0x64] ss:$8 sps:$4 sm:$0xff]  }
0x1579   :  { %v13461_v22 = vadd.f32 %v13457_v51, %v13417_v56  ;;  %v21417_v56 = vld [vmem:[#allocation48 + $0x74] ss:$8 sps:$4 sm:$0xff]   ;;  %v21415_v51 = vld [vmem:[#allocation48 + $0x70] ss:$8 sps:$4 sm:$0xff]   ;;  %v21420_v20 = vld [vmem:[#allocation48 + $0x84] ss:$8 sps:$4 sm:$0xff]  }
0x157a   :  { %v13504_v44 = vadd.f32 %v13500_v0, %v13460_v32  ;;  %v21418_v32 = vld [vmem:[#allocation48 + $0x80] ss:$8 sps:$4 sm:$0xff]   ;;  %v21423_v0 = vld [vmem:[#allocation48 + $0x94] ss:$8 sps:$4 sm:$0xff]  }
0x157b   :  { %v13505_v28 = vadd.f32 %v13501_v7, %v13461_v22  ;;  %v21421_v22 = vld [vmem:[#allocation48 + $0x90] ss:$8 sps:$4 sm:$0xff]   ;;  %v21426_v7 = vld [vmem:[#allocation48 + $0xa4] ss:$8 sps:$4 sm:$0xff]  }
0x15b0   :  { %v14313_v47 = vpop.f32.mrb[96].mxu0  ;;  %v14994_v59 = vpop.f32.mrb[108].mxu1 }
0x15b1   :  { %v14314_v18 = vadd.f32 %v14313_v47, %v14272_v57  ;;  %v14995_v40 = vadd.f32 %v14994_v59, %v14232_v8  ;;  %v14315_v24 = vpop.f32.mrb[97].mxu0  ;;  %v14996_v12 = vpop.f32.mrb[109].mxu1 }
0x15b2   :  { %v14316_v38 = vadd.f32 %v14315_v24, %v14274_v43  ;;  %v14997_v45 = vadd.f32 %v14996_v12, %v14234_v6  ;;  %v14317_v26 = vpop.f32.mrb[98].mxu0  ;;  %v14998_v61 = vpop.f32.mrb[110].mxu1  ;;  %v15132_v43 = vrot.slane %v23911_v58, %v23172_v34 }
0x15b3   :  { %v14318_v27 = vpop.f32.mrb[99].mxu0  ;;  %v14999_v62 = vpop.f32.mrb[111].mxu1 }
0x15f0   :  { %v15035_v57 = vpop.f32.mrb[100].mxu0 }
0x15f1   :  { %v15036_v8 = vadd.f32 %v15035_v57, %v14995_v40  ;;  %v15076_v17 = vpop.f32.mrb[112].mxu1  ;;  %v15037_v6 = vpop.f32.mrb[101].mxu0  ;;  %v2214_v57 = vld [vmem:[#allocation44 + $0x8] sm:$0x77] }
0x15f2   :  { %v23916_v49 = vadd.f32 %v15076_v17, %v14314_v18  ;;  %v15038_v54 = vadd.f32 %v15037_v6, %v14997_v45  ;;  %v15078_v47 = vpop.f32.mrb[113].mxu1  ;;  %v15039_v59 = vpop.f32.mrb[102].mxu0  ;;  %v21399_v45 = vld [vmem:[#allocation48 + $0x14] ss:$8 sps:$4 sm:$0xff]   ;;  %v13395_v6 = vrot.slane %v2214_v57, %v23284_v4  ;;  %v21430_v4 = vld [vmem:[#allocation48 + $0xc0] ss:$8 sps:$4 sm:$0xff]  }
0x15f3   :  { %v15124_v24 = vadd.f32 %v15036_v8, %v13504_v44  ;;  %v23920_v12 = vadd.f32 %v15078_v47, %v14316_v38  ;;  %v15080_v26 = vpop.f32.mrb[114].mxu1  ;;  %v15040_v61 = vpop.f32.mrb[103].mxu0  ;;  %v21397_v38 = vld [vmem:[#allocation48 + $0x10] ss:$8 sps:$4 sm:$0xff]   ;;  %v21424_v44 = vld [vmem:[#allocation48 + $0xa0] ss:$8 sps:$4 sm:$0xff]   ;;  %v13391_v8 = vrot.slane %v2214_v57, %v23172_v34  ;;  %v13475_v59 = vrot.slane %v2214_v57, %v23178_v36 }
0x15f4   :  { %v15125_v40 = vadd.f32 %v15038_v54, %v13505_v28  ;;  %v15081_v27 = vpop.f32.mrb[115].mxu1  ;;  %v21429_v17 = vld [vmem:[#allocation48 + $0xb4] ss:$8 sps:$4 sm:$0xff]   ;;  %v13435_v28 = vrot.slane %v2214_v57, %v23287_v60  ;;  %v21427_v54 = vld [vmem:[#allocation48 + $0xb0] ss:$8 sps:$4 sm:$0xff]   ;;  %v13415_v26 = vrot.slane %v13395_v6, %v23172_v34 }
0x15f5   :  { %v15149_v62 = vadd.f32 %v15132_v43, %v15124_v24  ;;  %v13431_v43 = vrot.slane %v2214_v57, %v23175_v35  ;;  %v21432_v24 = vld [vmem:[#allocation48 + $0xc4] ss:$8 sps:$4 sm:$0xff]  }
0x15f6   :  { %v15150_v30 = vadd.f32 %v15136_v29, %v15125_v40  ;;  %v13411_v29 = vrot.slane %v13391_v8, %v23172_v34  ;;  %v13455_v61 = vrot.slane %v13435_v28, %v23175_v35  ;;  %v13479_v40 = vrot.slane %v2214_v57, %v23294_v5  ;;  %v21453_v8 = vld [vmem:[#allocation47 + $0x14] ss:$8 sps:$4 sm:$0xff]   ;;  %v21459_v6 = vld [vmem:[#allocation47 + $0x24] ss:$8 sps:$4 sm:$0xff]   ;;  %v21454_v28 = vld [vmem:[#allocation48 + $0x120] ss:$8 sps:$4 sm:$0xff]  }
0x15f7   :  { %v15153_v18 = vmax.f32 %v15149_v62, 0.0  ;;  %v13451_v47 = vrot.slane %v13431_v43, %v23175_v35  ;;  %v13495_v62 = vrot.slane %v13475_v59, %v23178_v36  ;;  %v15318_v57 = vpack.c.bf16 %v23837_v55, %v23837_v55  ;;  %v21448_v43 = vld [vmem:[#allocation48 + $0x110] ss:$8 sps:$4 sm:$0xff]   ;;  %v21456_v55 = vld [vmem:[#allocation48 + $0x124] ss:$8 sps:$4 sm:$0xff]  }
0x15f8   :  { %v15154_v9 = vmax.f32 %v15150_v30, 0.0  ;;  %v13418_v60 = vmul.f32 %v13411_v29, %v23751_v13  ;;  %v21435_v30 = vld [vmem:[#allocation48 + $0xd4] ss:$8 sps:$4 sm:$0xff]   ;;  %v21468_v59 = vld [vmem:[#allocation48 + $0x144] ss:$8 sps:$4 sm:$0xff]  }
0x15f9   :  { %v13458_v27 = vmul.f32 %v13451_v47, %v23757_v48  ;;  %v13502_v5 = vmul.f32 %v13495_v62, %v23768_v16  ;;  %v21465_v29 = vld [vmem:[#allocation47 + $0x34] ss:$8 sps:$4 sm:$0xff]   ;;  %v21463_v47 = vld [vmem:[#allocation47 + $0x30] ss:$8 sps:$4 sm:$0xff]   ;;  %v21480_v62 = vld [vmem:[#allocation48 + $0x164] ss:$8 sps:$4 sm:$0xff]  }
0x15fa   :  { %18574 = vmatprep.subr.msk.mxu1 %vm9374_vm14, %v15154_v9  ;;  %v13419_v9 = vmul.f32 %v13415_v26, %v23751_v13  ;;  %v15140_v13 = vrot.slane %v23911_v58, %v23178_v36  ;;  %v21466_v26 = vld [vmem:[#allocation48 + $0x140] ss:$8 sps:$4 sm:$0xff]  }
0x15fb   :  { %18575 = vmatpush1.msk.msra.mxu1 %vm9374_vm14, %v15153_v18  ;;  %v13499_v18 = vrot.slane %v13479_v40, %v23178_v36  ;;  %v21447_v36 = vld [vmem:[#allocation47 + $0x4] ss:$8 sps:$4 sm:$0xff]   ;;  %v21474_v40 = vld [vmem:[#allocation48 + $0x154] ss:$8 sps:$4 sm:$0xff]  }
0x15fc   :  { %18576 = vmatmul.mubr.msk.f32.vlgmr.msra.gmra.mrb[98].mxu1 %vm9370_vm15, %v23782_v52  ;;  %15639 = vmatprep.subr.bf16.mxu1 %v21396_v14  ;;  %v13459_v14 = vmul.f32 %v13455_v61, %v23757_v48  ;;  %v21469_v61 = vld [vmem:[#allocation47 + $0x40] ss:$8 sps:$4 sm:$0xff]  }
0x15fd   :  { %15640 = vmatpush1.bf16.msra.mxu1 %v21394_v50  ;;  %15671 = vmatprep.mubr.bf16.mxu1 %v15316_v21  ;;  %v13462_v50 = vadd.f32 %v13458_v27, %v13418_v60  ;;  %v21472_v60 = vld [vmem:[#allocation48 + $0x150] ss:$8 sps:$4 sm:$0xff]  }
0x15fe   :  { %15641 = vmatprep.subr.bf16.mxu1 %v21399_v45  ;;  %v21433_v45 = vld [vmem:[#allocation48 + $0xd0] ss:$8 sps:$4 sm:$0xff]   ;;  %v13463_v21 = vadd.f32 %v13459_v14, %v13419_v9  ;;  %v21478_v9 = vld [vmem:[#allocation48 + $0x160] ss:$8 sps:$4 sm:$0xff]  }
0x15ff   :  { %v21475_v27 = vld [vmem:[#allocation47 + $0x50] ss:$8 sps:$4 sm:$0xff]   ;;  %v21481_v14 = vld [vmem:[#allocation47 + $0x60] ss:$8 sps:$4 sm:$0xff]  }
0x1601   :  { %15642 = vmatpush1.bf16.msra.mxu1 %v21397_v38  ;;  %v13503_v38 = vmul.f32 %v13499_v18, %v23768_v16  ;;  %v21441_v16 = vld [vmem:[#allocation48 + $0xf4] ss:$8 sps:$4 sm:$0xff]  }
0x1602   :  { %15643 = vmatprep.subr.bf16.mxu1 %v21402_v23  ;;  %v21438_v23 = vld [vmem:[#allocation48 + $0xe4] ss:$8 sps:$4 sm:$0xff]   ;;  %v21486_v18 = vld [vmem:[#allocation48 + $0x174] ss:$8 sps:$4 sm:$0xff]  }
0x1605   :  { %15644 = vmatpush1.bf16.msra.mxu1 %v21400_v3 }
0x1606   :  { %15645 = vmatprep.subr.bf16.mxu1 %v21405_v42  ;;  %v13506_v42 = vadd.f32 %v13502_v5, %v13462_v50  ;;  %v21489_v50 = vld [vmem:[#allocation47 + $0x74] ss:$8 sps:$4 sm:$0xff]   ;;  %v21484_v5 = vld [vmem:[#allocation48 + $0x170] ss:$8 sps:$4 sm:$0xff]  }
0x1609   :  { %15646 = vmatpush1.bf16.msra.mxu1 %v21403_v53 }
0x160a   :  { %15647 = vmatprep.subr.bf16.mxu1 %v21408_v11  ;;  %v21436_v11 = vld [vmem:[#allocation48 + $0xe0] ss:$8 sps:$4 sm:$0xff]  }
0x160d   :  { %15648 = vmatpush1.bf16.msra.mxu1 %v21406_v39  ;;  %v13507_v39 = vadd.f32 %v13503_v38, %v13463_v21  ;;  %v21492_v21 = vld [vmem:[#allocation48 + $0x184] ss:$8 sps:$4 sm:$0xff]  }
0x160e   :  { %15649 = vmatprep.subr.bf16.mxu1 %v21411_v31  ;;  %v21495_v38 = vld [vmem:[#allocation47 + $0x84] ss:$8 sps:$4 sm:$0xff]  }
0x1611   :  { %15650 = vmatpush1.bf16.msra.mxu1 %v21409_v10  ;;  %v15144_v10 = vrot.slane %v23911_v58, %v23181_v37  ;;  %v21442_v37 = vld [vmem:[#allocation48 + $0x100] ss:$8 sps:$4 sm:$0xff]  }
0x1612   :  { %15651 = vmatprep.subr.bf16.mxu1 %v21414_v33  ;;  %v21445_v58 = vld [vmem:[#allocation47] ss:$8 sps:$4 sm:$0xff]  }
0x1615   :  { %15652 = vmatpush1.bf16.msra.mxu1 %v21412_v46 }
0x1616   :  { %15653 = vmatprep.subr.bf16.mxu1 %v21417_v56 }
0x1619   :  { %15654 = vmatpush1.bf16.msra.mxu1 %v21415_v51 }
0x161a   :  { %15655 = vmatprep.subr.bf16.mxu1 %v21420_v20 }
0x161d   :  { %15656 = vmatpush1.bf16.msra.mxu1 %v21418_v32 }
0x161e   :  { %15657 = vmatprep.subr.bf16.mxu1 %v21423_v0 }
0x1621   :  { %15658 = vmatpush1.bf16.msra.mxu1 %v21421_v22 }
0x1622   :  { %15659 = vmatprep.subr.bf16.mxu1 %v21426_v7  ;;  %v21444_v7 = vld [vmem:[#allocation48 + $0x104] ss:$8 sps:$4 sm:$0xff]  }
0x1625   :  { %15660 = vmatpush1.bf16.msra.mxu1 %v21424_v44  ;;  %v21450_v44 = vld [vmem:[#allocation48 + $0x114] ss:$8 sps:$4 sm:$0xff]  }
0x1626   :  { %15661 = vmatprep.subr.bf16.mxu1 %v21429_v17  ;;  %v21451_v17 = vld [vmem:[#allocation47 + $0x10] ss:$8 sps:$4 sm:$0xff]  }
0x1629   :  { %15662 = vmatpush1.bf16.msra.mxu1 %v21427_v54  ;;  %v21462_v54 = vld [vmem:[#allocation48 + $0x134] ss:$8 sps:$4 sm:$0xff]  }
0x162a   :  { %15663 = vmatprep.subr.bf16.mxu1 %v21432_v24  ;;  %v21471_v24 = vld [vmem:[#allocation47 + $0x44] ss:$8 sps:$4 sm:$0xff]  }
0x162d   :  { %15664 = vmatpush1.bf16.msra.mxu1 %v21430_v4  ;;  %v21477_v4 = vld [vmem:[#allocation47 + $0x54] ss:$8 sps:$4 sm:$0xff]  }
0x162e   :  { %15665 = vmatprep.subr.bf16.mxu1 %v21435_v30  ;;  %v21483_v30 = vld [vmem:[#allocation47 + $0x64] ss:$8 sps:$4 sm:$0xff]  }
0x1630   :  { %v15117_v3 = vpop.f32.mrb[104].mxu0 }
0x1631   :  { %v15118_v53 = vadd.f32 %v15117_v3, %v23916_v49  ;;  %v15119_v48 = vpop.f32.mrb[105].mxu0  ;;  %15666 = vmatpush1.bf16.msra.mxu1 %v21433_v45  ;;  %v21439_v49 = vld [vmem:[#allocation48 + $0xf0] ss:$8 sps:$4 sm:$0xff]   ;;  %v21493_v3 = vld [vmem:[#allocation47 + $0x80] ss:$8 sps:$4 sm:$0xff]  }
0x1632   :  { %v15120_v31 = vadd.f32 %v15119_v48, %v23920_v12  ;;  %v15121_v33 = vpop.f32.mrb[106].mxu0  ;;  %15667 = vmatprep.subr.bf16.mxu1 %v21438_v23  ;;  %v15315_v12 = vpack.c.bf16 %v23818_v2, %v23818_v2  ;;  %v15312_v2 = vpack.c.bf16 %v23653_v25, %v23653_v25  ;;  %v21460_v25 = vld [vmem:[#allocation48 + $0x130] ss:$8 sps:$4 sm:$0xff]   ;;  %v21490_v23 = vld [vmem:[#allocation48 + $0x180] ss:$8 sps:$4 sm:$0xff]  }
0x1633   :  { %v15126_v46 = vadd.f32 %v15118_v53, %v13506_v42  ;;  %v15122_v56 = vpop.f32.mrb[107].mxu0  ;;  %v21487_v45 = vld [vmem:[#allocation47 + $0x70] ss:$8 sps:$4 sm:$0xff]   ;;  %v21498_v42 = vld [vmem:[#allocation48 + $0x194] ss:$8 sps:$4 sm:$0xff]  }
0x1634   :  { %v15127_v51 = vadd.f32 %v15120_v31, %v13507_v39  ;;  %v21501_v53 = vld [vmem:[#allocation47 + $0x94] ss:$8 sps:$4 sm:$0xff]   ;;  %v21499_v48 = vld [vmem:[#allocation47 + $0x90] ss:$8 sps:$4 sm:$0xff]   ;;  %v21507_v39 = vld [vmem:[#allocation47 + $0xa4] ss:$8 sps:$4 sm:$0xff]  }
0x1635   :  { %v15151_v20 = vadd.f32 %v15140_v13, %v15126_v46  ;;  %15668 = vmatpush1.bf16.msra.mxu1 %v21436_v11  ;;  %v21496_v13 = vld [vmem:[#allocation48 + $0x190] ss:$8 sps:$4 sm:$0xff]   ;;  %v21504_v11 = vld [vmem:[#allocation48 + $0x1a4] ss:$8 sps:$4 sm:$0xff]   ;;  %v21502_v31 = vld [vmem:[#allocation48 + $0x1a0] ss:$8 sps:$4 sm:$0xff]  }
0x1636   :  { %v15152_v32 = vadd.f32 %v15144_v10, %v15127_v51  ;;  %15669 = vmatprep.subr.bf16.mxu1 %v21441_v16  ;;  %v21505_v10 = vld [vmem:[#allocation47 + $0xa0] ss:$8 sps:$4 sm:$0xff]   ;;  %v21510_v33 = vld [vmem:[#allocation48 + $0x1b4] ss:$8 sps:$4 sm:$0xff]   ;;  %v21508_v46 = vld [vmem:[#allocation48 + $0x1b0] ss:$8 sps:$4 sm:$0xff]  }
0x1637   :  { %v15155_v22 = vmax.f32 %v15151_v20, 0.0  ;;  %v21513_v16 = vld [vmem:[#allocation47 + $0xb4] ss:$8 sps:$4 sm:$0xff]   ;;  %v21511_v56 = vld [vmem:[#allocation47 + $0xb0] ss:$8 sps:$4 sm:$0xff]  }
0x1638   :  { %v15156_v0 = vmax.f32 %v15152_v32, 0.0  ;;  %v21516_v51 = vld [vmem:[#allocation48 + $0x1c4] ss:$8 sps:$4 sm:$0xff]   ;;  %v21517_v32 = vld [vmem:[#allocation47 + $0xc0] ss:$8 sps:$4 sm:$0xff]  }
0x1639   :  { %15670 = vmatpush1.bf16.msra.mxu1 %v21439_v49  ;;  %v21519_v20 = vld [vmem:[#allocation47 + $0xc4] ss:$8 sps:$4 sm:$0xff]   ;;  %v21514_v49 = vld [vmem:[#allocation48 + $0x1c0] ss:$8 sps:$4 sm:$0xff]  }
0x163a   :  { %18577 = vmatprep.subr.msk.mxu0 %vm9374_vm14, %v15156_v0  ;;  %16041 = vmatprep.subr.bf16.mxu1 %v21447_v36  ;;  %v21522_v36 = vld [vmem:[#allocation48 + $0x1d4] ss:$8 sps:$4 sm:$0xff]  }
0x163b   :  { %18578 = vmatpush1.msk.msra.mxu0 %vm9374_vm14, %v15155_v22  ;;  %v21525_v0 = vld [vmem:[#allocation47 + $0xd4] ss:$8 sps:$4 sm:$0xff]   ;;  %v21520_v22 = vld [vmem:[#allocation48 + $0x1d0] ss:$8 sps:$4 sm:$0xff]  }
0x163c   :  { %18579 = vmatmul.mubr.msk.f32.vlgmr.msra.gmra.mrb[108].mxu0 %vm9370_vm15, %v23782_v52  ;;  %15672 = vmatmul.mubr.bf16.vlgmr.msra.gmra.mrb[116].mxu1 %v15315_v12  ;;  %v21457_v52 = vld [vmem:[#allocation47 + $0x20] ss:$8 sps:$4 sm:$0xff]   ;;  %v21528_v12 = vld [vmem:[#allocation48 + $0x1e4] ss:$8 sps:$4 sm:$0xff]  }
0x163d   :  { %15680 = vmatprep.subr.bf16.mxu0 %v21444_v7  ;;  %15712 = vmatprep.mubr.bf16.mxu0 %v15318_v57  ;;  %v21523_v7 = vld [vmem:[#allocation47 + $0xd0] ss:$8 sps:$4 sm:$0xff]   ;;  %v21529_v57 = vld [vmem:[#allocation47 + $0xe0] ss:$8 sps:$4 sm:$0xff]  }
0x163e   :  { %15681 = vmatpush1.bf16.msra.mxu0 %v21442_v37  ;;  %16042 = vmatpush1.bf16.msra.mxu1 %v21445_v58  ;;  %v21531_v37 = vld [vmem:[#allocation47 + $0xe4] ss:$8 sps:$4 sm:$0xff]   ;;  %v21526_v58 = vld [vmem:[#allocation48 + $0x1e0] ss:$8 sps:$4 sm:$0xff]  }
0x163f   :  { %16073 = vmatprep.mubr.bf16.mxu1 %v15312_v2  ;;  %15682 = vmatprep.subr.bf16.mxu0 %v21450_v44  ;;  %v21534_v44 = vld [vmem:[#allocation48 + $0x1f4] ss:$8 sps:$4 sm:$0xff]   ;;  %v21532_v2 = vld [vmem:[#allocation48 + $0x1f0] ss:$8 sps:$4 sm:$0xff]  }
0x1640   :  { %16043 = vmatprep.subr.bf16.mxu1 %v21453_v8  ;;  %v21537_v8 = vld [vmem:[#allocation47 + $0xf4] ss:$8 sps:$4 sm:$0xff]  }
0x1642   :  { %15683 = vmatpush1.bf16.msra.mxu0 %v21448_v43  ;;  %16044 = vmatpush1.bf16.msra.mxu1 %v21451_v17  ;;  %v21535_v43 = vld [vmem:[#allocation47 + $0xf0] ss:$8 sps:$4 sm:$0xff]   ;;  %v21540_v17 = vld [vmem:[#allocation47 + $0x104] ss:$8 sps:$4 sm:$0xff]  }
0x1643   :  { %15684 = vmatprep.subr.bf16.mxu0 %v21456_v55  ;;  %16045 = vmatprep.subr.bf16.mxu1 %v21459_v6  ;;  %v21561_v55 = vld [vmem:[#allocation50 + $0x4] ss:$8 sps:$4 sm:$0xff]   ;;  %v21538_v6 = vld [vmem:[#allocation47 + $0x100] ss:$8 sps:$4 sm:$0xff]  }
0x1646   :  { %15685 = vmatpush1.bf16.msra.mxu0 %v21454_v28  ;;  %16046 = vmatpush1.bf16.msra.mxu1 %v21457_v52  ;;  %v15311_v28 = vpack.c.bf16 %v23658_v15, %v23658_v15  ;;  %v15317_v52 = vpack.c.bf16 %v23835_v63, %v23835_v63  ;;  %v21565_v15 = vld [vmem:[#allocation50 + $0x10] ss:$8 sps:$4 sm:$0xff]   ;;  %v21544_v63 = vld [vmem:[#allocation47 + $0x120] ss:$8 sps:$4 sm:$0xff]  }
0x1647   :  { %15686 = vmatprep.subr.bf16.mxu0 %v21462_v54  ;;  %16047 = vmatprep.subr.bf16.mxu1 %v21465_v29  ;;  %v21543_v54 = vld [vmem:[#allocation47 + $0x114] ss:$8 sps:$4 sm:$0xff]   ;;  %v21559_v29 = vld [vmem:[#allocation50] ss:$8 sps:$4 sm:$0xff]  }
0x164a   :  { %15687 = vmatpush1.bf16.msra.mxu0 %v21460_v25  ;;  %16048 = vmatpush1.bf16.msra.mxu1 %v21463_v47  ;;  %v15314_v25 = vpack.c.bf16 %v23671_v41, %v23671_v41  ;;  %v21567_v47 = vld [vmem:[#allocation50 + $0x14] ss:$8 sps:$4 sm:$0xff]  }
0x164b   :  { %15688 = vmatprep.subr.bf16.mxu0 %v21468_v59  ;;  %16049 = vmatprep.subr.bf16.mxu1 %v21471_v24  ;;  %v21541_v59 = vld [vmem:[#allocation47 + $0x110] ss:$8 sps:$4 sm:$0xff]   ;;  %v21546_v24 = vld [vmem:[#allocation47 + $0x124] ss:$8 sps:$4 sm:$0xff]   ;;  %v21579_v41 = vld [vmem:[#allocation50 + $0x34] ss:$8 sps:$4 sm:$0xff]  }
0x164e   :  { %15689 = vmatpush1.bf16.msra.mxu0 %v21466_v26  ;;  %16050 = vmatpush1.bf16.msra.mxu1 %v21469_v61  ;;  %v21573_v26 = vld [vmem:[#allocation50 + $0x24] ss:$8 sps:$4 sm:$0xff]   ;;  %v21549_v61 = vld [vmem:[#allocation47 + $0x134] ss:$8 sps:$4 sm:$0xff]  }
0x164f   :  { %15690 = vmatprep.subr.bf16.mxu0 %v21474_v40  ;;  %16051 = vmatprep.subr.bf16.mxu1 %v21477_v4  ;;  %v21571_v40 = vld [vmem:[#allocation50 + $0x20] ss:$8 sps:$4 sm:$0xff]   ;;  %v21547_v4 = vld [vmem:[#allocation47 + $0x130] ss:$8 sps:$4 sm:$0xff]  }
0x1652   :  { %15691 = vmatpush1.bf16.msra.mxu0 %v21472_v60  ;;  %16052 = vmatpush1.bf16.msra.mxu1 %v21475_v27  ;;  %v21552_v60 = vld [vmem:[#allocation47 + $0x144] ss:$8 sps:$4 sm:$0xff]   ;;  %v21577_v27 = vld [vmem:[#allocation50 + $0x30] ss:$8 sps:$4 sm:$0xff]  }
0x1653   :  { %15692 = vmatprep.subr.bf16.mxu0 %v21480_v62  ;;  %16053 = vmatprep.subr.bf16.mxu1 %v21483_v30  ;;  %v21585_v62 = vld [vmem:[#allocation50 + $0x44] ss:$8 sps:$4 sm:$0xff]   ;;  %v21550_v30 = vld [vmem:[#allocation47 + $0x140] ss:$8 sps:$4 sm:$0xff]  }
0x1656   :  { %15693 = vmatpush1.bf16.msra.mxu0 %v21478_v9  ;;  %16054 = vmatpush1.bf16.msra.mxu1 %v21481_v14  ;;  %v21555_v9 = vld [vmem:[#allocation47 + $0x154] ss:$8 sps:$4 sm:$0xff]   ;;  %v21583_v14 = vld [vmem:[#allocation50 + $0x40] ss:$8 sps:$4 sm:$0xff]  }
0x1657   :  { %15694 = vmatprep.subr.bf16.mxu0 %v21486_v18  ;;  %16055 = vmatprep.subr.bf16.mxu1 %v21489_v50  ;;  %v21591_v18 = vld [vmem:[#allocation50 + $0x54] ss:$8 sps:$4 sm:$0xff]   ;;  %v21553_v50 = vld [vmem:[#allocation47 + $0x150] ss:$8 sps:$4 sm:$0xff]  }
0x165a   :  { %15695 = vmatpush1.bf16.msra.mxu0 %v21484_v5  ;;  %16056 = vmatpush1.bf16.msra.mxu1 %v21487_v45  ;;  %v21558_v5 = vld [vmem:[#allocation47 + $0x164] ss:$8 sps:$4 sm:$0xff]   ;;  %v21589_v45 = vld [vmem:[#allocation50 + $0x50] ss:$8 sps:$4 sm:$0xff]  }
0x165b   :  { %15696 = vmatprep.subr.bf16.mxu0 %v21492_v21  ;;  %16057 = vmatprep.subr.bf16.mxu1 %v21495_v38  ;;  %v21597_v21 = vld [vmem:[#allocation50 + $0x64] ss:$8 sps:$4 sm:$0xff]   ;;  %v21556_v38 = vld [vmem:[#allocation47 + $0x160] ss:$8 sps:$4 sm:$0xff]  }
0x165e   :  { %15697 = vmatpush1.bf16.msra.mxu0 %v21490_v23  ;;  %16058 = vmatpush1.bf16.msra.mxu1 %v21493_v3  ;;  %v21564_v23 = vld [vmem:[#allocation47 + $0x174] ss:$8 sps:$4 sm:$0xff]   ;;  %v21595_v3 = vld [vmem:[#allocation50 + $0x60] ss:$8 sps:$4 sm:$0xff]  }
0x165f   :  { %15698 = vmatprep.subr.bf16.mxu0 %v21498_v42  ;;  %16059 = vmatprep.subr.bf16.mxu1 %v21501_v53  ;;  %v21603_v42 = vld [vmem:[#allocation50 + $0x74] ss:$8 sps:$4 sm:$0xff]   ;;  %v21562_v53 = vld [vmem:[#allocation47 + $0x170] ss:$8 sps:$4 sm:$0xff]  }
0x1662   :  { %15699 = vmatpush1.bf16.msra.mxu0 %v21496_v13  ;;  %16060 = vmatpush1.bf16.msra.mxu1 %v21499_v48  ;;  %v21570_v13 = vld [vmem:[#allocation47 + $0x184] ss:$8 sps:$4 sm:$0xff]   ;;  %v21601_v48 = vld [vmem:[#allocation50 + $0x70] ss:$8 sps:$4 sm:$0xff]  }
0x1663   :  { %15700 = vmatprep.subr.bf16.mxu0 %v21504_v11  ;;  %16061 = vmatprep.subr.bf16.mxu1 %v21507_v39  ;;  %v21609_v11 = vld [vmem:[#allocation50 + $0x84] ss:$8 sps:$4 sm:$0xff]   ;;  %v21568_v39 = vld [vmem:[#allocation47 + $0x180] ss:$8 sps:$4 sm:$0xff]  }
0x1666   :  { %15701 = vmatpush1.bf16.msra.mxu0 %v21502_v31  ;;  %16062 = vmatpush1.bf16.msra.mxu1 %v21505_v10  ;;  %v21576_v31 = vld [vmem:[#allocation47 + $0x194] ss:$8 sps:$4 sm:$0xff]   ;;  %v21607_v10 = vld [vmem:[#allocation50 + $0x80] ss:$8 sps:$4 sm:$0xff]  }
0x1667   :  { %15702 = vmatprep.subr.bf16.mxu0 %v21510_v33  ;;  %16063 = vmatprep.subr.bf16.mxu1 %v21513_v16  ;;  %v21615_v33 = vld [vmem:[#allocation50 + $0x94] ss:$8 sps:$4 sm:$0xff]   ;;  %v21574_v16 = vld [vmem:[#allocation47 + $0x190] ss:$8 sps:$4 sm:$0xff]  }
0x166a   :  { %15703 = vmatpush1.bf16.msra.mxu0 %v21508_v46  ;;  %16064 = vmatpush1.bf16.msra.mxu1 %v21511_v56  ;;  %v21582_v46 = vld [vmem:[#allocation47 + $0x1a4] ss:$8 sps:$4 sm:$0xff]   ;;  %v21613_v56 = vld [vmem:[#allocation50 + $0x90] ss:$8 sps:$4 sm:$0xff]  }
0x166b   :  { %15704 = vmatprep.subr.bf16.mxu0 %v21516_v51  ;;  %16065 = vmatprep.subr.bf16.mxu1 %v21519_v20  ;;  %v21618_v51 = vld [vmem:[#allocation50 + $0xa4] ss:$8 sps:$4 sm:$0xff]   ;;  %v21580_v20 = vld [vmem:[#allocation47 + $0x1a0] ss:$8 sps:$4 sm:$0xff]  }
0x166e   :  { %15705 = vmatpush1.bf16.msra.mxu0 %v21514_v49  ;;  %16066 = vmatpush1.bf16.msra.mxu1 %v21517_v32  ;;  %v21588_v49 = vld [vmem:[#allocation47 + $0x1b4] ss:$8 sps:$4 sm:$0xff]   ;;  %v21616_v32 = vld [vmem:[#allocation50 + $0xa0] ss:$8 sps:$4 sm:$0xff]  }
0x166f   :  { %15706 = vmatprep.subr.bf16.mxu0 %v21522_v36  ;;  %16067 = vmatprep.subr.bf16.mxu1 %v21525_v0  ;;  %v21621_v36 = vld [vmem:[#allocation50 + $0xb4] ss:$8 sps:$4 sm:$0xff]   ;;  %v21586_v0 = vld [vmem:[#allocation47 + $0x1b0] ss:$8 sps:$4 sm:$0xff]  }
0x1672   :  { %15707 = vmatpush1.bf16.msra.mxu0 %v21520_v22  ;;  %16068 = vmatpush1.bf16.msra.mxu1 %v21523_v7  ;;  %v21594_v22 = vld [vmem:[#allocation47 + $0x1c4] ss:$8 sps:$4 sm:$0xff]   ;;  %v21619_v7 = vld [vmem:[#allocation50 + $0xb0] ss:$8 sps:$4 sm:$0xff]  }
0x1673   :  { %15708 = vmatprep.subr.bf16.mxu0 %v21528_v12  ;;  %16069 = vmatprep.subr.bf16.mxu1 %v21531_v37  ;;  %v21624_v12 = vld [vmem:[#allocation50 + $0xc4] ss:$8 sps:$4 sm:$0xff]   ;;  %v21592_v37 = vld [vmem:[#allocation47 + $0x1c0] ss:$8 sps:$4 sm:$0xff]  }
0x1676   :  { %15709 = vmatpush1.bf16.msra.mxu0 %v21526_v58  ;;  %16070 = vmatpush1.bf16.msra.mxu1 %v21529_v57  ;;  %v21600_v58 = vld [vmem:[#allocation47 + $0x1d4] ss:$8 sps:$4 sm:$0xff]   ;;  %v21622_v57 = vld [vmem:[#allocation50 + $0xc0] ss:$8 sps:$4 sm:$0xff]  }
0x1677   :  { %15710 = vmatprep.subr.bf16.mxu0 %v21534_v44  ;;  %16071 = vmatprep.subr.bf16.mxu1 %v21537_v8  ;;  %v21627_v44 = vld [vmem:[#allocation50 + $0xd4] ss:$8 sps:$4 sm:$0xff]   ;;  %v21598_v8 = vld [vmem:[#allocation47 + $0x1d0] ss:$8 sps:$4 sm:$0xff]  }
0x167a   :  { %15711 = vmatpush1.bf16.msra.mxu0 %v21532_v2  ;;  %16072 = vmatpush1.bf16.msra.mxu1 %v21535_v43  ;;  %v21606_v2 = vld [vmem:[#allocation47 + $0x1e4] ss:$8 sps:$4 sm:$0xff]   ;;  %v21625_v43 = vld [vmem:[#allocation50 + $0xd0] ss:$8 sps:$4 sm:$0xff]  }
0x167b   :  { %16082 = vmatprep.subr.bf16.mxu0 %v21540_v17  ;;  %16447 = vmatprep.subr.bf16.mxu1 %v21561_v55  ;;  %v21630_v17 = vld [vmem:[#allocation50 + $0xe4] ss:$8 sps:$4 sm:$0xff]   ;;  %v21604_v55 = vld [vmem:[#allocation47 + $0x1e0] ss:$8 sps:$4 sm:$0xff]  }
0x167d   :  { %15713 = vmatmul.mubr.bf16.vlgmr.msra.gmra.mrb[112].mxu0 %v15317_v52  ;;  %16074 = vmatmul.mubr.bf16.vlgmr.msra.gmra.mrb[120].mxu1 %v15311_v28  ;;  %v21628_v28 = vld [vmem:[#allocation50 + $0xe0] ss:$8 sps:$4 sm:$0xff]   ;;  %v21633_v52 = vld [vmem:[#allocation50 + $0xf4] ss:$8 sps:$4 sm:$0xff]  }
0x167e   :  { %16083 = vmatpush1.bf16.msra.mxu0 %v21538_v6  ;;  %16114 = vmatprep.mubr.bf16.mxu0 %v15314_v25  ;;  %v21612_v6 = vld [vmem:[#allocation47 + $0x1f4] ss:$8 sps:$4 sm:$0xff]   ;;  %v21636_v25 = vld [vmem:[#allocation50 + $0x104] ss:$8 sps:$4 sm:$0xff]  }
0x167f   :  { %16084 = vmatprep.subr.bf16.mxu0 %v21543_v54  ;;  %16448 = vmatpush1.bf16.msra.mxu1 %v21559_v29  ;;  %v21610_v54 = vld [vmem:[#allocation47 + $0x1f0] ss:$8 sps:$4 sm:$0xff]  }
0x1680   :  { %16449 = vmatprep.subr.bf16.mxu1 %v21567_v47  ;;  %v21631_v29 = vld [vmem:[#allocation50 + $0xf0] ss:$8 sps:$4 sm:$0xff]   ;;  %v21634_v47 = vld [vmem:[#allocation50 + $0x100] ss:$8 sps:$4 sm:$0xff]  }
0x1682   :  { %16085 = vmatpush1.bf16.msra.mxu0 %v21541_v59  ;;  %v15313_v59 = vpack.c.bf16 %v23673_v19, %v23673_v19  ;;  %v21651_v19 = vld [vmem:[#allocation50 + $0x154] ss:$8 sps:$4 sm:$0xff]  }
0x1683   :  { %16086 = vmatprep.subr.bf16.mxu0 %v21546_v24  ;;  %16450 = vmatpush1.bf16.msra.mxu1 %v21565_v15  ;;  %v21639_v24 = vld [vmem:[#allocation50 + $0x114] ss:$8 sps:$4 sm:$0xff]   ;;  %v21637_v15 = vld [vmem:[#allocation50 + $0x110] ss:$8 sps:$4 sm:$0xff]  }
0x1684   :  { %16451 = vmatprep.subr.bf16.mxu1 %v21573_v26  ;;  %v21642_v26 = vld [vmem:[#allocation50 + $0x124] ss:$8 sps:$4 sm:$0xff]  }
0x1686   :  { %16087 = vmatpush1.bf16.msra.mxu0 %v21544_v63  ;;  %v21640_v63 = vld [vmem:[#allocation50 + $0x120] ss:$8 sps:$4 sm:$0xff]  }
0x1687   :  { %16088 = vmatprep.subr.bf16.mxu0 %v21549_v61  ;;  %16452 = vmatpush1.bf16.msra.mxu1 %v21571_v40  ;;  %v21645_v61 = vld [vmem:[#allocation50 + $0x134] ss:$8 sps:$4 sm:$0xff]   ;;  %v21643_v40 = vld [vmem:[#allocation50 + $0x130] ss:$8 sps:$4 sm:$0xff]  }
0x1688   :  { %16453 = vmatprep.subr.bf16.mxu1 %v21579_v41  ;;  %v21648_v41 = vld [vmem:[#allocation50 + $0x144] ss:$8 sps:$4 sm:$0xff]  }
0x168a   :  { %16089 = vmatpush1.bf16.msra.mxu0 %v21547_v4  ;;  %v21646_v4 = vld [vmem:[#allocation50 + $0x140] ss:$8 sps:$4 sm:$0xff]  }
0x168b   :  { %16090 = vmatprep.subr.bf16.mxu0 %v21552_v60  ;;  %16454 = vmatpush1.bf16.msra.mxu1 %v21577_v27  ;;  %v21649_v60 = vld [vmem:[#allocation50 + $0x150] ss:$8 sps:$4 sm:$0xff]  }
0x168c   :  { %16455 = vmatprep.subr.bf16.mxu1 %v21585_v62  ;;  %v21654_v62 = vld [vmem:[#allocation50 + $0x164] ss:$8 sps:$4 sm:$0xff]  }
0x168e   :  { %16091 = vmatpush1.bf16.msra.mxu0 %v21550_v30 }
0x168f   :  { %16092 = vmatprep.subr.bf16.mxu0 %v21555_v9  ;;  %16456 = vmatpush1.bf16.msra.mxu1 %v21583_v14 }
0x1690   :  { %16457 = vmatprep.subr.bf16.mxu1 %v21591_v18  ;;  %v21652_v18 = vld [vmem:[#allocation50 + $0x160] ss:$8 sps:$4 sm:$0xff]  }
0x1692   :  { %16093 = vmatpush1.bf16.msra.mxu0 %v21553_v50  ;;  %v21657_v50 = vld [vmem:[#allocation50 + $0x174] ss:$8 sps:$4 sm:$0xff]  }
0x1693   :  { %16094 = vmatprep.subr.bf16.mxu0 %v21558_v5  ;;  %16458 = vmatpush1.bf16.msra.mxu1 %v21589_v45  ;;  %v21655_v5 = vld [vmem:[#allocation50 + $0x170] ss:$8 sps:$4 sm:$0xff]   ;;  %v21660_v45 = vld [vmem:[#allocation50 + $0x184] ss:$8 sps:$4 sm:$0xff]  }
0x1694   :  { %16459 = vmatprep.subr.bf16.mxu1 %v21597_v21  ;;  %v21658_v21 = vld [vmem:[#allocation50 + $0x180] ss:$8 sps:$4 sm:$0xff]  }
0x1696   :  { %16095 = vmatpush1.bf16.msra.mxu0 %v21556_v38  ;;  %v21663_v38 = vld [vmem:[#allocation50 + $0x194] ss:$8 sps:$4 sm:$0xff]  }
0x1697   :  { %16096 = vmatprep.subr.bf16.mxu0 %v21564_v23  ;;  %16460 = vmatpush1.bf16.msra.mxu1 %v21595_v3  ;;  %v21661_v23 = vld [vmem:[#allocation50 + $0x190] ss:$8 sps:$4 sm:$0xff]   ;;  %v21666_v3 = vld [vmem:[#allocation50 + $0x1a4] ss:$8 sps:$4 sm:$0xff]  }
0x1698   :  { %16461 = vmatprep.subr.bf16.mxu1 %v21603_v42  ;;  %v21664_v42 = vld [vmem:[#allocation50 + $0x1a0] ss:$8 sps:$4 sm:$0xff]  }
0x169a   :  { %16097 = vmatpush1.bf16.msra.mxu0 %v21562_v53  ;;  %v21669_v53 = vld [vmem:[#allocation50 + $0x1b4] ss:$8 sps:$4 sm:$0xff]  }
0x169b   :  { %16098 = vmatprep.subr.bf16.mxu0 %v21570_v13  ;;  %16462 = vmatpush1.bf16.msra.mxu1 %v21601_v48  ;;  %v21667_v13 = vld [vmem:[#allocation50 + $0x1b0] ss:$8 sps:$4 sm:$0xff]   ;;  %v21672_v48 = vld [vmem:[#allocation50 + $0x1c4] ss:$8 sps:$4 sm:$0xff]  }
0x169c   :  { %16463 = vmatprep.subr.bf16.mxu1 %v21609_v11  ;;  %v21670_v11 = vld [vmem:[#allocation50 + $0x1c0] ss:$8 sps:$4 sm:$0xff]  }
0x169e   :  { %16099 = vmatpush1.bf16.msra.mxu0 %v21568_v39  ;;  %v21675_v39 = vld [vmem:[#allocation50 + $0x1d4] ss:$8 sps:$4 sm:$0xff]  }
0x169f   :  { %16100 = vmatprep.subr.bf16.mxu0 %v21576_v31  ;;  %16464 = vmatpush1.bf16.msra.mxu1 %v21607_v10  ;;  %v21673_v31 = vld [vmem:[#allocation50 + $0x1d0] ss:$8 sps:$4 sm:$0xff]   ;;  %v21678_v10 = vld [vmem:[#allocation50 + $0x1e4] ss:$8 sps:$4 sm:$0xff]  }
0x16a0   :  { %16465 = vmatprep.subr.bf16.mxu1 %v21615_v33  ;;  %v21676_v33 = vld [vmem:[#allocation50 + $0x1e0] ss:$8 sps:$4 sm:$0xff]  }
0x16a2   :  { %16101 = vmatpush1.bf16.msra.mxu0 %v21574_v16  ;;  %v21681_v16 = vld [vmem:[#allocation50 + $0x1f4] ss:$8 sps:$4 sm:$0xff]  }
0x16a3   :  { %16102 = vmatprep.subr.bf16.mxu0 %v21582_v46  ;;  %16466 = vmatpush1.bf16.msra.mxu1 %v21613_v56  ;;  %v21679_v46 = vld [vmem:[#allocation50 + $0x1f0] ss:$8 sps:$4 sm:$0xff]  }
0x16a4   :  { %16467 = vmatprep.subr.bf16.mxu1 %v21618_v51 }
0x16a6   :  { %16103 = vmatpush1.bf16.msra.mxu0 %v21580_v20 }
0x16a7   :  { %16104 = vmatprep.subr.bf16.mxu0 %v21588_v49  ;;  %16468 = vmatpush1.bf16.msra.mxu1 %v21616_v32 }
0x16a8   :  { %16469 = vmatprep.subr.bf16.mxu1 %v21621_v36 }
0x16aa   :  { %16105 = vmatpush1.bf16.msra.mxu0 %v21586_v0 }
0x16ab   :  { %16106 = vmatprep.subr.bf16.mxu0 %v21594_v22  ;;  %16470 = vmatpush1.bf16.msra.mxu1 %v21619_v7  ;;  %v2425_v7 = vld [vmem:[%s24113_s3 + $0x80] sm:$0xff] }
0x16ac   :  { %16471 = vmatprep.subr.bf16.mxu1 %v21624_v12  ;;  %v2426_v12 = vld [vmem:[%s24113_s3 + $0x88] sm:$0xff] }
0x16ae   :  { %16107 = vmatpush1.bf16.msra.mxu0 %v21592_v37  ;;  %v2409_v37 = vld [vmem:[%s24113_s3] sm:$0xff] }
0x16af   :  { %16108 = vmatprep.subr.bf16.mxu0 %v21600_v58  ;;  %16472 = vmatpush1.bf16.msra.mxu1 %v21622_v57  ;;  %v18895_v58 = vpack.c.bf16 %v2426_v12, %v2425_v7  ;;  %v2410_v57 = vld [vmem:[%s24113_s3 + $0x8] sm:$0xff] }
0x16b0   :  { %16473 = vmatprep.subr.bf16.mxu1 %v21627_v44  ;;  %v2427_v44 = vld [vmem:[%s24113_s3 + $0x90] sm:$0xff] }
0x16b2   :  { %16109 = vmatpush1.bf16.msra.mxu0 %v21598_v8  ;;  %v2428_v8 = vld [vmem:[%s24113_s3 + $0x98] sm:$0xff] }
0x16b3   :  { %16110 = vmatprep.subr.bf16.mxu0 %v21606_v2  ;;  %16474 = vmatpush1.bf16.msra.mxu1 %v21625_v43  ;;  %v18897_v2 = vpack.c.bf16 %v2410_v57, %v2409_v37  ;;  %v18899_v43 = vpack.c.bf16 %v2428_v8, %v2427_v44 }
0x16b4   :  { %16475 = vmatprep.subr.bf16.mxu1 %v21630_v17  ;;  %v2411_v17 = vld [vmem:[%s24113_s3 + $0x10] sm:$0xff] }
0x16b6   :  { %16111 = vmatpush1.bf16.msra.mxu0 %v21604_v55  ;;  %v2412_v55 = vld [vmem:[%s24113_s3 + $0x18] sm:$0xff] }
0x16b7   :  { %16112 = vmatprep.subr.bf16.mxu0 %v21612_v6  ;;  %16476 = vmatpush1.bf16.msra.mxu1 %v21628_v28  ;;  %v2429_v6 = vld [vmem:[%s24113_s3 + $0xa0] sm:$0xff]  ;;  %v2430_v28 = vld [vmem:[%s24113_s3 + $0xa8] sm:$0xff] }
0x16b8   :  { %16477 = vmatprep.subr.bf16.mxu1 %v21633_v52  ;;  %v18901_v52 = vpack.c.bf16 %v2412_v55, %v2411_v17  ;;  %v2408_v17 = vld [vmem:[#allocation51] sm:$0x3] }
0x16ba   :  { %16113 = vmatpush1.bf16.msra.mxu0 %v21610_v54  ;;  %v18903_v54 = vpack.c.bf16 %v2430_v28, %v2429_v6  ;;  %v16535_v28 = vrot.slane %v2408_v17, %v23172_v34 }
0x16bb   :  { %16478 = vmatpush1.bf16.msra.mxu1 %v21631_v29  ;;  %16488 = vmatprep.subr.bf16.mxu0 %v21636_v25  ;;  %v2413_v29 = vld [vmem:[%s24113_s3 + $0x20] sm:$0xff]  ;;  %v2414_v25 = vld [vmem:[%s24113_s3 + $0x28] sm:$0xff] }
0x16bc   :  { %18896 = vmatprep.subr.bf16.mxu1 %v18895_v58 }
0x16bd   :  { %16115 = vmatmul.mubr.bf16.vlgmr.msra.gmra.mrb[116].mxu0 %v15313_v59  ;;  %v2432_v59 = vld [vmem:[%s24113_s3 + $0xb8] sm:$0xff] }
0x16be   :  { %16489 = vmatpush1.bf16.msra.mxu0 %v21634_v47  ;;  %v2431_v47 = vld [vmem:[%s24113_s3 + $0xb0] sm:$0xff] }
0x16bf   :  { %16490 = vmatprep.subr.bf16.mxu0 %v21639_v24  ;;  %v18905_v24 = vpack.c.bf16 %v2414_v25, %v2413_v29  ;;  %v16539_v29 = vrot.slane %v2408_v17, %v23175_v35 }
0x16c2   :  { %16491 = vmatpush1.bf16.msra.mxu0 %v21637_v15  ;;  %v18907_v15 = vpack.c.bf16 %v2432_v59, %v2431_v47 }
0x16c3   :  { %16492 = vmatprep.subr.bf16.mxu0 %v21642_v26  ;;  %v2415_v26 = vld [vmem:[%s24113_s3 + $0x30] sm:$0xff] }
0x16c6   :  { %16493 = vmatpush1.bf16.msra.mxu0 %v21640_v63  ;;  %v2416_v63 = vld [vmem:[%s24113_s3 + $0x38] sm:$0xff] }
0x16c7   :  { %16494 = vmatprep.subr.bf16.mxu0 %v21645_v61  ;;  %v2433_v61 = vld [vmem:[%s24113_s3 + $0xc0] sm:$0xff] }
0x16ca   :  { %16495 = vmatpush1.bf16.msra.mxu0 %v21643_v40  ;;  %v2434_v40 = vld [vmem:[%s24113_s3 + $0xc8] sm:$0xff] }
0x16cb   :  { %16496 = vmatprep.subr.bf16.mxu0 %v21648_v41  ;;  %v18909_v41 = vpack.c.bf16 %v2416_v63, %v2415_v26 }
0x16ce   :  { %16497 = vmatpush1.bf16.msra.mxu0 %v21646_v4  ;;  %v18911_v4 = vpack.c.bf16 %v2434_v40, %v2433_v61 }
0x16cf   :  { %v15235_v27 = vpop.f32.mrb[98].mxu1  ;;  %16498 = vmatprep.subr.bf16.mxu0 %v21651_v19  ;;  %v2417_v19 = vld [vmem:[%s24113_s3 + $0x40] sm:$0xff] }
0x16d0   :  { %v15237_v30 = vpop.f32.mrb[99].mxu1  ;;  %v16123_v14 = vpack.c.bf16 %v15235_v27, %v15235_v27 }
0x16d1   :  { %v16124_v9 = vpack.c.bf16 %v15237_v30, %v15237_v30 }
0x16d2   :  { %16499 = vmatpush1.bf16.msra.mxu0 %v21649_v60  ;;  %v2418_v60 = vld [vmem:[%s24113_s3 + $0x48] sm:$0xff] }
0x16d3   :  { %16479 = vmatprep.mubr.bf16.mxu1 %v16124_v9  ;;  %16500 = vmatprep.subr.bf16.mxu0 %v21654_v62  ;;  %v18913_v27 = vpack.c.bf16 %v2418_v60, %v2417_v19 }
0x16d4   :  { %16480 = vmatmul.mubr.bf16.vlgmr.msra.gmra.mrb[124].mxu1 %v16123_v14 }
0x16d5   :  { %18898 = vmatpush3.bf16.msra.mxu1 %v18897_v2 }
0x16d6   :  { %16501 = vmatpush1.bf16.msra.mxu0 %v21652_v18  ;;  %18900 = vmatprep.subr.bf16.mxu1 %v18899_v43 }
0x16d7   :  { %16502 = vmatprep.subr.bf16.mxu0 %v21657_v50 }
0x16d9   :  { %18902 = vmatpush3.bf16.msra.mxu1 %v18901_v52 }
0x16da   :  { %16503 = vmatpush1.bf16.msra.mxu0 %v21655_v5  ;;  %18904 = vmatprep.subr.bf16.mxu1 %v18903_v54 }
0x16db   :  { %16504 = vmatprep.subr.bf16.mxu0 %v21660_v45 }
0x16dd   :  { %18906 = vmatpush3.bf16.msra.mxu1 %v18905_v24 }
0x16de   :  { %16505 = vmatpush1.bf16.msra.mxu0 %v21658_v21  ;;  %18908 = vmatprep.subr.bf16.mxu1 %v18907_v15 }
0x16df   :  { %16506 = vmatprep.subr.bf16.mxu0 %v21663_v38 }
0x16e1   :  { %18910 = vmatpush3.bf16.msra.mxu1 %v18909_v41 }
0x16e2   :  { %16507 = vmatpush1.bf16.msra.mxu0 %v21661_v23  ;;  %18912 = vmatprep.subr.bf16.mxu1 %v18911_v4  ;;  %v18772_v4 = vld [vmem:[#allocation53] ss:$0 sm:$0xff] }
0x16e3   :  { %16508 = vmatprep.subr.bf16.mxu0 %v21666_v3 }
0x16e5   :  { %18914 = vmatpush3.bf16.msra.mxu1 %v18913_v27 }
0x16e6   :  { %16509 = vmatpush1.bf16.msra.mxu0 %v21664_v42  ;;  %v2435_v42 = vld [vmem:[%s24113_s3 + $0xd0] sm:$0xff] }
0x16e7   :  { %16510 = vmatprep.subr.bf16.mxu0 %v21669_v53  ;;  %v2436_v53 = vld [vmem:[%s24113_s3 + $0xd8] sm:$0xff] }
0x16ea   :  { %16511 = vmatpush1.bf16.msra.mxu0 %v21667_v13  ;;  %v18915_v13 = vpack.c.bf16 %v2436_v53, %v2435_v42 }
0x16eb   :  { %16512 = vmatprep.subr.bf16.mxu0 %v21672_v48  ;;  %v2419_v48 = vld [vmem:[%s24113_s3 + $0x50] sm:$0xff] }
0x16ec   :  { %18916 = vmatprep.subr.bf16.mxu1 %v18915_v13  ;;  %v2448_v13 = vld [vmem:[#allocation2] sm:$0x1] }
0x16ed   :  { %16796 = vperm.xlu0 %19087, %v2448_v13  }
0x16ee   :  { %16513 = vmatpush1.bf16.msra.mxu0 %v21670_v11  ;;  %v2420_v11 = vld [vmem:[%s24113_s3 + $0x58] sm:$0xff] }
0x16ef   :  { %16514 = vmatprep.subr.bf16.mxu0 %v21675_v39  ;;  %v2437_v39 = vld [vmem:[%s24113_s3 + $0xe0] sm:$0xff] }
0x16f2   :  { %16515 = vmatpush1.bf16.msra.mxu0 %v21673_v31  ;;  %v18917_v31 = vpack.c.bf16 %v2420_v11, %v2419_v48  ;;  %v18776_v48 = vld [vmem:[#allocation54] ss:$0 sm:$0xff] }
0x16f3   :  { %16516 = vmatprep.subr.bf16.mxu0 %v21678_v10  ;;  %v2438_v10 = vld [vmem:[%s24113_s3 + $0xe8] sm:$0xff] }
0x16f4   :  { %18918 = vmatpush3.bf16.msra.mxu1 %v18917_v31 }
0x16f6   :  { %16517 = vmatpush1.bf16.msra.mxu0 %v21676_v33  ;;  %v2421_v33 = vld [vmem:[%s24113_s3 + $0x60] sm:$0xff] }
0x16f7   :  { %16518 = vmatprep.subr.bf16.mxu0 %v21681_v16  ;;  %v2422_v16 = vld [vmem:[%s24113_s3 + $0x68] sm:$0xff] }
0x16fa   :  { %16519 = vmatpush1.bf16.msra.mxu0 %v21679_v46  ;;  %v18919_v46 = vpack.c.bf16 %v2438_v10, %v2437_v39 }
0x16fb   :  { %18826 = vmatprep.subr.mxu0 %v22620_v1 }
0x16fc   :  { %18920 = vmatprep.subr.bf16.mxu1 %v18919_v46 }
0x170f   :  { %v15306_v56 = vpop.f32.mrb[108].mxu0  ;;  %v15673_v51 = vpop.f32.mrb[116].mxu1 }
0x1710   :  { %v15308_v20 = vpop.f32.mrb[109].mxu0  ;;  %v15675_v49 = vpop.f32.mrb[117].mxu1  ;;  %v16125_v0 = vpack.c.bf16 %v15306_v56, %v15306_v56  ;;  %v2439_v56 = vld [vmem:[%s24113_s3 + $0xf0] sm:$0xff] }
0x1711   :  { %v16126_v32 = vpack.c.bf16 %v15308_v20, %v15308_v20  ;;  %v15677_v36 = vpop.f32.mrb[118].mxu1  ;;  %v18921_v20 = vpack.c.bf16 %v2422_v16, %v2421_v33 }
0x1712   :  { %v15678_v22 = vpop.f32.mrb[119].mxu1  ;;  %v2424_v36 = vld [vmem:[%s24113_s3 + $0x78] sm:$0xff] }
0x1713   :  { %16520 = vmatprep.mubr.bf16.mxu0 %v16126_v32  ;;  %v2423_v32 = vld [vmem:[%s24113_s3 + $0x70] sm:$0xff]  ;;  %18922 = vmatpush3.bf16.msra.mxu1 %v18921_v20 }
0x1714   :  { %16521 = vmatmul.mubr.bf16.vlgmr.msra.gmra.mrb[120].mxu0 %v16125_v0  ;;  %v18925_v0 = vpack.c.bf16 %v2424_v36, %v2423_v32 }
0x1715   :  { %18828 = vmatprep.mubr.msk.f32.mxu0 %vm22625_vm1, %v22620_v1 }
0x1750   :  { %v15714_v62 = vpop.f32.mrb[112].mxu0  ;;  %v16075_v30 = vpop.f32.mrb[120].mxu1 }
0x1751   :  { %v15715_v9 = vadd.f32 %v15714_v62, %v15673_v51  ;;  %v15716_v14 = vpop.f32.mrb[113].mxu0  ;;  %v16077_v18 = vpop.f32.mrb[121].mxu1  ;;  %v2440_v51 = vld [vmem:[%s24113_s3 + $0xf8] sm:$0xff]  ;;  %v652_v62 = vld [vmem:[%s24114_s2] sm:$0x3] }
0x1752   :  { %v15717_v50 = vadd.f32 %v15716_v14, %v15675_v49  ;;  %v15718_v5 = vpop.f32.mrb[114].mxu0  ;;  %v16079_v45 = vpop.f32.mrb[122].mxu1  ;;  %v18923_v49 = vpack.c.bf16 %v2440_v51, %v2439_v56  ;;  %v2444_v14 = vld [vmem:[%s24115_s6 + $0x10] sm:$0xff]  ;;  %v2447_v56 = vld [vmem:[#allocation56] sm:$0x1] }
0x1753   :  { %v16076_v21 = vadd.f32 %v16075_v30, %v15715_v9  ;;  %v15719_v38 = vpop.f32.mrb[115].mxu0  ;;  %v16080_v23 = vpop.f32.mrb[123].mxu1  ;;  %v2442_v30 = vld [vmem:[%s24115_s6] sm:$0xff]  ;;  %v2443_v9 = vld [vmem:[%s24115_s6 + $0x8] sm:$0xff]  ;;  %v2445_v5 = vld [vmem:[%s24115_s6 + $0x18] sm:$0xff] }
0x1754   :  { %v16078_v3 = vadd.f32 %v16077_v18, %v15717_v50  ;;  %18924 = vmatprep.subr.bf16.mxu1 %v18923_v49  ;;  %v22626_v18 = vmov 0.0|0.0   ;;  %v18928_v50 = vpack.c.bf16 %v2443_v9, %v2442_v30  ;;  %v18931_v45 = vpack.c.bf16 %v2445_v5, %v2444_v14 }
0x1755   :  { %18926 = vmatpush3.bf16.msra.mxu1 %v18925_v0 }
0x176c   :  { %v16797_v51 = vpop.permute.xlu0 %16796 }
0x1790   :  { %v16116_v22 = vpop.f32.mrb[116].mxu0 }
0x1791   :  { %v16117_v7 = vadd.f32 %v16116_v22, %v16076_v21  ;;  %v16118_v12 = vpop.f32.mrb[117].mxu0 }
0x1792   :  { %v16119_v37 = vadd.f32 %v16118_v12, %v16078_v3  ;;  %v16120_v58 = vpop.f32.mrb[118].mxu0 }
0x1793   :  { %v16121_v57 = vpop.f32.mrb[119].mxu0 }
0x17a7   :  { %v16481_v44 = vpop.f32.mrb[124].mxu1 }
0x17a8   :  { %v16483_v8 = vpop.f32.mrb[125].mxu1 }
0x17a9   :  { %v16485_v2 = vpop.f32.mrb[126].mxu1 }
0x17aa   :  { %v16486_v43 = vpop.f32.mrb[127].mxu1 }
0x17e7   :  { %v16522_v55 = vpop.f32.mrb[120].mxu0 }
0x17e8   :  { %v16523_v6 = vadd.f32 %v16522_v55, %v16481_v44  ;;  %v16524_v52 = vpop.f32.mrb[121].mxu0 }
0x17e9   :  { %v16525_v54 = vadd.f32 %v16524_v52, %v16483_v8  ;;  %v16526_v25 = vpop.f32.mrb[122].mxu0 }
0x17ea   :  { %v16529_v47 = vadd.f32 %v16523_v6, %v16117_v7  ;;  %v16527_v59 = vpop.f32.mrb[123].mxu0 }
0x17eb   :  { %v16530_v24 = vadd.f32 %v16525_v54, %v16119_v37 }
0x17ec   :  { %v16542_v15 = vadd.f32 %v16535_v28, %v16529_v47 }
0x17ed   :  { %v16543_v26 = vadd.f32 %v16539_v29, %v16530_v24 }
0x17ee   :  { %v16546_v63 = vmul.f32 0.1, %v16542_v15  ;;  %vm16544_vm0 = vcmp.gt.f32.partialorder %v16542_v15, 0.0 }
0x17ef   :  { %vm16545_vm13 = vcmp.gt.f32.partialorder %v16543_v26, 0.0  ;;  %v16547_v61 = vmul.f32 0.1, %v16543_v26 }
0x17f0   :  { %v16548_v41 = vsel %vm16544_vm0, %v16542_v15, %v16546_v63 }
0x17f1   :  { %v16549_v40 = vsel %vm16545_vm13, %v16543_v26, %v16547_v61 }
0x17f2   :  { %16620 = vmatprep.mubr.f32.mxu1 %v16549_v40 }
0x17f3   :  { %16621 = vmatmul.mubr.f32.vlgmr.msra.gmra.mrb[128].mxu1 %v16548_v41 }
0x18c6   :  { %v18814_v35 = vpop.f32.mrb[128].mxu1 }
0x18c7   :  { %v18815_v19 = vpop.f32.mrb[129].mxu1 }
0x18c8   :  { %v18816_v60 = vadd.f32 %v18815_v19, %v18814_v35 }
0x18ca   :  { %v16623_v27 = vadd.f32 %v18816_v60, %v18772_v4 }
0x18cc   :  { %18827 = vmatpush3.msk.msra.mxu0 %vm9374_vm14, %v16623_v27  ;;  %vm16714_vm14 = vcmask 261120  }
0x18cd   :  { %18829 = vmatmul.mubr.msk.f32.vlgmr.msra.gmra.mrb[110].mxu0 %vm9370_vm15, %v652_v62  ;;  %18927 = vmatprep.subr.bf16.mxu0 %v22626_v18  ;;  %vm16885_vm15 = vcmask 8192  }
0x18ce   :  { %18839 = vmatprep.mubr.msk.f32.mxu0 %vm22625_vm1, %v22620_v1  ;;  %18929 = vmatpush3.bf16.msra.mxu0 %v18928_v50 }
0x18cf   :  { %18930 = vmatprep.subr.bf16.mxu0 %v22626_v18 }
0x18d2   :  { %18932 = vmatpush3.bf16.msra.mxu0 %v18931_v45 }
0x18d3   :  { %18842 = vmatprep.subr.mxu0 %v22620_v1 }
0x19a0   :  { %v16698_v21 = vpop.f32.mrb[110].mxu0 }
0x19a1   :  { %v18775_v38 = vmul.f32 -1.442695, %v16698_v21  ;;  %v18830_v23 = vpop.f32.mrb[111].mxu0 }
0x19a3   :  { %21688 = vpow2.f32 %v18775_v38 }
0x19ad   :  { %v21689_v3 = vpop.eup %21688 }
0x19ae   :  { %v16705_v42 = vadd.f32 1.0, %v21689_v3 }
0x19b0   :  { %21690 = vrcp.f32 %v16705_v42 }
0x19ba   :  { %v21691_v53 = vpop.eup %21690 }
0x19bb   :  { %18840 = vmatmul.mubr.msk.f32.vlgmr.msra.gmra.mrb[124].mxu0 %vm16714_vm14, %v21691_v53 }
0x19bc   :  { %18844 = vmatprep.mubr.msk.f32.mxu0 %vm22625_vm1, %v22620_v1  ;;  %v16802_v1 = vrot.slane %v16797_v51, %v23172_v34 }
0x1a8e   :  { %v16784_v11 = vpop.f32.mrb[124].mxu0 }
0x1a8f   :  { %v16785_v39 = vadd.f32 %v18776_v48, %v16784_v11  ;;  %v18841_v31 = vpop.f32.mrb[125].mxu0 }
0x1a91   :  { %v18778_v10 = vmul.f32 -1.442695, %v16785_v39 }
0x1a93   :  { %21692 = vpow2.f32 %v18778_v10 }
0x1a9d   :  { %v21693_v33 = vpop.eup %21692 }
0x1a9e   :  { %v16791_v16 = vadd.f32 1.0, %v21693_v33 }
0x1aa0   :  { %21694 = vrcp.f32 %v16791_v16 }
0x1aaa   :  { %v21695_v46 = vpop.eup %21694 }
0x1aab   :  { %18843 = vmatpush3.xpose.msk.msra.mxu0 %vm3569_vm10, %v21695_v46 }
0x1aae   :  { %18845 = vmatmul.mubr.msk.f32.vlgmr.msra.gmra.mrb[126].mxu0 %vm3569_vm10, %v2447_v56 }
0x1b81   :  { %v16875_v20 = vpop.f32.mrb[126].mxu0 }
0x1b82   :  { %v16876_v49 = vadd.f32 %v16875_v20, %v16802_v1  ;;  %v18846_v32 = vpop.f32.mrb[127].mxu0 }
0x1b84   :  { %v18781_v36 = vmul.f32 -1.442695, %v16876_v49 }
0x1b86   :  { %21696 = vpow2.f32 %v18781_v36 }
0x1b90   :  { %v21697_v0 = vpop.eup %21696 }
0x1b91   :  { %v16882_v22 = vadd.f32 1.0, %v21697_v0 }
0x1b93   :  { %21698 = vrcp.f32 %v16882_v22 }
0x1b9d   :  { %v21699_v7 = vpop.eup %21698 }
0x1b9e   :  { %16886 = vst.msk [vmem:[#allocation57] sm:$0x1] %vm16885_vm15, %v21699_v7 }
0x1b9f   :  { %22481 = shalt.err (!%p22478_p4)
}
0x1ba0   :  { %s22482_s8 = scalar_lea.hbm %s22879_s9, 16 }
0x1ba1   :  { %p22483_p5 = scmp.ne.s32.totalorder %s22879_s9, %s22482_s8  ;;  %p22486_p6 = scmp.lt.u32.totalorder %s22482_s8, %s22879_s9 }
0x1ba3   :  { %p22488_p7 = pnand %p22486_p6, %p22483_p5 }
0x1ba5   :  { %22491 = shalt.err (!%p22488_p7)
}
0x1ba6   :  { %16896 = dma.vmem_to_hbm [thread:$0]  %s16894_s24, 16, %s22879_s9, [#allocation5]  }
0x1ba7   :  { %22528 = dma.done.wait [#allocation5], 16  }
0x1ba8   :  { %22529 = vsyncadd [#allocation5], 4294967280 }
0x1ba9   :  { %16900 = vsyncpa [#allocation4], 1 }
0x1baa   :  { %16901 = vsyncpa [#allocation7], 1 }
0x1bab   :  { %16902 = vsyncpa [#allocation10], 1 }
0x1bac   :  { %16903 = vsyncpa [#allocation13], 1 }
0x1bad   :  { %16904 = vsyncpa [#allocation16], 1 }
0x1bae   :  { %16905 = vsyncpa [#allocation19], 1 }
0x1baf   :  { %16906 = vsyncpa [#allocation22], 1 }
0x1bb0   :  { %16907 = vsyncpa [#allocation25], 1 }
0x1bb1   :  { %16908 = vsyncpa [#allocation28], 1 }
0x1bb2   :  { %16909 = vsyncpa [#allocation31], 1 }
0x1bb3   :  { %16910 = vsyncpa [#allocation34], 1 }
0x1bb4   :  { %16911 = vsyncpa [#allocation37], 1 }
0x1bb5   :  { %16912 = vsyncpa [#allocation40], 1 }
0x1bb6   :  { %16913 = vsyncpa [#allocation43], 1 }
0x1bb7   :  { %16914 = vsyncpa [#allocation46], 1 }
0x1bb8   :  { %16915 = vsyncpa [#allocation49], 1 }
0x1bb9   :  { %16916 = vsyncpa [#allocation52], 1 }
0x1bba   :  { %16917 = vsyncpa [#allocation55], 1 }
0x1bbb   :  { %16918 = vsyncpa [#allocation5], 1 }

</bundles_post_ra>
